<compile_context>
chip_gen: v7x
topology: tpu7x:2x2x1
jax: 0.10.0
libtpu: 0.0.40
codegen_flags: <defaults>
</compile_context>

<pallas_src>
import functools

import jax
import jax.numpy as jnp
from jax.experimental import pallas as pl
from jax.experimental.pallas import tpu as pltpu


# Order in which the (stacked) parameter arrays are passed to the kernel.
_PARAM_ORDER = (
    # encoder stack
    "e_wq", "e_wkv", "e_bq", "e_bkv", "e_wo", "e_bo",
    "e_ln1_g", "e_ln1_b", "e_w1", "e_b1", "e_w2t", "e_b2", "e_ln2_g", "e_ln2_b",
    # decoder stack: self-attn
    "ds_wq", "ds_wkv", "ds_bq", "ds_bkv", "ds_wo", "ds_bo",
    "d_ln1_g", "d_ln1_b",
    # decoder stack: cross-attn
    "dc_wq", "dc_wkv", "dc_bq", "dc_bkv", "dc_wo", "dc_bo",
    "d_ln2_g", "d_ln2_b", "d_w1", "d_b1", "d_w2t", "d_b2", "d_ln3_g", "d_ln3_b",
    # final norms + output head
    "enc_norm_g", "enc_norm_b", "dec_norm_g", "dec_norm_b", "fc_w", "fc_b",
)


# ----------------------------------------------------------------------------
# Fused whole-model kernel (one grid step == one batch element)
# ----------------------------------------------------------------------------
def _transformer_kernel(*refs, E, nhead, n_enc, n_dec, dff, ffn_chunk):
    assert len(refs) == len(_PARAM_ORDER) + 3, (len(refs), len(_PARAM_ORDER))
    src_ref, trg_ref = refs[0], refs[1]          # (S, E), (T, E) for this batch
    out_ref = refs[-1]                           # (T, V)
    p = dict(zip(_PARAM_ORDER, refs[2:-1]))

    hd = E // nhead
    scale = 1.0 / float(hd) ** 0.5

    def layer_norm(x, g, b):
        # PyTorch LayerNorm: biased variance, eps=1e-5, over last dim.
        mu = jnp.mean(x, axis=-1, keepdims=True)
        xc = x - mu
        var = jnp.mean(xc * xc, axis=-1, keepdims=True)
        return xc * jax.lax.rsqrt(var + 1e-5) * g + b

    def mha(x_q, x_kv, wq, wkv, bq, bkv, wo, bo, l):
        """nn.MultiheadAttention (no masks) for one batch element.

        x_q: (Lq, E), x_kv: (Lk, E).  Q and (K|V) projections are fused into
        two matmuls; per-head work uses static lane slices of width hd.  The
        output projection is accumulated per head
        (sum_h o_h @ Wo_h == concat(o_h) @ Wo), so no in-kernel concat.
        """
        q_all = jnp.dot(x_q, wq[l], preferred_element_type=jnp.float32) + bq[l]
        kv_all = jnp.dot(x_kv, wkv[l], preferred_element_type=jnp.float32) + bkv[l]
        acc = None
        for h in range(nhead):
            q = q_all[:, h * hd:(h + 1) * hd]                 # (Lq, hd)
            k = kv_all[:, h * hd:(h + 1) * hd]                # (Lk, hd)
            v = kv_all[:, E + h * hd:E + (h + 1) * hd]        # (Lk, hd)
            s = jax.lax.dot_general(q, k, (((1,), (1,)), ((), ())),
                                    preferred_element_type=jnp.float32) * scale
            s = s - jnp.max(s, axis=-1, keepdims=True)
            e = jnp.exp(s)
            pr = e * pl.reciprocal(jnp.sum(e, axis=-1, keepdims=True), approx=True)
            o = jnp.dot(pr, v, preferred_element_type=jnp.float32)          # (Lq, hd)
            c = jnp.dot(o, wo[l, h], preferred_element_type=jnp.float32)    # (Lq, E)
            acc = c if acc is None else acc + c
        return acc + bo[l]

    def ffn(x, w1, b1, w2t, b2, l):
        """relu(x @ W1 + b1) @ W2 + b2, accumulated over dff chunks.

        W2 is stored transposed as (E, dff) (lane-dense), consumed via an
        NT dot_general so the (rows, dff) hidden never materializes whole.
        """
        acc = None
        for c0 in range(0, dff, ffn_chunk):
            ce = min(c0 + ffn_chunk, dff)
            h = jnp.dot(x, w1[l, :, c0:ce], preferred_element_type=jnp.float32)
            h = jnp.maximum(h + b1[l, :, c0:ce], 0.0)
            c = jax.lax.dot_general(h, w2t[l, :, c0:ce], (((1,), (1,)), ((), ())),
                                    preferred_element_type=jnp.float32)
            acc = c if acc is None else acc + c
        return acc + b2[l]

    # ----- encoder stack (post-LN layers) + final encoder LayerNorm -----
    x = src_ref[...]                                         # (S, E)
    for l in range(n_enc):
        sa = mha(x, x, p["e_wq"], p["e_wkv"], p["e_bq"], p["e_bkv"],
                 p["e_wo"], p["e_bo"], l)
        x = layer_norm(x + sa, p["e_ln1_g"][l], p["e_ln1_b"][l])
        ff = ffn(x, p["e_w1"], p["e_b1"], p["e_w2t"], p["e_b2"], l)
        x = layer_norm(x + ff, p["e_ln2_g"][l], p["e_ln2_b"][l])
    mem = layer_norm(x, p["enc_norm_g"][...], p["enc_norm_b"][...])

    # ----- decoder stack (post-LN layers) + final decoder LayerNorm -----
    y = trg_ref[...]                                         # (T, E)
    for l in range(n_dec):
        sa = mha(y, y, p["ds_wq"], p["ds_wkv"], p["ds_bq"], p["ds_bkv"],
                 p["ds_wo"], p["ds_bo"], l)
        y = layer_norm(y + sa, p["d_ln1_g"][l], p["d_ln1_b"][l])
        ca = mha(y, mem, p["dc_wq"], p["dc_wkv"], p["dc_bq"], p["dc_bkv"],
                 p["dc_wo"], p["dc_bo"], l)
        y = layer_norm(y + ca, p["d_ln2_g"][l], p["d_ln2_b"][l])
        ff = ffn(y, p["d_w1"], p["d_b1"], p["d_w2t"], p["d_b2"], l)
        y = layer_norm(y + ff, p["d_ln3_g"][l], p["d_ln3_b"][l])
    y = layer_norm(y, p["dec_norm_g"][...], p["dec_norm_b"][...])

    # ----- fc_out: lane-dense (V = 128) store, the only HBM writeback -----
    out_ref[...] = (jnp.dot(y, p["fc_w"][...], preferred_element_type=jnp.float32)
                    + p["fc_b"][...])


# ----------------------------------------------------------------------------
# Host-side wrapper: one pallas_call for the whole forward pass
# ----------------------------------------------------------------------------
@functools.partial(jax.jit, static_argnames=("nhead",))
def transformer_forward(src, trg, params, *, nhead):
    S, N, E = src.shape
    T = trg.shape[0]
    V = params["fc_w"].shape[1]
    n_enc = params["e_wq"].shape[0]
    n_dec = params["ds_wq"].shape[0]
    dff = params["e_w1"].shape[-1]

    # batch-leading layout so the grid can iterate over batch elements
    src_b = jnp.transpose(src, (1, 0, 2))        # (N, S, E)
    trg_b = jnp.transpose(trg, (1, 0, 2))        # (N, T, E)

    weight_list = [params[k] for k in _PARAM_ORDER]

    def _bcast_spec(a):
        # full array, same block for every grid step (weights stay in VMEM)
        nd = a.ndim
        return pl.BlockSpec(a.shape, lambda n, _nd=nd: (0,) * _nd)

    in_specs = (
        [pl.BlockSpec((None, S, E), lambda n: (n, 0, 0)),    # per-batch src
         pl.BlockSpec((None, T, E), lambda n: (n, 0, 0))]    # per-batch trg
        + [_bcast_spec(a) for a in weight_list]
    )

    kernel = functools.partial(
        _transformer_kernel, E=E, nhead=nhead,
        n_enc=n_enc, n_dec=n_dec, dff=dff, ffn_chunk=512)

    out = pl.pallas_call(
        kernel,
        out_shape=jax.ShapeDtypeStruct((N, T, V), jnp.float32),
        grid=(N,),
        in_specs=in_specs,
        out_specs=pl.BlockSpec((None, T, V), lambda n: (n, 0, 0)),
        compiler_params=pltpu.CompilerParams(
            dimension_semantics=("parallel",),        # v7x: one batch per TC
            vmem_limit_bytes=32 * 1024 * 1024),
    )(src_b, trg_b, *weight_list)

    return jnp.transpose(out, (1, 0, 2))              # back to (T, N, V)


# ----------------------------------------------------------------------------
# Deterministic parameter init (PyTorch-like uniform(-1/sqrt(fan_in), ...)),
# already laid out as the kernel expects (stacked per layer, Q / K|V fused,
# output projection split per head, W2 stored transposed).
# ----------------------------------------------------------------------------
def init_params(key, vocab_size, d_model, nhead, num_enc, num_dec, dff):
    E, H, F = d_model, nhead, dff
    hd = E // H
    kit = iter(jax.random.split(key, 256))

    def uni(shape, fan_in):
        b = 1.0 / float(fan_in) ** 0.5
        return jax.random.uniform(next(kit), shape, jnp.float32, -b, b)

    def attn():
        # weights in "x @ W" orientation; columns of wq / wkv are head-major
        wq = uni((E, E), E)
        wkv = uni((E, 2 * E), E)           # [K cols | V cols]
        bq = uni((E,), E).reshape(1, E)
        bkv = uni((2 * E,), E).reshape(1, 2 * E)
        wo = uni((E, E), E)
        bo = uni((E,), E).reshape(1, E)
        return dict(
            wq=wq, wkv=wkv, bq=bq, bkv=bkv,
            wo=wo.reshape(H, hd, E),       # per-head rows of the out-proj
            bo=bo,
        )

    def ffn():
        return dict(w1=uni((E, F), E), b1=uni((F,), E).reshape(1, F),
                    w2t=uni((E, F), F),                      # == W2.T, lane-dense
                    b2=uni((E,), F).reshape(1, E))

    def ln_pair():
        return jnp.ones((1, E), jnp.float32), jnp.zeros((1, E), jnp.float32)

    p = {}

    def add_stack(prefix, dicts):
        for k in dicts[0]:
            p[prefix + k] = jnp.stack([d[k] for d in dicts])

    # encoder stack
    add_stack("e_", [attn() for _ in range(num_enc)])
    add_stack("e_", [ffn() for _ in range(num_enc)])
    for tag in ("ln1", "ln2"):
        gs, bs = zip(*[ln_pair() for _ in range(num_enc)])
        p[f"e_{tag}_g"], p[f"e_{tag}_b"] = jnp.stack(gs), jnp.stack(bs)

    # decoder stack
    add_stack("ds_", [attn() for _ in range(num_dec)])
    add_stack("dc_", [attn() for _ in range(num_dec)])
    add_stack("d_", [ffn() for _ in range(num_dec)])
    for tag in ("ln1", "ln2", "ln3"):
        gs, bs = zip(*[ln_pair() for _ in range(num_dec)])
        p[f"d_{tag}_g"], p[f"d_{tag}_b"] = jnp.stack(gs), jnp.stack(bs)

    # final norms + output head
    p["enc_norm_g"], p["enc_norm_b"] = ln_pair()
    p["dec_norm_g"], p["dec_norm_b"] = ln_pair()
    p["fc_w"] = uni((E, vocab_size), E)
    p["fc_b"] = uni((vocab_size,), E).reshape(1, vocab_size)
    return p


# ----------------------------------------------------------------------------
# main
# ----------------------------------------------------------------------------
if __name__ == "__main__":
    vocab_size = 128
    d_model = 32
    nhead = 4
    num_encoder_layers = 2
    num_decoder_layers = 2
    dim_feedforward = 2048      # nn.Transformer default

    src_len, tgt_len, batch = 16, 8, 2

    key = jax.random.PRNGKey(0)
    k_src, k_trg = jax.random.split(key)
    # nn.Transformer takes already-embedded float tensors of shape (S, N, E).
    src = jax.random.normal(k_src, (src_len, batch, d_model), jnp.float32)
    trg = jax.random.normal(k_trg, (tgt_len, batch, d_model), jnp.float32)

    params = init_params(jax.random.PRNGKey(1), vocab_size, d_model, nhead,
                         num_encoder_layers, num_decoder_layers, dim_feedforward)

    out = transformer_forward(src, trg, params, nhead=nhead)
    out = jax.block_until_ready(out)

    assert out.shape == (tgt_len, batch, vocab_size), out.shape
    assert out.dtype == jnp.float32
    assert bool(jnp.all(jnp.isfinite(out)))
    print("KERNEL_OK")
</pallas_src>

<mosaic_0001>
module attributes {stable_mosaic.version = 11 : i64} {
  func.func @_transformer_kernel(%arg0: i32, %arg1: memref<1x16x32xf32, #tpu.memory_space<vmem>>, %arg2: memref<1x8x32xf32, #tpu.memory_space<vmem>>, %arg3: memref<2x32x32xf32, #tpu.memory_space<vmem>>, %arg4: memref<2x32x64xf32, #tpu.memory_space<vmem>>, %arg5: memref<2x1x32xf32, #tpu.memory_space<vmem>>, %arg6: memref<2x1x64xf32, #tpu.memory_space<vmem>>, %arg7: memref<2x4x8x32xf32, #tpu.memory_space<vmem>>, %arg8: memref<2x1x32xf32, #tpu.memory_space<vmem>>, %arg9: memref<2x1x32xf32, #tpu.memory_space<vmem>>, %arg10: memref<2x1x32xf32, #tpu.memory_space<vmem>>, %arg11: memref<2x32x2048xf32, #tpu.memory_space<vmem>>, %arg12: memref<2x1x2048xf32, #tpu.memory_space<vmem>>, %arg13: memref<2x32x2048xf32, #tpu.memory_space<vmem>>, %arg14: memref<2x1x32xf32, #tpu.memory_space<vmem>>, %arg15: memref<2x1x32xf32, #tpu.memory_space<vmem>>, %arg16: memref<2x1x32xf32, #tpu.memory_space<vmem>>, %arg17: memref<2x32x32xf32, #tpu.memory_space<vmem>>, %arg18: memref<2x32x64xf32, #tpu.memory_space<vmem>>, %arg19: memref<2x1x32xf32, #tpu.memory_space<vmem>>, %arg20: memref<2x1x64xf32, #tpu.memory_space<vmem>>, %arg21: memref<2x4x8x32xf32, #tpu.memory_space<vmem>>, %arg22: memref<2x1x32xf32, #tpu.memory_space<vmem>>, %arg23: memref<2x1x32xf32, #tpu.memory_space<vmem>>, %arg24: memref<2x1x32xf32, #tpu.memory_space<vmem>>, %arg25: memref<2x32x32xf32, #tpu.memory_space<vmem>>, %arg26: memref<2x32x64xf32, #tpu.memory_space<vmem>>, %arg27: memref<2x1x32xf32, #tpu.memory_space<vmem>>, %arg28: memref<2x1x64xf32, #tpu.memory_space<vmem>>, %arg29: memref<2x4x8x32xf32, #tpu.memory_space<vmem>>, %arg30: memref<2x1x32xf32, #tpu.memory_space<vmem>>, %arg31: memref<2x1x32xf32, #tpu.memory_space<vmem>>, %arg32: memref<2x1x32xf32, #tpu.memory_space<vmem>>, %arg33: memref<2x32x2048xf32, #tpu.memory_space<vmem>>, %arg34: memref<2x1x2048xf32, #tpu.memory_space<vmem>>, %arg35: memref<2x32x2048xf32, #tpu.memory_space<vmem>>, %arg36: memref<2x1x32xf32, #tpu.memory_space<vmem>>, %arg37: memref<2x1x32xf32, #tpu.memory_space<vmem>>, %arg38: memref<2x1x32xf32, #tpu.memory_space<vmem>>, %arg39: memref<1x32xf32, #tpu.memory_space<vmem>>, %arg40: memref<1x32xf32, #tpu.memory_space<vmem>>, %arg41: memref<1x32xf32, #tpu.memory_space<vmem>>, %arg42: memref<1x32xf32, #tpu.memory_space<vmem>>, %arg43: memref<32x128xf32, #tpu.memory_space<vmem>>, %arg44: memref<1x128xf32, #tpu.memory_space<vmem>>, %arg45: memref<1x8x128xf32, #tpu.memory_space<vmem>>) attributes {dimension_semantics = [#tpu.dimension_semantics<parallel>], iteration_bounds = array<i64: 2>, scalar_prefetch = 0 : i64, scratch_operands = 0 : i64, tpu.core_type = #tpu.core_type<tc>, window_params = [{transform_indices = @transform_0, window_bounds = array<i64: 1, 16, 32>}, {transform_indices = @transform_1, window_bounds = array<i64: 1, 8, 32>}, {pipeline_mode = #tpu.pipeline_mode<synchronous>, transform_indices = @transform_2, window_bounds = array<i64: 2, 32, 32>}, {pipeline_mode = #tpu.pipeline_mode<synchronous>, transform_indices = @transform_3, window_bounds = array<i64: 2, 32, 64>}, {pipeline_mode = #tpu.pipeline_mode<synchronous>, transform_indices = @transform_4, window_bounds = array<i64: 2, 1, 32>}, {pipeline_mode = #tpu.pipeline_mode<synchronous>, transform_indices = @transform_5, window_bounds = array<i64: 2, 1, 64>}, {pipeline_mode = #tpu.pipeline_mode<synchronous>, transform_indices = @transform_6, window_bounds = array<i64: 2, 4, 8, 32>}, {pipeline_mode = #tpu.pipeline_mode<synchronous>, transform_indices = @transform_7, window_bounds = array<i64: 2, 1, 32>}, {pipeline_mode = #tpu.pipeline_mode<synchronous>, transform_indices = @transform_8, window_bounds = array<i64: 2, 1, 32>}, {pipeline_mode = #tpu.pipeline_mode<synchronous>, transform_indices = @transform_9, window_bounds = array<i64: 2, 1, 32>}, {pipeline_mode = #tpu.pipeline_mode<synchronous>, transform_indices = @transform_10, window_bounds = array<i64: 2, 32, 2048>}, {pipeline_mode = #tpu.pipeline_mode<synchronous>, transform_indices = @transform_11, window_bounds = array<i64: 2, 1, 2048>}, {pipeline_mode = #tpu.pipeline_mode<synchronous>, transform_indices = @transform_12, window_bounds = array<i64: 2, 32, 2048>}, {pipeline_mode = #tpu.pipeline_mode<synchronous>, transform_indices = @transform_13, window_bounds = array<i64: 2, 1, 32>}, {pipeline_mode = #tpu.pipeline_mode<synchronous>, transform_indices = @transform_14, window_bounds = array<i64: 2, 1, 32>}, {pipeline_mode = #tpu.pipeline_mode<synchronous>, transform_indices = @transform_15, window_bounds = array<i64: 2, 1, 32>}, {pipeline_mode = #tpu.pipeline_mode<synchronous>, transform_indices = @transform_16, window_bounds = array<i64: 2, 32, 32>}, {pipeline_mode = #tpu.pipeline_mode<synchronous>, transform_indices = @transform_17, window_bounds = array<i64: 2, 32, 64>}, {pipeline_mode = #tpu.pipeline_mode<synchronous>, transform_indices = @transform_18, window_bounds = array<i64: 2, 1, 32>}, {pipeline_mode = #tpu.pipeline_mode<synchronous>, transform_indices = @transform_19, window_bounds = array<i64: 2, 1, 64>}, {pipeline_mode = #tpu.pipeline_mode<synchronous>, transform_indices = @transform_20, window_bounds = array<i64: 2, 4, 8, 32>}, {pipeline_mode = #tpu.pipeline_mode<synchronous>, transform_indices = @transform_21, window_bounds = array<i64: 2, 1, 32>}, {pipeline_mode = #tpu.pipeline_mode<synchronous>, transform_indices = @transform_22, window_bounds = array<i64: 2, 1, 32>}, {pipeline_mode = #tpu.pipeline_mode<synchronous>, transform_indices = @transform_23, window_bounds = array<i64: 2, 1, 32>}, {pipeline_mode = #tpu.pipeline_mode<synchronous>, transform_indices = @transform_24, window_bounds = array<i64: 2, 32, 32>}, {pipeline_mode = #tpu.pipeline_mode<synchronous>, transform_indices = @transform_25, window_bounds = array<i64: 2, 32, 64>}, {pipeline_mode = #tpu.pipeline_mode<synchronous>, transform_indices = @transform_26, window_bounds = array<i64: 2, 1, 32>}, {pipeline_mode = #tpu.pipeline_mode<synchronous>, transform_indices = @transform_27, window_bounds = array<i64: 2, 1, 64>}, {pipeline_mode = #tpu.pipeline_mode<synchronous>, transform_indices = @transform_28, window_bounds = array<i64: 2, 4, 8, 32>}, {pipeline_mode = #tpu.pipeline_mode<synchronous>, transform_indices = @transform_29, window_bounds = array<i64: 2, 1, 32>}, {pipeline_mode = #tpu.pipeline_mode<synchronous>, transform_indices = @transform_30, window_bounds = array<i64: 2, 1, 32>}, {pipeline_mode = #tpu.pipeline_mode<synchronous>, transform_indices = @transform_31, window_bounds = array<i64: 2, 1, 32>}, {pipeline_mode = #tpu.pipeline_mode<synchronous>, transform_indices = @transform_32, window_bounds = array<i64: 2, 32, 2048>}, {pipeline_mode = #tpu.pipeline_mode<synchronous>, transform_indices = @transform_33, window_bounds = array<i64: 2, 1, 2048>}, {pipeline_mode = #tpu.pipeline_mode<synchronous>, transform_indices = @transform_34, window_bounds = array<i64: 2, 32, 2048>}, {pipeline_mode = #tpu.pipeline_mode<synchronous>, transform_indices = @transform_35, window_bounds = array<i64: 2, 1, 32>}, {pipeline_mode = #tpu.pipeline_mode<synchronous>, transform_indices = @transform_36, window_bounds = array<i64: 2, 1, 32>}, {pipeline_mode = #tpu.pipeline_mode<synchronous>, transform_indices = @transform_37, window_bounds = array<i64: 2, 1, 32>}, {pipeline_mode = #tpu.pipeline_mode<synchronous>, transform_indices = @transform_38, window_bounds = array<i64: 1, 32>}, {pipeline_mode = #tpu.pipeline_mode<synchronous>, transform_indices = @transform_39, window_bounds = array<i64: 1, 32>}, {pipeline_mode = #tpu.pipeline_mode<synchronous>, transform_indices = @transform_40, window_bounds = array<i64: 1, 32>}, {pipeline_mode = #tpu.pipeline_mode<synchronous>, transform_indices = @transform_41, window_bounds = array<i64: 1, 32>}, {pipeline_mode = #tpu.pipeline_mode<synchronous>, transform_indices = @transform_42, window_bounds = array<i64: 32, 128>}, {pipeline_mode = #tpu.pipeline_mode<synchronous>, transform_indices = @transform_43, window_bounds = array<i64: 1, 128>}, {transform_indices = @transform_44, window_bounds = array<i64: 1, 8, 128>}]} {
    %c0 = arith.constant 0 : index
    %c0_0 = arith.constant 0 : index
    %c0_1 = arith.constant 0 : index
    %0 = vector.load %arg1[%c0, %c0_0, %c0_1] : memref<1x16x32xf32, #tpu.memory_space<vmem>>, vector<1x16x32xf32>
    %1 = vector.shape_cast %0 : vector<1x16x32xf32> to vector<16x32xf32>
    %c0_2 = arith.constant 0 : index
    %c0_3 = arith.constant 0 : index
    %c0_4 = arith.constant 0 : index
    %2 = vector.load %arg3[%c0_2, %c0_3, %c0_4] : memref<2x32x32xf32, #tpu.memory_space<vmem>>, vector<1x32x32xf32>
    %3 = vector.shape_cast %2 : vector<1x32x32xf32> to vector<32x32xf32>
    %cst = arith.constant dense<0.000000e+00> : vector<16x32xf32>
    %4 = tpu.matmul %1, %3, %cst {dimension_numbers = #tpu.dot_dimension_numbers<[1], [0], [0], [1], [0, 0, 1, 1], [], []>} : vector<16x32xf32>, vector<32x32xf32>, vector<16x32xf32> -> vector<16x32xf32>
    %c0_5 = arith.constant 0 : index
    %c0_6 = arith.constant 0 : index
    %c0_7 = arith.constant 0 : index
    %5 = vector.load %arg5[%c0_5, %c0_6, %c0_7] : memref<2x1x32xf32, #tpu.memory_space<vmem>>, vector<1x1x32xf32>
    %6 = vector.shape_cast %5 : vector<1x1x32xf32> to vector<1x32xf32>
    %7 = vector.broadcast %6 : vector<1x32xf32> to vector<16x32xf32>
    %8 = arith.addf %4, %7 : vector<16x32xf32>
    %c0_8 = arith.constant 0 : index
    %c0_9 = arith.constant 0 : index
    %c0_10 = arith.constant 0 : index
    %9 = vector.load %arg4[%c0_8, %c0_9, %c0_10] : memref<2x32x64xf32, #tpu.memory_space<vmem>>, vector<1x32x64xf32>
    %10 = vector.shape_cast %9 : vector<1x32x64xf32> to vector<32x64xf32>
    %cst_11 = arith.constant dense<0.000000e+00> : vector<16x64xf32>
    %11 = tpu.matmul %1, %10, %cst_11 {dimension_numbers = #tpu.dot_dimension_numbers<[1], [0], [0], [1], [0, 0, 1, 1], [], []>} : vector<16x32xf32>, vector<32x64xf32>, vector<16x64xf32> -> vector<16x64xf32>
    %c0_12 = arith.constant 0 : index
    %c0_13 = arith.constant 0 : index
    %c0_14 = arith.constant 0 : index
    %12 = vector.load %arg6[%c0_12, %c0_13, %c0_14] : memref<2x1x64xf32, #tpu.memory_space<vmem>>, vector<1x1x64xf32>
    %13 = vector.shape_cast %12 : vector<1x1x64xf32> to vector<1x64xf32>
    %14 = vector.broadcast %13 : vector<1x64xf32> to vector<16x64xf32>
    %15 = arith.addf %11, %14 : vector<16x64xf32>
    %16 = vector.extract_strided_slice %8 {offsets = [0, 0], sizes = [16, 8], strides = [1, 1]} : vector<16x32xf32> to vector<16x8xf32>
    %17 = vector.extract_strided_slice %15 {offsets = [0, 0], sizes = [16, 8], strides = [1, 1]} : vector<16x64xf32> to vector<16x8xf32>
    %18 = vector.extract_strided_slice %15 {offsets = [0, 32], sizes = [16, 8], strides = [1, 1]} : vector<16x64xf32> to vector<16x8xf32>
    %cst_15 = arith.constant dense<0.000000e+00> : vector<16x16xf32>
    %19 = tpu.matmul %16, %17, %cst_15 {dimension_numbers = #tpu.dot_dimension_numbers<[1], [1], [0], [0], [0, 0, 1, 0], [], []>} : vector<16x8xf32>, vector<16x8xf32>, vector<16x16xf32> -> vector<16x16xf32>
    %cst_16 = arith.constant 0.353553385 : f32
    %20 = vector.broadcast %cst_16 : f32 to vector<16x16xf32>
    %21 = arith.mulf %19, %20 : vector<16x16xf32>
    %cst_17 = arith.constant dense<0xFF800000> : vector<16xf32>
    %22 = vector.multi_reduction <maximumf>, %21, %cst_17 [1] : vector<16x16xf32> to vector<16xf32>
    %23 = vector.shape_cast %22 : vector<16xf32> to vector<16x1xf32>
    %24 = vector.broadcast %23 : vector<16x1xf32> to vector<16x16xf32>
    %25 = arith.subf %21, %24 : vector<16x16xf32>
    %26 = math.exp %25 : vector<16x16xf32>
    %cst_18 = arith.constant dense<0.000000e+00> : vector<16xf32>
    %27 = vector.multi_reduction <add>, %26, %cst_18 [1] : vector<16x16xf32> to vector<16xf32>
    %28 = vector.shape_cast %27 : vector<16xf32> to vector<16x1xf32>
    %29 = tpu.reciprocal %28 {approx = true} : vector<16x1xf32> -> vector<16x1xf32>
    %30 = vector.broadcast %29 : vector<16x1xf32> to vector<16x16xf32>
    %31 = arith.mulf %26, %30 : vector<16x16xf32>
    %cst_19 = arith.constant dense<0.000000e+00> : vector<16x8xf32>
    %32 = tpu.matmul %31, %18, %cst_19 {dimension_numbers = #tpu.dot_dimension_numbers<[1], [0], [0], [1], [0, 0, 1, 1], [], []>} : vector<16x16xf32>, vector<16x8xf32>, vector<16x8xf32> -> vector<16x8xf32>
    %c0_20 = arith.constant 0 : index
    %c0_21 = arith.constant 0 : index
    %c0_22 = arith.constant 0 : index
    %c0_23 = arith.constant 0 : index
    %33 = vector.load %arg7[%c0_20, %c0_21, %c0_22, %c0_23] : memref<2x4x8x32xf32, #tpu.memory_space<vmem>>, vector<1x1x8x32xf32>
    %34 = vector.shape_cast %33 : vector<1x1x8x32xf32> to vector<8x32xf32>
    %cst_24 = arith.constant dense<0.000000e+00> : vector<16x32xf32>
    %35 = tpu.matmul %32, %34, %cst_24 {dimension_numbers = #tpu.dot_dimension_numbers<[1], [0], [0], [1], [0, 0, 1, 1], [], []>} : vector<16x8xf32>, vector<8x32xf32>, vector<16x32xf32> -> vector<16x32xf32>
    %36 = vector.extract_strided_slice %8 {offsets = [0, 8], sizes = [16, 8], strides = [1, 1]} : vector<16x32xf32> to vector<16x8xf32>
    %37 = vector.extract_strided_slice %15 {offsets = [0, 8], sizes = [16, 8], strides = [1, 1]} : vector<16x64xf32> to vector<16x8xf32>
    %38 = vector.extract_strided_slice %15 {offsets = [0, 40], sizes = [16, 8], strides = [1, 1]} : vector<16x64xf32> to vector<16x8xf32>
    %cst_25 = arith.constant dense<0.000000e+00> : vector<16x16xf32>
    %39 = tpu.matmul %36, %37, %cst_25 {dimension_numbers = #tpu.dot_dimension_numbers<[1], [1], [0], [0], [0, 0, 1, 0], [], []>} : vector<16x8xf32>, vector<16x8xf32>, vector<16x16xf32> -> vector<16x16xf32>
    %cst_26 = arith.constant 0.353553385 : f32
    %40 = vector.broadcast %cst_26 : f32 to vector<16x16xf32>
    %41 = arith.mulf %39, %40 : vector<16x16xf32>
    %cst_27 = arith.constant dense<0xFF800000> : vector<16xf32>
    %42 = vector.multi_reduction <maximumf>, %41, %cst_27 [1] : vector<16x16xf32> to vector<16xf32>
    %43 = vector.shape_cast %42 : vector<16xf32> to vector<16x1xf32>
    %44 = vector.broadcast %43 : vector<16x1xf32> to vector<16x16xf32>
    %45 = arith.subf %41, %44 : vector<16x16xf32>
    %46 = math.exp %45 : vector<16x16xf32>
    %cst_28 = arith.constant dense<0.000000e+00> : vector<16xf32>
    %47 = vector.multi_reduction <add>, %46, %cst_28 [1] : vector<16x16xf32> to vector<16xf32>
    %48 = vector.shape_cast %47 : vector<16xf32> to vector<16x1xf32>
    %49 = tpu.reciprocal %48 {approx = true} : vector<16x1xf32> -> vector<16x1xf32>
    %50 = vector.broadcast %49 : vector<16x1xf32> to vector<16x16xf32>
    %51 = arith.mulf %46, %50 : vector<16x16xf32>
    %cst_29 = arith.constant dense<0.000000e+00> : vector<16x8xf32>
    %52 = tpu.matmul %51, %38, %cst_29 {dimension_numbers = #tpu.dot_dimension_numbers<[1], [0], [0], [1], [0, 0, 1, 1], [], []>} : vector<16x16xf32>, vector<16x8xf32>, vector<16x8xf32> -> vector<16x8xf32>
    %c0_30 = arith.constant 0 : index
    %c1 = arith.constant 1 : index
    %c0_31 = arith.constant 0 : index
    %c0_32 = arith.constant 0 : index
    %53 = vector.load %arg7[%c0_30, %c1, %c0_31, %c0_32] : memref<2x4x8x32xf32, #tpu.memory_space<vmem>>, vector<1x1x8x32xf32>
    %54 = vector.shape_cast %53 : vector<1x1x8x32xf32> to vector<8x32xf32>
    %cst_33 = arith.constant dense<0.000000e+00> : vector<16x32xf32>
    %55 = tpu.matmul %52, %54, %cst_33 {dimension_numbers = #tpu.dot_dimension_numbers<[1], [0], [0], [1], [0, 0, 1, 1], [], []>} : vector<16x8xf32>, vector<8x32xf32>, vector<16x32xf32> -> vector<16x32xf32>
    %56 = arith.addf %35, %55 : vector<16x32xf32>
    %57 = vector.extract_strided_slice %8 {offsets = [0, 16], sizes = [16, 8], strides = [1, 1]} : vector<16x32xf32> to vector<16x8xf32>
    %58 = vector.extract_strided_slice %15 {offsets = [0, 16], sizes = [16, 8], strides = [1, 1]} : vector<16x64xf32> to vector<16x8xf32>
    %59 = vector.extract_strided_slice %15 {offsets = [0, 48], sizes = [16, 8], strides = [1, 1]} : vector<16x64xf32> to vector<16x8xf32>
    %cst_34 = arith.constant dense<0.000000e+00> : vector<16x16xf32>
    %60 = tpu.matmul %57, %58, %cst_34 {dimension_numbers = #tpu.dot_dimension_numbers<[1], [1], [0], [0], [0, 0, 1, 0], [], []>} : vector<16x8xf32>, vector<16x8xf32>, vector<16x16xf32> -> vector<16x16xf32>
    %cst_35 = arith.constant 0.353553385 : f32
    %61 = vector.broadcast %cst_35 : f32 to vector<16x16xf32>
    %62 = arith.mulf %60, %61 : vector<16x16xf32>
    %cst_36 = arith.constant dense<0xFF800000> : vector<16xf32>
    %63 = vector.multi_reduction <maximumf>, %62, %cst_36 [1] : vector<16x16xf32> to vector<16xf32>
    %64 = vector.shape_cast %63 : vector<16xf32> to vector<16x1xf32>
    %65 = vector.broadcast %64 : vector<16x1xf32> to vector<16x16xf32>
    %66 = arith.subf %62, %65 : vector<16x16xf32>
    %67 = math.exp %66 : vector<16x16xf32>
    %cst_37 = arith.constant dense<0.000000e+00> : vector<16xf32>
    %68 = vector.multi_reduction <add>, %67, %cst_37 [1] : vector<16x16xf32> to vector<16xf32>
    %69 = vector.shape_cast %68 : vector<16xf32> to vector<16x1xf32>
    %70 = tpu.reciprocal %69 {approx = true} : vector<16x1xf32> -> vector<16x1xf32>
    %71 = vector.broadcast %70 : vector<16x1xf32> to vector<16x16xf32>
    %72 = arith.mulf %67, %71 : vector<16x16xf32>
    %cst_38 = arith.constant dense<0.000000e+00> : vector<16x8xf32>
    %73 = tpu.matmul %72, %59, %cst_38 {dimension_numbers = #tpu.dot_dimension_numbers<[1], [0], [0], [1], [0, 0, 1, 1], [], []>} : vector<16x16xf32>, vector<16x8xf32>, vector<16x8xf32> -> vector<16x8xf32>
    %c0_39 = arith.constant 0 : index
    %c2 = arith.constant 2 : index
    %c0_40 = arith.constant 0 : index
    %c0_41 = arith.constant 0 : index
    %74 = vector.load %arg7[%c0_39, %c2, %c0_40, %c0_41] : memref<2x4x8x32xf32, #tpu.memory_space<vmem>>, vector<1x1x8x32xf32>
    %75 = vector.shape_cast %74 : vector<1x1x8x32xf32> to vector<8x32xf32>
    %cst_42 = arith.constant dense<0.000000e+00> : vector<16x32xf32>
    %76 = tpu.matmul %73, %75, %cst_42 {dimension_numbers = #tpu.dot_dimension_numbers<[1], [0], [0], [1], [0, 0, 1, 1], [], []>} : vector<16x8xf32>, vector<8x32xf32>, vector<16x32xf32> -> vector<16x32xf32>
    %77 = arith.addf %56, %76 : vector<16x32xf32>
    %78 = vector.extract_strided_slice %8 {offsets = [0, 24], sizes = [16, 8], strides = [1, 1]} : vector<16x32xf32> to vector<16x8xf32>
    %79 = vector.extract_strided_slice %15 {offsets = [0, 24], sizes = [16, 8], strides = [1, 1]} : vector<16x64xf32> to vector<16x8xf32>
    %80 = vector.extract_strided_slice %15 {offsets = [0, 56], sizes = [16, 8], strides = [1, 1]} : vector<16x64xf32> to vector<16x8xf32>
    %cst_43 = arith.constant dense<0.000000e+00> : vector<16x16xf32>
    %81 = tpu.matmul %78, %79, %cst_43 {dimension_numbers = #tpu.dot_dimension_numbers<[1], [1], [0], [0], [0, 0, 1, 0], [], []>} : vector<16x8xf32>, vector<16x8xf32>, vector<16x16xf32> -> vector<16x16xf32>
    %cst_44 = arith.constant 0.353553385 : f32
    %82 = vector.broadcast %cst_44 : f32 to vector<16x16xf32>
    %83 = arith.mulf %81, %82 : vector<16x16xf32>
    %cst_45 = arith.constant dense<0xFF800000> : vector<16xf32>
    %84 = vector.multi_reduction <maximumf>, %83, %cst_45 [1] : vector<16x16xf32> to vector<16xf32>
    %85 = vector.shape_cast %84 : vector<16xf32> to vector<16x1xf32>
    %86 = vector.broadcast %85 : vector<16x1xf32> to vector<16x16xf32>
    %87 = arith.subf %83, %86 : vector<16x16xf32>
    %88 = math.exp %87 : vector<16x16xf32>
    %cst_46 = arith.constant dense<0.000000e+00> : vector<16xf32>
    %89 = vector.multi_reduction <add>, %88, %cst_46 [1] : vector<16x16xf32> to vector<16xf32>
    %90 = vector.shape_cast %89 : vector<16xf32> to vector<16x1xf32>
    %91 = tpu.reciprocal %90 {approx = true} : vector<16x1xf32> -> vector<16x1xf32>
    %92 = vector.broadcast %91 : vector<16x1xf32> to vector<16x16xf32>
    %93 = arith.mulf %88, %92 : vector<16x16xf32>
    %cst_47 = arith.constant dense<0.000000e+00> : vector<16x8xf32>
    %94 = tpu.matmul %93, %80, %cst_47 {dimension_numbers = #tpu.dot_dimension_numbers<[1], [0], [0], [1], [0, 0, 1, 1], [], []>} : vector<16x16xf32>, vector<16x8xf32>, vector<16x8xf32> -> vector<16x8xf32>
    %c0_48 = arith.constant 0 : index
    %c3 = arith.constant 3 : index
    %c0_49 = arith.constant 0 : index
    %c0_50 = arith.constant 0 : index
    %95 = vector.load %arg7[%c0_48, %c3, %c0_49, %c0_50] : memref<2x4x8x32xf32, #tpu.memory_space<vmem>>, vector<1x1x8x32xf32>
    %96 = vector.shape_cast %95 : vector<1x1x8x32xf32> to vector<8x32xf32>
    %cst_51 = arith.constant dense<0.000000e+00> : vector<16x32xf32>
    %97 = tpu.matmul %94, %96, %cst_51 {dimension_numbers = #tpu.dot_dimension_numbers<[1], [0], [0], [1], [0, 0, 1, 1], [], []>} : vector<16x8xf32>, vector<8x32xf32>, vector<16x32xf32> -> vector<16x32xf32>
    %98 = arith.addf %77, %97 : vector<16x32xf32>
    %c0_52 = arith.constant 0 : index
    %c0_53 = arith.constant 0 : index
    %c0_54 = arith.constant 0 : index
    %99 = vector.load %arg8[%c0_52, %c0_53, %c0_54] : memref<2x1x32xf32, #tpu.memory_space<vmem>>, vector<1x1x32xf32>
    %100 = vector.shape_cast %99 : vector<1x1x32xf32> to vector<1x32xf32>
    %101 = vector.broadcast %100 : vector<1x32xf32> to vector<16x32xf32>
    %102 = arith.addf %98, %101 : vector<16x32xf32>
    %103 = arith.addf %1, %102 : vector<16x32xf32>
    %c0_55 = arith.constant 0 : index
    %c0_56 = arith.constant 0 : index
    %c0_57 = arith.constant 0 : index
    %104 = vector.load %arg9[%c0_55, %c0_56, %c0_57] : memref<2x1x32xf32, #tpu.memory_space<vmem>>, vector<1x1x32xf32>
    %105 = vector.shape_cast %104 : vector<1x1x32xf32> to vector<1x32xf32>
    %c0_58 = arith.constant 0 : index
    %c0_59 = arith.constant 0 : index
    %c0_60 = arith.constant 0 : index
    %106 = vector.load %arg10[%c0_58, %c0_59, %c0_60] : memref<2x1x32xf32, #tpu.memory_space<vmem>>, vector<1x1x32xf32>
    %107 = vector.shape_cast %106 : vector<1x1x32xf32> to vector<1x32xf32>
    %cst_61 = arith.constant dense<0.000000e+00> : vector<16xf32>
    %108 = vector.multi_reduction <add>, %103, %cst_61 [1] : vector<16x32xf32> to vector<16xf32>
    %109 = vector.shape_cast %108 : vector<16xf32> to vector<16x1xf32>
    %cst_62 = arith.constant 3.200000e+01 : f32
    %110 = vector.broadcast %cst_62 : f32 to vector<16x1xf32>
    %111 = arith.divf %109, %110 : vector<16x1xf32>
    %112 = vector.broadcast %111 : vector<16x1xf32> to vector<16x32xf32>
    %113 = arith.subf %103, %112 : vector<16x32xf32>
    %114 = arith.mulf %113, %113 : vector<16x32xf32>
    %cst_63 = arith.constant dense<0.000000e+00> : vector<16xf32>
    %115 = vector.multi_reduction <add>, %114, %cst_63 [1] : vector<16x32xf32> to vector<16xf32>
    %116 = vector.shape_cast %115 : vector<16xf32> to vector<16x1xf32>
    %cst_64 = arith.constant 3.200000e+01 : f32
    %117 = vector.broadcast %cst_64 : f32 to vector<16x1xf32>
    %118 = arith.divf %116, %117 : vector<16x1xf32>
    %cst_65 = arith.constant 9.99999974E-6 : f32
    %119 = vector.broadcast %cst_65 : f32 to vector<16x1xf32>
    %120 = arith.addf %118, %119 : vector<16x1xf32>
    %121 = math.rsqrt %120 : vector<16x1xf32>
    %122 = vector.broadcast %121 : vector<16x1xf32> to vector<16x32xf32>
    %123 = arith.mulf %113, %122 : vector<16x32xf32>
    %124 = vector.broadcast %105 : vector<1x32xf32> to vector<16x32xf32>
    %125 = arith.mulf %123, %124 : vector<16x32xf32>
    %126 = vector.broadcast %107 : vector<1x32xf32> to vector<16x32xf32>
    %127 = arith.addf %125, %126 : vector<16x32xf32>
    %c0_66 = arith.constant 0 : index
    %c0_67 = arith.constant 0 : index
    %c0_68 = arith.constant 0 : index
    %128 = vector.load %arg11[%c0_66, %c0_67, %c0_68] : memref<2x32x2048xf32, #tpu.memory_space<vmem>>, vector<1x32x512xf32>
    %129 = vector.shape_cast %128 : vector<1x32x512xf32> to vector<32x512xf32>
    %cst_69 = arith.constant dense<0.000000e+00> : vector<16x512xf32>
    %130 = tpu.matmul %127, %129, %cst_69 {dimension_numbers = #tpu.dot_dimension_numbers<[1], [0], [0], [1], [0, 0, 1, 1], [], []>} : vector<16x32xf32>, vector<32x512xf32>, vector<16x512xf32> -> vector<16x512xf32>
    %c0_70 = arith.constant 0 : index
    %c0_71 = arith.constant 0 : index
    %c0_72 = arith.constant 0 : index
    %131 = vector.load %arg12[%c0_70, %c0_71, %c0_72] : memref<2x1x2048xf32, #tpu.memory_space<vmem>>, vector<1x1x512xf32>
    %132 = vector.shape_cast %131 : vector<1x1x512xf32> to vector<1x512xf32>
    %133 = vector.broadcast %132 : vector<1x512xf32> to vector<16x512xf32>
    %134 = arith.addf %130, %133 : vector<16x512xf32>
    %cst_73 = arith.constant 0.000000e+00 : f32
    %135 = vector.broadcast %cst_73 : f32 to vector<16x512xf32>
    %136 = arith.maximumf %134, %135 : vector<16x512xf32>
    %c0_74 = arith.constant 0 : index
    %c0_75 = arith.constant 0 : index
    %c0_76 = arith.constant 0 : index
    %137 = vector.load %arg13[%c0_74, %c0_75, %c0_76] : memref<2x32x2048xf32, #tpu.memory_space<vmem>>, vector<1x32x512xf32>
    %138 = vector.shape_cast %137 : vector<1x32x512xf32> to vector<32x512xf32>
    %cst_77 = arith.constant dense<0.000000e+00> : vector<16x32xf32>
    %139 = tpu.matmul %136, %138, %cst_77 {dimension_numbers = #tpu.dot_dimension_numbers<[1], [1], [0], [0], [0, 0, 1, 0], [], []>} : vector<16x512xf32>, vector<32x512xf32>, vector<16x32xf32> -> vector<16x32xf32>
    %c0_78 = arith.constant 0 : index
    %c0_79 = arith.constant 0 : index
    %c512 = arith.constant 512 : index
    %140 = vector.load %arg11[%c0_78, %c0_79, %c512] : memref<2x32x2048xf32, #tpu.memory_space<vmem>>, vector<1x32x512xf32>
    %141 = vector.shape_cast %140 : vector<1x32x512xf32> to vector<32x512xf32>
    %cst_80 = arith.constant dense<0.000000e+00> : vector<16x512xf32>
    %142 = tpu.matmul %127, %141, %cst_80 {dimension_numbers = #tpu.dot_dimension_numbers<[1], [0], [0], [1], [0, 0, 1, 1], [], []>} : vector<16x32xf32>, vector<32x512xf32>, vector<16x512xf32> -> vector<16x512xf32>
    %c0_81 = arith.constant 0 : index
    %c0_82 = arith.constant 0 : index
    %c512_83 = arith.constant 512 : index
    %143 = vector.load %arg12[%c0_81, %c0_82, %c512_83] : memref<2x1x2048xf32, #tpu.memory_space<vmem>>, vector<1x1x512xf32>
    %144 = vector.shape_cast %143 : vector<1x1x512xf32> to vector<1x512xf32>
    %145 = vector.broadcast %144 : vector<1x512xf32> to vector<16x512xf32>
    %146 = arith.addf %142, %145 : vector<16x512xf32>
    %cst_84 = arith.constant 0.000000e+00 : f32
    %147 = vector.broadcast %cst_84 : f32 to vector<16x512xf32>
    %148 = arith.maximumf %146, %147 : vector<16x512xf32>
    %c0_85 = arith.constant 0 : index
    %c0_86 = arith.constant 0 : index
    %c512_87 = arith.constant 512 : index
    %149 = vector.load %arg13[%c0_85, %c0_86, %c512_87] : memref<2x32x2048xf32, #tpu.memory_space<vmem>>, vector<1x32x512xf32>
    %150 = vector.shape_cast %149 : vector<1x32x512xf32> to vector<32x512xf32>
    %cst_88 = arith.constant dense<0.000000e+00> : vector<16x32xf32>
    %151 = tpu.matmul %148, %150, %cst_88 {dimension_numbers = #tpu.dot_dimension_numbers<[1], [1], [0], [0], [0, 0, 1, 0], [], []>} : vector<16x512xf32>, vector<32x512xf32>, vector<16x32xf32> -> vector<16x32xf32>
    %152 = arith.addf %139, %151 : vector<16x32xf32>
    %c0_89 = arith.constant 0 : index
    %c0_90 = arith.constant 0 : index
    %c1024 = arith.constant 1024 : index
    %153 = vector.load %arg11[%c0_89, %c0_90, %c1024] : memref<2x32x2048xf32, #tpu.memory_space<vmem>>, vector<1x32x512xf32>
    %154 = vector.shape_cast %153 : vector<1x32x512xf32> to vector<32x512xf32>
    %cst_91 = arith.constant dense<0.000000e+00> : vector<16x512xf32>
    %155 = tpu.matmul %127, %154, %cst_91 {dimension_numbers = #tpu.dot_dimension_numbers<[1], [0], [0], [1], [0, 0, 1, 1], [], []>} : vector<16x32xf32>, vector<32x512xf32>, vector<16x512xf32> -> vector<16x512xf32>
    %c0_92 = arith.constant 0 : index
    %c0_93 = arith.constant 0 : index
    %c1024_94 = arith.constant 1024 : index
    %156 = vector.load %arg12[%c0_92, %c0_93, %c1024_94] : memref<2x1x2048xf32, #tpu.memory_space<vmem>>, vector<1x1x512xf32>
    %157 = vector.shape_cast %156 : vector<1x1x512xf32> to vector<1x512xf32>
    %158 = vector.broadcast %157 : vector<1x512xf32> to vector<16x512xf32>
    %159 = arith.addf %155, %158 : vector<16x512xf32>
    %cst_95 = arith.constant 0.000000e+00 : f32
    %160 = vector.broadcast %cst_95 : f32 to vector<16x512xf32>
    %161 = arith.maximumf %159, %160 : vector<16x512xf32>
    %c0_96 = arith.constant 0 : index
    %c0_97 = arith.constant 0 : index
    %c1024_98 = arith.constant 1024 : index
    %162 = vector.load %arg13[%c0_96, %c0_97, %c1024_98] : memref<2x32x2048xf32, #tpu.memory_space<vmem>>, vector<1x32x512xf32>
    %163 = vector.shape_cast %162 : vector<1x32x512xf32> to vector<32x512xf32>
    %cst_99 = arith.constant dense<0.000000e+00> : vector<16x32xf32>
    %164 = tpu.matmul %161, %163, %cst_99 {dimension_numbers = #tpu.dot_dimension_numbers<[1], [1], [0], [0], [0, 0, 1, 0], [], []>} : vector<16x512xf32>, vector<32x512xf32>, vector<16x32xf32> -> vector<16x32xf32>
    %165 = arith.addf %152, %164 : vector<16x32xf32>
    %c0_100 = arith.constant 0 : index
    %c0_101 = arith.constant 0 : index
    %c1536 = arith.constant 1536 : index
    %166 = vector.load %arg11[%c0_100, %c0_101, %c1536] : memref<2x32x2048xf32, #tpu.memory_space<vmem>>, vector<1x32x512xf32>
    %167 = vector.shape_cast %166 : vector<1x32x512xf32> to vector<32x512xf32>
    %cst_102 = arith.constant dense<0.000000e+00> : vector<16x512xf32>
    %168 = tpu.matmul %127, %167, %cst_102 {dimension_numbers = #tpu.dot_dimension_numbers<[1], [0], [0], [1], [0, 0, 1, 1], [], []>} : vector<16x32xf32>, vector<32x512xf32>, vector<16x512xf32> -> vector<16x512xf32>
    %c0_103 = arith.constant 0 : index
    %c0_104 = arith.constant 0 : index
    %c1536_105 = arith.constant 1536 : index
    %169 = vector.load %arg12[%c0_103, %c0_104, %c1536_105] : memref<2x1x2048xf32, #tpu.memory_space<vmem>>, vector<1x1x512xf32>
    %170 = vector.shape_cast %169 : vector<1x1x512xf32> to vector<1x512xf32>
    %171 = vector.broadcast %170 : vector<1x512xf32> to vector<16x512xf32>
    %172 = arith.addf %168, %171 : vector<16x512xf32>
    %cst_106 = arith.constant 0.000000e+00 : f32
    %173 = vector.broadcast %cst_106 : f32 to vector<16x512xf32>
    %174 = arith.maximumf %172, %173 : vector<16x512xf32>
    %c0_107 = arith.constant 0 : index
    %c0_108 = arith.constant 0 : index
    %c1536_109 = arith.constant 1536 : index
    %175 = vector.load %arg13[%c0_107, %c0_108, %c1536_109] : memref<2x32x2048xf32, #tpu.memory_space<vmem>>, vector<1x32x512xf32>
    %176 = vector.shape_cast %175 : vector<1x32x512xf32> to vector<32x512xf32>
    %cst_110 = arith.constant dense<0.000000e+00> : vector<16x32xf32>
    %177 = tpu.matmul %174, %176, %cst_110 {dimension_numbers = #tpu.dot_dimension_numbers<[1], [1], [0], [0], [0, 0, 1, 0], [], []>} : vector<16x512xf32>, vector<32x512xf32>, vector<16x32xf32> -> vector<16x32xf32>
    %178 = arith.addf %165, %177 : vector<16x32xf32>
    %c0_111 = arith.constant 0 : index
    %c0_112 = arith.constant 0 : index
    %c0_113 = arith.constant 0 : index
    %179 = vector.load %arg14[%c0_111, %c0_112, %c0_113] : memref<2x1x32xf32, #tpu.memory_space<vmem>>, vector<1x1x32xf32>
    %180 = vector.shape_cast %179 : vector<1x1x32xf32> to vector<1x32xf32>
    %181 = vector.broadcast %180 : vector<1x32xf32> to vector<16x32xf32>
    %182 = arith.addf %178, %181 : vector<16x32xf32>
    %183 = arith.addf %127, %182 : vector<16x32xf32>
    %c0_114 = arith.constant 0 : index
    %c0_115 = arith.constant 0 : index
    %c0_116 = arith.constant 0 : index
    %184 = vector.load %arg15[%c0_114, %c0_115, %c0_116] : memref<2x1x32xf32, #tpu.memory_space<vmem>>, vector<1x1x32xf32>
    %185 = vector.shape_cast %184 : vector<1x1x32xf32> to vector<1x32xf32>
    %c0_117 = arith.constant 0 : index
    %c0_118 = arith.constant 0 : index
    %c0_119 = arith.constant 0 : index
    %186 = vector.load %arg16[%c0_117, %c0_118, %c0_119] : memref<2x1x32xf32, #tpu.memory_space<vmem>>, vector<1x1x32xf32>
    %187 = vector.shape_cast %186 : vector<1x1x32xf32> to vector<1x32xf32>
    %cst_120 = arith.constant dense<0.000000e+00> : vector<16xf32>
    %188 = vector.multi_reduction <add>, %183, %cst_120 [1] : vector<16x32xf32> to vector<16xf32>
    %189 = vector.shape_cast %188 : vector<16xf32> to vector<16x1xf32>
    %cst_121 = arith.constant 3.200000e+01 : f32
    %190 = vector.broadcast %cst_121 : f32 to vector<16x1xf32>
    %191 = arith.divf %189, %190 : vector<16x1xf32>
    %192 = vector.broadcast %191 : vector<16x1xf32> to vector<16x32xf32>
    %193 = arith.subf %183, %192 : vector<16x32xf32>
    %194 = arith.mulf %193, %193 : vector<16x32xf32>
    %cst_122 = arith.constant dense<0.000000e+00> : vector<16xf32>
    %195 = vector.multi_reduction <add>, %194, %cst_122 [1] : vector<16x32xf32> to vector<16xf32>
    %196 = vector.shape_cast %195 : vector<16xf32> to vector<16x1xf32>
    %cst_123 = arith.constant 3.200000e+01 : f32
    %197 = vector.broadcast %cst_123 : f32 to vector<16x1xf32>
    %198 = arith.divf %196, %197 : vector<16x1xf32>
    %cst_124 = arith.constant 9.99999974E-6 : f32
    %199 = vector.broadcast %cst_124 : f32 to vector<16x1xf32>
    %200 = arith.addf %198, %199 : vector<16x1xf32>
    %201 = math.rsqrt %200 : vector<16x1xf32>
    %202 = vector.broadcast %201 : vector<16x1xf32> to vector<16x32xf32>
    %203 = arith.mulf %193, %202 : vector<16x32xf32>
    %204 = vector.broadcast %185 : vector<1x32xf32> to vector<16x32xf32>
    %205 = arith.mulf %203, %204 : vector<16x32xf32>
    %206 = vector.broadcast %187 : vector<1x32xf32> to vector<16x32xf32>
    %207 = arith.addf %205, %206 : vector<16x32xf32>
    %c1_125 = arith.constant 1 : index
    %c0_126 = arith.constant 0 : index
    %c0_127 = arith.constant 0 : index
    %208 = vector.load %arg3[%c1_125, %c0_126, %c0_127] : memref<2x32x32xf32, #tpu.memory_space<vmem>>, vector<1x32x32xf32>
    %209 = vector.shape_cast %208 : vector<1x32x32xf32> to vector<32x32xf32>
    %cst_128 = arith.constant dense<0.000000e+00> : vector<16x32xf32>
    %210 = tpu.matmul %207, %209, %cst_128 {dimension_numbers = #tpu.dot_dimension_numbers<[1], [0], [0], [1], [0, 0, 1, 1], [], []>} : vector<16x32xf32>, vector<32x32xf32>, vector<16x32xf32> -> vector<16x32xf32>
    %c1_129 = arith.constant 1 : index
    %c0_130 = arith.constant 0 : index
    %c0_131 = arith.constant 0 : index
    %211 = vector.load %arg5[%c1_129, %c0_130, %c0_131] : memref<2x1x32xf32, #tpu.memory_space<vmem>>, vector<1x1x32xf32>
    %212 = vector.shape_cast %211 : vector<1x1x32xf32> to vector<1x32xf32>
    %213 = vector.broadcast %212 : vector<1x32xf32> to vector<16x32xf32>
    %214 = arith.addf %210, %213 : vector<16x32xf32>
    %c1_132 = arith.constant 1 : index
    %c0_133 = arith.constant 0 : index
    %c0_134 = arith.constant 0 : index
    %215 = vector.load %arg4[%c1_132, %c0_133, %c0_134] : memref<2x32x64xf32, #tpu.memory_space<vmem>>, vector<1x32x64xf32>
    %216 = vector.shape_cast %215 : vector<1x32x64xf32> to vector<32x64xf32>
    %cst_135 = arith.constant dense<0.000000e+00> : vector<16x64xf32>
    %217 = tpu.matmul %207, %216, %cst_135 {dimension_numbers = #tpu.dot_dimension_numbers<[1], [0], [0], [1], [0, 0, 1, 1], [], []>} : vector<16x32xf32>, vector<32x64xf32>, vector<16x64xf32> -> vector<16x64xf32>
    %c1_136 = arith.constant 1 : index
    %c0_137 = arith.constant 0 : index
    %c0_138 = arith.constant 0 : index
    %218 = vector.load %arg6[%c1_136, %c0_137, %c0_138] : memref<2x1x64xf32, #tpu.memory_space<vmem>>, vector<1x1x64xf32>
    %219 = vector.shape_cast %218 : vector<1x1x64xf32> to vector<1x64xf32>
    %220 = vector.broadcast %219 : vector<1x64xf32> to vector<16x64xf32>
    %221 = arith.addf %217, %220 : vector<16x64xf32>
    %222 = vector.extract_strided_slice %214 {offsets = [0, 0], sizes = [16, 8], strides = [1, 1]} : vector<16x32xf32> to vector<16x8xf32>
    %223 = vector.extract_strided_slice %221 {offsets = [0, 0], sizes = [16, 8], strides = [1, 1]} : vector<16x64xf32> to vector<16x8xf32>
    %224 = vector.extract_strided_slice %221 {offsets = [0, 32], sizes = [16, 8], strides = [1, 1]} : vector<16x64xf32> to vector<16x8xf32>
    %cst_139 = arith.constant dense<0.000000e+00> : vector<16x16xf32>
    %225 = tpu.matmul %222, %223, %cst_139 {dimension_numbers = #tpu.dot_dimension_numbers<[1], [1], [0], [0], [0, 0, 1, 0], [], []>} : vector<16x8xf32>, vector<16x8xf32>, vector<16x16xf32> -> vector<16x16xf32>
    %cst_140 = arith.constant 0.353553385 : f32
    %226 = vector.broadcast %cst_140 : f32 to vector<16x16xf32>
    %227 = arith.mulf %225, %226 : vector<16x16xf32>
    %cst_141 = arith.constant dense<0xFF800000> : vector<16xf32>
    %228 = vector.multi_reduction <maximumf>, %227, %cst_141 [1] : vector<16x16xf32> to vector<16xf32>
    %229 = vector.shape_cast %228 : vector<16xf32> to vector<16x1xf32>
    %230 = vector.broadcast %229 : vector<16x1xf32> to vector<16x16xf32>
    %231 = arith.subf %227, %230 : vector<16x16xf32>
    %232 = math.exp %231 : vector<16x16xf32>
    %cst_142 = arith.constant dense<0.000000e+00> : vector<16xf32>
    %233 = vector.multi_reduction <add>, %232, %cst_142 [1] : vector<16x16xf32> to vector<16xf32>
    %234 = vector.shape_cast %233 : vector<16xf32> to vector<16x1xf32>
    %235 = tpu.reciprocal %234 {approx = true} : vector<16x1xf32> -> vector<16x1xf32>
    %236 = vector.broadcast %235 : vector<16x1xf32> to vector<16x16xf32>
    %237 = arith.mulf %232, %236 : vector<16x16xf32>
    %cst_143 = arith.constant dense<0.000000e+00> : vector<16x8xf32>
    %238 = tpu.matmul %237, %224, %cst_143 {dimension_numbers = #tpu.dot_dimension_numbers<[1], [0], [0], [1], [0, 0, 1, 1], [], []>} : vector<16x16xf32>, vector<16x8xf32>, vector<16x8xf32> -> vector<16x8xf32>
    %c1_144 = arith.constant 1 : index
    %c0_145 = arith.constant 0 : index
    %c0_146 = arith.constant 0 : index
    %c0_147 = arith.constant 0 : index
    %239 = vector.load %arg7[%c1_144, %c0_145, %c0_146, %c0_147] : memref<2x4x8x32xf32, #tpu.memory_space<vmem>>, vector<1x1x8x32xf32>
    %240 = vector.shape_cast %239 : vector<1x1x8x32xf32> to vector<8x32xf32>
    %cst_148 = arith.constant dense<0.000000e+00> : vector<16x32xf32>
    %241 = tpu.matmul %238, %240, %cst_148 {dimension_numbers = #tpu.dot_dimension_numbers<[1], [0], [0], [1], [0, 0, 1, 1], [], []>} : vector<16x8xf32>, vector<8x32xf32>, vector<16x32xf32> -> vector<16x32xf32>
    %242 = vector.extract_strided_slice %214 {offsets = [0, 8], sizes = [16, 8], strides = [1, 1]} : vector<16x32xf32> to vector<16x8xf32>
    %243 = vector.extract_strided_slice %221 {offsets = [0, 8], sizes = [16, 8], strides = [1, 1]} : vector<16x64xf32> to vector<16x8xf32>
    %244 = vector.extract_strided_slice %221 {offsets = [0, 40], sizes = [16, 8], strides = [1, 1]} : vector<16x64xf32> to vector<16x8xf32>
    %cst_149 = arith.constant dense<0.000000e+00> : vector<16x16xf32>
    %245 = tpu.matmul %242, %243, %cst_149 {dimension_numbers = #tpu.dot_dimension_numbers<[1], [1], [0], [0], [0, 0, 1, 0], [], []>} : vector<16x8xf32>, vector<16x8xf32>, vector<16x16xf32> -> vector<16x16xf32>
    %cst_150 = arith.constant 0.353553385 : f32
    %246 = vector.broadcast %cst_150 : f32 to vector<16x16xf32>
    %247 = arith.mulf %245, %246 : vector<16x16xf32>
    %cst_151 = arith.constant dense<0xFF800000> : vector<16xf32>
    %248 = vector.multi_reduction <maximumf>, %247, %cst_151 [1] : vector<16x16xf32> to vector<16xf32>
    %249 = vector.shape_cast %248 : vector<16xf32> to vector<16x1xf32>
    %250 = vector.broadcast %249 : vector<16x1xf32> to vector<16x16xf32>
    %251 = arith.subf %247, %250 : vector<16x16xf32>
    %252 = math.exp %251 : vector<16x16xf32>
    %cst_152 = arith.constant dense<0.000000e+00> : vector<16xf32>
    %253 = vector.multi_reduction <add>, %252, %cst_152 [1] : vector<16x16xf32> to vector<16xf32>
    %254 = vector.shape_cast %253 : vector<16xf32> to vector<16x1xf32>
    %255 = tpu.reciprocal %254 {approx = true} : vector<16x1xf32> -> vector<16x1xf32>
    %256 = vector.broadcast %255 : vector<16x1xf32> to vector<16x16xf32>
    %257 = arith.mulf %252, %256 : vector<16x16xf32>
    %cst_153 = arith.constant dense<0.000000e+00> : vector<16x8xf32>
    %258 = tpu.matmul %257, %244, %cst_153 {dimension_numbers = #tpu.dot_dimension_numbers<[1], [0], [0], [1], [0, 0, 1, 1], [], []>} : vector<16x16xf32>, vector<16x8xf32>, vector<16x8xf32> -> vector<16x8xf32>
    %c1_154 = arith.constant 1 : index
    %c1_155 = arith.constant 1 : index
    %c0_156 = arith.constant 0 : index
    %c0_157 = arith.constant 0 : index
    %259 = vector.load %arg7[%c1_154, %c1_155, %c0_156, %c0_157] : memref<2x4x8x32xf32, #tpu.memory_space<vmem>>, vector<1x1x8x32xf32>
    %260 = vector.shape_cast %259 : vector<1x1x8x32xf32> to vector<8x32xf32>
    %cst_158 = arith.constant dense<0.000000e+00> : vector<16x32xf32>
    %261 = tpu.matmul %258, %260, %cst_158 {dimension_numbers = #tpu.dot_dimension_numbers<[1], [0], [0], [1], [0, 0, 1, 1], [], []>} : vector<16x8xf32>, vector<8x32xf32>, vector<16x32xf32> -> vector<16x32xf32>
    %262 = arith.addf %241, %261 : vector<16x32xf32>
    %263 = vector.extract_strided_slice %214 {offsets = [0, 16], sizes = [16, 8], strides = [1, 1]} : vector<16x32xf32> to vector<16x8xf32>
    %264 = vector.extract_strided_slice %221 {offsets = [0, 16], sizes = [16, 8], strides = [1, 1]} : vector<16x64xf32> to vector<16x8xf32>
    %265 = vector.extract_strided_slice %221 {offsets = [0, 48], sizes = [16, 8], strides = [1, 1]} : vector<16x64xf32> to vector<16x8xf32>
    %cst_159 = arith.constant dense<0.000000e+00> : vector<16x16xf32>
    %266 = tpu.matmul %263, %264, %cst_159 {dimension_numbers = #tpu.dot_dimension_numbers<[1], [1], [0], [0], [0, 0, 1, 0], [], []>} : vector<16x8xf32>, vector<16x8xf32>, vector<16x16xf32> -> vector<16x16xf32>
    %cst_160 = arith.constant 0.353553385 : f32
    %267 = vector.broadcast %cst_160 : f32 to vector<16x16xf32>
    %268 = arith.mulf %266, %267 : vector<16x16xf32>
    %cst_161 = arith.constant dense<0xFF800000> : vector<16xf32>
    %269 = vector.multi_reduction <maximumf>, %268, %cst_161 [1] : vector<16x16xf32> to vector<16xf32>
    %270 = vector.shape_cast %269 : vector<16xf32> to vector<16x1xf32>
    %271 = vector.broadcast %270 : vector<16x1xf32> to vector<16x16xf32>
    %272 = arith.subf %268, %271 : vector<16x16xf32>
    %273 = math.exp %272 : vector<16x16xf32>
    %cst_162 = arith.constant dense<0.000000e+00> : vector<16xf32>
    %274 = vector.multi_reduction <add>, %273, %cst_162 [1] : vector<16x16xf32> to vector<16xf32>
    %275 = vector.shape_cast %274 : vector<16xf32> to vector<16x1xf32>
    %276 = tpu.reciprocal %275 {approx = true} : vector<16x1xf32> -> vector<16x1xf32>
    %277 = vector.broadcast %276 : vector<16x1xf32> to vector<16x16xf32>
    %278 = arith.mulf %273, %277 : vector<16x16xf32>
    %cst_163 = arith.constant dense<0.000000e+00> : vector<16x8xf32>
    %279 = tpu.matmul %278, %265, %cst_163 {dimension_numbers = #tpu.dot_dimension_numbers<[1], [0], [0], [1], [0, 0, 1, 1], [], []>} : vector<16x16xf32>, vector<16x8xf32>, vector<16x8xf32> -> vector<16x8xf32>
    %c1_164 = arith.constant 1 : index
    %c2_165 = arith.constant 2 : index
    %c0_166 = arith.constant 0 : index
    %c0_167 = arith.constant 0 : index
    %280 = vector.load %arg7[%c1_164, %c2_165, %c0_166, %c0_167] : memref<2x4x8x32xf32, #tpu.memory_space<vmem>>, vector<1x1x8x32xf32>
    %281 = vector.shape_cast %280 : vector<1x1x8x32xf32> to vector<8x32xf32>
    %cst_168 = arith.constant dense<0.000000e+00> : vector<16x32xf32>
    %282 = tpu.matmul %279, %281, %cst_168 {dimension_numbers = #tpu.dot_dimension_numbers<[1], [0], [0], [1], [0, 0, 1, 1], [], []>} : vector<16x8xf32>, vector<8x32xf32>, vector<16x32xf32> -> vector<16x32xf32>
    %283 = arith.addf %262, %282 : vector<16x32xf32>
    %284 = vector.extract_strided_slice %214 {offsets = [0, 24], sizes = [16, 8], strides = [1, 1]} : vector<16x32xf32> to vector<16x8xf32>
    %285 = vector.extract_strided_slice %221 {offsets = [0, 24], sizes = [16, 8], strides = [1, 1]} : vector<16x64xf32> to vector<16x8xf32>
    %286 = vector.extract_strided_slice %221 {offsets = [0, 56], sizes = [16, 8], strides = [1, 1]} : vector<16x64xf32> to vector<16x8xf32>
    %cst_169 = arith.constant dense<0.000000e+00> : vector<16x16xf32>
    %287 = tpu.matmul %284, %285, %cst_169 {dimension_numbers = #tpu.dot_dimension_numbers<[1], [1], [0], [0], [0, 0, 1, 0], [], []>} : vector<16x8xf32>, vector<16x8xf32>, vector<16x16xf32> -> vector<16x16xf32>
    %cst_170 = arith.constant 0.353553385 : f32
    %288 = vector.broadcast %cst_170 : f32 to vector<16x16xf32>
    %289 = arith.mulf %287, %288 : vector<16x16xf32>
    %cst_171 = arith.constant dense<0xFF800000> : vector<16xf32>
    %290 = vector.multi_reduction <maximumf>, %289, %cst_171 [1] : vector<16x16xf32> to vector<16xf32>
    %291 = vector.shape_cast %290 : vector<16xf32> to vector<16x1xf32>
    %292 = vector.broadcast %291 : vector<16x1xf32> to vector<16x16xf32>
    %293 = arith.subf %289, %292 : vector<16x16xf32>
    %294 = math.exp %293 : vector<16x16xf32>
    %cst_172 = arith.constant dense<0.000000e+00> : vector<16xf32>
    %295 = vector.multi_reduction <add>, %294, %cst_172 [1] : vector<16x16xf32> to vector<16xf32>
    %296 = vector.shape_cast %295 : vector<16xf32> to vector<16x1xf32>
    %297 = tpu.reciprocal %296 {approx = true} : vector<16x1xf32> -> vector<16x1xf32>
    %298 = vector.broadcast %297 : vector<16x1xf32> to vector<16x16xf32>
    %299 = arith.mulf %294, %298 : vector<16x16xf32>
    %cst_173 = arith.constant dense<0.000000e+00> : vector<16x8xf32>
    %300 = tpu.matmul %299, %286, %cst_173 {dimension_numbers = #tpu.dot_dimension_numbers<[1], [0], [0], [1], [0, 0, 1, 1], [], []>} : vector<16x16xf32>, vector<16x8xf32>, vector<16x8xf32> -> vector<16x8xf32>
    %c1_174 = arith.constant 1 : index
    %c3_175 = arith.constant 3 : index
    %c0_176 = arith.constant 0 : index
    %c0_177 = arith.constant 0 : index
    %301 = vector.load %arg7[%c1_174, %c3_175, %c0_176, %c0_177] : memref<2x4x8x32xf32, #tpu.memory_space<vmem>>, vector<1x1x8x32xf32>
    %302 = vector.shape_cast %301 : vector<1x1x8x32xf32> to vector<8x32xf32>
    %cst_178 = arith.constant dense<0.000000e+00> : vector<16x32xf32>
    %303 = tpu.matmul %300, %302, %cst_178 {dimension_numbers = #tpu.dot_dimension_numbers<[1], [0], [0], [1], [0, 0, 1, 1], [], []>} : vector<16x8xf32>, vector<8x32xf32>, vector<16x32xf32> -> vector<16x32xf32>
    %304 = arith.addf %283, %303 : vector<16x32xf32>
    %c1_179 = arith.constant 1 : index
    %c0_180 = arith.constant 0 : index
    %c0_181 = arith.constant 0 : index
    %305 = vector.load %arg8[%c1_179, %c0_180, %c0_181] : memref<2x1x32xf32, #tpu.memory_space<vmem>>, vector<1x1x32xf32>
    %306 = vector.shape_cast %305 : vector<1x1x32xf32> to vector<1x32xf32>
    %307 = vector.broadcast %306 : vector<1x32xf32> to vector<16x32xf32>
    %308 = arith.addf %304, %307 : vector<16x32xf32>
    %309 = arith.addf %207, %308 : vector<16x32xf32>
    %c1_182 = arith.constant 1 : index
    %c0_183 = arith.constant 0 : index
    %c0_184 = arith.constant 0 : index
    %310 = vector.load %arg9[%c1_182, %c0_183, %c0_184] : memref<2x1x32xf32, #tpu.memory_space<vmem>>, vector<1x1x32xf32>
    %311 = vector.shape_cast %310 : vector<1x1x32xf32> to vector<1x32xf32>
    %c1_185 = arith.constant 1 : index
    %c0_186 = arith.constant 0 : index
    %c0_187 = arith.constant 0 : index
    %312 = vector.load %arg10[%c1_185, %c0_186, %c0_187] : memref<2x1x32xf32, #tpu.memory_space<vmem>>, vector<1x1x32xf32>
    %313 = vector.shape_cast %312 : vector<1x1x32xf32> to vector<1x32xf32>
    %cst_188 = arith.constant dense<0.000000e+00> : vector<16xf32>
    %314 = vector.multi_reduction <add>, %309, %cst_188 [1] : vector<16x32xf32> to vector<16xf32>
    %315 = vector.shape_cast %314 : vector<16xf32> to vector<16x1xf32>
    %cst_189 = arith.constant 3.200000e+01 : f32
    %316 = vector.broadcast %cst_189 : f32 to vector<16x1xf32>
    %317 = arith.divf %315, %316 : vector<16x1xf32>
    %318 = vector.broadcast %317 : vector<16x1xf32> to vector<16x32xf32>
    %319 = arith.subf %309, %318 : vector<16x32xf32>
    %320 = arith.mulf %319, %319 : vector<16x32xf32>
    %cst_190 = arith.constant dense<0.000000e+00> : vector<16xf32>
    %321 = vector.multi_reduction <add>, %320, %cst_190 [1] : vector<16x32xf32> to vector<16xf32>
    %322 = vector.shape_cast %321 : vector<16xf32> to vector<16x1xf32>
    %cst_191 = arith.constant 3.200000e+01 : f32
    %323 = vector.broadcast %cst_191 : f32 to vector<16x1xf32>
    %324 = arith.divf %322, %323 : vector<16x1xf32>
    %cst_192 = arith.constant 9.99999974E-6 : f32
    %325 = vector.broadcast %cst_192 : f32 to vector<16x1xf32>
    %326 = arith.addf %324, %325 : vector<16x1xf32>
    %327 = math.rsqrt %326 : vector<16x1xf32>
    %328 = vector.broadcast %327 : vector<16x1xf32> to vector<16x32xf32>
    %329 = arith.mulf %319, %328 : vector<16x32xf32>
    %330 = vector.broadcast %311 : vector<1x32xf32> to vector<16x32xf32>
    %331 = arith.mulf %329, %330 : vector<16x32xf32>
    %332 = vector.broadcast %313 : vector<1x32xf32> to vector<16x32xf32>
    %333 = arith.addf %331, %332 : vector<16x32xf32>
    %c1_193 = arith.constant 1 : index
    %c0_194 = arith.constant 0 : index
    %c0_195 = arith.constant 0 : index
    %334 = vector.load %arg11[%c1_193, %c0_194, %c0_195] : memref<2x32x2048xf32, #tpu.memory_space<vmem>>, vector<1x32x512xf32>
    %335 = vector.shape_cast %334 : vector<1x32x512xf32> to vector<32x512xf32>
    %cst_196 = arith.constant dense<0.000000e+00> : vector<16x512xf32>
    %336 = tpu.matmul %333, %335, %cst_196 {dimension_numbers = #tpu.dot_dimension_numbers<[1], [0], [0], [1], [0, 0, 1, 1], [], []>} : vector<16x32xf32>, vector<32x512xf32>, vector<16x512xf32> -> vector<16x512xf32>
    %c1_197 = arith.constant 1 : index
    %c0_198 = arith.constant 0 : index
    %c0_199 = arith.constant 0 : index
    %337 = vector.load %arg12[%c1_197, %c0_198, %c0_199] : memref<2x1x2048xf32, #tpu.memory_space<vmem>>, vector<1x1x512xf32>
    %338 = vector.shape_cast %337 : vector<1x1x512xf32> to vector<1x512xf32>
    %339 = vector.broadcast %338 : vector<1x512xf32> to vector<16x512xf32>
    %340 = arith.addf %336, %339 : vector<16x512xf32>
    %cst_200 = arith.constant 0.000000e+00 : f32
    %341 = vector.broadcast %cst_200 : f32 to vector<16x512xf32>
    %342 = arith.maximumf %340, %341 : vector<16x512xf32>
    %c1_201 = arith.constant 1 : index
    %c0_202 = arith.constant 0 : index
    %c0_203 = arith.constant 0 : index
    %343 = vector.load %arg13[%c1_201, %c0_202, %c0_203] : memref<2x32x2048xf32, #tpu.memory_space<vmem>>, vector<1x32x512xf32>
    %344 = vector.shape_cast %343 : vector<1x32x512xf32> to vector<32x512xf32>
    %cst_204 = arith.constant dense<0.000000e+00> : vector<16x32xf32>
    %345 = tpu.matmul %342, %344, %cst_204 {dimension_numbers = #tpu.dot_dimension_numbers<[1], [1], [0], [0], [0, 0, 1, 0], [], []>} : vector<16x512xf32>, vector<32x512xf32>, vector<16x32xf32> -> vector<16x32xf32>
    %c1_205 = arith.constant 1 : index
    %c0_206 = arith.constant 0 : index
    %c512_207 = arith.constant 512 : index
    %346 = vector.load %arg11[%c1_205, %c0_206, %c512_207] : memref<2x32x2048xf32, #tpu.memory_space<vmem>>, vector<1x32x512xf32>
    %347 = vector.shape_cast %346 : vector<1x32x512xf32> to vector<32x512xf32>
    %cst_208 = arith.constant dense<0.000000e+00> : vector<16x512xf32>
    %348 = tpu.matmul %333, %347, %cst_208 {dimension_numbers = #tpu.dot_dimension_numbers<[1], [0], [0], [1], [0, 0, 1, 1], [], []>} : vector<16x32xf32>, vector<32x512xf32>, vector<16x512xf32> -> vector<16x512xf32>
    %c1_209 = arith.constant 1 : index
    %c0_210 = arith.constant 0 : index
    %c512_211 = arith.constant 512 : index
    %349 = vector.load %arg12[%c1_209, %c0_210, %c512_211] : memref<2x1x2048xf32, #tpu.memory_space<vmem>>, vector<1x1x512xf32>
    %350 = vector.shape_cast %349 : vector<1x1x512xf32> to vector<1x512xf32>
    %351 = vector.broadcast %350 : vector<1x512xf32> to vector<16x512xf32>
    %352 = arith.addf %348, %351 : vector<16x512xf32>
    %cst_212 = arith.constant 0.000000e+00 : f32
    %353 = vector.broadcast %cst_212 : f32 to vector<16x512xf32>
    %354 = arith.maximumf %352, %353 : vector<16x512xf32>
    %c1_213 = arith.constant 1 : index
    %c0_214 = arith.constant 0 : index
    %c512_215 = arith.constant 512 : index
    %355 = vector.load %arg13[%c1_213, %c0_214, %c512_215] : memref<2x32x2048xf32, #tpu.memory_space<vmem>>, vector<1x32x512xf32>
    %356 = vector.shape_cast %355 : vector<1x32x512xf32> to vector<32x512xf32>
    %cst_216 = arith.constant dense<0.000000e+00> : vector<16x32xf32>
    %357 = tpu.matmul %354, %356, %cst_216 {dimension_numbers = #tpu.dot_dimension_numbers<[1], [1], [0], [0], [0, 0, 1, 0], [], []>} : vector<16x512xf32>, vector<32x512xf32>, vector<16x32xf32> -> vector<16x32xf32>
    %358 = arith.addf %345, %357 : vector<16x32xf32>
    %c1_217 = arith.constant 1 : index
    %c0_218 = arith.constant 0 : index
    %c1024_219 = arith.constant 1024 : index
    %359 = vector.load %arg11[%c1_217, %c0_218, %c1024_219] : memref<2x32x2048xf32, #tpu.memory_space<vmem>>, vector<1x32x512xf32>
    %360 = vector.shape_cast %359 : vector<1x32x512xf32> to vector<32x512xf32>
    %cst_220 = arith.constant dense<0.000000e+00> : vector<16x512xf32>
    %361 = tpu.matmul %333, %360, %cst_220 {dimension_numbers = #tpu.dot_dimension_numbers<[1], [0], [0], [1], [0, 0, 1, 1], [], []>} : vector<16x32xf32>, vector<32x512xf32>, vector<16x512xf32> -> vector<16x512xf32>
    %c1_221 = arith.constant 1 : index
    %c0_222 = arith.constant 0 : index
    %c1024_223 = arith.constant 1024 : index
    %362 = vector.load %arg12[%c1_221, %c0_222, %c1024_223] : memref<2x1x2048xf32, #tpu.memory_space<vmem>>, vector<1x1x512xf32>
    %363 = vector.shape_cast %362 : vector<1x1x512xf32> to vector<1x512xf32>
    %364 = vector.broadcast %363 : vector<1x512xf32> to vector<16x512xf32>
    %365 = arith.addf %361, %364 : vector<16x512xf32>
    %cst_224 = arith.constant 0.000000e+00 : f32
    %366 = vector.broadcast %cst_224 : f32 to vector<16x512xf32>
    %367 = arith.maximumf %365, %366 : vector<16x512xf32>
    %c1_225 = arith.constant 1 : index
    %c0_226 = arith.constant 0 : index
    %c1024_227 = arith.constant 1024 : index
    %368 = vector.load %arg13[%c1_225, %c0_226, %c1024_227] : memref<2x32x2048xf32, #tpu.memory_space<vmem>>, vector<1x32x512xf32>
    %369 = vector.shape_cast %368 : vector<1x32x512xf32> to vector<32x512xf32>
    %cst_228 = arith.constant dense<0.000000e+00> : vector<16x32xf32>
    %370 = tpu.matmul %367, %369, %cst_228 {dimension_numbers = #tpu.dot_dimension_numbers<[1], [1], [0], [0], [0, 0, 1, 0], [], []>} : vector<16x512xf32>, vector<32x512xf32>, vector<16x32xf32> -> vector<16x32xf32>
    %371 = arith.addf %358, %370 : vector<16x32xf32>
    %c1_229 = arith.constant 1 : index
    %c0_230 = arith.constant 0 : index
    %c1536_231 = arith.constant 1536 : index
    %372 = vector.load %arg11[%c1_229, %c0_230, %c1536_231] : memref<2x32x2048xf32, #tpu.memory_space<vmem>>, vector<1x32x512xf32>
    %373 = vector.shape_cast %372 : vector<1x32x512xf32> to vector<32x512xf32>
    %cst_232 = arith.constant dense<0.000000e+00> : vector<16x512xf32>
    %374 = tpu.matmul %333, %373, %cst_232 {dimension_numbers = #tpu.dot_dimension_numbers<[1], [0], [0], [1], [0, 0, 1, 1], [], []>} : vector<16x32xf32>, vector<32x512xf32>, vector<16x512xf32> -> vector<16x512xf32>
    %c1_233 = arith.constant 1 : index
    %c0_234 = arith.constant 0 : index
    %c1536_235 = arith.constant 1536 : index
    %375 = vector.load %arg12[%c1_233, %c0_234, %c1536_235] : memref<2x1x2048xf32, #tpu.memory_space<vmem>>, vector<1x1x512xf32>
    %376 = vector.shape_cast %375 : vector<1x1x512xf32> to vector<1x512xf32>
    %377 = vector.broadcast %376 : vector<1x512xf32> to vector<16x512xf32>
    %378 = arith.addf %374, %377 : vector<16x512xf32>
    %cst_236 = arith.constant 0.000000e+00 : f32
    %379 = vector.broadcast %cst_236 : f32 to vector<16x512xf32>
    %380 = arith.maximumf %378, %379 : vector<16x512xf32>
    %c1_237 = arith.constant 1 : index
    %c0_238 = arith.constant 0 : index
    %c1536_239 = arith.constant 1536 : index
    %381 = vector.load %arg13[%c1_237, %c0_238, %c1536_239] : memref<2x32x2048xf32, #tpu.memory_space<vmem>>, vector<1x32x512xf32>
    %382 = vector.shape_cast %381 : vector<1x32x512xf32> to vector<32x512xf32>
    %cst_240 = arith.constant dense<0.000000e+00> : vector<16x32xf32>
    %383 = tpu.matmul %380, %382, %cst_240 {dimension_numbers = #tpu.dot_dimension_numbers<[1], [1], [0], [0], [0, 0, 1, 0], [], []>} : vector<16x512xf32>, vector<32x512xf32>, vector<16x32xf32> -> vector<16x32xf32>
    %384 = arith.addf %371, %383 : vector<16x32xf32>
    %c1_241 = arith.constant 1 : index
    %c0_242 = arith.constant 0 : index
    %c0_243 = arith.constant 0 : index
    %385 = vector.load %arg14[%c1_241, %c0_242, %c0_243] : memref<2x1x32xf32, #tpu.memory_space<vmem>>, vector<1x1x32xf32>
    %386 = vector.shape_cast %385 : vector<1x1x32xf32> to vector<1x32xf32>
    %387 = vector.broadcast %386 : vector<1x32xf32> to vector<16x32xf32>
    %388 = arith.addf %384, %387 : vector<16x32xf32>
    %389 = arith.addf %333, %388 : vector<16x32xf32>
    %c1_244 = arith.constant 1 : index
    %c0_245 = arith.constant 0 : index
    %c0_246 = arith.constant 0 : index
    %390 = vector.load %arg15[%c1_244, %c0_245, %c0_246] : memref<2x1x32xf32, #tpu.memory_space<vmem>>, vector<1x1x32xf32>
    %391 = vector.shape_cast %390 : vector<1x1x32xf32> to vector<1x32xf32>
    %c1_247 = arith.constant 1 : index
    %c0_248 = arith.constant 0 : index
    %c0_249 = arith.constant 0 : index
    %392 = vector.load %arg16[%c1_247, %c0_248, %c0_249] : memref<2x1x32xf32, #tpu.memory_space<vmem>>, vector<1x1x32xf32>
    %393 = vector.shape_cast %392 : vector<1x1x32xf32> to vector<1x32xf32>
    %cst_250 = arith.constant dense<0.000000e+00> : vector<16xf32>
    %394 = vector.multi_reduction <add>, %389, %cst_250 [1] : vector<16x32xf32> to vector<16xf32>
    %395 = vector.shape_cast %394 : vector<16xf32> to vector<16x1xf32>
    %cst_251 = arith.constant 3.200000e+01 : f32
    %396 = vector.broadcast %cst_251 : f32 to vector<16x1xf32>
    %397 = arith.divf %395, %396 : vector<16x1xf32>
    %398 = vector.broadcast %397 : vector<16x1xf32> to vector<16x32xf32>
    %399 = arith.subf %389, %398 : vector<16x32xf32>
    %400 = arith.mulf %399, %399 : vector<16x32xf32>
    %cst_252 = arith.constant dense<0.000000e+00> : vector<16xf32>
    %401 = vector.multi_reduction <add>, %400, %cst_252 [1] : vector<16x32xf32> to vector<16xf32>
    %402 = vector.shape_cast %401 : vector<16xf32> to vector<16x1xf32>
    %cst_253 = arith.constant 3.200000e+01 : f32
    %403 = vector.broadcast %cst_253 : f32 to vector<16x1xf32>
    %404 = arith.divf %402, %403 : vector<16x1xf32>
    %cst_254 = arith.constant 9.99999974E-6 : f32
    %405 = vector.broadcast %cst_254 : f32 to vector<16x1xf32>
    %406 = arith.addf %404, %405 : vector<16x1xf32>
    %407 = math.rsqrt %406 : vector<16x1xf32>
    %408 = vector.broadcast %407 : vector<16x1xf32> to vector<16x32xf32>
    %409 = arith.mulf %399, %408 : vector<16x32xf32>
    %410 = vector.broadcast %391 : vector<1x32xf32> to vector<16x32xf32>
    %411 = arith.mulf %409, %410 : vector<16x32xf32>
    %412 = vector.broadcast %393 : vector<1x32xf32> to vector<16x32xf32>
    %413 = arith.addf %411, %412 : vector<16x32xf32>
    %c0_255 = arith.constant 0 : index
    %c0_256 = arith.constant 0 : index
    %414 = vector.load %arg39[%c0_255, %c0_256] : memref<1x32xf32, #tpu.memory_space<vmem>>, vector<1x32xf32>
    %c0_257 = arith.constant 0 : index
    %c0_258 = arith.constant 0 : index
    %415 = vector.load %arg40[%c0_257, %c0_258] : memref<1x32xf32, #tpu.memory_space<vmem>>, vector<1x32xf32>
    %cst_259 = arith.constant dense<0.000000e+00> : vector<16xf32>
    %416 = vector.multi_reduction <add>, %413, %cst_259 [1] : vector<16x32xf32> to vector<16xf32>
    %417 = vector.shape_cast %416 : vector<16xf32> to vector<16x1xf32>
    %cst_260 = arith.constant 3.200000e+01 : f32
    %418 = vector.broadcast %cst_260 : f32 to vector<16x1xf32>
    %419 = arith.divf %417, %418 : vector<16x1xf32>
    %420 = vector.broadcast %419 : vector<16x1xf32> to vector<16x32xf32>
    %421 = arith.subf %413, %420 : vector<16x32xf32>
    %422 = arith.mulf %421, %421 : vector<16x32xf32>
    %cst_261 = arith.constant dense<0.000000e+00> : vector<16xf32>
    %423 = vector.multi_reduction <add>, %422, %cst_261 [1] : vector<16x32xf32> to vector<16xf32>
    %424 = vector.shape_cast %423 : vector<16xf32> to vector<16x1xf32>
    %cst_262 = arith.constant 3.200000e+01 : f32
    %425 = vector.broadcast %cst_262 : f32 to vector<16x1xf32>
    %426 = arith.divf %424, %425 : vector<16x1xf32>
    %cst_263 = arith.constant 9.99999974E-6 : f32
    %427 = vector.broadcast %cst_263 : f32 to vector<16x1xf32>
    %428 = arith.addf %426, %427 : vector<16x1xf32>
    %429 = math.rsqrt %428 : vector<16x1xf32>
    %430 = vector.broadcast %429 : vector<16x1xf32> to vector<16x32xf32>
    %431 = arith.mulf %421, %430 : vector<16x32xf32>
    %432 = vector.broadcast %414 : vector<1x32xf32> to vector<16x32xf32>
    %433 = arith.mulf %431, %432 : vector<16x32xf32>
    %434 = vector.broadcast %415 : vector<1x32xf32> to vector<16x32xf32>
    %435 = arith.addf %433, %434 : vector<16x32xf32>
    %c0_264 = arith.constant 0 : index
    %c0_265 = arith.constant 0 : index
    %c0_266 = arith.constant 0 : index
    %436 = vector.load %arg2[%c0_264, %c0_265, %c0_266] : memref<1x8x32xf32, #tpu.memory_space<vmem>>, vector<1x8x32xf32>
    %437 = vector.shape_cast %436 : vector<1x8x32xf32> to vector<8x32xf32>
    %c0_267 = arith.constant 0 : index
    %c0_268 = arith.constant 0 : index
    %c0_269 = arith.constant 0 : index
    %438 = vector.load %arg17[%c0_267, %c0_268, %c0_269] : memref<2x32x32xf32, #tpu.memory_space<vmem>>, vector<1x32x32xf32>
    %439 = vector.shape_cast %438 : vector<1x32x32xf32> to vector<32x32xf32>
    %cst_270 = arith.constant dense<0.000000e+00> : vector<8x32xf32>
    %440 = tpu.matmul %437, %439, %cst_270 {dimension_numbers = #tpu.dot_dimension_numbers<[1], [0], [0], [1], [0, 0, 1, 1], [], []>} : vector<8x32xf32>, vector<32x32xf32>, vector<8x32xf32> -> vector<8x32xf32>
    %c0_271 = arith.constant 0 : index
    %c0_272 = arith.constant 0 : index
    %c0_273 = arith.constant 0 : index
    %441 = vector.load %arg19[%c0_271, %c0_272, %c0_273] : memref<2x1x32xf32, #tpu.memory_space<vmem>>, vector<1x1x32xf32>
    %442 = vector.shape_cast %441 : vector<1x1x32xf32> to vector<1x32xf32>
    %443 = vector.broadcast %442 : vector<1x32xf32> to vector<8x32xf32>
    %444 = arith.addf %440, %443 : vector<8x32xf32>
    %c0_274 = arith.constant 0 : index
    %c0_275 = arith.constant 0 : index
    %c0_276 = arith.constant 0 : index
    %445 = vector.load %arg18[%c0_274, %c0_275, %c0_276] : memref<2x32x64xf32, #tpu.memory_space<vmem>>, vector<1x32x64xf32>
    %446 = vector.shape_cast %445 : vector<1x32x64xf32> to vector<32x64xf32>
    %cst_277 = arith.constant dense<0.000000e+00> : vector<8x64xf32>
    %447 = tpu.matmul %437, %446, %cst_277 {dimension_numbers = #tpu.dot_dimension_numbers<[1], [0], [0], [1], [0, 0, 1, 1], [], []>} : vector<8x32xf32>, vector<32x64xf32>, vector<8x64xf32> -> vector<8x64xf32>
    %c0_278 = arith.constant 0 : index
    %c0_279 = arith.constant 0 : index
    %c0_280 = arith.constant 0 : index
    %448 = vector.load %arg20[%c0_278, %c0_279, %c0_280] : memref<2x1x64xf32, #tpu.memory_space<vmem>>, vector<1x1x64xf32>
    %449 = vector.shape_cast %448 : vector<1x1x64xf32> to vector<1x64xf32>
    %450 = vector.broadcast %449 : vector<1x64xf32> to vector<8x64xf32>
    %451 = arith.addf %447, %450 : vector<8x64xf32>
    %452 = vector.extract_strided_slice %444 {offsets = [0, 0], sizes = [8, 8], strides = [1, 1]} : vector<8x32xf32> to vector<8x8xf32>
    %453 = vector.extract_strided_slice %451 {offsets = [0, 0], sizes = [8, 8], strides = [1, 1]} : vector<8x64xf32> to vector<8x8xf32>
    %454 = vector.extract_strided_slice %451 {offsets = [0, 32], sizes = [8, 8], strides = [1, 1]} : vector<8x64xf32> to vector<8x8xf32>
    %cst_281 = arith.constant dense<0.000000e+00> : vector<8x8xf32>
    %455 = tpu.matmul %452, %453, %cst_281 {dimension_numbers = #tpu.dot_dimension_numbers<[1], [1], [0], [0], [0, 0, 1, 0], [], []>} : vector<8x8xf32>, vector<8x8xf32>, vector<8x8xf32> -> vector<8x8xf32>
    %cst_282 = arith.constant 0.353553385 : f32
    %456 = vector.broadcast %cst_282 : f32 to vector<8x8xf32>
    %457 = arith.mulf %455, %456 : vector<8x8xf32>
    %cst_283 = arith.constant dense<0xFF800000> : vector<8xf32>
    %458 = vector.multi_reduction <maximumf>, %457, %cst_283 [1] : vector<8x8xf32> to vector<8xf32>
    %459 = vector.shape_cast %458 : vector<8xf32> to vector<8x1xf32>
    %460 = vector.broadcast %459 : vector<8x1xf32> to vector<8x8xf32>
    %461 = arith.subf %457, %460 : vector<8x8xf32>
    %462 = math.exp %461 : vector<8x8xf32>
    %cst_284 = arith.constant dense<0.000000e+00> : vector<8xf32>
    %463 = vector.multi_reduction <add>, %462, %cst_284 [1] : vector<8x8xf32> to vector<8xf32>
    %464 = vector.shape_cast %463 : vector<8xf32> to vector<8x1xf32>
    %465 = tpu.reciprocal %464 {approx = true} : vector<8x1xf32> -> vector<8x1xf32>
    %466 = vector.broadcast %465 : vector<8x1xf32> to vector<8x8xf32>
    %467 = arith.mulf %462, %466 : vector<8x8xf32>
    %cst_285 = arith.constant dense<0.000000e+00> : vector<8x8xf32>
    %468 = tpu.matmul %467, %454, %cst_285 {dimension_numbers = #tpu.dot_dimension_numbers<[1], [0], [0], [1], [0, 0, 1, 1], [], []>} : vector<8x8xf32>, vector<8x8xf32>, vector<8x8xf32> -> vector<8x8xf32>
    %c0_286 = arith.constant 0 : index
    %c0_287 = arith.constant 0 : index
    %c0_288 = arith.constant 0 : index
    %c0_289 = arith.constant 0 : index
    %469 = vector.load %arg21[%c0_286, %c0_287, %c0_288, %c0_289] : memref<2x4x8x32xf32, #tpu.memory_space<vmem>>, vector<1x1x8x32xf32>
    %470 = vector.shape_cast %469 : vector<1x1x8x32xf32> to vector<8x32xf32>
    %cst_290 = arith.constant dense<0.000000e+00> : vector<8x32xf32>
    %471 = tpu.matmul %468, %470, %cst_290 {dimension_numbers = #tpu.dot_dimension_numbers<[1], [0], [0], [1], [0, 0, 1, 1], [], []>} : vector<8x8xf32>, vector<8x32xf32>, vector<8x32xf32> -> vector<8x32xf32>
    %472 = vector.extract_strided_slice %444 {offsets = [0, 8], sizes = [8, 8], strides = [1, 1]} : vector<8x32xf32> to vector<8x8xf32>
    %473 = vector.extract_strided_slice %451 {offsets = [0, 8], sizes = [8, 8], strides = [1, 1]} : vector<8x64xf32> to vector<8x8xf32>
    %474 = vector.extract_strided_slice %451 {offsets = [0, 40], sizes = [8, 8], strides = [1, 1]} : vector<8x64xf32> to vector<8x8xf32>
    %cst_291 = arith.constant dense<0.000000e+00> : vector<8x8xf32>
    %475 = tpu.matmul %472, %473, %cst_291 {dimension_numbers = #tpu.dot_dimension_numbers<[1], [1], [0], [0], [0, 0, 1, 0], [], []>} : vector<8x8xf32>, vector<8x8xf32>, vector<8x8xf32> -> vector<8x8xf32>
    %cst_292 = arith.constant 0.353553385 : f32
    %476 = vector.broadcast %cst_292 : f32 to vector<8x8xf32>
    %477 = arith.mulf %475, %476 : vector<8x8xf32>
    %cst_293 = arith.constant dense<0xFF800000> : vector<8xf32>
    %478 = vector.multi_reduction <maximumf>, %477, %cst_293 [1] : vector<8x8xf32> to vector<8xf32>
    %479 = vector.shape_cast %478 : vector<8xf32> to vector<8x1xf32>
    %480 = vector.broadcast %479 : vector<8x1xf32> to vector<8x8xf32>
    %481 = arith.subf %477, %480 : vector<8x8xf32>
    %482 = math.exp %481 : vector<8x8xf32>
    %cst_294 = arith.constant dense<0.000000e+00> : vector<8xf32>
    %483 = vector.multi_reduction <add>, %482, %cst_294 [1] : vector<8x8xf32> to vector<8xf32>
    %484 = vector.shape_cast %483 : vector<8xf32> to vector<8x1xf32>
    %485 = tpu.reciprocal %484 {approx = true} : vector<8x1xf32> -> vector<8x1xf32>
    %486 = vector.broadcast %485 : vector<8x1xf32> to vector<8x8xf32>
    %487 = arith.mulf %482, %486 : vector<8x8xf32>
    %cst_295 = arith.constant dense<0.000000e+00> : vector<8x8xf32>
    %488 = tpu.matmul %487, %474, %cst_295 {dimension_numbers = #tpu.dot_dimension_numbers<[1], [0], [0], [1], [0, 0, 1, 1], [], []>} : vector<8x8xf32>, vector<8x8xf32>, vector<8x8xf32> -> vector<8x8xf32>
    %c0_296 = arith.constant 0 : index
    %c1_297 = arith.constant 1 : index
    %c0_298 = arith.constant 0 : index
    %c0_299 = arith.constant 0 : index
    %489 = vector.load %arg21[%c0_296, %c1_297, %c0_298, %c0_299] : memref<2x4x8x32xf32, #tpu.memory_space<vmem>>, vector<1x1x8x32xf32>
    %490 = vector.shape_cast %489 : vector<1x1x8x32xf32> to vector<8x32xf32>
    %cst_300 = arith.constant dense<0.000000e+00> : vector<8x32xf32>
    %491 = tpu.matmul %488, %490, %cst_300 {dimension_numbers = #tpu.dot_dimension_numbers<[1], [0], [0], [1], [0, 0, 1, 1], [], []>} : vector<8x8xf32>, vector<8x32xf32>, vector<8x32xf32> -> vector<8x32xf32>
    %492 = arith.addf %471, %491 : vector<8x32xf32>
    %493 = vector.extract_strided_slice %444 {offsets = [0, 16], sizes = [8, 8], strides = [1, 1]} : vector<8x32xf32> to vector<8x8xf32>
    %494 = vector.extract_strided_slice %451 {offsets = [0, 16], sizes = [8, 8], strides = [1, 1]} : vector<8x64xf32> to vector<8x8xf32>
    %495 = vector.extract_strided_slice %451 {offsets = [0, 48], sizes = [8, 8], strides = [1, 1]} : vector<8x64xf32> to vector<8x8xf32>
    %cst_301 = arith.constant dense<0.000000e+00> : vector<8x8xf32>
    %496 = tpu.matmul %493, %494, %cst_301 {dimension_numbers = #tpu.dot_dimension_numbers<[1], [1], [0], [0], [0, 0, 1, 0], [], []>} : vector<8x8xf32>, vector<8x8xf32>, vector<8x8xf32> -> vector<8x8xf32>
    %cst_302 = arith.constant 0.353553385 : f32
    %497 = vector.broadcast %cst_302 : f32 to vector<8x8xf32>
    %498 = arith.mulf %496, %497 : vector<8x8xf32>
    %cst_303 = arith.constant dense<0xFF800000> : vector<8xf32>
    %499 = vector.multi_reduction <maximumf>, %498, %cst_303 [1] : vector<8x8xf32> to vector<8xf32>
    %500 = vector.shape_cast %499 : vector<8xf32> to vector<8x1xf32>
    %501 = vector.broadcast %500 : vector<8x1xf32> to vector<8x8xf32>
    %502 = arith.subf %498, %501 : vector<8x8xf32>
    %503 = math.exp %502 : vector<8x8xf32>
    %cst_304 = arith.constant dense<0.000000e+00> : vector<8xf32>
    %504 = vector.multi_reduction <add>, %503, %cst_304 [1] : vector<8x8xf32> to vector<8xf32>
    %505 = vector.shape_cast %504 : vector<8xf32> to vector<8x1xf32>
    %506 = tpu.reciprocal %505 {approx = true} : vector<8x1xf32> -> vector<8x1xf32>
    %507 = vector.broadcast %506 : vector<8x1xf32> to vector<8x8xf32>
    %508 = arith.mulf %503, %507 : vector<8x8xf32>
    %cst_305 = arith.constant dense<0.000000e+00> : vector<8x8xf32>
    %509 = tpu.matmul %508, %495, %cst_305 {dimension_numbers = #tpu.dot_dimension_numbers<[1], [0], [0], [1], [0, 0, 1, 1], [], []>} : vector<8x8xf32>, vector<8x8xf32>, vector<8x8xf32> -> vector<8x8xf32>
    %c0_306 = arith.constant 0 : index
    %c2_307 = arith.constant 2 : index
    %c0_308 = arith.constant 0 : index
    %c0_309 = arith.constant 0 : index
    %510 = vector.load %arg21[%c0_306, %c2_307, %c0_308, %c0_309] : memref<2x4x8x32xf32, #tpu.memory_space<vmem>>, vector<1x1x8x32xf32>
    %511 = vector.shape_cast %510 : vector<1x1x8x32xf32> to vector<8x32xf32>
    %cst_310 = arith.constant dense<0.000000e+00> : vector<8x32xf32>
    %512 = tpu.matmul %509, %511, %cst_310 {dimension_numbers = #tpu.dot_dimension_numbers<[1], [0], [0], [1], [0, 0, 1, 1], [], []>} : vector<8x8xf32>, vector<8x32xf32>, vector<8x32xf32> -> vector<8x32xf32>
    %513 = arith.addf %492, %512 : vector<8x32xf32>
    %514 = vector.extract_strided_slice %444 {offsets = [0, 24], sizes = [8, 8], strides = [1, 1]} : vector<8x32xf32> to vector<8x8xf32>
    %515 = vector.extract_strided_slice %451 {offsets = [0, 24], sizes = [8, 8], strides = [1, 1]} : vector<8x64xf32> to vector<8x8xf32>
    %516 = vector.extract_strided_slice %451 {offsets = [0, 56], sizes = [8, 8], strides = [1, 1]} : vector<8x64xf32> to vector<8x8xf32>
    %cst_311 = arith.constant dense<0.000000e+00> : vector<8x8xf32>
    %517 = tpu.matmul %514, %515, %cst_311 {dimension_numbers = #tpu.dot_dimension_numbers<[1], [1], [0], [0], [0, 0, 1, 0], [], []>} : vector<8x8xf32>, vector<8x8xf32>, vector<8x8xf32> -> vector<8x8xf32>
    %cst_312 = arith.constant 0.353553385 : f32
    %518 = vector.broadcast %cst_312 : f32 to vector<8x8xf32>
    %519 = arith.mulf %517, %518 : vector<8x8xf32>
    %cst_313 = arith.constant dense<0xFF800000> : vector<8xf32>
    %520 = vector.multi_reduction <maximumf>, %519, %cst_313 [1] : vector<8x8xf32> to vector<8xf32>
    %521 = vector.shape_cast %520 : vector<8xf32> to vector<8x1xf32>
    %522 = vector.broadcast %521 : vector<8x1xf32> to vector<8x8xf32>
    %523 = arith.subf %519, %522 : vector<8x8xf32>
    %524 = math.exp %523 : vector<8x8xf32>
    %cst_314 = arith.constant dense<0.000000e+00> : vector<8xf32>
    %525 = vector.multi_reduction <add>, %524, %cst_314 [1] : vector<8x8xf32> to vector<8xf32>
    %526 = vector.shape_cast %525 : vector<8xf32> to vector<8x1xf32>
    %527 = tpu.reciprocal %526 {approx = true} : vector<8x1xf32> -> vector<8x1xf32>
    %528 = vector.broadcast %527 : vector<8x1xf32> to vector<8x8xf32>
    %529 = arith.mulf %524, %528 : vector<8x8xf32>
    %cst_315 = arith.constant dense<0.000000e+00> : vector<8x8xf32>
    %530 = tpu.matmul %529, %516, %cst_315 {dimension_numbers = #tpu.dot_dimension_numbers<[1], [0], [0], [1], [0, 0, 1, 1], [], []>} : vector<8x8xf32>, vector<8x8xf32>, vector<8x8xf32> -> vector<8x8xf32>
    %c0_316 = arith.constant 0 : index
    %c3_317 = arith.constant 3 : index
    %c0_318 = arith.constant 0 : index
    %c0_319 = arith.constant 0 : index
    %531 = vector.load %arg21[%c0_316, %c3_317, %c0_318, %c0_319] : memref<2x4x8x32xf32, #tpu.memory_space<vmem>>, vector<1x1x8x32xf32>
    %532 = vector.shape_cast %531 : vector<1x1x8x32xf32> to vector<8x32xf32>
    %cst_320 = arith.constant dense<0.000000e+00> : vector<8x32xf32>
    %533 = tpu.matmul %530, %532, %cst_320 {dimension_numbers = #tpu.dot_dimension_numbers<[1], [0], [0], [1], [0, 0, 1, 1], [], []>} : vector<8x8xf32>, vector<8x32xf32>, vector<8x32xf32> -> vector<8x32xf32>
    %534 = arith.addf %513, %533 : vector<8x32xf32>
    %c0_321 = arith.constant 0 : index
    %c0_322 = arith.constant 0 : index
    %c0_323 = arith.constant 0 : index
    %535 = vector.load %arg22[%c0_321, %c0_322, %c0_323] : memref<2x1x32xf32, #tpu.memory_space<vmem>>, vector<1x1x32xf32>
    %536 = vector.shape_cast %535 : vector<1x1x32xf32> to vector<1x32xf32>
    %537 = vector.broadcast %536 : vector<1x32xf32> to vector<8x32xf32>
    %538 = arith.addf %534, %537 : vector<8x32xf32>
    %539 = arith.addf %437, %538 : vector<8x32xf32>
    %c0_324 = arith.constant 0 : index
    %c0_325 = arith.constant 0 : index
    %c0_326 = arith.constant 0 : index
    %540 = vector.load %arg23[%c0_324, %c0_325, %c0_326] : memref<2x1x32xf32, #tpu.memory_space<vmem>>, vector<1x1x32xf32>
    %541 = vector.shape_cast %540 : vector<1x1x32xf32> to vector<1x32xf32>
    %c0_327 = arith.constant 0 : index
    %c0_328 = arith.constant 0 : index
    %c0_329 = arith.constant 0 : index
    %542 = vector.load %arg24[%c0_327, %c0_328, %c0_329] : memref<2x1x32xf32, #tpu.memory_space<vmem>>, vector<1x1x32xf32>
    %543 = vector.shape_cast %542 : vector<1x1x32xf32> to vector<1x32xf32>
    %cst_330 = arith.constant dense<0.000000e+00> : vector<8xf32>
    %544 = vector.multi_reduction <add>, %539, %cst_330 [1] : vector<8x32xf32> to vector<8xf32>
    %545 = vector.shape_cast %544 : vector<8xf32> to vector<8x1xf32>
    %cst_331 = arith.constant 3.200000e+01 : f32
    %546 = vector.broadcast %cst_331 : f32 to vector<8x1xf32>
    %547 = arith.divf %545, %546 : vector<8x1xf32>
    %548 = vector.broadcast %547 : vector<8x1xf32> to vector<8x32xf32>
    %549 = arith.subf %539, %548 : vector<8x32xf32>
    %550 = arith.mulf %549, %549 : vector<8x32xf32>
    %cst_332 = arith.constant dense<0.000000e+00> : vector<8xf32>
    %551 = vector.multi_reduction <add>, %550, %cst_332 [1] : vector<8x32xf32> to vector<8xf32>
    %552 = vector.shape_cast %551 : vector<8xf32> to vector<8x1xf32>
    %cst_333 = arith.constant 3.200000e+01 : f32
    %553 = vector.broadcast %cst_333 : f32 to vector<8x1xf32>
    %554 = arith.divf %552, %553 : vector<8x1xf32>
    %cst_334 = arith.constant 9.99999974E-6 : f32
    %555 = vector.broadcast %cst_334 : f32 to vector<8x1xf32>
    %556 = arith.addf %554, %555 : vector<8x1xf32>
    %557 = math.rsqrt %556 : vector<8x1xf32>
    %558 = vector.broadcast %557 : vector<8x1xf32> to vector<8x32xf32>
    %559 = arith.mulf %549, %558 : vector<8x32xf32>
    %560 = vector.broadcast %541 : vector<1x32xf32> to vector<8x32xf32>
    %561 = arith.mulf %559, %560 : vector<8x32xf32>
    %562 = vector.broadcast %543 : vector<1x32xf32> to vector<8x32xf32>
    %563 = arith.addf %561, %562 : vector<8x32xf32>
    %c0_335 = arith.constant 0 : index
    %c0_336 = arith.constant 0 : index
    %c0_337 = arith.constant 0 : index
    %564 = vector.load %arg25[%c0_335, %c0_336, %c0_337] : memref<2x32x32xf32, #tpu.memory_space<vmem>>, vector<1x32x32xf32>
    %565 = vector.shape_cast %564 : vector<1x32x32xf32> to vector<32x32xf32>
    %cst_338 = arith.constant dense<0.000000e+00> : vector<8x32xf32>
    %566 = tpu.matmul %563, %565, %cst_338 {dimension_numbers = #tpu.dot_dimension_numbers<[1], [0], [0], [1], [0, 0, 1, 1], [], []>} : vector<8x32xf32>, vector<32x32xf32>, vector<8x32xf32> -> vector<8x32xf32>
    %c0_339 = arith.constant 0 : index
    %c0_340 = arith.constant 0 : index
    %c0_341 = arith.constant 0 : index
    %567 = vector.load %arg27[%c0_339, %c0_340, %c0_341] : memref<2x1x32xf32, #tpu.memory_space<vmem>>, vector<1x1x32xf32>
    %568 = vector.shape_cast %567 : vector<1x1x32xf32> to vector<1x32xf32>
    %569 = vector.broadcast %568 : vector<1x32xf32> to vector<8x32xf32>
    %570 = arith.addf %566, %569 : vector<8x32xf32>
    %c0_342 = arith.constant 0 : index
    %c0_343 = arith.constant 0 : index
    %c0_344 = arith.constant 0 : index
    %571 = vector.load %arg26[%c0_342, %c0_343, %c0_344] : memref<2x32x64xf32, #tpu.memory_space<vmem>>, vector<1x32x64xf32>
    %572 = vector.shape_cast %571 : vector<1x32x64xf32> to vector<32x64xf32>
    %cst_345 = arith.constant dense<0.000000e+00> : vector<16x64xf32>
    %573 = tpu.matmul %435, %572, %cst_345 {dimension_numbers = #tpu.dot_dimension_numbers<[1], [0], [0], [1], [0, 0, 1, 1], [], []>} : vector<16x32xf32>, vector<32x64xf32>, vector<16x64xf32> -> vector<16x64xf32>
    %c0_346 = arith.constant 0 : index
    %c0_347 = arith.constant 0 : index
    %c0_348 = arith.constant 0 : index
    %574 = vector.load %arg28[%c0_346, %c0_347, %c0_348] : memref<2x1x64xf32, #tpu.memory_space<vmem>>, vector<1x1x64xf32>
    %575 = vector.shape_cast %574 : vector<1x1x64xf32> to vector<1x64xf32>
    %576 = vector.broadcast %575 : vector<1x64xf32> to vector<16x64xf32>
    %577 = arith.addf %573, %576 : vector<16x64xf32>
    %578 = vector.extract_strided_slice %570 {offsets = [0, 0], sizes = [8, 8], strides = [1, 1]} : vector<8x32xf32> to vector<8x8xf32>
    %579 = vector.extract_strided_slice %577 {offsets = [0, 0], sizes = [16, 8], strides = [1, 1]} : vector<16x64xf32> to vector<16x8xf32>
    %580 = vector.extract_strided_slice %577 {offsets = [0, 32], sizes = [16, 8], strides = [1, 1]} : vector<16x64xf32> to vector<16x8xf32>
    %cst_349 = arith.constant dense<0.000000e+00> : vector<8x16xf32>
    %581 = tpu.matmul %578, %579, %cst_349 {dimension_numbers = #tpu.dot_dimension_numbers<[1], [1], [0], [0], [0, 0, 1, 0], [], []>} : vector<8x8xf32>, vector<16x8xf32>, vector<8x16xf32> -> vector<8x16xf32>
    %cst_350 = arith.constant 0.353553385 : f32
    %582 = vector.broadcast %cst_350 : f32 to vector<8x16xf32>
    %583 = arith.mulf %581, %582 : vector<8x16xf32>
    %cst_351 = arith.constant dense<0xFF800000> : vector<8xf32>
    %584 = vector.multi_reduction <maximumf>, %583, %cst_351 [1] : vector<8x16xf32> to vector<8xf32>
    %585 = vector.shape_cast %584 : vector<8xf32> to vector<8x1xf32>
    %586 = vector.broadcast %585 : vector<8x1xf32> to vector<8x16xf32>
    %587 = arith.subf %583, %586 : vector<8x16xf32>
    %588 = math.exp %587 : vector<8x16xf32>
    %cst_352 = arith.constant dense<0.000000e+00> : vector<8xf32>
    %589 = vector.multi_reduction <add>, %588, %cst_352 [1] : vector<8x16xf32> to vector<8xf32>
    %590 = vector.shape_cast %589 : vector<8xf32> to vector<8x1xf32>
    %591 = tpu.reciprocal %590 {approx = true} : vector<8x1xf32> -> vector<8x1xf32>
    %592 = vector.broadcast %591 : vector<8x1xf32> to vector<8x16xf32>
    %593 = arith.mulf %588, %592 : vector<8x16xf32>
    %cst_353 = arith.constant dense<0.000000e+00> : vector<8x8xf32>
    %594 = tpu.matmul %593, %580, %cst_353 {dimension_numbers = #tpu.dot_dimension_numbers<[1], [0], [0], [1], [0, 0, 1, 1], [], []>} : vector<8x16xf32>, vector<16x8xf32>, vector<8x8xf32> -> vector<8x8xf32>
    %c0_354 = arith.constant 0 : index
    %c0_355 = arith.constant 0 : index
    %c0_356 = arith.constant 0 : index
    %c0_357 = arith.constant 0 : index
    %595 = vector.load %arg29[%c0_354, %c0_355, %c0_356, %c0_357] : memref<2x4x8x32xf32, #tpu.memory_space<vmem>>, vector<1x1x8x32xf32>
    %596 = vector.shape_cast %595 : vector<1x1x8x32xf32> to vector<8x32xf32>
    %cst_358 = arith.constant dense<0.000000e+00> : vector<8x32xf32>
    %597 = tpu.matmul %594, %596, %cst_358 {dimension_numbers = #tpu.dot_dimension_numbers<[1], [0], [0], [1], [0, 0, 1, 1], [], []>} : vector<8x8xf32>, vector<8x32xf32>, vector<8x32xf32> -> vector<8x32xf32>
    %598 = vector.extract_strided_slice %570 {offsets = [0, 8], sizes = [8, 8], strides = [1, 1]} : vector<8x32xf32> to vector<8x8xf32>
    %599 = vector.extract_strided_slice %577 {offsets = [0, 8], sizes = [16, 8], strides = [1, 1]} : vector<16x64xf32> to vector<16x8xf32>
    %600 = vector.extract_strided_slice %577 {offsets = [0, 40], sizes = [16, 8], strides = [1, 1]} : vector<16x64xf32> to vector<16x8xf32>
    %cst_359 = arith.constant dense<0.000000e+00> : vector<8x16xf32>
    %601 = tpu.matmul %598, %599, %cst_359 {dimension_numbers = #tpu.dot_dimension_numbers<[1], [1], [0], [0], [0, 0, 1, 0], [], []>} : vector<8x8xf32>, vector<16x8xf32>, vector<8x16xf32> -> vector<8x16xf32>
    %cst_360 = arith.constant 0.353553385 : f32
    %602 = vector.broadcast %cst_360 : f32 to vector<8x16xf32>
    %603 = arith.mulf %601, %602 : vector<8x16xf32>
    %cst_361 = arith.constant dense<0xFF800000> : vector<8xf32>
    %604 = vector.multi_reduction <maximumf>, %603, %cst_361 [1] : vector<8x16xf32> to vector<8xf32>
    %605 = vector.shape_cast %604 : vector<8xf32> to vector<8x1xf32>
    %606 = vector.broadcast %605 : vector<8x1xf32> to vector<8x16xf32>
    %607 = arith.subf %603, %606 : vector<8x16xf32>
    %608 = math.exp %607 : vector<8x16xf32>
    %cst_362 = arith.constant dense<0.000000e+00> : vector<8xf32>
    %609 = vector.multi_reduction <add>, %608, %cst_362 [1] : vector<8x16xf32> to vector<8xf32>
    %610 = vector.shape_cast %609 : vector<8xf32> to vector<8x1xf32>
    %611 = tpu.reciprocal %610 {approx = true} : vector<8x1xf32> -> vector<8x1xf32>
    %612 = vector.broadcast %611 : vector<8x1xf32> to vector<8x16xf32>
    %613 = arith.mulf %608, %612 : vector<8x16xf32>
    %cst_363 = arith.constant dense<0.000000e+00> : vector<8x8xf32>
    %614 = tpu.matmul %613, %600, %cst_363 {dimension_numbers = #tpu.dot_dimension_numbers<[1], [0], [0], [1], [0, 0, 1, 1], [], []>} : vector<8x16xf32>, vector<16x8xf32>, vector<8x8xf32> -> vector<8x8xf32>
    %c0_364 = arith.constant 0 : index
    %c1_365 = arith.constant 1 : index
    %c0_366 = arith.constant 0 : index
    %c0_367 = arith.constant 0 : index
    %615 = vector.load %arg29[%c0_364, %c1_365, %c0_366, %c0_367] : memref<2x4x8x32xf32, #tpu.memory_space<vmem>>, vector<1x1x8x32xf32>
    %616 = vector.shape_cast %615 : vector<1x1x8x32xf32> to vector<8x32xf32>
    %cst_368 = arith.constant dense<0.000000e+00> : vector<8x32xf32>
    %617 = tpu.matmul %614, %616, %cst_368 {dimension_numbers = #tpu.dot_dimension_numbers<[1], [0], [0], [1], [0, 0, 1, 1], [], []>} : vector<8x8xf32>, vector<8x32xf32>, vector<8x32xf32> -> vector<8x32xf32>
    %618 = arith.addf %597, %617 : vector<8x32xf32>
    %619 = vector.extract_strided_slice %570 {offsets = [0, 16], sizes = [8, 8], strides = [1, 1]} : vector<8x32xf32> to vector<8x8xf32>
    %620 = vector.extract_strided_slice %577 {offsets = [0, 16], sizes = [16, 8], strides = [1, 1]} : vector<16x64xf32> to vector<16x8xf32>
    %621 = vector.extract_strided_slice %577 {offsets = [0, 48], sizes = [16, 8], strides = [1, 1]} : vector<16x64xf32> to vector<16x8xf32>
    %cst_369 = arith.constant dense<0.000000e+00> : vector<8x16xf32>
    %622 = tpu.matmul %619, %620, %cst_369 {dimension_numbers = #tpu.dot_dimension_numbers<[1], [1], [0], [0], [0, 0, 1, 0], [], []>} : vector<8x8xf32>, vector<16x8xf32>, vector<8x16xf32> -> vector<8x16xf32>
    %cst_370 = arith.constant 0.353553385 : f32
    %623 = vector.broadcast %cst_370 : f32 to vector<8x16xf32>
    %624 = arith.mulf %622, %623 : vector<8x16xf32>
    %cst_371 = arith.constant dense<0xFF800000> : vector<8xf32>
    %625 = vector.multi_reduction <maximumf>, %624, %cst_371 [1] : vector<8x16xf32> to vector<8xf32>
    %626 = vector.shape_cast %625 : vector<8xf32> to vector<8x1xf32>
    %627 = vector.broadcast %626 : vector<8x1xf32> to vector<8x16xf32>
    %628 = arith.subf %624, %627 : vector<8x16xf32>
    %629 = math.exp %628 : vector<8x16xf32>
    %cst_372 = arith.constant dense<0.000000e+00> : vector<8xf32>
    %630 = vector.multi_reduction <add>, %629, %cst_372 [1] : vector<8x16xf32> to vector<8xf32>
    %631 = vector.shape_cast %630 : vector<8xf32> to vector<8x1xf32>
    %632 = tpu.reciprocal %631 {approx = true} : vector<8x1xf32> -> vector<8x1xf32>
    %633 = vector.broadcast %632 : vector<8x1xf32> to vector<8x16xf32>
    %634 = arith.mulf %629, %633 : vector<8x16xf32>
    %cst_373 = arith.constant dense<0.000000e+00> : vector<8x8xf32>
    %635 = tpu.matmul %634, %621, %cst_373 {dimension_numbers = #tpu.dot_dimension_numbers<[1], [0], [0], [1], [0, 0, 1, 1], [], []>} : vector<8x16xf32>, vector<16x8xf32>, vector<8x8xf32> -> vector<8x8xf32>
    %c0_374 = arith.constant 0 : index
    %c2_375 = arith.constant 2 : index
    %c0_376 = arith.constant 0 : index
    %c0_377 = arith.constant 0 : index
    %636 = vector.load %arg29[%c0_374, %c2_375, %c0_376, %c0_377] : memref<2x4x8x32xf32, #tpu.memory_space<vmem>>, vector<1x1x8x32xf32>
    %637 = vector.shape_cast %636 : vector<1x1x8x32xf32> to vector<8x32xf32>
    %cst_378 = arith.constant dense<0.000000e+00> : vector<8x32xf32>
    %638 = tpu.matmul %635, %637, %cst_378 {dimension_numbers = #tpu.dot_dimension_numbers<[1], [0], [0], [1], [0, 0, 1, 1], [], []>} : vector<8x8xf32>, vector<8x32xf32>, vector<8x32xf32> -> vector<8x32xf32>
    %639 = arith.addf %618, %638 : vector<8x32xf32>
    %640 = vector.extract_strided_slice %570 {offsets = [0, 24], sizes = [8, 8], strides = [1, 1]} : vector<8x32xf32> to vector<8x8xf32>
    %641 = vector.extract_strided_slice %577 {offsets = [0, 24], sizes = [16, 8], strides = [1, 1]} : vector<16x64xf32> to vector<16x8xf32>
    %642 = vector.extract_strided_slice %577 {offsets = [0, 56], sizes = [16, 8], strides = [1, 1]} : vector<16x64xf32> to vector<16x8xf32>
    %cst_379 = arith.constant dense<0.000000e+00> : vector<8x16xf32>
    %643 = tpu.matmul %640, %641, %cst_379 {dimension_numbers = #tpu.dot_dimension_numbers<[1], [1], [0], [0], [0, 0, 1, 0], [], []>} : vector<8x8xf32>, vector<16x8xf32>, vector<8x16xf32> -> vector<8x16xf32>
    %cst_380 = arith.constant 0.353553385 : f32
    %644 = vector.broadcast %cst_380 : f32 to vector<8x16xf32>
    %645 = arith.mulf %643, %644 : vector<8x16xf32>
    %cst_381 = arith.constant dense<0xFF800000> : vector<8xf32>
    %646 = vector.multi_reduction <maximumf>, %645, %cst_381 [1] : vector<8x16xf32> to vector<8xf32>
    %647 = vector.shape_cast %646 : vector<8xf32> to vector<8x1xf32>
    %648 = vector.broadcast %647 : vector<8x1xf32> to vector<8x16xf32>
    %649 = arith.subf %645, %648 : vector<8x16xf32>
    %650 = math.exp %649 : vector<8x16xf32>
    %cst_382 = arith.constant dense<0.000000e+00> : vector<8xf32>
    %651 = vector.multi_reduction <add>, %650, %cst_382 [1] : vector<8x16xf32> to vector<8xf32>
    %652 = vector.shape_cast %651 : vector<8xf32> to vector<8x1xf32>
    %653 = tpu.reciprocal %652 {approx = true} : vector<8x1xf32> -> vector<8x1xf32>
    %654 = vector.broadcast %653 : vector<8x1xf32> to vector<8x16xf32>
    %655 = arith.mulf %650, %654 : vector<8x16xf32>
    %cst_383 = arith.constant dense<0.000000e+00> : vector<8x8xf32>
    %656 = tpu.matmul %655, %642, %cst_383 {dimension_numbers = #tpu.dot_dimension_numbers<[1], [0], [0], [1], [0, 0, 1, 1], [], []>} : vector<8x16xf32>, vector<16x8xf32>, vector<8x8xf32> -> vector<8x8xf32>
    %c0_384 = arith.constant 0 : index
    %c3_385 = arith.constant 3 : index
    %c0_386 = arith.constant 0 : index
    %c0_387 = arith.constant 0 : index
    %657 = vector.load %arg29[%c0_384, %c3_385, %c0_386, %c0_387] : memref<2x4x8x32xf32, #tpu.memory_space<vmem>>, vector<1x1x8x32xf32>
    %658 = vector.shape_cast %657 : vector<1x1x8x32xf32> to vector<8x32xf32>
    %cst_388 = arith.constant dense<0.000000e+00> : vector<8x32xf32>
    %659 = tpu.matmul %656, %658, %cst_388 {dimension_numbers = #tpu.dot_dimension_numbers<[1], [0], [0], [1], [0, 0, 1, 1], [], []>} : vector<8x8xf32>, vector<8x32xf32>, vector<8x32xf32> -> vector<8x32xf32>
    %660 = arith.addf %639, %659 : vector<8x32xf32>
    %c0_389 = arith.constant 0 : index
    %c0_390 = arith.constant 0 : index
    %c0_391 = arith.constant 0 : index
    %661 = vector.load %arg30[%c0_389, %c0_390, %c0_391] : memref<2x1x32xf32, #tpu.memory_space<vmem>>, vector<1x1x32xf32>
    %662 = vector.shape_cast %661 : vector<1x1x32xf32> to vector<1x32xf32>
    %663 = vector.broadcast %662 : vector<1x32xf32> to vector<8x32xf32>
    %664 = arith.addf %660, %663 : vector<8x32xf32>
    %665 = arith.addf %563, %664 : vector<8x32xf32>
    %c0_392 = arith.constant 0 : index
    %c0_393 = arith.constant 0 : index
    %c0_394 = arith.constant 0 : index
    %666 = vector.load %arg31[%c0_392, %c0_393, %c0_394] : memref<2x1x32xf32, #tpu.memory_space<vmem>>, vector<1x1x32xf32>
    %667 = vector.shape_cast %666 : vector<1x1x32xf32> to vector<1x32xf32>
    %c0_395 = arith.constant 0 : index
    %c0_396 = arith.constant 0 : index
    %c0_397 = arith.constant 0 : index
    %668 = vector.load %arg32[%c0_395, %c0_396, %c0_397] : memref<2x1x32xf32, #tpu.memory_space<vmem>>, vector<1x1x32xf32>
    %669 = vector.shape_cast %668 : vector<1x1x32xf32> to vector<1x32xf32>
    %cst_398 = arith.constant dense<0.000000e+00> : vector<8xf32>
    %670 = vector.multi_reduction <add>, %665, %cst_398 [1] : vector<8x32xf32> to vector<8xf32>
    %671 = vector.shape_cast %670 : vector<8xf32> to vector<8x1xf32>
    %cst_399 = arith.constant 3.200000e+01 : f32
    %672 = vector.broadcast %cst_399 : f32 to vector<8x1xf32>
    %673 = arith.divf %671, %672 : vector<8x1xf32>
    %674 = vector.broadcast %673 : vector<8x1xf32> to vector<8x32xf32>
    %675 = arith.subf %665, %674 : vector<8x32xf32>
    %676 = arith.mulf %675, %675 : vector<8x32xf32>
    %cst_400 = arith.constant dense<0.000000e+00> : vector<8xf32>
    %677 = vector.multi_reduction <add>, %676, %cst_400 [1] : vector<8x32xf32> to vector<8xf32>
    %678 = vector.shape_cast %677 : vector<8xf32> to vector<8x1xf32>
    %cst_401 = arith.constant 3.200000e+01 : f32
    %679 = vector.broadcast %cst_401 : f32 to vector<8x1xf32>
    %680 = arith.divf %678, %679 : vector<8x1xf32>
    %cst_402 = arith.constant 9.99999974E-6 : f32
    %681 = vector.broadcast %cst_402 : f32 to vector<8x1xf32>
    %682 = arith.addf %680, %681 : vector<8x1xf32>
    %683 = math.rsqrt %682 : vector<8x1xf32>
    %684 = vector.broadcast %683 : vector<8x1xf32> to vector<8x32xf32>
    %685 = arith.mulf %675, %684 : vector<8x32xf32>
    %686 = vector.broadcast %667 : vector<1x32xf32> to vector<8x32xf32>
    %687 = arith.mulf %685, %686 : vector<8x32xf32>
    %688 = vector.broadcast %669 : vector<1x32xf32> to vector<8x32xf32>
    %689 = arith.addf %687, %688 : vector<8x32xf32>
    %c0_403 = arith.constant 0 : index
    %c0_404 = arith.constant 0 : index
    %c0_405 = arith.constant 0 : index
    %690 = vector.load %arg33[%c0_403, %c0_404, %c0_405] : memref<2x32x2048xf32, #tpu.memory_space<vmem>>, vector<1x32x512xf32>
    %691 = vector.shape_cast %690 : vector<1x32x512xf32> to vector<32x512xf32>
    %cst_406 = arith.constant dense<0.000000e+00> : vector<8x512xf32>
    %692 = tpu.matmul %689, %691, %cst_406 {dimension_numbers = #tpu.dot_dimension_numbers<[1], [0], [0], [1], [0, 0, 1, 1], [], []>} : vector<8x32xf32>, vector<32x512xf32>, vector<8x512xf32> -> vector<8x512xf32>
    %c0_407 = arith.constant 0 : index
    %c0_408 = arith.constant 0 : index
    %c0_409 = arith.constant 0 : index
    %693 = vector.load %arg34[%c0_407, %c0_408, %c0_409] : memref<2x1x2048xf32, #tpu.memory_space<vmem>>, vector<1x1x512xf32>
    %694 = vector.shape_cast %693 : vector<1x1x512xf32> to vector<1x512xf32>
    %695 = vector.broadcast %694 : vector<1x512xf32> to vector<8x512xf32>
    %696 = arith.addf %692, %695 : vector<8x512xf32>
    %cst_410 = arith.constant 0.000000e+00 : f32
    %697 = vector.broadcast %cst_410 : f32 to vector<8x512xf32>
    %698 = arith.maximumf %696, %697 : vector<8x512xf32>
    %c0_411 = arith.constant 0 : index
    %c0_412 = arith.constant 0 : index
    %c0_413 = arith.constant 0 : index
    %699 = vector.load %arg35[%c0_411, %c0_412, %c0_413] : memref<2x32x2048xf32, #tpu.memory_space<vmem>>, vector<1x32x512xf32>
    %700 = vector.shape_cast %699 : vector<1x32x512xf32> to vector<32x512xf32>
    %cst_414 = arith.constant dense<0.000000e+00> : vector<8x32xf32>
    %701 = tpu.matmul %698, %700, %cst_414 {dimension_numbers = #tpu.dot_dimension_numbers<[1], [1], [0], [0], [0, 0, 1, 0], [], []>} : vector<8x512xf32>, vector<32x512xf32>, vector<8x32xf32> -> vector<8x32xf32>
    %c0_415 = arith.constant 0 : index
    %c0_416 = arith.constant 0 : index
    %c512_417 = arith.constant 512 : index
    %702 = vector.load %arg33[%c0_415, %c0_416, %c512_417] : memref<2x32x2048xf32, #tpu.memory_space<vmem>>, vector<1x32x512xf32>
    %703 = vector.shape_cast %702 : vector<1x32x512xf32> to vector<32x512xf32>
    %cst_418 = arith.constant dense<0.000000e+00> : vector<8x512xf32>
    %704 = tpu.matmul %689, %703, %cst_418 {dimension_numbers = #tpu.dot_dimension_numbers<[1], [0], [0], [1], [0, 0, 1, 1], [], []>} : vector<8x32xf32>, vector<32x512xf32>, vector<8x512xf32> -> vector<8x512xf32>
    %c0_419 = arith.constant 0 : index
    %c0_420 = arith.constant 0 : index
    %c512_421 = arith.constant 512 : index
    %705 = vector.load %arg34[%c0_419, %c0_420, %c512_421] : memref<2x1x2048xf32, #tpu.memory_space<vmem>>, vector<1x1x512xf32>
    %706 = vector.shape_cast %705 : vector<1x1x512xf32> to vector<1x512xf32>
    %707 = vector.broadcast %706 : vector<1x512xf32> to vector<8x512xf32>
    %708 = arith.addf %704, %707 : vector<8x512xf32>
    %cst_422 = arith.constant 0.000000e+00 : f32
    %709 = vector.broadcast %cst_422 : f32 to vector<8x512xf32>
    %710 = arith.maximumf %708, %709 : vector<8x512xf32>
    %c0_423 = arith.constant 0 : index
    %c0_424 = arith.constant 0 : index
    %c512_425 = arith.constant 512 : index
    %711 = vector.load %arg35[%c0_423, %c0_424, %c512_425] : memref<2x32x2048xf32, #tpu.memory_space<vmem>>, vector<1x32x512xf32>
    %712 = vector.shape_cast %711 : vector<1x32x512xf32> to vector<32x512xf32>
    %cst_426 = arith.constant dense<0.000000e+00> : vector<8x32xf32>
    %713 = tpu.matmul %710, %712, %cst_426 {dimension_numbers = #tpu.dot_dimension_numbers<[1], [1], [0], [0], [0, 0, 1, 0], [], []>} : vector<8x512xf32>, vector<32x512xf32>, vector<8x32xf32> -> vector<8x32xf32>
    %714 = arith.addf %701, %713 : vector<8x32xf32>
    %c0_427 = arith.constant 0 : index
    %c0_428 = arith.constant 0 : index
    %c1024_429 = arith.constant 1024 : index
    %715 = vector.load %arg33[%c0_427, %c0_428, %c1024_429] : memref<2x32x2048xf32, #tpu.memory_space<vmem>>, vector<1x32x512xf32>
    %716 = vector.shape_cast %715 : vector<1x32x512xf32> to vector<32x512xf32>
    %cst_430 = arith.constant dense<0.000000e+00> : vector<8x512xf32>
    %717 = tpu.matmul %689, %716, %cst_430 {dimension_numbers = #tpu.dot_dimension_numbers<[1], [0], [0], [1], [0, 0, 1, 1], [], []>} : vector<8x32xf32>, vector<32x512xf32>, vector<8x512xf32> -> vector<8x512xf32>
    %c0_431 = arith.constant 0 : index
    %c0_432 = arith.constant 0 : index
    %c1024_433 = arith.constant 1024 : index
    %718 = vector.load %arg34[%c0_431, %c0_432, %c1024_433] : memref<2x1x2048xf32, #tpu.memory_space<vmem>>, vector<1x1x512xf32>
    %719 = vector.shape_cast %718 : vector<1x1x512xf32> to vector<1x512xf32>
    %720 = vector.broadcast %719 : vector<1x512xf32> to vector<8x512xf32>
    %721 = arith.addf %717, %720 : vector<8x512xf32>
    %cst_434 = arith.constant 0.000000e+00 : f32
    %722 = vector.broadcast %cst_434 : f32 to vector<8x512xf32>
    %723 = arith.maximumf %721, %722 : vector<8x512xf32>
    %c0_435 = arith.constant 0 : index
    %c0_436 = arith.constant 0 : index
    %c1024_437 = arith.constant 1024 : index
    %724 = vector.load %arg35[%c0_435, %c0_436, %c1024_437] : memref<2x32x2048xf32, #tpu.memory_space<vmem>>, vector<1x32x512xf32>
    %725 = vector.shape_cast %724 : vector<1x32x512xf32> to vector<32x512xf32>
    %cst_438 = arith.constant dense<0.000000e+00> : vector<8x32xf32>
    %726 = tpu.matmul %723, %725, %cst_438 {dimension_numbers = #tpu.dot_dimension_numbers<[1], [1], [0], [0], [0, 0, 1, 0], [], []>} : vector<8x512xf32>, vector<32x512xf32>, vector<8x32xf32> -> vector<8x32xf32>
    %727 = arith.addf %714, %726 : vector<8x32xf32>
    %c0_439 = arith.constant 0 : index
    %c0_440 = arith.constant 0 : index
    %c1536_441 = arith.constant 1536 : index
    %728 = vector.load %arg33[%c0_439, %c0_440, %c1536_441] : memref<2x32x2048xf32, #tpu.memory_space<vmem>>, vector<1x32x512xf32>
    %729 = vector.shape_cast %728 : vector<1x32x512xf32> to vector<32x512xf32>
    %cst_442 = arith.constant dense<0.000000e+00> : vector<8x512xf32>
    %730 = tpu.matmul %689, %729, %cst_442 {dimension_numbers = #tpu.dot_dimension_numbers<[1], [0], [0], [1], [0, 0, 1, 1], [], []>} : vector<8x32xf32>, vector<32x512xf32>, vector<8x512xf32> -> vector<8x512xf32>
    %c0_443 = arith.constant 0 : index
    %c0_444 = arith.constant 0 : index
    %c1536_445 = arith.constant 1536 : index
    %731 = vector.load %arg34[%c0_443, %c0_444, %c1536_445] : memref<2x1x2048xf32, #tpu.memory_space<vmem>>, vector<1x1x512xf32>
    %732 = vector.shape_cast %731 : vector<1x1x512xf32> to vector<1x512xf32>
    %733 = vector.broadcast %732 : vector<1x512xf32> to vector<8x512xf32>
    %734 = arith.addf %730, %733 : vector<8x512xf32>
    %cst_446 = arith.constant 0.000000e+00 : f32
    %735 = vector.broadcast %cst_446 : f32 to vector<8x512xf32>
    %736 = arith.maximumf %734, %735 : vector<8x512xf32>
    %c0_447 = arith.constant 0 : index
    %c0_448 = arith.constant 0 : index
    %c1536_449 = arith.constant 1536 : index
    %737 = vector.load %arg35[%c0_447, %c0_448, %c1536_449] : memref<2x32x2048xf32, #tpu.memory_space<vmem>>, vector<1x32x512xf32>
    %738 = vector.shape_cast %737 : vector<1x32x512xf32> to vector<32x512xf32>
    %cst_450 = arith.constant dense<0.000000e+00> : vector<8x32xf32>
    %739 = tpu.matmul %736, %738, %cst_450 {dimension_numbers = #tpu.dot_dimension_numbers<[1], [1], [0], [0], [0, 0, 1, 0], [], []>} : vector<8x512xf32>, vector<32x512xf32>, vector<8x32xf32> -> vector<8x32xf32>
    %740 = arith.addf %727, %739 : vector<8x32xf32>
    %c0_451 = arith.constant 0 : index
    %c0_452 = arith.constant 0 : index
    %c0_453 = arith.constant 0 : index
    %741 = vector.load %arg36[%c0_451, %c0_452, %c0_453] : memref<2x1x32xf32, #tpu.memory_space<vmem>>, vector<1x1x32xf32>
    %742 = vector.shape_cast %741 : vector<1x1x32xf32> to vector<1x32xf32>
    %743 = vector.broadcast %742 : vector<1x32xf32> to vector<8x32xf32>
    %744 = arith.addf %740, %743 : vector<8x32xf32>
    %745 = arith.addf %689, %744 : vector<8x32xf32>
    %c0_454 = arith.constant 0 : index
    %c0_455 = arith.constant 0 : index
    %c0_456 = arith.constant 0 : index
    %746 = vector.load %arg37[%c0_454, %c0_455, %c0_456] : memref<2x1x32xf32, #tpu.memory_space<vmem>>, vector<1x1x32xf32>
    %747 = vector.shape_cast %746 : vector<1x1x32xf32> to vector<1x32xf32>
    %c0_457 = arith.constant 0 : index
    %c0_458 = arith.constant 0 : index
    %c0_459 = arith.constant 0 : index
    %748 = vector.load %arg38[%c0_457, %c0_458, %c0_459] : memref<2x1x32xf32, #tpu.memory_space<vmem>>, vector<1x1x32xf32>
    %749 = vector.shape_cast %748 : vector<1x1x32xf32> to vector<1x32xf32>
    %cst_460 = arith.constant dense<0.000000e+00> : vector<8xf32>
    %750 = vector.multi_reduction <add>, %745, %cst_460 [1] : vector<8x32xf32> to vector<8xf32>
    %751 = vector.shape_cast %750 : vector<8xf32> to vector<8x1xf32>
    %cst_461 = arith.constant 3.200000e+01 : f32
    %752 = vector.broadcast %cst_461 : f32 to vector<8x1xf32>
    %753 = arith.divf %751, %752 : vector<8x1xf32>
    %754 = vector.broadcast %753 : vector<8x1xf32> to vector<8x32xf32>
    %755 = arith.subf %745, %754 : vector<8x32xf32>
    %756 = arith.mulf %755, %755 : vector<8x32xf32>
    %cst_462 = arith.constant dense<0.000000e+00> : vector<8xf32>
    %757 = vector.multi_reduction <add>, %756, %cst_462 [1] : vector<8x32xf32> to vector<8xf32>
    %758 = vector.shape_cast %757 : vector<8xf32> to vector<8x1xf32>
    %cst_463 = arith.constant 3.200000e+01 : f32
    %759 = vector.broadcast %cst_463 : f32 to vector<8x1xf32>
    %760 = arith.divf %758, %759 : vector<8x1xf32>
    %cst_464 = arith.constant 9.99999974E-6 : f32
    %761 = vector.broadcast %cst_464 : f32 to vector<8x1xf32>
    %762 = arith.addf %760, %761 : vector<8x1xf32>
    %763 = math.rsqrt %762 : vector<8x1xf32>
    %764 = vector.broadcast %763 : vector<8x1xf32> to vector<8x32xf32>
    %765 = arith.mulf %755, %764 : vector<8x32xf32>
    %766 = vector.broadcast %747 : vector<1x32xf32> to vector<8x32xf32>
    %767 = arith.mulf %765, %766 : vector<8x32xf32>
    %768 = vector.broadcast %749 : vector<1x32xf32> to vector<8x32xf32>
    %769 = arith.addf %767, %768 : vector<8x32xf32>
    %c1_465 = arith.constant 1 : index
    %c0_466 = arith.constant 0 : index
    %c0_467 = arith.constant 0 : index
    %770 = vector.load %arg17[%c1_465, %c0_466, %c0_467] : memref<2x32x32xf32, #tpu.memory_space<vmem>>, vector<1x32x32xf32>
    %771 = vector.shape_cast %770 : vector<1x32x32xf32> to vector<32x32xf32>
    %cst_468 = arith.constant dense<0.000000e+00> : vector<8x32xf32>
    %772 = tpu.matmul %769, %771, %cst_468 {dimension_numbers = #tpu.dot_dimension_numbers<[1], [0], [0], [1], [0, 0, 1, 1], [], []>} : vector<8x32xf32>, vector<32x32xf32>, vector<8x32xf32> -> vector<8x32xf32>
    %c1_469 = arith.constant 1 : index
    %c0_470 = arith.constant 0 : index
    %c0_471 = arith.constant 0 : index
    %773 = vector.load %arg19[%c1_469, %c0_470, %c0_471] : memref<2x1x32xf32, #tpu.memory_space<vmem>>, vector<1x1x32xf32>
    %774 = vector.shape_cast %773 : vector<1x1x32xf32> to vector<1x32xf32>
    %775 = vector.broadcast %774 : vector<1x32xf32> to vector<8x32xf32>
    %776 = arith.addf %772, %775 : vector<8x32xf32>
    %c1_472 = arith.constant 1 : index
    %c0_473 = arith.constant 0 : index
    %c0_474 = arith.constant 0 : index
    %777 = vector.load %arg18[%c1_472, %c0_473, %c0_474] : memref<2x32x64xf32, #tpu.memory_space<vmem>>, vector<1x32x64xf32>
    %778 = vector.shape_cast %777 : vector<1x32x64xf32> to vector<32x64xf32>
    %cst_475 = arith.constant dense<0.000000e+00> : vector<8x64xf32>
    %779 = tpu.matmul %769, %778, %cst_475 {dimension_numbers = #tpu.dot_dimension_numbers<[1], [0], [0], [1], [0, 0, 1, 1], [], []>} : vector<8x32xf32>, vector<32x64xf32>, vector<8x64xf32> -> vector<8x64xf32>
    %c1_476 = arith.constant 1 : index
    %c0_477 = arith.constant 0 : index
    %c0_478 = arith.constant 0 : index
    %780 = vector.load %arg20[%c1_476, %c0_477, %c0_478] : memref<2x1x64xf32, #tpu.memory_space<vmem>>, vector<1x1x64xf32>
    %781 = vector.shape_cast %780 : vector<1x1x64xf32> to vector<1x64xf32>
    %782 = vector.broadcast %781 : vector<1x64xf32> to vector<8x64xf32>
    %783 = arith.addf %779, %782 : vector<8x64xf32>
    %784 = vector.extract_strided_slice %776 {offsets = [0, 0], sizes = [8, 8], strides = [1, 1]} : vector<8x32xf32> to vector<8x8xf32>
    %785 = vector.extract_strided_slice %783 {offsets = [0, 0], sizes = [8, 8], strides = [1, 1]} : vector<8x64xf32> to vector<8x8xf32>
    %786 = vector.extract_strided_slice %783 {offsets = [0, 32], sizes = [8, 8], strides = [1, 1]} : vector<8x64xf32> to vector<8x8xf32>
    %cst_479 = arith.constant dense<0.000000e+00> : vector<8x8xf32>
    %787 = tpu.matmul %784, %785, %cst_479 {dimension_numbers = #tpu.dot_dimension_numbers<[1], [1], [0], [0], [0, 0, 1, 0], [], []>} : vector<8x8xf32>, vector<8x8xf32>, vector<8x8xf32> -> vector<8x8xf32>
    %cst_480 = arith.constant 0.353553385 : f32
    %788 = vector.broadcast %cst_480 : f32 to vector<8x8xf32>
    %789 = arith.mulf %787, %788 : vector<8x8xf32>
    %cst_481 = arith.constant dense<0xFF800000> : vector<8xf32>
    %790 = vector.multi_reduction <maximumf>, %789, %cst_481 [1] : vector<8x8xf32> to vector<8xf32>
    %791 = vector.shape_cast %790 : vector<8xf32> to vector<8x1xf32>
    %792 = vector.broadcast %791 : vector<8x1xf32> to vector<8x8xf32>
    %793 = arith.subf %789, %792 : vector<8x8xf32>
    %794 = math.exp %793 : vector<8x8xf32>
    %cst_482 = arith.constant dense<0.000000e+00> : vector<8xf32>
    %795 = vector.multi_reduction <add>, %794, %cst_482 [1] : vector<8x8xf32> to vector<8xf32>
    %796 = vector.shape_cast %795 : vector<8xf32> to vector<8x1xf32>
    %797 = tpu.reciprocal %796 {approx = true} : vector<8x1xf32> -> vector<8x1xf32>
    %798 = vector.broadcast %797 : vector<8x1xf32> to vector<8x8xf32>
    %799 = arith.mulf %794, %798 : vector<8x8xf32>
    %cst_483 = arith.constant dense<0.000000e+00> : vector<8x8xf32>
    %800 = tpu.matmul %799, %786, %cst_483 {dimension_numbers = #tpu.dot_dimension_numbers<[1], [0], [0], [1], [0, 0, 1, 1], [], []>} : vector<8x8xf32>, vector<8x8xf32>, vector<8x8xf32> -> vector<8x8xf32>
    %c1_484 = arith.constant 1 : index
    %c0_485 = arith.constant 0 : index
    %c0_486 = arith.constant 0 : index
    %c0_487 = arith.constant 0 : index
    %801 = vector.load %arg21[%c1_484, %c0_485, %c0_486, %c0_487] : memref<2x4x8x32xf32, #tpu.memory_space<vmem>>, vector<1x1x8x32xf32>
    %802 = vector.shape_cast %801 : vector<1x1x8x32xf32> to vector<8x32xf32>
    %cst_488 = arith.constant dense<0.000000e+00> : vector<8x32xf32>
    %803 = tpu.matmul %800, %802, %cst_488 {dimension_numbers = #tpu.dot_dimension_numbers<[1], [0], [0], [1], [0, 0, 1, 1], [], []>} : vector<8x8xf32>, vector<8x32xf32>, vector<8x32xf32> -> vector<8x32xf32>
    %804 = vector.extract_strided_slice %776 {offsets = [0, 8], sizes = [8, 8], strides = [1, 1]} : vector<8x32xf32> to vector<8x8xf32>
    %805 = vector.extract_strided_slice %783 {offsets = [0, 8], sizes = [8, 8], strides = [1, 1]} : vector<8x64xf32> to vector<8x8xf32>
    %806 = vector.extract_strided_slice %783 {offsets = [0, 40], sizes = [8, 8], strides = [1, 1]} : vector<8x64xf32> to vector<8x8xf32>
    %cst_489 = arith.constant dense<0.000000e+00> : vector<8x8xf32>
    %807 = tpu.matmul %804, %805, %cst_489 {dimension_numbers = #tpu.dot_dimension_numbers<[1], [1], [0], [0], [0, 0, 1, 0], [], []>} : vector<8x8xf32>, vector<8x8xf32>, vector<8x8xf32> -> vector<8x8xf32>
    %cst_490 = arith.constant 0.353553385 : f32
    %808 = vector.broadcast %cst_490 : f32 to vector<8x8xf32>
    %809 = arith.mulf %807, %808 : vector<8x8xf32>
    %cst_491 = arith.constant dense<0xFF800000> : vector<8xf32>
    %810 = vector.multi_reduction <maximumf>, %809, %cst_491 [1] : vector<8x8xf32> to vector<8xf32>
    %811 = vector.shape_cast %810 : vector<8xf32> to vector<8x1xf32>
    %812 = vector.broadcast %811 : vector<8x1xf32> to vector<8x8xf32>
    %813 = arith.subf %809, %812 : vector<8x8xf32>
    %814 = math.exp %813 : vector<8x8xf32>
    %cst_492 = arith.constant dense<0.000000e+00> : vector<8xf32>
    %815 = vector.multi_reduction <add>, %814, %cst_492 [1] : vector<8x8xf32> to vector<8xf32>
    %816 = vector.shape_cast %815 : vector<8xf32> to vector<8x1xf32>
    %817 = tpu.reciprocal %816 {approx = true} : vector<8x1xf32> -> vector<8x1xf32>
    %818 = vector.broadcast %817 : vector<8x1xf32> to vector<8x8xf32>
    %819 = arith.mulf %814, %818 : vector<8x8xf32>
    %cst_493 = arith.constant dense<0.000000e+00> : vector<8x8xf32>
    %820 = tpu.matmul %819, %806, %cst_493 {dimension_numbers = #tpu.dot_dimension_numbers<[1], [0], [0], [1], [0, 0, 1, 1], [], []>} : vector<8x8xf32>, vector<8x8xf32>, vector<8x8xf32> -> vector<8x8xf32>
    %c1_494 = arith.constant 1 : index
    %c1_495 = arith.constant 1 : index
    %c0_496 = arith.constant 0 : index
    %c0_497 = arith.constant 0 : index
    %821 = vector.load %arg21[%c1_494, %c1_495, %c0_496, %c0_497] : memref<2x4x8x32xf32, #tpu.memory_space<vmem>>, vector<1x1x8x32xf32>
    %822 = vector.shape_cast %821 : vector<1x1x8x32xf32> to vector<8x32xf32>
    %cst_498 = arith.constant dense<0.000000e+00> : vector<8x32xf32>
    %823 = tpu.matmul %820, %822, %cst_498 {dimension_numbers = #tpu.dot_dimension_numbers<[1], [0], [0], [1], [0, 0, 1, 1], [], []>} : vector<8x8xf32>, vector<8x32xf32>, vector<8x32xf32> -> vector<8x32xf32>
    %824 = arith.addf %803, %823 : vector<8x32xf32>
    %825 = vector.extract_strided_slice %776 {offsets = [0, 16], sizes = [8, 8], strides = [1, 1]} : vector<8x32xf32> to vector<8x8xf32>
    %826 = vector.extract_strided_slice %783 {offsets = [0, 16], sizes = [8, 8], strides = [1, 1]} : vector<8x64xf32> to vector<8x8xf32>
    %827 = vector.extract_strided_slice %783 {offsets = [0, 48], sizes = [8, 8], strides = [1, 1]} : vector<8x64xf32> to vector<8x8xf32>
    %cst_499 = arith.constant dense<0.000000e+00> : vector<8x8xf32>
    %828 = tpu.matmul %825, %826, %cst_499 {dimension_numbers = #tpu.dot_dimension_numbers<[1], [1], [0], [0], [0, 0, 1, 0], [], []>} : vector<8x8xf32>, vector<8x8xf32>, vector<8x8xf32> -> vector<8x8xf32>
    %cst_500 = arith.constant 0.353553385 : f32
    %829 = vector.broadcast %cst_500 : f32 to vector<8x8xf32>
    %830 = arith.mulf %828, %829 : vector<8x8xf32>
    %cst_501 = arith.constant dense<0xFF800000> : vector<8xf32>
    %831 = vector.multi_reduction <maximumf>, %830, %cst_501 [1] : vector<8x8xf32> to vector<8xf32>
    %832 = vector.shape_cast %831 : vector<8xf32> to vector<8x1xf32>
    %833 = vector.broadcast %832 : vector<8x1xf32> to vector<8x8xf32>
    %834 = arith.subf %830, %833 : vector<8x8xf32>
    %835 = math.exp %834 : vector<8x8xf32>
    %cst_502 = arith.constant dense<0.000000e+00> : vector<8xf32>
    %836 = vector.multi_reduction <add>, %835, %cst_502 [1] : vector<8x8xf32> to vector<8xf32>
    %837 = vector.shape_cast %836 : vector<8xf32> to vector<8x1xf32>
    %838 = tpu.reciprocal %837 {approx = true} : vector<8x1xf32> -> vector<8x1xf32>
    %839 = vector.broadcast %838 : vector<8x1xf32> to vector<8x8xf32>
    %840 = arith.mulf %835, %839 : vector<8x8xf32>
    %cst_503 = arith.constant dense<0.000000e+00> : vector<8x8xf32>
    %841 = tpu.matmul %840, %827, %cst_503 {dimension_numbers = #tpu.dot_dimension_numbers<[1], [0], [0], [1], [0, 0, 1, 1], [], []>} : vector<8x8xf32>, vector<8x8xf32>, vector<8x8xf32> -> vector<8x8xf32>
    %c1_504 = arith.constant 1 : index
    %c2_505 = arith.constant 2 : index
    %c0_506 = arith.constant 0 : index
    %c0_507 = arith.constant 0 : index
    %842 = vector.load %arg21[%c1_504, %c2_505, %c0_506, %c0_507] : memref<2x4x8x32xf32, #tpu.memory_space<vmem>>, vector<1x1x8x32xf32>
    %843 = vector.shape_cast %842 : vector<1x1x8x32xf32> to vector<8x32xf32>
    %cst_508 = arith.constant dense<0.000000e+00> : vector<8x32xf32>
    %844 = tpu.matmul %841, %843, %cst_508 {dimension_numbers = #tpu.dot_dimension_numbers<[1], [0], [0], [1], [0, 0, 1, 1], [], []>} : vector<8x8xf32>, vector<8x32xf32>, vector<8x32xf32> -> vector<8x32xf32>
    %845 = arith.addf %824, %844 : vector<8x32xf32>
    %846 = vector.extract_strided_slice %776 {offsets = [0, 24], sizes = [8, 8], strides = [1, 1]} : vector<8x32xf32> to vector<8x8xf32>
    %847 = vector.extract_strided_slice %783 {offsets = [0, 24], sizes = [8, 8], strides = [1, 1]} : vector<8x64xf32> to vector<8x8xf32>
    %848 = vector.extract_strided_slice %783 {offsets = [0, 56], sizes = [8, 8], strides = [1, 1]} : vector<8x64xf32> to vector<8x8xf32>
    %cst_509 = arith.constant dense<0.000000e+00> : vector<8x8xf32>
    %849 = tpu.matmul %846, %847, %cst_509 {dimension_numbers = #tpu.dot_dimension_numbers<[1], [1], [0], [0], [0, 0, 1, 0], [], []>} : vector<8x8xf32>, vector<8x8xf32>, vector<8x8xf32> -> vector<8x8xf32>
    %cst_510 = arith.constant 0.353553385 : f32
    %850 = vector.broadcast %cst_510 : f32 to vector<8x8xf32>
    %851 = arith.mulf %849, %850 : vector<8x8xf32>
    %cst_511 = arith.constant dense<0xFF800000> : vector<8xf32>
    %852 = vector.multi_reduction <maximumf>, %851, %cst_511 [1] : vector<8x8xf32> to vector<8xf32>
    %853 = vector.shape_cast %852 : vector<8xf32> to vector<8x1xf32>
    %854 = vector.broadcast %853 : vector<8x1xf32> to vector<8x8xf32>
    %855 = arith.subf %851, %854 : vector<8x8xf32>
    %856 = math.exp %855 : vector<8x8xf32>
    %cst_512 = arith.constant dense<0.000000e+00> : vector<8xf32>
    %857 = vector.multi_reduction <add>, %856, %cst_512 [1] : vector<8x8xf32> to vector<8xf32>
    %858 = vector.shape_cast %857 : vector<8xf32> to vector<8x1xf32>
    %859 = tpu.reciprocal %858 {approx = true} : vector<8x1xf32> -> vector<8x1xf32>
    %860 = vector.broadcast %859 : vector<8x1xf32> to vector<8x8xf32>
    %861 = arith.mulf %856, %860 : vector<8x8xf32>
    %cst_513 = arith.constant dense<0.000000e+00> : vector<8x8xf32>
    %862 = tpu.matmul %861, %848, %cst_513 {dimension_numbers = #tpu.dot_dimension_numbers<[1], [0], [0], [1], [0, 0, 1, 1], [], []>} : vector<8x8xf32>, vector<8x8xf32>, vector<8x8xf32> -> vector<8x8xf32>
    %c1_514 = arith.constant 1 : index
    %c3_515 = arith.constant 3 : index
    %c0_516 = arith.constant 0 : index
    %c0_517 = arith.constant 0 : index
    %863 = vector.load %arg21[%c1_514, %c3_515, %c0_516, %c0_517] : memref<2x4x8x32xf32, #tpu.memory_space<vmem>>, vector<1x1x8x32xf32>
    %864 = vector.shape_cast %863 : vector<1x1x8x32xf32> to vector<8x32xf32>
    %cst_518 = arith.constant dense<0.000000e+00> : vector<8x32xf32>
    %865 = tpu.matmul %862, %864, %cst_518 {dimension_numbers = #tpu.dot_dimension_numbers<[1], [0], [0], [1], [0, 0, 1, 1], [], []>} : vector<8x8xf32>, vector<8x32xf32>, vector<8x32xf32> -> vector<8x32xf32>
    %866 = arith.addf %845, %865 : vector<8x32xf32>
    %c1_519 = arith.constant 1 : index
    %c0_520 = arith.constant 0 : index
    %c0_521 = arith.constant 0 : index
    %867 = vector.load %arg22[%c1_519, %c0_520, %c0_521] : memref<2x1x32xf32, #tpu.memory_space<vmem>>, vector<1x1x32xf32>
    %868 = vector.shape_cast %867 : vector<1x1x32xf32> to vector<1x32xf32>
    %869 = vector.broadcast %868 : vector<1x32xf32> to vector<8x32xf32>
    %870 = arith.addf %866, %869 : vector<8x32xf32>
    %871 = arith.addf %769, %870 : vector<8x32xf32>
    %c1_522 = arith.constant 1 : index
    %c0_523 = arith.constant 0 : index
    %c0_524 = arith.constant 0 : index
    %872 = vector.load %arg23[%c1_522, %c0_523, %c0_524] : memref<2x1x32xf32, #tpu.memory_space<vmem>>, vector<1x1x32xf32>
    %873 = vector.shape_cast %872 : vector<1x1x32xf32> to vector<1x32xf32>
    %c1_525 = arith.constant 1 : index
    %c0_526 = arith.constant 0 : index
    %c0_527 = arith.constant 0 : index
    %874 = vector.load %arg24[%c1_525, %c0_526, %c0_527] : memref<2x1x32xf32, #tpu.memory_space<vmem>>, vector<1x1x32xf32>
    %875 = vector.shape_cast %874 : vector<1x1x32xf32> to vector<1x32xf32>
    %cst_528 = arith.constant dense<0.000000e+00> : vector<8xf32>
    %876 = vector.multi_reduction <add>, %871, %cst_528 [1] : vector<8x32xf32> to vector<8xf32>
    %877 = vector.shape_cast %876 : vector<8xf32> to vector<8x1xf32>
    %cst_529 = arith.constant 3.200000e+01 : f32
    %878 = vector.broadcast %cst_529 : f32 to vector<8x1xf32>
    %879 = arith.divf %877, %878 : vector<8x1xf32>
    %880 = vector.broadcast %879 : vector<8x1xf32> to vector<8x32xf32>
    %881 = arith.subf %871, %880 : vector<8x32xf32>
    %882 = arith.mulf %881, %881 : vector<8x32xf32>
    %cst_530 = arith.constant dense<0.000000e+00> : vector<8xf32>
    %883 = vector.multi_reduction <add>, %882, %cst_530 [1] : vector<8x32xf32> to vector<8xf32>
    %884 = vector.shape_cast %883 : vector<8xf32> to vector<8x1xf32>
    %cst_531 = arith.constant 3.200000e+01 : f32
    %885 = vector.broadcast %cst_531 : f32 to vector<8x1xf32>
    %886 = arith.divf %884, %885 : vector<8x1xf32>
    %cst_532 = arith.constant 9.99999974E-6 : f32
    %887 = vector.broadcast %cst_532 : f32 to vector<8x1xf32>
    %888 = arith.addf %886, %887 : vector<8x1xf32>
    %889 = math.rsqrt %888 : vector<8x1xf32>
    %890 = vector.broadcast %889 : vector<8x1xf32> to vector<8x32xf32>
    %891 = arith.mulf %881, %890 : vector<8x32xf32>
    %892 = vector.broadcast %873 : vector<1x32xf32> to vector<8x32xf32>
    %893 = arith.mulf %891, %892 : vector<8x32xf32>
    %894 = vector.broadcast %875 : vector<1x32xf32> to vector<8x32xf32>
    %895 = arith.addf %893, %894 : vector<8x32xf32>
    %c1_533 = arith.constant 1 : index
    %c0_534 = arith.constant 0 : index
    %c0_535 = arith.constant 0 : index
    %896 = vector.load %arg25[%c1_533, %c0_534, %c0_535] : memref<2x32x32xf32, #tpu.memory_space<vmem>>, vector<1x32x32xf32>
    %897 = vector.shape_cast %896 : vector<1x32x32xf32> to vector<32x32xf32>
    %cst_536 = arith.constant dense<0.000000e+00> : vector<8x32xf32>
    %898 = tpu.matmul %895, %897, %cst_536 {dimension_numbers = #tpu.dot_dimension_numbers<[1], [0], [0], [1], [0, 0, 1, 1], [], []>} : vector<8x32xf32>, vector<32x32xf32>, vector<8x32xf32> -> vector<8x32xf32>
    %c1_537 = arith.constant 1 : index
    %c0_538 = arith.constant 0 : index
    %c0_539 = arith.constant 0 : index
    %899 = vector.load %arg27[%c1_537, %c0_538, %c0_539] : memref<2x1x32xf32, #tpu.memory_space<vmem>>, vector<1x1x32xf32>
    %900 = vector.shape_cast %899 : vector<1x1x32xf32> to vector<1x32xf32>
    %901 = vector.broadcast %900 : vector<1x32xf32> to vector<8x32xf32>
    %902 = arith.addf %898, %901 : vector<8x32xf32>
    %c1_540 = arith.constant 1 : index
    %c0_541 = arith.constant 0 : index
    %c0_542 = arith.constant 0 : index
    %903 = vector.load %arg26[%c1_540, %c0_541, %c0_542] : memref<2x32x64xf32, #tpu.memory_space<vmem>>, vector<1x32x64xf32>
    %904 = vector.shape_cast %903 : vector<1x32x64xf32> to vector<32x64xf32>
    %cst_543 = arith.constant dense<0.000000e+00> : vector<16x64xf32>
    %905 = tpu.matmul %435, %904, %cst_543 {dimension_numbers = #tpu.dot_dimension_numbers<[1], [0], [0], [1], [0, 0, 1, 1], [], []>} : vector<16x32xf32>, vector<32x64xf32>, vector<16x64xf32> -> vector<16x64xf32>
    %c1_544 = arith.constant 1 : index
    %c0_545 = arith.constant 0 : index
    %c0_546 = arith.constant 0 : index
    %906 = vector.load %arg28[%c1_544, %c0_545, %c0_546] : memref<2x1x64xf32, #tpu.memory_space<vmem>>, vector<1x1x64xf32>
    %907 = vector.shape_cast %906 : vector<1x1x64xf32> to vector<1x64xf32>
    %908 = vector.broadcast %907 : vector<1x64xf32> to vector<16x64xf32>
    %909 = arith.addf %905, %908 : vector<16x64xf32>
    %910 = vector.extract_strided_slice %902 {offsets = [0, 0], sizes = [8, 8], strides = [1, 1]} : vector<8x32xf32> to vector<8x8xf32>
    %911 = vector.extract_strided_slice %909 {offsets = [0, 0], sizes = [16, 8], strides = [1, 1]} : vector<16x64xf32> to vector<16x8xf32>
    %912 = vector.extract_strided_slice %909 {offsets = [0, 32], sizes = [16, 8], strides = [1, 1]} : vector<16x64xf32> to vector<16x8xf32>
    %cst_547 = arith.constant dense<0.000000e+00> : vector<8x16xf32>
    %913 = tpu.matmul %910, %911, %cst_547 {dimension_numbers = #tpu.dot_dimension_numbers<[1], [1], [0], [0], [0, 0, 1, 0], [], []>} : vector<8x8xf32>, vector<16x8xf32>, vector<8x16xf32> -> vector<8x16xf32>
    %cst_548 = arith.constant 0.353553385 : f32
    %914 = vector.broadcast %cst_548 : f32 to vector<8x16xf32>
    %915 = arith.mulf %913, %914 : vector<8x16xf32>
    %cst_549 = arith.constant dense<0xFF800000> : vector<8xf32>
    %916 = vector.multi_reduction <maximumf>, %915, %cst_549 [1] : vector<8x16xf32> to vector<8xf32>
    %917 = vector.shape_cast %916 : vector<8xf32> to vector<8x1xf32>
    %918 = vector.broadcast %917 : vector<8x1xf32> to vector<8x16xf32>
    %919 = arith.subf %915, %918 : vector<8x16xf32>
    %920 = math.exp %919 : vector<8x16xf32>
    %cst_550 = arith.constant dense<0.000000e+00> : vector<8xf32>
    %921 = vector.multi_reduction <add>, %920, %cst_550 [1] : vector<8x16xf32> to vector<8xf32>
    %922 = vector.shape_cast %921 : vector<8xf32> to vector<8x1xf32>
    %923 = tpu.reciprocal %922 {approx = true} : vector<8x1xf32> -> vector<8x1xf32>
    %924 = vector.broadcast %923 : vector<8x1xf32> to vector<8x16xf32>
    %925 = arith.mulf %920, %924 : vector<8x16xf32>
    %cst_551 = arith.constant dense<0.000000e+00> : vector<8x8xf32>
    %926 = tpu.matmul %925, %912, %cst_551 {dimension_numbers = #tpu.dot_dimension_numbers<[1], [0], [0], [1], [0, 0, 1, 1], [], []>} : vector<8x16xf32>, vector<16x8xf32>, vector<8x8xf32> -> vector<8x8xf32>
    %c1_552 = arith.constant 1 : index
    %c0_553 = arith.constant 0 : index
    %c0_554 = arith.constant 0 : index
    %c0_555 = arith.constant 0 : index
    %927 = vector.load %arg29[%c1_552, %c0_553, %c0_554, %c0_555] : memref<2x4x8x32xf32, #tpu.memory_space<vmem>>, vector<1x1x8x32xf32>
    %928 = vector.shape_cast %927 : vector<1x1x8x32xf32> to vector<8x32xf32>
    %cst_556 = arith.constant dense<0.000000e+00> : vector<8x32xf32>
    %929 = tpu.matmul %926, %928, %cst_556 {dimension_numbers = #tpu.dot_dimension_numbers<[1], [0], [0], [1], [0, 0, 1, 1], [], []>} : vector<8x8xf32>, vector<8x32xf32>, vector<8x32xf32> -> vector<8x32xf32>
    %930 = vector.extract_strided_slice %902 {offsets = [0, 8], sizes = [8, 8], strides = [1, 1]} : vector<8x32xf32> to vector<8x8xf32>
    %931 = vector.extract_strided_slice %909 {offsets = [0, 8], sizes = [16, 8], strides = [1, 1]} : vector<16x64xf32> to vector<16x8xf32>
    %932 = vector.extract_strided_slice %909 {offsets = [0, 40], sizes = [16, 8], strides = [1, 1]} : vector<16x64xf32> to vector<16x8xf32>
    %cst_557 = arith.constant dense<0.000000e+00> : vector<8x16xf32>
    %933 = tpu.matmul %930, %931, %cst_557 {dimension_numbers = #tpu.dot_dimension_numbers<[1], [1], [0], [0], [0, 0, 1, 0], [], []>} : vector<8x8xf32>, vector<16x8xf32>, vector<8x16xf32> -> vector<8x16xf32>
    %cst_558 = arith.constant 0.353553385 : f32
    %934 = vector.broadcast %cst_558 : f32 to vector<8x16xf32>
    %935 = arith.mulf %933, %934 : vector<8x16xf32>
    %cst_559 = arith.constant dense<0xFF800000> : vector<8xf32>
    %936 = vector.multi_reduction <maximumf>, %935, %cst_559 [1] : vector<8x16xf32> to vector<8xf32>
    %937 = vector.shape_cast %936 : vector<8xf32> to vector<8x1xf32>
    %938 = vector.broadcast %937 : vector<8x1xf32> to vector<8x16xf32>
    %939 = arith.subf %935, %938 : vector<8x16xf32>
    %940 = math.exp %939 : vector<8x16xf32>
    %cst_560 = arith.constant dense<0.000000e+00> : vector<8xf32>
    %941 = vector.multi_reduction <add>, %940, %cst_560 [1] : vector<8x16xf32> to vector<8xf32>
    %942 = vector.shape_cast %941 : vector<8xf32> to vector<8x1xf32>
    %943 = tpu.reciprocal %942 {approx = true} : vector<8x1xf32> -> vector<8x1xf32>
    %944 = vector.broadcast %943 : vector<8x1xf32> to vector<8x16xf32>
    %945 = arith.mulf %940, %944 : vector<8x16xf32>
    %cst_561 = arith.constant dense<0.000000e+00> : vector<8x8xf32>
    %946 = tpu.matmul %945, %932, %cst_561 {dimension_numbers = #tpu.dot_dimension_numbers<[1], [0], [0], [1], [0, 0, 1, 1], [], []>} : vector<8x16xf32>, vector<16x8xf32>, vector<8x8xf32> -> vector<8x8xf32>
    %c1_562 = arith.constant 1 : index
    %c1_563 = arith.constant 1 : index
    %c0_564 = arith.constant 0 : index
    %c0_565 = arith.constant 0 : index
    %947 = vector.load %arg29[%c1_562, %c1_563, %c0_564, %c0_565] : memref<2x4x8x32xf32, #tpu.memory_space<vmem>>, vector<1x1x8x32xf32>
    %948 = vector.shape_cast %947 : vector<1x1x8x32xf32> to vector<8x32xf32>
    %cst_566 = arith.constant dense<0.000000e+00> : vector<8x32xf32>
    %949 = tpu.matmul %946, %948, %cst_566 {dimension_numbers = #tpu.dot_dimension_numbers<[1], [0], [0], [1], [0, 0, 1, 1], [], []>} : vector<8x8xf32>, vector<8x32xf32>, vector<8x32xf32> -> vector<8x32xf32>
    %950 = arith.addf %929, %949 : vector<8x32xf32>
    %951 = vector.extract_strided_slice %902 {offsets = [0, 16], sizes = [8, 8], strides = [1, 1]} : vector<8x32xf32> to vector<8x8xf32>
    %952 = vector.extract_strided_slice %909 {offsets = [0, 16], sizes = [16, 8], strides = [1, 1]} : vector<16x64xf32> to vector<16x8xf32>
    %953 = vector.extract_strided_slice %909 {offsets = [0, 48], sizes = [16, 8], strides = [1, 1]} : vector<16x64xf32> to vector<16x8xf32>
    %cst_567 = arith.constant dense<0.000000e+00> : vector<8x16xf32>
    %954 = tpu.matmul %951, %952, %cst_567 {dimension_numbers = #tpu.dot_dimension_numbers<[1], [1], [0], [0], [0, 0, 1, 0], [], []>} : vector<8x8xf32>, vector<16x8xf32>, vector<8x16xf32> -> vector<8x16xf32>
    %cst_568 = arith.constant 0.353553385 : f32
    %955 = vector.broadcast %cst_568 : f32 to vector<8x16xf32>
    %956 = arith.mulf %954, %955 : vector<8x16xf32>
    %cst_569 = arith.constant dense<0xFF800000> : vector<8xf32>
    %957 = vector.multi_reduction <maximumf>, %956, %cst_569 [1] : vector<8x16xf32> to vector<8xf32>
    %958 = vector.shape_cast %957 : vector<8xf32> to vector<8x1xf32>
    %959 = vector.broadcast %958 : vector<8x1xf32> to vector<8x16xf32>
    %960 = arith.subf %956, %959 : vector<8x16xf32>
    %961 = math.exp %960 : vector<8x16xf32>
    %cst_570 = arith.constant dense<0.000000e+00> : vector<8xf32>
    %962 = vector.multi_reduction <add>, %961, %cst_570 [1] : vector<8x16xf32> to vector<8xf32>
    %963 = vector.shape_cast %962 : vector<8xf32> to vector<8x1xf32>
    %964 = tpu.reciprocal %963 {approx = true} : vector<8x1xf32> -> vector<8x1xf32>
    %965 = vector.broadcast %964 : vector<8x1xf32> to vector<8x16xf32>
    %966 = arith.mulf %961, %965 : vector<8x16xf32>
    %cst_571 = arith.constant dense<0.000000e+00> : vector<8x8xf32>
    %967 = tpu.matmul %966, %953, %cst_571 {dimension_numbers = #tpu.dot_dimension_numbers<[1], [0], [0], [1], [0, 0, 1, 1], [], []>} : vector<8x16xf32>, vector<16x8xf32>, vector<8x8xf32> -> vector<8x8xf32>
    %c1_572 = arith.constant 1 : index
    %c2_573 = arith.constant 2 : index
    %c0_574 = arith.constant 0 : index
    %c0_575 = arith.constant 0 : index
    %968 = vector.load %arg29[%c1_572, %c2_573, %c0_574, %c0_575] : memref<2x4x8x32xf32, #tpu.memory_space<vmem>>, vector<1x1x8x32xf32>
    %969 = vector.shape_cast %968 : vector<1x1x8x32xf32> to vector<8x32xf32>
    %cst_576 = arith.constant dense<0.000000e+00> : vector<8x32xf32>
    %970 = tpu.matmul %967, %969, %cst_576 {dimension_numbers = #tpu.dot_dimension_numbers<[1], [0], [0], [1], [0, 0, 1, 1], [], []>} : vector<8x8xf32>, vector<8x32xf32>, vector<8x32xf32> -> vector<8x32xf32>
    %971 = arith.addf %950, %970 : vector<8x32xf32>
    %972 = vector.extract_strided_slice %902 {offsets = [0, 24], sizes = [8, 8], strides = [1, 1]} : vector<8x32xf32> to vector<8x8xf32>
    %973 = vector.extract_strided_slice %909 {offsets = [0, 24], sizes = [16, 8], strides = [1, 1]} : vector<16x64xf32> to vector<16x8xf32>
    %974 = vector.extract_strided_slice %909 {offsets = [0, 56], sizes = [16, 8], strides = [1, 1]} : vector<16x64xf32> to vector<16x8xf32>
    %cst_577 = arith.constant dense<0.000000e+00> : vector<8x16xf32>
    %975 = tpu.matmul %972, %973, %cst_577 {dimension_numbers = #tpu.dot_dimension_numbers<[1], [1], [0], [0], [0, 0, 1, 0], [], []>} : vector<8x8xf32>, vector<16x8xf32>, vector<8x16xf32> -> vector<8x16xf32>
    %cst_578 = arith.constant 0.353553385 : f32
    %976 = vector.broadcast %cst_578 : f32 to vector<8x16xf32>
    %977 = arith.mulf %975, %976 : vector<8x16xf32>
    %cst_579 = arith.constant dense<0xFF800000> : vector<8xf32>
    %978 = vector.multi_reduction <maximumf>, %977, %cst_579 [1] : vector<8x16xf32> to vector<8xf32>
    %979 = vector.shape_cast %978 : vector<8xf32> to vector<8x1xf32>
    %980 = vector.broadcast %979 : vector<8x1xf32> to vector<8x16xf32>
    %981 = arith.subf %977, %980 : vector<8x16xf32>
    %982 = math.exp %981 : vector<8x16xf32>
    %cst_580 = arith.constant dense<0.000000e+00> : vector<8xf32>
    %983 = vector.multi_reduction <add>, %982, %cst_580 [1] : vector<8x16xf32> to vector<8xf32>
    %984 = vector.shape_cast %983 : vector<8xf32> to vector<8x1xf32>
    %985 = tpu.reciprocal %984 {approx = true} : vector<8x1xf32> -> vector<8x1xf32>
    %986 = vector.broadcast %985 : vector<8x1xf32> to vector<8x16xf32>
    %987 = arith.mulf %982, %986 : vector<8x16xf32>
    %cst_581 = arith.constant dense<0.000000e+00> : vector<8x8xf32>
    %988 = tpu.matmul %987, %974, %cst_581 {dimension_numbers = #tpu.dot_dimension_numbers<[1], [0], [0], [1], [0, 0, 1, 1], [], []>} : vector<8x16xf32>, vector<16x8xf32>, vector<8x8xf32> -> vector<8x8xf32>
    %c1_582 = arith.constant 1 : index
    %c3_583 = arith.constant 3 : index
    %c0_584 = arith.constant 0 : index
    %c0_585 = arith.constant 0 : index
    %989 = vector.load %arg29[%c1_582, %c3_583, %c0_584, %c0_585] : memref<2x4x8x32xf32, #tpu.memory_space<vmem>>, vector<1x1x8x32xf32>
    %990 = vector.shape_cast %989 : vector<1x1x8x32xf32> to vector<8x32xf32>
    %cst_586 = arith.constant dense<0.000000e+00> : vector<8x32xf32>
    %991 = tpu.matmul %988, %990, %cst_586 {dimension_numbers = #tpu.dot_dimension_numbers<[1], [0], [0], [1], [0, 0, 1, 1], [], []>} : vector<8x8xf32>, vector<8x32xf32>, vector<8x32xf32> -> vector<8x32xf32>
    %992 = arith.addf %971, %991 : vector<8x32xf32>
    %c1_587 = arith.constant 1 : index
    %c0_588 = arith.constant 0 : index
    %c0_589 = arith.constant 0 : index
    %993 = vector.load %arg30[%c1_587, %c0_588, %c0_589] : memref<2x1x32xf32, #tpu.memory_space<vmem>>, vector<1x1x32xf32>
    %994 = vector.shape_cast %993 : vector<1x1x32xf32> to vector<1x32xf32>
    %995 = vector.broadcast %994 : vector<1x32xf32> to vector<8x32xf32>
    %996 = arith.addf %992, %995 : vector<8x32xf32>
    %997 = arith.addf %895, %996 : vector<8x32xf32>
    %c1_590 = arith.constant 1 : index
    %c0_591 = arith.constant 0 : index
    %c0_592 = arith.constant 0 : index
    %998 = vector.load %arg31[%c1_590, %c0_591, %c0_592] : memref<2x1x32xf32, #tpu.memory_space<vmem>>, vector<1x1x32xf32>
    %999 = vector.shape_cast %998 : vector<1x1x32xf32> to vector<1x32xf32>
    %c1_593 = arith.constant 1 : index
    %c0_594 = arith.constant 0 : index
    %c0_595 = arith.constant 0 : index
    %1000 = vector.load %arg32[%c1_593, %c0_594, %c0_595] : memref<2x1x32xf32, #tpu.memory_space<vmem>>, vector<1x1x32xf32>
    %1001 = vector.shape_cast %1000 : vector<1x1x32xf32> to vector<1x32xf32>
    %cst_596 = arith.constant dense<0.000000e+00> : vector<8xf32>
    %1002 = vector.multi_reduction <add>, %997, %cst_596 [1] : vector<8x32xf32> to vector<8xf32>
    %1003 = vector.shape_cast %1002 : vector<8xf32> to vector<8x1xf32>
    %cst_597 = arith.constant 3.200000e+01 : f32
    %1004 = vector.broadcast %cst_597 : f32 to vector<8x1xf32>
    %1005 = arith.divf %1003, %1004 : vector<8x1xf32>
    %1006 = vector.broadcast %1005 : vector<8x1xf32> to vector<8x32xf32>
    %1007 = arith.subf %997, %1006 : vector<8x32xf32>
    %1008 = arith.mulf %1007, %1007 : vector<8x32xf32>
    %cst_598 = arith.constant dense<0.000000e+00> : vector<8xf32>
    %1009 = vector.multi_reduction <add>, %1008, %cst_598 [1] : vector<8x32xf32> to vector<8xf32>
    %1010 = vector.shape_cast %1009 : vector<8xf32> to vector<8x1xf32>
    %cst_599 = arith.constant 3.200000e+01 : f32
    %1011 = vector.broadcast %cst_599 : f32 to vector<8x1xf32>
    %1012 = arith.divf %1010, %1011 : vector<8x1xf32>
    %cst_600 = arith.constant 9.99999974E-6 : f32
    %1013 = vector.broadcast %cst_600 : f32 to vector<8x1xf32>
    %1014 = arith.addf %1012, %1013 : vector<8x1xf32>
    %1015 = math.rsqrt %1014 : vector<8x1xf32>
    %1016 = vector.broadcast %1015 : vector<8x1xf32> to vector<8x32xf32>
    %1017 = arith.mulf %1007, %1016 : vector<8x32xf32>
    %1018 = vector.broadcast %999 : vector<1x32xf32> to vector<8x32xf32>
    %1019 = arith.mulf %1017, %1018 : vector<8x32xf32>
    %1020 = vector.broadcast %1001 : vector<1x32xf32> to vector<8x32xf32>
    %1021 = arith.addf %1019, %1020 : vector<8x32xf32>
    %c1_601 = arith.constant 1 : index
    %c0_602 = arith.constant 0 : index
    %c0_603 = arith.constant 0 : index
    %1022 = vector.load %arg33[%c1_601, %c0_602, %c0_603] : memref<2x32x2048xf32, #tpu.memory_space<vmem>>, vector<1x32x512xf32>
    %1023 = vector.shape_cast %1022 : vector<1x32x512xf32> to vector<32x512xf32>
    %cst_604 = arith.constant dense<0.000000e+00> : vector<8x512xf32>
    %1024 = tpu.matmul %1021, %1023, %cst_604 {dimension_numbers = #tpu.dot_dimension_numbers<[1], [0], [0], [1], [0, 0, 1, 1], [], []>} : vector<8x32xf32>, vector<32x512xf32>, vector<8x512xf32> -> vector<8x512xf32>
    %c1_605 = arith.constant 1 : index
    %c0_606 = arith.constant 0 : index
    %c0_607 = arith.constant 0 : index
    %1025 = vector.load %arg34[%c1_605, %c0_606, %c0_607] : memref<2x1x2048xf32, #tpu.memory_space<vmem>>, vector<1x1x512xf32>
    %1026 = vector.shape_cast %1025 : vector<1x1x512xf32> to vector<1x512xf32>
    %1027 = vector.broadcast %1026 : vector<1x512xf32> to vector<8x512xf32>
    %1028 = arith.addf %1024, %1027 : vector<8x512xf32>
    %cst_608 = arith.constant 0.000000e+00 : f32
    %1029 = vector.broadcast %cst_608 : f32 to vector<8x512xf32>
    %1030 = arith.maximumf %1028, %1029 : vector<8x512xf32>
    %c1_609 = arith.constant 1 : index
    %c0_610 = arith.constant 0 : index
    %c0_611 = arith.constant 0 : index
    %1031 = vector.load %arg35[%c1_609, %c0_610, %c0_611] : memref<2x32x2048xf32, #tpu.memory_space<vmem>>, vector<1x32x512xf32>
    %1032 = vector.shape_cast %1031 : vector<1x32x512xf32> to vector<32x512xf32>
    %cst_612 = arith.constant dense<0.000000e+00> : vector<8x32xf32>
    %1033 = tpu.matmul %1030, %1032, %cst_612 {dimension_numbers = #tpu.dot_dimension_numbers<[1], [1], [0], [0], [0, 0, 1, 0], [], []>} : vector<8x512xf32>, vector<32x512xf32>, vector<8x32xf32> -> vector<8x32xf32>
    %c1_613 = arith.constant 1 : index
    %c0_614 = arith.constant 0 : index
    %c512_615 = arith.constant 512 : index
    %1034 = vector.load %arg33[%c1_613, %c0_614, %c512_615] : memref<2x32x2048xf32, #tpu.memory_space<vmem>>, vector<1x32x512xf32>
    %1035 = vector.shape_cast %1034 : vector<1x32x512xf32> to vector<32x512xf32>
    %cst_616 = arith.constant dense<0.000000e+00> : vector<8x512xf32>
    %1036 = tpu.matmul %1021, %1035, %cst_616 {dimension_numbers = #tpu.dot_dimension_numbers<[1], [0], [0], [1], [0, 0, 1, 1], [], []>} : vector<8x32xf32>, vector<32x512xf32>, vector<8x512xf32> -> vector<8x512xf32>
    %c1_617 = arith.constant 1 : index
    %c0_618 = arith.constant 0 : index
    %c512_619 = arith.constant 512 : index
    %1037 = vector.load %arg34[%c1_617, %c0_618, %c512_619] : memref<2x1x2048xf32, #tpu.memory_space<vmem>>, vector<1x1x512xf32>
    %1038 = vector.shape_cast %1037 : vector<1x1x512xf32> to vector<1x512xf32>
    %1039 = vector.broadcast %1038 : vector<1x512xf32> to vector<8x512xf32>
    %1040 = arith.addf %1036, %1039 : vector<8x512xf32>
    %cst_620 = arith.constant 0.000000e+00 : f32
    %1041 = vector.broadcast %cst_620 : f32 to vector<8x512xf32>
    %1042 = arith.maximumf %1040, %1041 : vector<8x512xf32>
    %c1_621 = arith.constant 1 : index
    %c0_622 = arith.constant 0 : index
    %c512_623 = arith.constant 512 : index
    %1043 = vector.load %arg35[%c1_621, %c0_622, %c512_623] : memref<2x32x2048xf32, #tpu.memory_space<vmem>>, vector<1x32x512xf32>
    %1044 = vector.shape_cast %1043 : vector<1x32x512xf32> to vector<32x512xf32>
    %cst_624 = arith.constant dense<0.000000e+00> : vector<8x32xf32>
    %1045 = tpu.matmul %1042, %1044, %cst_624 {dimension_numbers = #tpu.dot_dimension_numbers<[1], [1], [0], [0], [0, 0, 1, 0], [], []>} : vector<8x512xf32>, vector<32x512xf32>, vector<8x32xf32> -> vector<8x32xf32>
    %1046 = arith.addf %1033, %1045 : vector<8x32xf32>
    %c1_625 = arith.constant 1 : index
    %c0_626 = arith.constant 0 : index
    %c1024_627 = arith.constant 1024 : index
    %1047 = vector.load %arg33[%c1_625, %c0_626, %c1024_627] : memref<2x32x2048xf32, #tpu.memory_space<vmem>>, vector<1x32x512xf32>
    %1048 = vector.shape_cast %1047 : vector<1x32x512xf32> to vector<32x512xf32>
    %cst_628 = arith.constant dense<0.000000e+00> : vector<8x512xf32>
    %1049 = tpu.matmul %1021, %1048, %cst_628 {dimension_numbers = #tpu.dot_dimension_numbers<[1], [0], [0], [1], [0, 0, 1, 1], [], []>} : vector<8x32xf32>, vector<32x512xf32>, vector<8x512xf32> -> vector<8x512xf32>
    %c1_629 = arith.constant 1 : index
    %c0_630 = arith.constant 0 : index
    %c1024_631 = arith.constant 1024 : index
    %1050 = vector.load %arg34[%c1_629, %c0_630, %c1024_631] : memref<2x1x2048xf32, #tpu.memory_space<vmem>>, vector<1x1x512xf32>
    %1051 = vector.shape_cast %1050 : vector<1x1x512xf32> to vector<1x512xf32>
    %1052 = vector.broadcast %1051 : vector<1x512xf32> to vector<8x512xf32>
    %1053 = arith.addf %1049, %1052 : vector<8x512xf32>
    %cst_632 = arith.constant 0.000000e+00 : f32
    %1054 = vector.broadcast %cst_632 : f32 to vector<8x512xf32>
    %1055 = arith.maximumf %1053, %1054 : vector<8x512xf32>
    %c1_633 = arith.constant 1 : index
    %c0_634 = arith.constant 0 : index
    %c1024_635 = arith.constant 1024 : index
    %1056 = vector.load %arg35[%c1_633, %c0_634, %c1024_635] : memref<2x32x2048xf32, #tpu.memory_space<vmem>>, vector<1x32x512xf32>
    %1057 = vector.shape_cast %1056 : vector<1x32x512xf32> to vector<32x512xf32>
    %cst_636 = arith.constant dense<0.000000e+00> : vector<8x32xf32>
    %1058 = tpu.matmul %1055, %1057, %cst_636 {dimension_numbers = #tpu.dot_dimension_numbers<[1], [1], [0], [0], [0, 0, 1, 0], [], []>} : vector<8x512xf32>, vector<32x512xf32>, vector<8x32xf32> -> vector<8x32xf32>
    %1059 = arith.addf %1046, %1058 : vector<8x32xf32>
    %c1_637 = arith.constant 1 : index
    %c0_638 = arith.constant 0 : index
    %c1536_639 = arith.constant 1536 : index
    %1060 = vector.load %arg33[%c1_637, %c0_638, %c1536_639] : memref<2x32x2048xf32, #tpu.memory_space<vmem>>, vector<1x32x512xf32>
    %1061 = vector.shape_cast %1060 : vector<1x32x512xf32> to vector<32x512xf32>
    %cst_640 = arith.constant dense<0.000000e+00> : vector<8x512xf32>
    %1062 = tpu.matmul %1021, %1061, %cst_640 {dimension_numbers = #tpu.dot_dimension_numbers<[1], [0], [0], [1], [0, 0, 1, 1], [], []>} : vector<8x32xf32>, vector<32x512xf32>, vector<8x512xf32> -> vector<8x512xf32>
    %c1_641 = arith.constant 1 : index
    %c0_642 = arith.constant 0 : index
    %c1536_643 = arith.constant 1536 : index
    %1063 = vector.load %arg34[%c1_641, %c0_642, %c1536_643] : memref<2x1x2048xf32, #tpu.memory_space<vmem>>, vector<1x1x512xf32>
    %1064 = vector.shape_cast %1063 : vector<1x1x512xf32> to vector<1x512xf32>
    %1065 = vector.broadcast %1064 : vector<1x512xf32> to vector<8x512xf32>
    %1066 = arith.addf %1062, %1065 : vector<8x512xf32>
    %cst_644 = arith.constant 0.000000e+00 : f32
    %1067 = vector.broadcast %cst_644 : f32 to vector<8x512xf32>
    %1068 = arith.maximumf %1066, %1067 : vector<8x512xf32>
    %c1_645 = arith.constant 1 : index
    %c0_646 = arith.constant 0 : index
    %c1536_647 = arith.constant 1536 : index
    %1069 = vector.load %arg35[%c1_645, %c0_646, %c1536_647] : memref<2x32x2048xf32, #tpu.memory_space<vmem>>, vector<1x32x512xf32>
    %1070 = vector.shape_cast %1069 : vector<1x32x512xf32> to vector<32x512xf32>
    %cst_648 = arith.constant dense<0.000000e+00> : vector<8x32xf32>
    %1071 = tpu.matmul %1068, %1070, %cst_648 {dimension_numbers = #tpu.dot_dimension_numbers<[1], [1], [0], [0], [0, 0, 1, 0], [], []>} : vector<8x512xf32>, vector<32x512xf32>, vector<8x32xf32> -> vector<8x32xf32>
    %1072 = arith.addf %1059, %1071 : vector<8x32xf32>
    %c1_649 = arith.constant 1 : index
    %c0_650 = arith.constant 0 : index
    %c0_651 = arith.constant 0 : index
    %1073 = vector.load %arg36[%c1_649, %c0_650, %c0_651] : memref<2x1x32xf32, #tpu.memory_space<vmem>>, vector<1x1x32xf32>
    %1074 = vector.shape_cast %1073 : vector<1x1x32xf32> to vector<1x32xf32>
    %1075 = vector.broadcast %1074 : vector<1x32xf32> to vector<8x32xf32>
    %1076 = arith.addf %1072, %1075 : vector<8x32xf32>
    %1077 = arith.addf %1021, %1076 : vector<8x32xf32>
    %c1_652 = arith.constant 1 : index
    %c0_653 = arith.constant 0 : index
    %c0_654 = arith.constant 0 : index
    %1078 = vector.load %arg37[%c1_652, %c0_653, %c0_654] : memref<2x1x32xf32, #tpu.memory_space<vmem>>, vector<1x1x32xf32>
    %1079 = vector.shape_cast %1078 : vector<1x1x32xf32> to vector<1x32xf32>
    %c1_655 = arith.constant 1 : index
    %c0_656 = arith.constant 0 : index
    %c0_657 = arith.constant 0 : index
    %1080 = vector.load %arg38[%c1_655, %c0_656, %c0_657] : memref<2x1x32xf32, #tpu.memory_space<vmem>>, vector<1x1x32xf32>
    %1081 = vector.shape_cast %1080 : vector<1x1x32xf32> to vector<1x32xf32>
    %cst_658 = arith.constant dense<0.000000e+00> : vector<8xf32>
    %1082 = vector.multi_reduction <add>, %1077, %cst_658 [1] : vector<8x32xf32> to vector<8xf32>
    %1083 = vector.shape_cast %1082 : vector<8xf32> to vector<8x1xf32>
    %cst_659 = arith.constant 3.200000e+01 : f32
    %1084 = vector.broadcast %cst_659 : f32 to vector<8x1xf32>
    %1085 = arith.divf %1083, %1084 : vector<8x1xf32>
    %1086 = vector.broadcast %1085 : vector<8x1xf32> to vector<8x32xf32>
    %1087 = arith.subf %1077, %1086 : vector<8x32xf32>
    %1088 = arith.mulf %1087, %1087 : vector<8x32xf32>
    %cst_660 = arith.constant dense<0.000000e+00> : vector<8xf32>
    %1089 = vector.multi_reduction <add>, %1088, %cst_660 [1] : vector<8x32xf32> to vector<8xf32>
    %1090 = vector.shape_cast %1089 : vector<8xf32> to vector<8x1xf32>
    %cst_661 = arith.constant 3.200000e+01 : f32
    %1091 = vector.broadcast %cst_661 : f32 to vector<8x1xf32>
    %1092 = arith.divf %1090, %1091 : vector<8x1xf32>
    %cst_662 = arith.constant 9.99999974E-6 : f32
    %1093 = vector.broadcast %cst_662 : f32 to vector<8x1xf32>
    %1094 = arith.addf %1092, %1093 : vector<8x1xf32>
    %1095 = math.rsqrt %1094 : vector<8x1xf32>
    %1096 = vector.broadcast %1095 : vector<8x1xf32> to vector<8x32xf32>
    %1097 = arith.mulf %1087, %1096 : vector<8x32xf32>
    %1098 = vector.broadcast %1079 : vector<1x32xf32> to vector<8x32xf32>
    %1099 = arith.mulf %1097, %1098 : vector<8x32xf32>
    %1100 = vector.broadcast %1081 : vector<1x32xf32> to vector<8x32xf32>
    %1101 = arith.addf %1099, %1100 : vector<8x32xf32>
    %c0_663 = arith.constant 0 : index
    %c0_664 = arith.constant 0 : index
    %1102 = vector.load %arg41[%c0_663, %c0_664] : memref<1x32xf32, #tpu.memory_space<vmem>>, vector<1x32xf32>
    %c0_665 = arith.constant 0 : index
    %c0_666 = arith.constant 0 : index
    %1103 = vector.load %arg42[%c0_665, %c0_666] : memref<1x32xf32, #tpu.memory_space<vmem>>, vector<1x32xf32>
    %cst_667 = arith.constant dense<0.000000e+00> : vector<8xf32>
    %1104 = vector.multi_reduction <add>, %1101, %cst_667 [1] : vector<8x32xf32> to vector<8xf32>
    %1105 = vector.shape_cast %1104 : vector<8xf32> to vector<8x1xf32>
    %cst_668 = arith.constant 3.200000e+01 : f32
    %1106 = vector.broadcast %cst_668 : f32 to vector<8x1xf32>
    %1107 = arith.divf %1105, %1106 : vector<8x1xf32>
    %1108 = vector.broadcast %1107 : vector<8x1xf32> to vector<8x32xf32>
    %1109 = arith.subf %1101, %1108 : vector<8x32xf32>
    %1110 = arith.mulf %1109, %1109 : vector<8x32xf32>
    %cst_669 = arith.constant dense<0.000000e+00> : vector<8xf32>
    %1111 = vector.multi_reduction <add>, %1110, %cst_669 [1] : vector<8x32xf32> to vector<8xf32>
    %1112 = vector.shape_cast %1111 : vector<8xf32> to vector<8x1xf32>
    %cst_670 = arith.constant 3.200000e+01 : f32
    %1113 = vector.broadcast %cst_670 : f32 to vector<8x1xf32>
    %1114 = arith.divf %1112, %1113 : vector<8x1xf32>
    %cst_671 = arith.constant 9.99999974E-6 : f32
    %1115 = vector.broadcast %cst_671 : f32 to vector<8x1xf32>
    %1116 = arith.addf %1114, %1115 : vector<8x1xf32>
    %1117 = math.rsqrt %1116 : vector<8x1xf32>
    %1118 = vector.broadcast %1117 : vector<8x1xf32> to vector<8x32xf32>
    %1119 = arith.mulf %1109, %1118 : vector<8x32xf32>
    %1120 = vector.broadcast %1102 : vector<1x32xf32> to vector<8x32xf32>
    %1121 = arith.mulf %1119, %1120 : vector<8x32xf32>
    %1122 = vector.broadcast %1103 : vector<1x32xf32> to vector<8x32xf32>
    %1123 = arith.addf %1121, %1122 : vector<8x32xf32>
    %c0_672 = arith.constant 0 : index
    %c0_673 = arith.constant 0 : index
    %1124 = vector.load %arg43[%c0_672, %c0_673] : memref<32x128xf32, #tpu.memory_space<vmem>>, vector<32x128xf32>
    %cst_674 = arith.constant dense<0.000000e+00> : vector<8x128xf32>
    %1125 = tpu.matmul %1123, %1124, %cst_674 {dimension_numbers = #tpu.dot_dimension_numbers<[1], [0], [0], [1], [0, 0, 1, 1], [], []>} : vector<8x32xf32>, vector<32x128xf32>, vector<8x128xf32> -> vector<8x128xf32>
    %c0_675 = arith.constant 0 : index
    %c0_676 = arith.constant 0 : index
    %1126 = vector.load %arg44[%c0_675, %c0_676] : memref<1x128xf32, #tpu.memory_space<vmem>>, vector<1x128xf32>
    %1127 = vector.broadcast %1126 : vector<1x128xf32> to vector<8x128xf32>
    %1128 = arith.addf %1125, %1127 : vector<8x128xf32>
    %c0_677 = arith.constant 0 : index
    %c0_678 = arith.constant 0 : index
    %c0_679 = arith.constant 0 : index
    %1129 = vector.load %arg45[%c0_677, %c0_678, %c0_679] : memref<1x8x128xf32, #tpu.memory_space<vmem>>, vector<1x8x128xf32>
    %1130 = vector.shape_cast %1129 : vector<1x8x128xf32> to vector<8x128xf32>
    %1131 = vector.shape_cast %1128 : vector<8x128xf32> to vector<1x8x128xf32>
    tpu.vector_store %arg45[%c0_677, %c0_678, %c0_679], %1131 {strides = array<i32>} : memref<1x8x128xf32, #tpu.memory_space<vmem>>, vector<1x8x128xf32>,
    return
  }
  func.func @transform_0(%arg0: i32) -> (i32, i32, i32) {
    %c0_i32 = arith.constant 0 : i32
    %c0_i32_0 = arith.constant 0 : i32
    %c0_i32_1 = arith.constant 0 : i32
    return %arg0, %c0_i32, %c0_i32_0 : i32, i32, i32
  }
  func.func @transform_1(%arg0: i32) -> (i32, i32, i32) {
    %c0_i32 = arith.constant 0 : i32
    %c0_i32_0 = arith.constant 0 : i32
    %c0_i32_1 = arith.constant 0 : i32
    return %arg0, %c0_i32, %c0_i32_0 : i32, i32, i32
  }
  func.func @transform_2(%arg0: i32) -> (i32, i32, i32) {
    %c0_i32 = arith.constant 0 : i32
    %c0_i32_0 = arith.constant 0 : i32
    %c0_i32_1 = arith.constant 0 : i32
    %c0_i32_2 = arith.constant 0 : i32
    return %c0_i32, %c0_i32_0, %c0_i32_1 : i32, i32, i32
  }
  func.func @transform_3(%arg0: i32) -> (i32, i32, i32) {
    %c0_i32 = arith.constant 0 : i32
    %c0_i32_0 = arith.constant 0 : i32
    %c0_i32_1 = arith.constant 0 : i32
    %c0_i32_2 = arith.constant 0 : i32
    return %c0_i32, %c0_i32_0, %c0_i32_1 : i32, i32, i32
  }
  func.func @transform_4(%arg0: i32) -> (i32, i32, i32) {
    %c0_i32 = arith.constant 0 : i32
    %c0_i32_0 = arith.constant 0 : i32
    %c0_i32_1 = arith.constant 0 : i32
    %c0_i32_2 = arith.constant 0 : i32
    return %c0_i32, %c0_i32_0, %c0_i32_1 : i32, i32, i32
  }
  func.func @transform_5(%arg0: i32) -> (i32, i32, i32) {
    %c0_i32 = arith.constant 0 : i32
    %c0_i32_0 = arith.constant 0 : i32
    %c0_i32_1 = arith.constant 0 : i32
    %c0_i32_2 = arith.constant 0 : i32
    return %c0_i32, %c0_i32_0, %c0_i32_1 : i32, i32, i32
  }
  func.func @transform_6(%arg0: i32) -> (i32, i32, i32, i32) {
    %c0_i32 = arith.constant 0 : i32
    %c0_i32_0 = arith.constant 0 : i32
    %c0_i32_1 = arith.constant 0 : i32
    %c0_i32_2 = arith.constant 0 : i32
    %c0_i32_3 = arith.constant 0 : i32
    return %c0_i32, %c0_i32_0, %c0_i32_1, %c0_i32_2 : i32, i32, i32, i32
  }
  func.func @transform_7(%arg0: i32) -> (i32, i32, i32) {
    %c0_i32 = arith.constant 0 : i32
    %c0_i32_0 = arith.constant 0 : i32
    %c0_i32_1 = arith.constant 0 : i32
    %c0_i32_2 = arith.constant 0 : i32
    return %c0_i32, %c0_i32_0, %c0_i32_1 : i32, i32, i32
  }
  func.func @transform_8(%arg0: i32) -> (i32, i32, i32) {
    %c0_i32 = arith.constant 0 : i32
    %c0_i32_0 = arith.constant 0 : i32
    %c0_i32_1 = arith.constant 0 : i32
    %c0_i32_2 = arith.constant 0 : i32
    return %c0_i32, %c0_i32_0, %c0_i32_1 : i32, i32, i32
  }
  func.func @transform_9(%arg0: i32) -> (i32, i32, i32) {
    %c0_i32 = arith.constant 0 : i32
    %c0_i32_0 = arith.constant 0 : i32
    %c0_i32_1 = arith.constant 0 : i32
    %c0_i32_2 = arith.constant 0 : i32
    return %c0_i32, %c0_i32_0, %c0_i32_1 : i32, i32, i32
  }
  func.func @transform_10(%arg0: i32) -> (i32, i32, i32) {
    %c0_i32 = arith.constant 0 : i32
    %c0_i32_0 = arith.constant 0 : i32
    %c0_i32_1 = arith.constant 0 : i32
    %c0_i32_2 = arith.constant 0 : i32
    return %c0_i32, %c0_i32_0, %c0_i32_1 : i32, i32, i32
  }
  func.func @transform_11(%arg0: i32) -> (i32, i32, i32) {
    %c0_i32 = arith.constant 0 : i32
    %c0_i32_0 = arith.constant 0 : i32
    %c0_i32_1 = arith.constant 0 : i32
    %c0_i32_2 = arith.constant 0 : i32
    return %c0_i32, %c0_i32_0, %c0_i32_1 : i32, i32, i32
  }
  func.func @transform_12(%arg0: i32) -> (i32, i32, i32) {
    %c0_i32 = arith.constant 0 : i32
    %c0_i32_0 = arith.constant 0 : i32
    %c0_i32_1 = arith.constant 0 : i32
    %c0_i32_2 = arith.constant 0 : i32
    return %c0_i32, %c0_i32_0, %c0_i32_1 : i32, i32, i32
  }
  func.func @transform_13(%arg0: i32) -> (i32, i32, i32) {
    %c0_i32 = arith.constant 0 : i32
    %c0_i32_0 = arith.constant 0 : i32
    %c0_i32_1 = arith.constant 0 : i32
    %c0_i32_2 = arith.constant 0 : i32
    return %c0_i32, %c0_i32_0, %c0_i32_1 : i32, i32, i32
  }
  func.func @transform_14(%arg0: i32) -> (i32, i32, i32) {
    %c0_i32 = arith.constant 0 : i32
    %c0_i32_0 = arith.constant 0 : i32
    %c0_i32_1 = arith.constant 0 : i32
    %c0_i32_2 = arith.constant 0 : i32
    return %c0_i32, %c0_i32_0, %c0_i32_1 : i32, i32, i32
  }
  func.func @transform_15(%arg0: i32) -> (i32, i32, i32) {
    %c0_i32 = arith.constant 0 : i32
    %c0_i32_0 = arith.constant 0 : i32
    %c0_i32_1 = arith.constant 0 : i32
    %c0_i32_2 = arith.constant 0 : i32
    return %c0_i32, %c0_i32_0, %c0_i32_1 : i32, i32, i32
  }
  func.func @transform_16(%arg0: i32) -> (i32, i32, i32) {
    %c0_i32 = arith.constant 0 : i32
    %c0_i32_0 = arith.constant 0 : i32
    %c0_i32_1 = arith.constant 0 : i32
    %c0_i32_2 = arith.constant 0 : i32
    return %c0_i32, %c0_i32_0, %c0_i32_1 : i32, i32, i32
  }
  func.func @transform_17(%arg0: i32) -> (i32, i32, i32) {
    %c0_i32 = arith.constant 0 : i32
    %c0_i32_0 = arith.constant 0 : i32
    %c0_i32_1 = arith.constant 0 : i32
    %c0_i32_2 = arith.constant 0 : i32
    return %c0_i32, %c0_i32_0, %c0_i32_1 : i32, i32, i32
  }
  func.func @transform_18(%arg0: i32) -> (i32, i32, i32) {
    %c0_i32 = arith.constant 0 : i32
    %c0_i32_0 = arith.constant 0 : i32
    %c0_i32_1 = arith.constant 0 : i32
    %c0_i32_2 = arith.constant 0 : i32
    return %c0_i32, %c0_i32_0, %c0_i32_1 : i32, i32, i32
  }
  func.func @transform_19(%arg0: i32) -> (i32, i32, i32) {
    %c0_i32 = arith.constant 0 : i32
    %c0_i32_0 = arith.constant 0 : i32
    %c0_i32_1 = arith.constant 0 : i32
    %c0_i32_2 = arith.constant 0 : i32
    return %c0_i32, %c0_i32_0, %c0_i32_1 : i32, i32, i32
  }
  func.func @transform_20(%arg0: i32) -> (i32, i32, i32, i32) {
    %c0_i32 = arith.constant 0 : i32
    %c0_i32_0 = arith.constant 0 : i32
    %c0_i32_1 = arith.constant 0 : i32
    %c0_i32_2 = arith.constant 0 : i32
    %c0_i32_3 = arith.constant 0 : i32
    return %c0_i32, %c0_i32_0, %c0_i32_1, %c0_i32_2 : i32, i32, i32, i32
  }
  func.func @transform_21(%arg0: i32) -> (i32, i32, i32) {
    %c0_i32 = arith.constant 0 : i32
    %c0_i32_0 = arith.constant 0 : i32
    %c0_i32_1 = arith.constant 0 : i32
    %c0_i32_2 = arith.constant 0 : i32
    return %c0_i32, %c0_i32_0, %c0_i32_1 : i32, i32, i32
  }
  func.func @transform_22(%arg0: i32) -> (i32, i32, i32) {
    %c0_i32 = arith.constant 0 : i32
    %c0_i32_0 = arith.constant 0 : i32
    %c0_i32_1 = arith.constant 0 : i32
    %c0_i32_2 = arith.constant 0 : i32
    return %c0_i32, %c0_i32_0, %c0_i32_1 : i32, i32, i32
  }
  func.func @transform_23(%arg0: i32) -> (i32, i32, i32) {
    %c0_i32 = arith.constant 0 : i32
    %c0_i32_0 = arith.constant 0 : i32
    %c0_i32_1 = arith.constant 0 : i32
    %c0_i32_2 = arith.constant 0 : i32
    return %c0_i32, %c0_i32_0, %c0_i32_1 : i32, i32, i32
  }
  func.func @transform_24(%arg0: i32) -> (i32, i32, i32) {
    %c0_i32 = arith.constant 0 : i32
    %c0_i32_0 = arith.constant 0 : i32
    %c0_i32_1 = arith.constant 0 : i32
    %c0_i32_2 = arith.constant 0 : i32
    return %c0_i32, %c0_i32_0, %c0_i32_1 : i32, i32, i32
  }
  func.func @transform_25(%arg0: i32) -> (i32, i32, i32) {
    %c0_i32 = arith.constant 0 : i32
    %c0_i32_0 = arith.constant 0 : i32
    %c0_i32_1 = arith.constant 0 : i32
    %c0_i32_2 = arith.constant 0 : i32
    return %c0_i32, %c0_i32_0, %c0_i32_1 : i32, i32, i32
  }
  func.func @transform_26(%arg0: i32) -> (i32, i32, i32) {
    %c0_i32 = arith.constant 0 : i32
    %c0_i32_0 = arith.constant 0 : i32
    %c0_i32_1 = arith.constant 0 : i32
    %c0_i32_2 = arith.constant 0 : i32
    return %c0_i32, %c0_i32_0, %c0_i32_1 : i32, i32, i32
  }
  func.func @transform_27(%arg0: i32) -> (i32, i32, i32) {
    %c0_i32 = arith.constant 0 : i32
    %c0_i32_0 = arith.constant 0 : i32
    %c0_i32_1 = arith.constant 0 : i32
    %c0_i32_2 = arith.constant 0 : i32
    return %c0_i32, %c0_i32_0, %c0_i32_1 : i32, i32, i32
  }
  func.func @transform_28(%arg0: i32) -> (i32, i32, i32, i32) {
    %c0_i32 = arith.constant 0 : i32
    %c0_i32_0 = arith.constant 0 : i32
    %c0_i32_1 = arith.constant 0 : i32
    %c0_i32_2 = arith.constant 0 : i32
    %c0_i32_3 = arith.constant 0 : i32
    return %c0_i32, %c0_i32_0, %c0_i32_1, %c0_i32_2 : i32, i32, i32, i32
  }
  func.func @transform_29(%arg0: i32) -> (i32, i32, i32) {
    %c0_i32 = arith.constant 0 : i32
    %c0_i32_0 = arith.constant 0 : i32
    %c0_i32_1 = arith.constant 0 : i32
    %c0_i32_2 = arith.constant 0 : i32
    return %c0_i32, %c0_i32_0, %c0_i32_1 : i32, i32, i32
  }
  func.func @transform_30(%arg0: i32) -> (i32, i32, i32) {
    %c0_i32 = arith.constant 0 : i32
    %c0_i32_0 = arith.constant 0 : i32
    %c0_i32_1 = arith.constant 0 : i32
    %c0_i32_2 = arith.constant 0 : i32
    return %c0_i32, %c0_i32_0, %c0_i32_1 : i32, i32, i32
  }
  func.func @transform_31(%arg0: i32) -> (i32, i32, i32) {
    %c0_i32 = arith.constant 0 : i32
    %c0_i32_0 = arith.constant 0 : i32
    %c0_i32_1 = arith.constant 0 : i32
    %c0_i32_2 = arith.constant 0 : i32
    return %c0_i32, %c0_i32_0, %c0_i32_1 : i32, i32, i32
  }
  func.func @transform_32(%arg0: i32) -> (i32, i32, i32) {
    %c0_i32 = arith.constant 0 : i32
    %c0_i32_0 = arith.constant 0 : i32
    %c0_i32_1 = arith.constant 0 : i32
    %c0_i32_2 = arith.constant 0 : i32
    return %c0_i32, %c0_i32_0, %c0_i32_1 : i32, i32, i32
  }
  func.func @transform_33(%arg0: i32) -> (i32, i32, i32) {
    %c0_i32 = arith.constant 0 : i32
    %c0_i32_0 = arith.constant 0 : i32
    %c0_i32_1 = arith.constant 0 : i32
    %c0_i32_2 = arith.constant 0 : i32
    return %c0_i32, %c0_i32_0, %c0_i32_1 : i32, i32, i32
  }
  func.func @transform_34(%arg0: i32) -> (i32, i32, i32) {
    %c0_i32 = arith.constant 0 : i32
    %c0_i32_0 = arith.constant 0 : i32
    %c0_i32_1 = arith.constant 0 : i32
    %c0_i32_2 = arith.constant 0 : i32
    return %c0_i32, %c0_i32_0, %c0_i32_1 : i32, i32, i32
  }
  func.func @transform_35(%arg0: i32) -> (i32, i32, i32) {
    %c0_i32 = arith.constant 0 : i32
    %c0_i32_0 = arith.constant 0 : i32
    %c0_i32_1 = arith.constant 0 : i32
    %c0_i32_2 = arith.constant 0 : i32
    return %c0_i32, %c0_i32_0, %c0_i32_1 : i32, i32, i32
  }
  func.func @transform_36(%arg0: i32) -> (i32, i32, i32) {
    %c0_i32 = arith.constant 0 : i32
    %c0_i32_0 = arith.constant 0 : i32
    %c0_i32_1 = arith.constant 0 : i32
    %c0_i32_2 = arith.constant 0 : i32
    return %c0_i32, %c0_i32_0, %c0_i32_1 : i32, i32, i32
  }
  func.func @transform_37(%arg0: i32) -> (i32, i32, i32) {
    %c0_i32 = arith.constant 0 : i32
    %c0_i32_0 = arith.constant 0 : i32
    %c0_i32_1 = arith.constant 0 : i32
    %c0_i32_2 = arith.constant 0 : i32
    return %c0_i32, %c0_i32_0, %c0_i32_1 : i32, i32, i32
  }
  func.func @transform_38(%arg0: i32) -> (i32, i32) {
    %c0_i32 = arith.constant 0 : i32
    %c0_i32_0 = arith.constant 0 : i32
    %c0_i32_1 = arith.constant 0 : i32
    return %c0_i32, %c0_i32_0 : i32, i32
  }
  func.func @transform_39(%arg0: i32) -> (i32, i32) {
    %c0_i32 = arith.constant 0 : i32
    %c0_i32_0 = arith.constant 0 : i32
    %c0_i32_1 = arith.constant 0 : i32
    return %c0_i32, %c0_i32_0 : i32, i32
  }
  func.func @transform_40(%arg0: i32) -> (i32, i32) {
    %c0_i32 = arith.constant 0 : i32
    %c0_i32_0 = arith.constant 0 : i32
    %c0_i32_1 = arith.constant 0 : i32
    return %c0_i32, %c0_i32_0 : i32, i32
  }
  func.func @transform_41(%arg0: i32) -> (i32, i32) {
    %c0_i32 = arith.constant 0 : i32
    %c0_i32_0 = arith.constant 0 : i32
    %c0_i32_1 = arith.constant 0 : i32
    return %c0_i32, %c0_i32_0 : i32, i32
  }
  func.func @transform_42(%arg0: i32) -> (i32, i32) {
    %c0_i32 = arith.constant 0 : i32
    %c0_i32_0 = arith.constant 0 : i32
    %c0_i32_1 = arith.constant 0 : i32
    return %c0_i32, %c0_i32_0 : i32, i32
  }
  func.func @transform_43(%arg0: i32) -> (i32, i32) {
    %c0_i32 = arith.constant 0 : i32
    %c0_i32_0 = arith.constant 0 : i32
    %c0_i32_1 = arith.constant 0 : i32
    return %c0_i32, %c0_i32_0 : i32, i32
  }
  func.func @transform_44(%arg0: i32) -> (i32, i32, i32) {
    %c0_i32 = arith.constant 0 : i32
    %c0_i32_0 = arith.constant 0 : i32
    %c0_i32_1 = arith.constant 0 : i32
    return %arg0, %c0_i32, %c0_i32_0 : i32, i32, i32
  }
}

</mosaic_0001>

<bundles_post_ra>
// kernel: transformer_forward.1
= control target key start
LH: loop header
LB: loop body
LE: loop exit
PB: predicated region body
PF: predicated region fallthrough
CT: control target
= control target key end

     0   :  { %s19369_s6 = smov 1   ;;  %s19370_s10 = smov 2   ;;  %s21329_s0 = inlined_call_operand.smem [shape: u32[45], index: -1, kind: input, shape index: {}] }
   0x1   :  { %s19472_s5 = sld [smem:[%s21329_s0]]   ;;  %s19371_s14 = smov 3  }
   0x2   :  { %s19477_s9 = sld [smem:[%s21329_s0 + %s19369_s6]]   ;;  %s19372_s18 = smov 4  }
   0x3   :  { %s19482_s13 = sld [smem:[%s21329_s0 + %s19370_s10]]   ;;  %s19373_s22 = smov 5  }
   0x4   :  { %s19487_s17 = sld [smem:[%s21329_s0 + %s19371_s14]]   ;;  %s19374_s26 = smov 6  }
   0x5   :  { %s19492_s21 = sld [smem:[%s21329_s0 + %s19372_s18]]   ;;  %s19375_s30 = smov 7  }
   0x6   :  { %s19497_s25 = sld [smem:[%s21329_s0 + %s19373_s22]]   ;;  %s19376_s4 = smov 8  }
   0x7   :  { %21394 = sst [smem:[#allocation73_spill]] %s19472_s5  ;;  %s19377_s10 = smov 9  }
   0x8   :  { %21395 = sst [smem:[#allocation74_spill]] %s19477_s9  ;;  %s19378_s15 = smov 10  }
   0x9   :  { %21396 = sst [smem:[#allocation75_spill]] %s19482_s13  ;;  %s19379_s20 = smov 11  }
   0xa   :  { %21397 = sst [smem:[#allocation76_spill]] %s19487_s17  ;;  %s19381_s1 = smov 13  }
   0xb   :  { %21398 = sst [smem:[#allocation77_spill]] %s19492_s21  ;;  %s19382_s7 = smov 14  }
   0xc   :  { %s19502_s29 = sld [smem:[%s21329_s0 + %s19374_s26]]   ;;  %s19380_s26 = smov 12  }
   0xd   :  { %s19507_s3 = sld [smem:[%s21329_s0 + %s19375_s30]]   ;;  %s19384_s22 = smov 16  }
   0xe   :  { %s19512_s8 = sld [smem:[%s21329_s0 + %s19376_s4]]   ;;  %s19385_s28 = smov 17  }
   0xf   :  { %s19517_s14 = sld [smem:[%s21329_s0 + %s19377_s10]]  }
  0x10   :  { %s19522_s19 = sld [smem:[%s21329_s0 + %s19378_s15]]   ;;  %s19383_s15 = smov 15  }
  0x11   :  { %s19527_s24 = sld [smem:[%s21329_s0 + %s19379_s20]]  }
  0x12   :  { %21399 = sst [smem:[#allocation78_spill]] %s19502_s29 }
  0x13   :  { %21400 = sst [smem:[#allocation79_spill]] %s19507_s3 }
  0x14   :  { %21401 = sst [smem:[#allocation80_spill]] %s19512_s8 }
  0x15   :  { %21402 = sst [smem:[#allocation81_spill]] %s19517_s14 }
  0x16   :  { %s19532_s30 = sld [smem:[%s21329_s0 + %s19380_s26]]  }
  0x17   :  { %21403 = sst [smem:[#allocation82_spill]] %s19527_s24 }
  0x18   :  { %s19537_s6 = sld [smem:[%s21329_s0 + %s19381_s1]]  }
  0x19   :  { %s19542_s12 = sld [smem:[%s21329_s0 + %s19382_s7]]   ;;  %s19386_s7 = smov 18  }
  0x1a   :  { %s19547_s20 = sld [smem:[%s21329_s0 + %s19383_s15]]   ;;  %s19387_s15 = smov 19  }
  0x1b   :  { %s19552_s27 = sld [smem:[%s21329_s0 + %s19384_s22]]   ;;  %s19388_s22 = smov 20  }
  0x1c   :  { %s19557_s4 = sld [smem:[%s21329_s0 + %s19385_s28]]   ;;  %s19389_s28 = smov 21  }
  0x1d   :  { %s19562_s9 = sld [smem:[%s21329_s0 + %s19386_s7]]   ;;  %s19390_s7 = smov 22  }
  0x1e   :  { %21404 = sst [smem:[#allocation83_spill]] %s19537_s6 }
  0x1f   :  { %21405 = sst [smem:[#allocation84_spill]] %s19542_s12 }
  0x20   :  { %21406 = sst [smem:[#allocation85_spill]] %s19547_s20 }
  0x21   :  { %s19567_s29 = sld [smem:[%s21329_s0 + %s19387_s15]]   ;;  %s19391_s15 = smov 23  }
  0x22   :  { %21407 = sst [smem:[#allocation86_spill]] %s19557_s4 }
  0x23   :  { %21408 = sst [smem:[#allocation87_spill]] %s19562_s9 }
  0x24   :  { %s19572_s13 = sld [smem:[%s21329_s0 + %s19388_s22]]   ;;  %s19392_s22 = smov 24  }
  0x25   :  { %s19577_s17 = sld [smem:[%s21329_s0 + %s19389_s28]]   ;;  %s19393_s28 = smov 25  }
  0x26   :  { %s19582_s5 = sld [smem:[%s21329_s0 + %s19390_s7]]   ;;  %s19394_s7 = smov 26  }
  0x27   :  { %21409 = sst [smem:[#allocation88_spill]] %s19567_s29 }
  0x28   :  { %s19587_s29 = sld [smem:[%s21329_s0 + %s19391_s15]]   ;;  %s19395_s15 = smov 27  }
  0x29   :  { %s19592_s4 = sld [smem:[%s21329_s0 + %s19392_s22]]   ;;  %s19396_s22 = smov 28  }
  0x2a   :  { %s19602_s20 = sld [smem:[%s21329_s0 + %s19394_s7]]   ;;  %s19398_s7 = smov 30  }
  0x2b   :  { %21410 = sst [smem:[#allocation89_spill]] %s19577_s17 }
  0x2c   :  { %21411 = sst [smem:[#allocation90_spill]] %s19582_s5 }
  0x2d   :  { %s19597_s17 = sld [smem:[%s21329_s0 + %s19393_s28]]   ;;  %s19397_s28 = smov 29  }
  0x2e   :  { %21412 = sst [smem:[#allocation91_spill]] %s19587_s29 }
  0x2f   :  { %21413 = sst [smem:[#allocation92_spill]] %s19592_s4 }
  0x30   :  { %s19607_s29 = sld [smem:[%s21329_s0 + %s19395_s15]]   ;;  %s19399_s15 = smov 31  }
  0x31   :  { %s19612_s6 = sld [smem:[%s21329_s0 + %s19396_s22]]   ;;  %s19400_s22 = smov 32  }
  0x32   :  { %s19622_s24 = sld [smem:[%s21329_s0 + %s19398_s7]]   ;;  %s19402_s7 = smov 34  }
  0x33   :  { %21414 = sst [smem:[#allocation93_spill]] %s19597_s17 }
  0x34   :  { %s19617_s17 = sld [smem:[%s21329_s0 + %s19397_s28]]   ;;  %s19401_s28 = smov 33  }
  0x35   :  { %s19632_s14 = sld [smem:[%s21329_s0 + %s19400_s22]]   ;;  %s19404_s22 = smov 36  }
  0x36   :  { %21415 = sst [smem:[#allocation94_spill]] %s19607_s29 }
  0x37   :  { %21416 = sst [smem:[#allocation95_spill]] %s19612_s6 }
  0x38   :  { %s19627_s29 = sld [smem:[%s21329_s0 + %s19399_s15]]   ;;  %s19403_s15 = smov 35  }
  0x39   :  { %s19642_s3 = sld [smem:[%s21329_s0 + %s19402_s7]]   ;;  %s19406_s7 = smov 38  }
  0x3a   :  { %21417 = sst [smem:[#allocation96_spill]] %s19617_s17 }
  0x3b   :  { %s19637_s17 = sld [smem:[%s21329_s0 + %s19401_s28]]   ;;  %s19405_s28 = smov 37  }
  0x3c   :  { %s19652_s21 = sld [smem:[%s21329_s0 + %s19404_s22]]   ;;  %s19408_s22 = smov 40  }
  0x3e   :  { %21418 = sst [smem:[#allocation97_spill]] %s19627_s29 }
  0x3f   :  { %21420 = sst [smem:[#allocation99_spill]] %s19642_s3 }
  0x40   :  { %s19647_s29 = sld [smem:[%s21329_s0 + %s19403_s15]]   ;;  %s19407_s15 = smov 39  }
  0x41   :  { %21419 = sst [smem:[#allocation98_spill]] %s19637_s17 }
  0x42   :  { %21422 = sst [smem:[#allocation101_spill]] %s19652_s21 }
  0x43   :  { %s19657_s17 = sld [smem:[%s21329_s0 + %s19405_s28]]   ;;  %s19409_s28 = smov 41  }
  0x44   :  { %s19662_s3 = sld [smem:[%s21329_s0 + %s19406_s7]]   ;;  %s19410_s7 = smov 42  }
  0x45   :  { %s19672_s21 = sld [smem:[%s21329_s0 + %s19408_s22]]   ;;  %s19412_s22 = smov 44  }
  0x46   :  { %21421 = sst [smem:[#allocation100_spill]] %s19647_s29 }
  0x47   :  { %s19667_s29 = sld [smem:[%s21329_s0 + %s19407_s15]]   ;;  %s19411_s15 = smov 43  }
  0x49   :  { %21423 = sst [smem:[#allocation102_spill]] %s19657_s17 }
  0x4a   :  { %21424 = sst [smem:[#allocation103_spill]] %s19662_s3 }
  0x4b   :  { %21426 = sst [smem:[#allocation105_spill]] %s19672_s21 }
  0x4c   :  { %s19677_s17 = sld [smem:[%s21329_s0 + %s19409_s28]]  }
  0x4d   :  { %21425 = sst [smem:[#allocation104_spill]] %s19667_s29 }
  0x4e   :  { %s19682_s3 = sld [smem:[%s21329_s0 + %s19410_s7]]  }
  0x4f   :  { %s19687_s29 = sld [smem:[%s21329_s0 + %s19411_s15]]  }
  0x50   :  { %s19692_s21 = sld [smem:[%s21329_s0 + %s19412_s22]]  }
  0x51   :  { %94 = vsyncpa [#allocation3], 0 }
  0x52   :  { %95 = vsyncpa [#allocation5], 0 }
  0x53   :  { %96 = vsyncpa [#allocation8], 0 }
  0x54   :  { %97 = vsyncpa [#allocation11], 0 }
  0x55   :  { %98 = vsyncpa [#allocation14], 0 }
  0x56   :  { %99 = vsyncpa [#allocation17], 0 }
  0x57   :  { %100 = vsyncpa [#allocation20], 0 }
  0x58   :  { %101 = vsyncpa [#allocation23], 0 }
  0x59   :  { %102 = vsyncpa [#allocation26], 0 }
  0x5a   :  { %103 = vsyncpa [#allocation29], 0 }
  0x5b   :  { %104 = vsyncpa [#allocation32], 0 }
  0x5c   :  { %105 = vsyncpa [#allocation35], 0 }
  0x5d   :  { %106 = vsyncpa [#allocation38], 0 }
  0x5e   :  { %107 = vsyncpa [#allocation41], 0 }
  0x5f   :  { %108 = vsyncpa [#allocation44], 0 }
  0x60   :  { %109 = vsyncpa [#allocation47], 0 }
  0x61   :  { %110 = vsyncpa [#allocation50], 0 }
  0x62   :  { %111 = vsyncpa [#allocation53], 0  ;;  %s19694_s0 = smov 0  }
  0x63 LB: > { %s21427_s12 = sld [smem:[#allocation84_spill]]  ;;  %s21428_s9 = sld [smem:[#allocation87_spill]]  ;;  %s19367_s0 = sphi %s19694_s0, %s117_s0  }
  0x64   : > { %s21429_s8 = sld [smem:[#allocation80_spill]]  ;;  %s21430_s6 = sld [smem:[#allocation95_spill]] }
  0x65   : > { %s21431_s5 = sld [smem:[#allocation90_spill]]  ;;  %s21432_s4 = sld [smem:[#allocation92_spill]] }
  0x66   : > { %s19700_s28 = sadd.s32 4294967295, %s19367_s0   ;;  %p15831_p0 = scmp.ge.s32.totalorder %s19367_s0, 1 }
  0x67   : > { %p1082_p1 = scmp.lt.s32.totalorder %s19367_s0, 3 }
  0x69   : > { %p19704_p2 = pnand %p15831_p0, %p1082_p1 }
  0x6a   : > { %p17904_p3 = scmp.eq.s32.totalorder (!%p19704_p2), %s19700_s28, 0  ;;  %s19413_s2 = smov (!%p19704_p2), [#allocation4]  }
  0x6b   : > { %1086 = sbr.rel (%p19704_p2) target bundleno = 957 (0x3bd), region = 12  ;;  %s1113_s7 = sshll.u32 (!%p19704_p2), %s19413_s2, 4  ;;  %s1114_s7 = int_to_ptr.vmem [resolvable:$true] %s1113_s7 }
  0x6c   : > { %s19414_s10 = smov (!%p19704_p2), [#allocation7]   ;;  %s18379_s15 = scalar_lea.hbm (!%p19704_p2), %s19497_s25, 32 }
  0x6d   : > { %s1142_s11 = sshll.u32 (!%p19704_p2), %s19414_s10, 4  ;;  %p18380_p4 = scmp.ne.s32.totalorder (!%p19704_p2), %s19497_s25, %s18379_s15  ;;  %s1143_s11 = int_to_ptr.vmem [resolvable:$true] %s1142_s11 }
  0x6e   : > { %p18385_p7 = scmp.lt.u32.totalorder (!%p19704_p2), %s18379_s15, %s19497_s25 }
  0x6f   : > { %p18381_p5 = pnand (!%p19704_p2), %p18380_p4, %p17904_p3 }
  0x71   : > { %p18382_p6 = pneg (!%p19704_p2), %p18381_p5 }
  0x73   : > { %p18387_p8 = pnand %p18385_p7, %p18382_p6 }
  0x75   : > { %18390 = shalt.err (!%p18387_p8)
}
  0x76   : > { %s18391_s16 = scalar_lea.vmem %s1114_s7, 32  ;;  %p18398_p12 = scmp.lt.s32.totalorder %s1114_s7, %s1114_s7 }
  0x77   : > { %p18392_p9 = scmp.ne.s32.totalorder %s1114_s7, %s18391_s16  ;;  %p18399_p13 = scmp.lt.s32.totalorder %s18391_s16, %s18391_s16 }
  0x79   : > { %p18393_p10 = pnand %p18392_p9, %p17904_p3  ;;  %p18400_p0 = por %p18399_p13, %p18398_p12 }
  0x7b   : > { %p18394_p11 = pneg %p18393_p10 }
  0x7d   : > { %p18401_p1 = pnand %p18400_p0, %p18394_p11 }
  0x7f   : > { %18404 = shalt.err (!%p18401_p1)
}
  0x80   : > { %s21353_s18 = smov 16   ;;  %s21362_s22 = smov 1  }
  0x81   : > { %17767 = dma.hbm_to_vmem [thread:$0]  (%p17904_p3), %s19497_s25, 32, %s1114_s7, [#allocation5], %s21353_s18, %s21353_s18, %s21362_s22  }
  0x82   : > { %s18405_s23 = scalar_lea.hbm %s21429_s8, 32 }
  0x83   : > { %p18406_p4 = scmp.ne.s32.totalorder %s21429_s8, %s18405_s23  ;;  %p18411_p7 = scmp.lt.u32.totalorder %s18405_s23, %s21429_s8 }
  0x85   : > { %p18407_p5 = pnand %p18406_p4, %p17904_p3 }
  0x87   : > { %p18408_p6 = pneg %p18407_p5 }
  0x89   : > { %p18413_p8 = pnand %p18411_p7, %p18408_p6 }
  0x8b   : > { %18416 = shalt.err (!%p18413_p8)
}
  0x8c   : > { %s18417_s26 = scalar_lea.vmem %s1143_s11, 32  ;;  %p18424_p12 = scmp.lt.s32.totalorder %s1143_s11, %s1143_s11 }
  0x8d   : > { %p18418_p9 = scmp.ne.s32.totalorder %s1143_s11, %s18417_s26  ;;  %p18425_p13 = scmp.lt.s32.totalorder %s18417_s26, %s18417_s26 }
  0x8f   : > { %p18419_p10 = pnand %p18418_p9, %p17904_p3  ;;  %p18426_p0 = por %p18425_p13, %p18424_p12 }
  0x91   : > { %p18420_p11 = pneg %p18419_p10 }
  0x93   : > { %p18427_p1 = pnand %p18426_p0, %p18420_p11 }
  0x95   : > { %18430 = shalt.err (!%p18427_p1)
}
  0x96   : > { %17771 = dma.hbm_to_vmem [thread:$0]  (%p17904_p3), %s21429_s8, 32, %s1143_s11, [#allocation8], %s21353_s18, %s21353_s18, %s21362_s22  }
  0x97   : > { %s19417_s2 = smov [#allocation10]   ;;  %s18431_s10 = scalar_lea.hbm %s19522_s19, 16384 }
  0x98   : > { %s1168_s7 = sshll.u32 %s19417_s2, 4  ;;  %p18432_p4 = scmp.ne.s32.totalorder %s19522_s19, %s18431_s10  ;;  %s1169_s7 = int_to_ptr.vmem [resolvable:$true] %s1168_s7 }
  0x99   : > { %p18437_p7 = scmp.lt.u32.totalorder %s18431_s10, %s19522_s19 }
  0x9a   : > { %p18433_p5 = pnand %p18432_p4, %p17904_p3 }
  0x9c   : > { %p18434_p6 = pneg %p18433_p5 }
  0x9e   : > { %p18439_p8 = pnand %p18437_p7, %p18434_p6 }
  0xa0   : > { %18442 = shalt.err (!%p18439_p8)
}
  0xa1   : > { %s18443_s15 = scalar_lea.vmem %s1169_s7, 16384  ;;  %p18450_p12 = scmp.lt.s32.totalorder %s1169_s7, %s1169_s7 }
  0xa2   : > { %p18444_p9 = scmp.ne.s32.totalorder %s1169_s7, %s18443_s15  ;;  %p18451_p13 = scmp.lt.s32.totalorder %s18443_s15, %s18443_s15 }
  0xa4   : > { %p18445_p10 = pnand %p18444_p9, %p17904_p3  ;;  %p18452_p0 = por %p18451_p13, %p18450_p12 }
  0xa6   : > { %p18446_p11 = pneg %p18445_p10 }
  0xa8   : > { %p18453_p1 = pnand %p18452_p0, %p18446_p11 }
  0xaa   : > { %18456 = shalt.err (!%p18453_p1)
}
  0xab   : > { %s21355_s11 = smov 2048   ;;  %s21357_s16 = smov 128  }
  0xac   : > { %17775 = dma.hbm_to_vmem [thread:$0]  (%p17904_p3), %s19522_s19, 16384, %s1169_s7, [#allocation11], %s21355_s11, %s21355_s11, %s21357_s16  }
  0xad   : > { %s19420_s23 = smov [#allocation13]   ;;  %s19421_s2 = smov [#allocation16]  }
  0xae   : > { %s1194_s26 = sshll.u32 %s19420_s23, 4  ;;  %s1220_s10 = sshll.u32 %s19421_s2, 4  ;;  %s1195_s26 = int_to_ptr.vmem [resolvable:$true] %s1194_s26  ;;  %s19750_s10 = int_to_ptr.vmem [resolvable:$true] %s1220_s10 }
  0xaf   : > { %s18457_s15 = scalar_lea.hbm %s19532_s30, 16384 }
  0xb0   : > { %p18458_p4 = scmp.ne.s32.totalorder %s19532_s30, %s18457_s15  ;;  %p18463_p7 = scmp.lt.u32.totalorder %s18457_s15, %s19532_s30 }
  0xb2   : > { %p18459_p5 = pnand %p18458_p4, %p17904_p3 }
  0xb4   : > { %p18460_p6 = pneg %p18459_p5 }
  0xb6   : > { %p18465_p8 = pnand %p18463_p7, %p18460_p6 }
  0xb8   : > { %18468 = shalt.err (!%p18465_p8)
}
  0xb9   : > { %s18469_s18 = scalar_lea.vmem %s1195_s26, 16384  ;;  %p18476_p12 = scmp.lt.s32.totalorder %s1195_s26, %s1195_s26 }
  0xba   : > { %p18470_p9 = scmp.ne.s32.totalorder %s1195_s26, %s18469_s18  ;;  %p18477_p13 = scmp.lt.s32.totalorder %s18469_s18, %s18469_s18 }
  0xbc   : > { %p18471_p10 = pnand %p18470_p9, %p17904_p3  ;;  %p18478_p0 = por %p18477_p13, %p18476_p12 }
  0xbe   : > { %p18472_p11 = pneg %p18471_p10 }
  0xc0   : > { %p18479_p1 = pnand %p18478_p0, %p18472_p11 }
  0xc2   : > { %18482 = shalt.err (!%p18479_p1)
}
  0xc3   : > { %17779 = dma.hbm_to_vmem [thread:$0]  (%p17904_p3), %s19532_s30, 16384, %s1195_s26, [#allocation14], %s21355_s11, %s21355_s11, %s21357_s16  }
  0xc4   : > { %s18483_s7 = scalar_lea.hbm %s21427_s12, 32 }
  0xc5   : > { %p18484_p4 = scmp.ne.s32.totalorder %s21427_s12, %s18483_s7  ;;  %p18489_p7 = scmp.lt.u32.totalorder %s18483_s7, %s21427_s12 }
  0xc7   : > { %p18485_p5 = pnand %p18484_p4, %p17904_p3 }
  0xc9   : > { %p18486_p6 = pneg %p18485_p5 }
  0xcb   : > { %p18491_p8 = pnand %p18489_p7, %p18486_p6 }
  0xcd   : > { %18494 = shalt.err (!%p18491_p8)
}
  0xce   : > { %s18495_s18 = scalar_lea.vmem %s19750_s10, 32  ;;  %p18502_p12 = scmp.lt.s32.totalorder %s19750_s10, %s19750_s10 }
  0xcf   : > { %p18496_p9 = scmp.ne.s32.totalorder %s19750_s10, %s18495_s18  ;;  %p18503_p13 = scmp.lt.s32.totalorder %s18495_s18, %s18495_s18 }
  0xd1   : > { %p18497_p10 = pnand %p18496_p9, %p17904_p3  ;;  %p18504_p0 = por %p18503_p13, %p18502_p12 }
  0xd3   : > { %p18498_p11 = pneg %p18497_p10 }
  0xd5   : > { %p18505_p1 = pnand %p18504_p0, %p18498_p11 }
  0xd7   : > { %18508 = shalt.err (!%p18505_p1)
}
  0xd8   : > { %s21434_s23 = smov 16   ;;  %s19422_s26 = smov [#allocation19]  }
  0xd9   : > { %17783 = dma.hbm_to_vmem [thread:$0]  (%p17904_p3), %s21427_s12, 32, %s19750_s10, [#allocation17], %s21434_s23, %s21434_s23, %s21362_s22  }
  0xda   : > { %s1246_s2 = sshll.u32 %s19422_s26, 4  ;;  %s19423_s15 = smov [#allocation22]   ;;  %s1247_s2 = int_to_ptr.vmem [resolvable:$true] %s1246_s2 }
  0xdb   : > { %s1272_s7 = sshll.u32 %s19423_s15, 4  ;;  %s18509_s18 = scalar_lea.hbm %s19552_s27, 1024  ;;  %s1273_s7 = int_to_ptr.vmem [resolvable:$true] %s1272_s7 }
  0xdc   : > { %p18510_p4 = scmp.ne.s32.totalorder %s19552_s27, %s18509_s18  ;;  %p18515_p7 = scmp.lt.u32.totalorder %s18509_s18, %s19552_s27 }
  0xde   : > { %p18511_p5 = pnand %p18510_p4, %p17904_p3 }
  0xe0   : > { %p18512_p6 = pneg %p18511_p5 }
  0xe2   : > { %p18517_p8 = pnand %p18515_p7, %p18512_p6 }
  0xe4   : > { %18520 = shalt.err (!%p18517_p8)
}
  0xe5   : > { %s18521_s11 = scalar_lea.vmem %s1247_s2, 1024  ;;  %p18528_p12 = scmp.lt.s32.totalorder %s1247_s2, %s1247_s2 }
  0xe6   : > { %p18522_p9 = scmp.ne.s32.totalorder %s1247_s2, %s18521_s11  ;;  %p18529_p13 = scmp.lt.s32.totalorder %s18521_s11, %s18521_s11 }
  0xe8   : > { %p18523_p10 = pnand %p18522_p9, %p17904_p3  ;;  %p18530_p0 = por %p18529_p13, %p18528_p12 }
  0xea   : > { %p18524_p11 = pneg %p18523_p10 }
  0xec   : > { %p18531_p1 = pnand %p18530_p0, %p18524_p11 }
  0xee   : > { %18534 = shalt.err (!%p18531_p1)
}
  0xef   : > { %s21359_s10 = smov 8   ;;  %s18535_s26 = scalar_lea.hbm %s21428_s9, 32 }
  0xf0   : > { %17787 = dma.hbm_to_vmem [thread:$0]  (%p17904_p3), %s19552_s27, 1024, %s1247_s2, [#allocation20], %s21357_s16, %s21357_s16, %s21359_s10  }
  0xf1   : > { %p18536_p4 = scmp.ne.s32.totalorder %s21428_s9, %s18535_s26  ;;  %p18541_p7 = scmp.lt.u32.totalorder %s18535_s26, %s21428_s9 }
  0xf3   : > { %p18537_p5 = pnand %p18536_p4, %p17904_p3 }
  0xf5   : > { %p18538_p6 = pneg %p18537_p5 }
  0xf7   : > { %p18543_p8 = pnand %p18541_p7, %p18538_p6 }
  0xf9   : > { %18546 = shalt.err (!%p18543_p8)
}
  0xfa   : > { %s18547_s11 = scalar_lea.vmem %s1273_s7, 32  ;;  %p18554_p12 = scmp.lt.s32.totalorder %s1273_s7, %s1273_s7 }
  0xfb   : > { %p18548_p9 = scmp.ne.s32.totalorder %s1273_s7, %s18547_s11  ;;  %p18555_p13 = scmp.lt.s32.totalorder %s18547_s11, %s18547_s11 }
  0xfd   : > { %p18549_p10 = pnand %p18548_p9, %p17904_p3  ;;  %p18556_p0 = por %p18555_p13, %p18554_p12 }
  0xff   : > { %p18550_p11 = pneg %p18549_p10 }
 0x101   : > { %p18557_p1 = pnand %p18556_p0, %p18550_p11 }
 0x103   : > { %18560 = shalt.err (!%p18557_p1)
}
 0x104   : > { %17791 = dma.hbm_to_vmem [thread:$0]  (%p17904_p3), %s21428_s9, 32, %s1273_s7, [#allocation23], %s21434_s23, %s21434_s23, %s21362_s22  }
 0x105   : > { %s19425_s2 = smov [#allocation25]   ;;  %s19426_s18 = smov [#allocation28]  }
 0x106   : > { %s1298_s15 = sshll.u32 %s19425_s2, 4  ;;  %s1324_s26 = sshll.u32 %s19426_s18, 4  ;;  %s1299_s15 = int_to_ptr.vmem [resolvable:$true] %s1298_s15  ;;  %s1325_s26 = int_to_ptr.vmem [resolvable:$true] %s1324_s26 }
 0x107   : > { %s18561_s11 = scalar_lea.hbm %s19572_s13, 1024 }
 0x108   : > { %p18562_p4 = scmp.ne.s32.totalorder %s19572_s13, %s18561_s11  ;;  %p18567_p7 = scmp.lt.u32.totalorder %s18561_s11, %s19572_s13 }
 0x10a   : > { %p18563_p5 = pnand %p18562_p4, %p17904_p3 }
 0x10c   : > { %p18564_p6 = pneg %p18563_p5 }
 0x10e   : > { %p18569_p8 = pnand %p18567_p7, %p18564_p6 }
 0x110   : > { %18572 = shalt.err (!%p18569_p8)
}
 0x111   : > { %s18573_s16 = scalar_lea.vmem %s1299_s15, 1024  ;;  %p18580_p12 = scmp.lt.s32.totalorder %s1299_s15, %s1299_s15 }
 0x112   : > { %p18574_p9 = scmp.ne.s32.totalorder %s1299_s15, %s18573_s16  ;;  %p18581_p13 = scmp.lt.s32.totalorder %s18573_s16, %s18573_s16 }
 0x114   : > { %p18575_p10 = pnand %p18574_p9, %p17904_p3  ;;  %p18582_p0 = por %p18581_p13, %p18580_p12 }
 0x116   : > { %p18576_p11 = pneg %p18575_p10 }
 0x118   : > { %p18583_p1 = pnand %p18582_p0, %p18576_p11 }
 0x11a   : > { %18586 = shalt.err (!%p18583_p1)
}
 0x11b   : > { %s21435_s7 = smov 128   ;;  %s18587_s2 = scalar_lea.hbm %s21431_s5, 32 }
 0x11c   : > { %17795 = dma.hbm_to_vmem [thread:$0]  (%p17904_p3), %s19572_s13, 1024, %s1299_s15, [#allocation26], %s21435_s7, %s21435_s7, %s21359_s10  }
 0x11d   : > { %p18588_p4 = scmp.ne.s32.totalorder %s21431_s5, %s18587_s2  ;;  %p18593_p7 = scmp.lt.u32.totalorder %s18587_s2, %s21431_s5 }
 0x11f   : > { %p18589_p5 = pnand %p18588_p4, %p17904_p3 }
 0x121   : > { %p18590_p6 = pneg %p18589_p5 }
 0x123   : > { %p18595_p8 = pnand %p18593_p7, %p18590_p6 }
 0x125   : > { %18598 = shalt.err (!%p18595_p8)
}
 0x126   : > { %s18599_s16 = scalar_lea.vmem %s1325_s26, 32  ;;  %p18606_p12 = scmp.lt.s32.totalorder %s1325_s26, %s1325_s26 }
 0x127   : > { %p18600_p9 = scmp.ne.s32.totalorder %s1325_s26, %s18599_s16  ;;  %p18607_p13 = scmp.lt.s32.totalorder %s18599_s16, %s18599_s16 }
 0x129   : > { %p18601_p10 = pnand %p18600_p9, %p17904_p3  ;;  %p18608_p0 = por %p18607_p13, %p18606_p12 }
 0x12b   : > { %p18602_p11 = pneg %p18601_p10 }
 0x12d   : > { %p18609_p1 = pnand %p18608_p0, %p18602_p11 }
 0x12f   : > { %18612 = shalt.err (!%p18609_p1)
}
 0x130   : > { %17799 = dma.hbm_to_vmem [thread:$0]  (%p17904_p3), %s21431_s5, 32, %s1325_s26, [#allocation29], %s21434_s23, %s21434_s23, %s21362_s22  }
 0x131   : > { %s19427_s15 = smov [#allocation31]   ;;  %s19428_s11 = smov [#allocation34]  }
 0x132   : > { %s1350_s18 = sshll.u32 %s19427_s15, 4  ;;  %s1376_s2 = sshll.u32 %s19428_s11, 4  ;;  %s1351_s18 = int_to_ptr.vmem [resolvable:$true] %s1350_s18  ;;  %s1377_s2 = int_to_ptr.vmem [resolvable:$true] %s1376_s2 }
 0x133   : > { %s18613_s16 = scalar_lea.hbm %s21432_s4, 1024 }
 0x134   : > { %p18614_p4 = scmp.ne.s32.totalorder %s21432_s4, %s18613_s16  ;;  %p18619_p7 = scmp.lt.u32.totalorder %s18613_s16, %s21432_s4 }
 0x136   : > { %p18615_p5 = pnand %p18614_p4, %p17904_p3 }
 0x138   : > { %p18616_p6 = pneg %p18615_p5 }
 0x13a   : > { %p18621_p8 = pnand %p18619_p7, %p18616_p6 }
 0x13c   : > { %18624 = shalt.err (!%p18621_p8)
}
 0x13d   : > { %s18625_s10 = scalar_lea.vmem %s1351_s18, 1024  ;;  %p18632_p12 = scmp.lt.s32.totalorder %s1351_s18, %s1351_s18 }
 0x13e   : > { %p18626_p9 = scmp.ne.s32.totalorder %s1351_s18, %s18625_s10  ;;  %p18633_p13 = scmp.lt.s32.totalorder %s18625_s10, %s18625_s10 }
 0x140   : > { %p18627_p10 = pnand %p18626_p9, %p17904_p3  ;;  %p18634_p0 = por %p18633_p13, %p18632_p12 }
 0x142   : > { %p18628_p11 = pneg %p18627_p10 }
 0x144   : > { %p18635_p1 = pnand %p18634_p0, %p18628_p11 }
 0x146   : > { %18638 = shalt.err (!%p18635_p1)
}
 0x147   : > { %s21436_s26 = smov 8   ;;  %s18639_s15 = scalar_lea.hbm %s19602_s20, 32 }
 0x148   : > { %17803 = dma.hbm_to_vmem [thread:$0]  (%p17904_p3), %s21432_s4, 1024, %s1351_s18, [#allocation32], %s21435_s7, %s21435_s7, %s21436_s26  }
 0x149   : > { %p18640_p4 = scmp.ne.s32.totalorder %s19602_s20, %s18639_s15  ;;  %p18645_p7 = scmp.lt.u32.totalorder %s18639_s15, %s19602_s20 }
 0x14b   : > { %p18641_p5 = pnand %p18640_p4, %p17904_p3 }
 0x14d   : > { %p18642_p6 = pneg %p18641_p5 }
 0x14f   : > { %p18647_p8 = pnand %p18645_p7, %p18642_p6 }
 0x151   : > { %18650 = shalt.err (!%p18647_p8)
}
 0x152   : > { %s18651_s10 = scalar_lea.vmem %s1377_s2, 32  ;;  %p18658_p12 = scmp.lt.s32.totalorder %s1377_s2, %s1377_s2 }
 0x153   : > { %p18652_p9 = scmp.ne.s32.totalorder %s1377_s2, %s18651_s10  ;;  %p18659_p13 = scmp.lt.s32.totalorder %s18651_s10, %s18651_s10 }
 0x155   : > { %p18653_p10 = pnand %p18652_p9, %p17904_p3  ;;  %p18660_p0 = por %p18659_p13, %p18658_p12 }
 0x157   : > { %p18654_p11 = pneg %p18653_p10 }
 0x159   : > { %p18661_p1 = pnand %p18660_p0, %p18654_p11 }
 0x15b   : > { %18664 = shalt.err (!%p18661_p1)
}
 0x15c   : > { %17807 = dma.hbm_to_vmem [thread:$0]  (%p17904_p3), %s19602_s20, 32, %s1377_s2, [#allocation35], %s21434_s23, %s21434_s23, %s21362_s22  }
 0x15d   : > { %s19429_s18 = smov [#allocation37]   ;;  %s19430_s16 = smov [#allocation40]  }
 0x15e   : > { %s1402_s11 = sshll.u32 %s19429_s18, 4  ;;  %s1428_s15 = sshll.u32 %s19430_s16, 4  ;;  %s1403_s11 = int_to_ptr.vmem [resolvable:$true] %s1402_s11  ;;  %s1429_s15 = int_to_ptr.vmem [resolvable:$true] %s1428_s15 }
 0x15f   : > { %s18665_s10 = scalar_lea.hbm %s21430_s6, 1024 }
 0x160   : > { %p18666_p4 = scmp.ne.s32.totalorder %s21430_s6, %s18665_s10  ;;  %p18671_p7 = scmp.lt.u32.totalorder %s18665_s10, %s21430_s6 }
 0x162   : > { %p18667_p5 = pnand %p18666_p4, %p17904_p3 }
 0x164   : > { %p18668_p6 = pneg %p18667_p5 }
 0x166   : > { %p18673_p8 = pnand %p18671_p7, %p18668_p6 }
 0x168   : > { %18676 = shalt.err (!%p18673_p8)
}
 0x169   : > { %s18677_s4 = scalar_lea.vmem %s1403_s11, 1024  ;;  %p18684_p12 = scmp.lt.s32.totalorder %s1403_s11, %s1403_s11 }
 0x16a   : > { %p18678_p9 = scmp.ne.s32.totalorder %s1403_s11, %s18677_s4  ;;  %p18685_p13 = scmp.lt.s32.totalorder %s18677_s4, %s18677_s4 }
 0x16c   : > { %p18679_p10 = pnand %p18678_p9, %p17904_p3  ;;  %p18686_p0 = por %p18685_p13, %p18684_p12 }
 0x16e   : > { %p18680_p11 = pneg %p18679_p10 }
 0x170   : > { %p18687_p1 = pnand %p18686_p0, %p18680_p11 }
 0x172   : > { %18690 = shalt.err (!%p18687_p1)
}
 0x173   : > { %17811 = dma.hbm_to_vmem [thread:$0]  (%p17904_p3), %s21430_s6, 1024, %s1403_s11, [#allocation38], %s21435_s7, %s21435_s7, %s21436_s26  }
 0x174   : > { %s18691_s2 = scalar_lea.hbm %s19622_s24, 32 }
 0x175   : > { %p18692_p4 = scmp.ne.s32.totalorder %s19622_s24, %s18691_s2  ;;  %p18697_p7 = scmp.lt.u32.totalorder %s18691_s2, %s19622_s24 }
 0x177   : > { %p18693_p5 = pnand %p18692_p4, %p17904_p3 }
 0x179   : > { %p18694_p6 = pneg %p18693_p5 }
 0x17b   : > { %p18699_p8 = pnand %p18697_p7, %p18694_p6 }
 0x17d   : > { %18702 = shalt.err (!%p18699_p8)
}
 0x17e   : > { %s18703_s4 = scalar_lea.vmem %s1429_s15, 32  ;;  %p18710_p12 = scmp.lt.s32.totalorder %s1429_s15, %s1429_s15 }
 0x17f   : > { %p18704_p9 = scmp.ne.s32.totalorder %s1429_s15, %s18703_s4  ;;  %p18711_p13 = scmp.lt.s32.totalorder %s18703_s4, %s18703_s4 }
 0x181   : > { %p18705_p10 = pnand %p18704_p9, %p17904_p3  ;;  %p18712_p0 = por %p18711_p13, %p18710_p12 }
 0x183   : > { %p18706_p11 = pneg %p18705_p10 }
 0x185   : > { %p18713_p1 = pnand %p18712_p0, %p18706_p11 }
 0x187   : > { %18716 = shalt.err (!%p18713_p1)
}
 0x188   : > { %17815 = dma.hbm_to_vmem [thread:$0]  (%p17904_p3), %s19622_s24, 32, %s1429_s15, [#allocation41], %s21434_s23, %s21434_s23, %s21362_s22  }
 0x189   : > { %s19431_s18 = smov [#allocation43]   ;;  %s19432_s16 = smov [#allocation46]  }
 0x18a   : > { %s1454_s11 = sshll.u32 %s19431_s18, 4  ;;  %s1480_s10 = sshll.u32 %s19432_s16, 4  ;;  %s1455_s11 = int_to_ptr.vmem [resolvable:$true] %s1454_s11  ;;  %s1481_s10 = int_to_ptr.vmem [resolvable:$true] %s1480_s10 }
 0x18b   : > { %s18717_s2 = scalar_lea.hbm %s19632_s14, 16384 }
 0x18c   : > { %p18718_p4 = scmp.ne.s32.totalorder %s19632_s14, %s18717_s2  ;;  %p18723_p7 = scmp.lt.u32.totalorder %s18717_s2, %s19632_s14 }
 0x18e   : > { %p18719_p5 = pnand %p18718_p4, %p17904_p3 }
 0x190   : > { %p18720_p6 = pneg %p18719_p5 }
 0x192   : > { %p18725_p8 = pnand %p18723_p7, %p18720_p6 }
 0x194   : > { %18728 = shalt.err (!%p18725_p8)
}
 0x195   : > { %s18729_s4 = scalar_lea.vmem %s1455_s11, 16384  ;;  %p18736_p12 = scmp.lt.s32.totalorder %s1455_s11, %s1455_s11 }
 0x196   : > { %p18730_p9 = scmp.ne.s32.totalorder %s1455_s11, %s18729_s4  ;;  %p18737_p13 = scmp.lt.s32.totalorder %s18729_s4, %s18729_s4 }
 0x198   : > { %p18731_p10 = pnand %p18730_p9, %p17904_p3  ;;  %p18738_p0 = por %p18737_p13, %p18736_p12 }
 0x19a   : > { %p18732_p11 = pneg %p18731_p10 }
 0x19c   : > { %p18739_p1 = pnand %p18738_p0, %p18732_p11 }
 0x19e   : > { %18742 = shalt.err (!%p18739_p1)
}
 0x19f   : > { %s21437_s15 = smov 2048   ;;  %s21438_s18 = sld [smem:[#allocation99_spill]] }
 0x1a0   : > { %17819 = dma.hbm_to_vmem [thread:$0]  (%p17904_p3), %s19632_s14, 16384, %s1455_s11, [#allocation44], %s21437_s15, %s21437_s15, %s21435_s7  }
 0x1a5   : > { %s18743_s16 = scalar_lea.hbm %s21438_s18, 16384 }
 0x1a6   : > { %p18744_p4 = scmp.ne.s32.totalorder %s21438_s18, %s18743_s16  ;;  %p18749_p7 = scmp.lt.u32.totalorder %s18743_s16, %s21438_s18 }
 0x1a8   : > { %p18745_p5 = pnand %p18744_p4, %p17904_p3 }
 0x1aa   : > { %p18746_p6 = pneg %p18745_p5 }
 0x1ac   : > { %p18751_p8 = pnand %p18749_p7, %p18746_p6 }
 0x1ae   : > { %18754 = shalt.err (!%p18751_p8)
}
 0x1af   : > { %s18755_s2 = scalar_lea.vmem %s1481_s10, 16384  ;;  %p18762_p12 = scmp.lt.s32.totalorder %s1481_s10, %s1481_s10 }
 0x1b0   : > { %p18756_p9 = scmp.ne.s32.totalorder %s1481_s10, %s18755_s2  ;;  %p18763_p13 = scmp.lt.s32.totalorder %s18755_s2, %s18755_s2 }
 0x1b2   : > { %p18757_p10 = pnand %p18756_p9, %p17904_p3  ;;  %p18764_p0 = por %p18763_p13, %p18762_p12 }
 0x1b4   : > { %p18758_p11 = pneg %p18757_p10 }
 0x1b6   : > { %p18765_p1 = pnand %p18764_p0, %p18758_p11 }
 0x1b8   : > { %18768 = shalt.err (!%p18765_p1)
}
 0x1b9   : > { %s21439_s11 = sld [smem:[#allocation101_spill]]  ;;  %s19433_s4 = smov [#allocation49]  }
 0x1ba   : > { %17823 = dma.hbm_to_vmem [thread:$0]  (%p17904_p3), %s21438_s18, 16384, %s1481_s10, [#allocation47], %s21437_s15, %s21437_s15, %s21435_s7  }
 0x1bb   : > { %s1506_s16 = sshll.u32 %s19433_s4, 4  ;;  %s19434_s22 = smov [#allocation52]   ;;  %s1507_s16 = int_to_ptr.vmem [resolvable:$true] %s1506_s16 }
 0x1bc   : > { %s1539_s5 = sshll.u32 %s19434_s22, 4  ;;  %s1540_s5 = int_to_ptr.vmem [resolvable:$true] %s1539_s5 }
 0x1bf   : > { %s18769_s2 = scalar_lea.hbm %s21439_s11, 32 }
 0x1c0   : > { %p18770_p4 = scmp.ne.s32.totalorder %s21439_s11, %s18769_s2  ;;  %p18775_p7 = scmp.lt.u32.totalorder %s18769_s2, %s21439_s11 }
 0x1c2   : > { %p18771_p5 = pnand %p18770_p4, %p17904_p3 }
 0x1c4   : > { %p18772_p6 = pneg %p18771_p5 }
 0x1c6   : > { %p18777_p8 = pnand %p18775_p7, %p18772_p6 }
 0x1c8   : > { %18780 = shalt.err (!%p18777_p8)
}
 0x1c9   : > { %s18781_s6 = scalar_lea.vmem %s1507_s16, 32  ;;  %p18788_p12 = scmp.lt.s32.totalorder %s1507_s16, %s1507_s16 }
 0x1ca   : > { %p18782_p9 = scmp.ne.s32.totalorder %s1507_s16, %s18781_s6  ;;  %p18789_p13 = scmp.lt.s32.totalorder %s18781_s6, %s18781_s6 }
 0x1cc   : > { %p18783_p10 = pnand %p18782_p9, %p17904_p3  ;;  %p18790_p0 = por %p18789_p13, %p18788_p12 }
 0x1ce   : > { %p18784_p11 = pneg %p18783_p10 }
 0x1d0   : > { %p18791_p1 = pnand %p18790_p0, %p18784_p11 }
 0x1d2   : > { %18794 = shalt.err (!%p18791_p1)
}
 0x1d3   : > { %s21440_s22 = smov 1   ;;  %s21441_s10 = sld [smem:[#allocation105_spill]] }
 0x1d4   : > { %17827 = dma.hbm_to_vmem [thread:$0]  (%p17904_p3), %s21439_s11, 32, %s1507_s16, [#allocation50], %s21434_s23, %s21434_s23, %s21440_s22  }
 0x1d9   : > { %s18795_s15 = scalar_lea.hbm %s21441_s10, 16 }
 0x1da   : > { %p18796_p4 = scmp.ne.s32.totalorder %s21441_s10, %s18795_s15  ;;  %p18801_p7 = scmp.lt.u32.totalorder %s18795_s15, %s21441_s10 }
 0x1dc   : > { %p18797_p5 = pnand %p18796_p4, %p17904_p3 }
 0x1de   : > { %p18798_p6 = pneg %p18797_p5 }
 0x1e0   : > { %p18803_p8 = pnand %p18801_p7, %p18798_p6 }
 0x1e2   : > { %18806 = shalt.err (!%p18803_p8)
}
 0x1e3   : > { %s18807_s6 = scalar_lea.vmem %s1540_s5, 16  ;;  %s18813_s4 = scalar_lea.vmem %s1540_s5, 32 }
 0x1e4   : > { %p18808_p9 = scmp.ne.s32.totalorder %s1540_s5, %s18807_s6  ;;  %p18814_p12 = scmp.lt.s32.totalorder %s1540_s5, %s1540_s5 }
 0x1e5   : > { %p18815_p13 = scmp.lt.s32.totalorder %s18813_s4, %s18807_s6 }
 0x1e6   : > { %p18809_p10 = pnand %p18808_p9, %p17904_p3 }
 0x1e7   : > { %p18816_p0 = por %p18815_p13, %p18814_p12 }
 0x1e8   : > { %p18810_p11 = pneg %p18809_p10 }
 0x1ea   : > { %p18817_p1 = pnand %p18816_p0, %p18810_p11 }
 0x1ec   : > { %18820 = shalt.err (!%p18817_p1)
}
 0x1ed   : > { %s21442_s16 = sld [smem:[#allocation77_spill]]  ;;  %s19435_s2 = smov [#allocation2]  }
 0x1ee   : > { %17831 = dma.hbm_to_vmem [thread:$0]  (%p17904_p3), %s21441_s10, 16, %s1540_s5, [#allocation53]  }
 0x1ef   : > { %s1100_s15 = sshll.u32 %s19435_s2, 4  ;;  %s19436_s8 = smov [#allocation6]   ;;  %s1101_s15 = int_to_ptr.vmem [resolvable:$true] %s1100_s15 }
 0x1f0   : > { %s1129_s9 = sshll.u32 %s19436_s8, 4  ;;  %s19936_s9 = int_to_ptr.vmem [resolvable:$true] %s1129_s9 }
 0x1f3   : > { %s18821_s11 = scalar_lea.hbm %s21442_s16, 32 }
 0x1f4   : > { %p18822_p4 = scmp.ne.s32.totalorder %s21442_s16, %s18821_s11  ;;  %p18827_p7 = scmp.lt.u32.totalorder %s18821_s11, %s21442_s16 }
 0x1f6   : > { %p18823_p5 = pnand %p18822_p4, %p17904_p3 }
 0x1f8   : > { %p18824_p6 = pneg %p18823_p5 }
 0x1fa   : > { %p18829_p8 = pnand %p18827_p7, %p18824_p6 }
 0x1fc   : > { %18832 = shalt.err (!%p18829_p8)
}
 0x1fd   : > { %s18833_s6 = scalar_lea.vmem %s1101_s15, 32  ;;  %p18840_p12 = scmp.lt.s32.totalorder %s1101_s15, %s1101_s15 }
 0x1fe   : > { %p18834_p9 = scmp.ne.s32.totalorder %s1101_s15, %s18833_s6  ;;  %p18841_p13 = scmp.lt.s32.totalorder %s18833_s6, %s18833_s6 }
 0x200   : > { %p18835_p10 = pnand %p18834_p9, %p17904_p3  ;;  %p18842_p0 = por %p18841_p13, %p18840_p12 }
 0x202   : > { %p18836_p11 = pneg %p18835_p10 }
 0x204   : > { %p18843_p1 = pnand %p18842_p0, %p18836_p11 }
 0x206   : > { %18846 = shalt.err (!%p18843_p1)
}
 0x207   : > { %s21443_s5 = sld [smem:[#allocation79_spill]] }
 0x208   : > { %17765 = dma.hbm_to_vmem [thread:$0]  (%p17904_p3), %s21442_s16, 32, %s1101_s15, [#allocation3], %s21434_s23, %s21434_s23, %s21440_s22  }
 0x20d   : > { %s18847_s8 = scalar_lea.hbm %s21443_s5, 32 }
 0x20e   : > { %p18848_p4 = scmp.ne.s32.totalorder %s21443_s5, %s18847_s8  ;;  %p18853_p7 = scmp.lt.u32.totalorder %s18847_s8, %s21443_s5 }
 0x210   : > { %p18849_p5 = pnand %p18848_p4, %p17904_p3 }
 0x212   : > { %p18850_p6 = pneg %p18849_p5 }
 0x214   : > { %p18855_p8 = pnand %p18853_p7, %p18850_p6 }
 0x216   : > { %18858 = shalt.err (!%p18855_p8)
}
 0x217   : > { %s18859_s11 = scalar_lea.vmem %s19936_s9, 32  ;;  %p18866_p12 = scmp.lt.s32.totalorder %s19936_s9, %s19936_s9 }
 0x218   : > { %p18860_p9 = scmp.ne.s32.totalorder %s19936_s9, %s18859_s11  ;;  %p18867_p13 = scmp.lt.s32.totalorder %s18859_s11, %s18859_s11 }
 0x21a   : > { %p18861_p10 = pnand %p18860_p9, %p17904_p3  ;;  %p18868_p0 = por %p18867_p13, %p18866_p12 }
 0x21c   : > { %p18862_p11 = pneg %p18861_p10 }
 0x21e   : > { %p18869_p1 = pnand %p18868_p0, %p18862_p11 }
 0x220   : > { %18872 = shalt.err (!%p18869_p1)
}
 0x221   : > { %s21444_s4 = sld [smem:[#allocation81_spill]]  ;;  %s19437_s2 = smov [#allocation9]  }
 0x222   : > { %17769 = dma.hbm_to_vmem [thread:$0]  (%p17904_p3), %s21443_s5, 32, %s19936_s9, [#allocation5], %s21434_s23, %s21434_s23, %s21440_s22  }
 0x223   : > { %s1155_s15 = sshll.u32 %s19437_s2, 4  ;;  %s19438_s6 = smov [#allocation12]   ;;  %s1156_s15 = int_to_ptr.vmem [resolvable:$true] %s1155_s15 }
 0x224   : > { %s1181_s8 = sshll.u32 %s19438_s6, 4  ;;  %s19969_s8 = int_to_ptr.vmem [resolvable:$true] %s1181_s8 }
 0x227   : > { %s18873_s11 = scalar_lea.hbm %s21444_s4, 32 }
 0x228   : > { %p18874_p4 = scmp.ne.s32.totalorder %s21444_s4, %s18873_s11  ;;  %p18879_p7 = scmp.lt.u32.totalorder %s18873_s11, %s21444_s4 }
 0x22a   : > { %p18875_p5 = pnand %p18874_p4, %p17904_p3 }
 0x22c   : > { %p18876_p6 = pneg %p18875_p5 }
 0x22e   : > { %p18881_p8 = pnand %p18879_p7, %p18876_p6 }
 0x230   : > { %18884 = shalt.err (!%p18881_p8)
}
 0x231   : > { %s18885_s10 = scalar_lea.vmem %s1156_s15, 32  ;;  %p18892_p12 = scmp.lt.s32.totalorder %s1156_s15, %s1156_s15 }
 0x232   : > { %p18886_p9 = scmp.ne.s32.totalorder %s1156_s15, %s18885_s10  ;;  %p18893_p13 = scmp.lt.s32.totalorder %s18885_s10, %s18885_s10 }
 0x234   : > { %p18887_p10 = pnand %p18886_p9, %p17904_p3  ;;  %p18894_p0 = por %p18893_p13, %p18892_p12 }
 0x236   : > { %p18888_p11 = pneg %p18887_p10 }
 0x238   : > { %p18895_p1 = pnand %p18894_p0, %p18888_p11 }
 0x23a   : > { %18898 = shalt.err (!%p18895_p1)
}
 0x23b   : > { %s21445_s9 = sld [smem:[#allocation82_spill]] }
 0x23c   : > { %17773 = dma.hbm_to_vmem [thread:$0]  (%p17904_p3), %s21444_s4, 32, %s1156_s15, [#allocation8], %s21434_s23, %s21434_s23, %s21440_s22  }
 0x241   : > { %s18899_s2 = scalar_lea.hbm %s21445_s9, 512 }
 0x242   : > { %p18900_p4 = scmp.ne.s32.totalorder %s21445_s9, %s18899_s2  ;;  %p18905_p7 = scmp.lt.u32.totalorder %s18899_s2, %s21445_s9 }
 0x244   : > { %p18901_p5 = pnand %p18900_p4, %p17904_p3 }
 0x246   : > { %p18902_p6 = pneg %p18901_p5 }
 0x248   : > { %p18907_p8 = pnand %p18905_p7, %p18902_p6 }
 0x24a   : > { %18910 = shalt.err (!%p18907_p8)
}
 0x24b   : > { %s18911_s10 = scalar_lea.vmem %s19969_s8, 512  ;;  %p18918_p12 = scmp.lt.s32.totalorder %s19969_s8, %s19969_s8 }
 0x24c   : > { %p18912_p9 = scmp.ne.s32.totalorder %s19969_s8, %s18911_s10  ;;  %p18919_p13 = scmp.lt.s32.totalorder %s18911_s10, %s18911_s10 }
 0x24e   : > { %p18913_p10 = pnand %p18912_p9, %p17904_p3  ;;  %p18920_p0 = por %p18919_p13, %p18918_p12 }
 0x250   : > { %p18914_p11 = pneg %p18913_p10 }
 0x252   : > { %p18921_p1 = pnand %p18920_p0, %p18914_p11 }
 0x254   : > { %18924 = shalt.err (!%p18921_p1)
}
 0x255   : > { %s21373_s15 = smov 256   ;;  %s21446_s6 = sld [smem:[#allocation83_spill]] }
 0x256   : > { %17777 = dma.hbm_to_vmem [thread:$0]  (%p17904_p3), %s21445_s9, 512, %s19969_s8, [#allocation11], %s21373_s15, %s21373_s15, %s21434_s23  }
 0x257   : > { %s19440_s11 = smov [#allocation15]   ;;  %s19441_s10 = smov [#allocation18]  }
 0x258   : > { %s1207_s2 = sshll.u32 %s19440_s11, 4  ;;  %s1233_s4 = sshll.u32 %s19441_s10, 4  ;;  %s1208_s2 = int_to_ptr.vmem [resolvable:$true] %s1207_s2  ;;  %s1234_s4 = int_to_ptr.vmem [resolvable:$true] %s1233_s4 }
 0x25b   : > { %s18925_s5 = scalar_lea.hbm %s21446_s6, 32 }
 0x25c   : > { %p18926_p4 = scmp.ne.s32.totalorder %s21446_s6, %s18925_s5  ;;  %p18931_p7 = scmp.lt.u32.totalorder %s18925_s5, %s21446_s6 }
 0x25e   : > { %p18927_p5 = pnand %p18926_p4, %p17904_p3 }
 0x260   : > { %p18928_p6 = pneg %p18927_p5 }
 0x262   : > { %p18933_p8 = pnand %p18931_p7, %p18928_p6 }
 0x264   : > { %18936 = shalt.err (!%p18933_p8)
}
 0x265   : > { %s18937_s12 = scalar_lea.vmem %s1208_s2, 32  ;;  %p18944_p12 = scmp.lt.s32.totalorder %s1208_s2, %s1208_s2 }
 0x266   : > { %p18938_p9 = scmp.ne.s32.totalorder %s1208_s2, %s18937_s12  ;;  %p18945_p13 = scmp.lt.s32.totalorder %s18937_s12, %s18937_s12 }
 0x268   : > { %p18939_p10 = pnand %p18938_p9, %p17904_p3  ;;  %p18946_p0 = por %p18945_p13, %p18944_p12 }
 0x26a   : > { %p18940_p11 = pneg %p18939_p10 }
 0x26c   : > { %p18947_p1 = pnand %p18946_p0, %p18940_p11 }
 0x26e   : > { %18950 = shalt.err (!%p18947_p1)
}
 0x26f   : > { %s21447_s5 = sld [smem:[#allocation85_spill]] }
 0x270   : > { %17781 = dma.hbm_to_vmem [thread:$0]  (%p17904_p3), %s21446_s6, 32, %s1208_s2, [#allocation14], %s21434_s23, %s21434_s23, %s21440_s22  }
 0x275   : > { %s18951_s8 = scalar_lea.hbm %s21447_s5, 32 }
 0x276   : > { %p18952_p4 = scmp.ne.s32.totalorder %s21447_s5, %s18951_s8  ;;  %p18957_p7 = scmp.lt.u32.totalorder %s18951_s8, %s21447_s5 }
 0x278   : > { %p18953_p5 = pnand %p18952_p4, %p17904_p3 }
 0x27a   : > { %p18954_p6 = pneg %p18953_p5 }
 0x27c   : > { %p18959_p8 = pnand %p18957_p7, %p18954_p6 }
 0x27e   : > { %18962 = shalt.err (!%p18959_p8)
}
 0x27f   : > { %s18963_s12 = scalar_lea.vmem %s1234_s4, 32  ;;  %p18970_p12 = scmp.lt.s32.totalorder %s1234_s4, %s1234_s4 }
 0x280   : > { %p18964_p9 = scmp.ne.s32.totalorder %s1234_s4, %s18963_s12  ;;  %p18971_p13 = scmp.lt.s32.totalorder %s18963_s12, %s18963_s12 }
 0x282   : > { %p18965_p10 = pnand %p18964_p9, %p17904_p3  ;;  %p18972_p0 = por %p18971_p13, %p18970_p12 }
 0x284   : > { %p18966_p11 = pneg %p18965_p10 }
 0x286   : > { %p18973_p1 = pnand %p18972_p0, %p18966_p11 }
 0x288   : > { %18976 = shalt.err (!%p18973_p1)
}
 0x289   : > { %s21448_s11 = sld [smem:[#allocation86_spill]]  ;;  %s19442_s2 = smov [#allocation21]  }
 0x28a   : > { %17785 = dma.hbm_to_vmem [thread:$0]  (%p17904_p3), %s21447_s5, 32, %s1234_s4, [#allocation17], %s21434_s23, %s21434_s23, %s21440_s22  }
 0x28b   : > { %s1259_s10 = sshll.u32 %s19442_s2, 4  ;;  %s19443_s8 = smov [#allocation24]   ;;  %s1260_s10 = int_to_ptr.vmem [resolvable:$true] %s1259_s10 }
 0x28c   : > { %s1285_s15 = sshll.u32 %s19443_s8, 4  ;;  %s1286_s15 = int_to_ptr.vmem [resolvable:$true] %s1285_s15 }
 0x28f   : > { %s18977_s12 = scalar_lea.hbm %s21448_s11, 1024 }
 0x290   : > { %p18978_p4 = scmp.ne.s32.totalorder %s21448_s11, %s18977_s12  ;;  %p18983_p7 = scmp.lt.u32.totalorder %s18977_s12, %s21448_s11 }
 0x292   : > { %p18979_p5 = pnand %p18978_p4, %p17904_p3 }
 0x294   : > { %p18980_p6 = pneg %p18979_p5 }
 0x296   : > { %p18985_p8 = pnand %p18983_p7, %p18980_p6 }
 0x298   : > { %18988 = shalt.err (!%p18985_p8)
}
 0x299   : > { %s18989_s6 = scalar_lea.vmem %s1260_s10, 1024  ;;  %p18996_p12 = scmp.lt.s32.totalorder %s1260_s10, %s1260_s10 }
 0x29a   : > { %p18990_p9 = scmp.ne.s32.totalorder %s1260_s10, %s18989_s6  ;;  %p18997_p13 = scmp.lt.s32.totalorder %s18989_s6, %s18989_s6 }
 0x29c   : > { %p18991_p10 = pnand %p18990_p9, %p17904_p3  ;;  %p18998_p0 = por %p18997_p13, %p18996_p12 }
 0x29e   : > { %p18992_p11 = pneg %p18991_p10 }
 0x2a0   : > { %p18999_p1 = pnand %p18998_p0, %p18992_p11 }
 0x2a2   : > { %19002 = shalt.err (!%p18999_p1)
}
 0x2a3   : > { %s21449_s4 = sld [smem:[#allocation88_spill]] }
 0x2a4   : > { %17789 = dma.hbm_to_vmem [thread:$0]  (%p17904_p3), %s21448_s11, 1024, %s1260_s10, [#allocation20], %s21435_s7, %s21435_s7, %s21436_s26  }
 0x2a9   : > { %s19003_s2 = scalar_lea.hbm %s21449_s4, 32 }
 0x2aa   : > { %p19004_p4 = scmp.ne.s32.totalorder %s21449_s4, %s19003_s2  ;;  %p19009_p7 = scmp.lt.u32.totalorder %s19003_s2, %s21449_s4 }
 0x2ac   : > { %p19005_p5 = pnand %p19004_p4, %p17904_p3 }
 0x2ae   : > { %p19006_p6 = pneg %p19005_p5 }
 0x2b0   : > { %p19011_p8 = pnand %p19009_p7, %p19006_p6 }
 0x2b2   : > { %19014 = shalt.err (!%p19011_p8)
}
 0x2b3   : > { %s19015_s6 = scalar_lea.vmem %s1286_s15, 32  ;;  %p19022_p12 = scmp.lt.s32.totalorder %s1286_s15, %s1286_s15 }
 0x2b4   : > { %p19016_p9 = scmp.ne.s32.totalorder %s1286_s15, %s19015_s6  ;;  %p19023_p13 = scmp.lt.s32.totalorder %s19015_s6, %s19015_s6 }
 0x2b6   : > { %p19017_p10 = pnand %p19016_p9, %p17904_p3  ;;  %p19024_p0 = por %p19023_p13, %p19022_p12 }
 0x2b8   : > { %p19018_p11 = pneg %p19017_p10 }
 0x2ba   : > { %p19025_p1 = pnand %p19024_p0, %p19018_p11 }
 0x2bc   : > { %19028 = shalt.err (!%p19025_p1)
}
 0x2bd   : > { %s21450_s10 = sld [smem:[#allocation89_spill]]  ;;  %s19444_s8 = smov [#allocation27]  }
 0x2be   : > { %17793 = dma.hbm_to_vmem [thread:$0]  (%p17904_p3), %s21449_s4, 32, %s1286_s15, [#allocation23], %s21434_s23, %s21434_s23, %s21440_s22  }
 0x2bf   : > { %s1311_s12 = sshll.u32 %s19444_s8, 4  ;;  %s19445_s2 = smov [#allocation30]   ;;  %s1312_s12 = int_to_ptr.vmem [resolvable:$true] %s1311_s12 }
 0x2c0   : > { %s1337_s5 = sshll.u32 %s19445_s2, 4  ;;  %s1338_s5 = int_to_ptr.vmem [resolvable:$true] %s1337_s5 }
 0x2c3   : > { %s19029_s6 = scalar_lea.hbm %s21450_s10, 32 }
 0x2c4   : > { %p19030_p4 = scmp.ne.s32.totalorder %s21450_s10, %s19029_s6  ;;  %p19035_p7 = scmp.lt.u32.totalorder %s19029_s6, %s21450_s10 }
 0x2c6   : > { %p19031_p5 = pnand %p19030_p4, %p17904_p3 }
 0x2c8   : > { %p19032_p6 = pneg %p19031_p5 }
 0x2ca   : > { %p19037_p8 = pnand %p19035_p7, %p19032_p6 }
 0x2cc   : > { %19040 = shalt.err (!%p19037_p8)
}
 0x2cd   : > { %s19041_s9 = scalar_lea.vmem %s1312_s12, 32  ;;  %p19048_p12 = scmp.lt.s32.totalorder %s1312_s12, %s1312_s12 }
 0x2ce   : > { %p19042_p9 = scmp.ne.s32.totalorder %s1312_s12, %s19041_s9  ;;  %p19049_p13 = scmp.lt.s32.totalorder %s19041_s9, %s19041_s9 }
 0x2d0   : > { %p19043_p10 = pnand %p19042_p9, %p17904_p3  ;;  %p19050_p0 = por %p19049_p13, %p19048_p12 }
 0x2d2   : > { %p19044_p11 = pneg %p19043_p10 }
 0x2d4   : > { %p19051_p1 = pnand %p19050_p0, %p19044_p11 }
 0x2d6   : > { %19054 = shalt.err (!%p19051_p1)
}
 0x2d7   : > { %s21451_s15 = sld [smem:[#allocation91_spill]] }
 0x2d8   : > { %17797 = dma.hbm_to_vmem [thread:$0]  (%p17904_p3), %s21450_s10, 32, %s1312_s12, [#allocation26], %s21434_s23, %s21434_s23, %s21440_s22  }
 0x2dd   : > { %s19055_s8 = scalar_lea.hbm %s21451_s15, 32 }
 0x2de   : > { %p19056_p4 = scmp.ne.s32.totalorder %s21451_s15, %s19055_s8  ;;  %p19061_p7 = scmp.lt.u32.totalorder %s19055_s8, %s21451_s15 }
 0x2e0   : > { %p19057_p5 = pnand %p19056_p4, %p17904_p3 }
 0x2e2   : > { %p19058_p6 = pneg %p19057_p5 }
 0x2e4   : > { %p19063_p8 = pnand %p19061_p7, %p19058_p6 }
 0x2e6   : > { %19066 = shalt.err (!%p19063_p8)
}
 0x2e7   : > { %s19067_s9 = scalar_lea.vmem %s1338_s5, 32  ;;  %p19074_p12 = scmp.lt.s32.totalorder %s1338_s5, %s1338_s5 }
 0x2e8   : > { %p19068_p9 = scmp.ne.s32.totalorder %s1338_s5, %s19067_s9  ;;  %p19075_p13 = scmp.lt.s32.totalorder %s19067_s9, %s19067_s9 }
 0x2ea   : > { %p19069_p10 = pnand %p19068_p9, %p17904_p3  ;;  %p19076_p0 = por %p19075_p13, %p19074_p12 }
 0x2ec   : > { %p19070_p11 = pneg %p19069_p10 }
 0x2ee   : > { %p19077_p1 = pnand %p19076_p0, %p19070_p11 }
 0x2f0   : > { %19080 = shalt.err (!%p19077_p1)
}
 0x2f1   : > { %s21452_s12 = sld [smem:[#allocation93_spill]]  ;;  %s19446_s2 = smov [#allocation33]  }
 0x2f2   : > { %17801 = dma.hbm_to_vmem [thread:$0]  (%p17904_p3), %s21451_s15, 32, %s1338_s5, [#allocation29], %s21434_s23, %s21434_s23, %s21440_s22  }
 0x2f3   : > { %s1363_s6 = sshll.u32 %s19446_s2, 4  ;;  %s19447_s8 = smov [#allocation36]   ;;  %s1364_s6 = int_to_ptr.vmem [resolvable:$true] %s1363_s6 }
 0x2f4   : > { %s1389_s4 = sshll.u32 %s19447_s8, 4  ;;  %s1390_s4 = int_to_ptr.vmem [resolvable:$true] %s1389_s4 }
 0x2f7   : > { %s19081_s9 = scalar_lea.hbm %s21452_s12, 1024 }
 0x2f8   : > { %p19082_p4 = scmp.ne.s32.totalorder %s21452_s12, %s19081_s9  ;;  %p19087_p7 = scmp.lt.u32.totalorder %s19081_s9, %s21452_s12 }
 0x2fa   : > { %p19083_p5 = pnand %p19082_p4, %p17904_p3 }
 0x2fc   : > { %p19084_p6 = pneg %p19083_p5 }
 0x2fe   : > { %p19089_p8 = pnand %p19087_p7, %p19084_p6 }
 0x300   : > { %19092 = shalt.err (!%p19089_p8)
}
 0x301   : > { %s19093_s10 = scalar_lea.vmem %s1364_s6, 1024  ;;  %p19100_p12 = scmp.lt.s32.totalorder %s1364_s6, %s1364_s6 }
 0x302   : > { %p19094_p9 = scmp.ne.s32.totalorder %s1364_s6, %s19093_s10  ;;  %p19101_p13 = scmp.lt.s32.totalorder %s19093_s10, %s19093_s10 }
 0x304   : > { %p19095_p10 = pnand %p19094_p9, %p17904_p3  ;;  %p19102_p0 = por %p19101_p13, %p19100_p12 }
 0x306   : > { %p19096_p11 = pneg %p19095_p10 }
 0x308   : > { %p19103_p1 = pnand %p19102_p0, %p19096_p11 }
 0x30a   : > { %19106 = shalt.err (!%p19103_p1)
}
 0x30b   : > { %s21453_s5 = sld [smem:[#allocation94_spill]] }
 0x30c   : > { %17805 = dma.hbm_to_vmem [thread:$0]  (%p17904_p3), %s21452_s12, 1024, %s1364_s6, [#allocation32], %s21435_s7, %s21435_s7, %s21436_s26  }
 0x311   : > { %s19107_s2 = scalar_lea.hbm %s21453_s5, 32 }
 0x312   : > { %p19108_p4 = scmp.ne.s32.totalorder %s21453_s5, %s19107_s2  ;;  %p19113_p7 = scmp.lt.u32.totalorder %s19107_s2, %s21453_s5 }
 0x314   : > { %p19109_p5 = pnand %p19108_p4, %p17904_p3 }
 0x316   : > { %p19110_p6 = pneg %p19109_p5 }
 0x318   : > { %p19115_p8 = pnand %p19113_p7, %p19110_p6 }
 0x31a   : > { %19118 = shalt.err (!%p19115_p8)
}
 0x31b   : > { %s19119_s10 = scalar_lea.vmem %s1390_s4, 32  ;;  %p19126_p12 = scmp.lt.s32.totalorder %s1390_s4, %s1390_s4 }
 0x31c   : > { %p19120_p9 = scmp.ne.s32.totalorder %s1390_s4, %s19119_s10  ;;  %p19127_p13 = scmp.lt.s32.totalorder %s19119_s10, %s19119_s10 }
 0x31e   : > { %p19121_p10 = pnand %p19120_p9, %p17904_p3  ;;  %p19128_p0 = por %p19127_p13, %p19126_p12 }
 0x320   : > { %p19122_p11 = pneg %p19121_p10 }
 0x322   : > { %p19129_p1 = pnand %p19128_p0, %p19122_p11 }
 0x324   : > { %19132 = shalt.err (!%p19129_p1)
}
 0x325   : > { %s21454_s7 = sld [smem:[#allocation96_spill]]  ;;  %s19448_s26 = smov [#allocation39]  }
 0x326   : > { %17809 = dma.hbm_to_vmem [thread:$0]  (%p17904_p3), %s21453_s5, 32, %s1390_s4, [#allocation35], %s21434_s23, %s21434_s23, %s21440_s22  }
 0x327   : > { %s1415_s6 = sshll.u32 %s19448_s26, 4  ;;  %s19449_s8 = smov [#allocation42]   ;;  %s1416_s6 = int_to_ptr.vmem [resolvable:$true] %s1415_s6 }
 0x328   : > { %s1441_s9 = sshll.u32 %s19449_s8, 4  ;;  %s1442_s9 = int_to_ptr.vmem [resolvable:$true] %s1441_s9 }
 0x32b   : > { %s19133_s2 = scalar_lea.hbm %s21454_s7, 32 }
 0x32c   : > { %p19134_p4 = scmp.ne.s32.totalorder %s21454_s7, %s19133_s2  ;;  %p19139_p7 = scmp.lt.u32.totalorder %s19133_s2, %s21454_s7 }
 0x32e   : > { %p19135_p5 = pnand %p19134_p4, %p17904_p3 }
 0x330   : > { %p19136_p6 = pneg %p19135_p5 }
 0x332   : > { %p19141_p8 = pnand %p19139_p7, %p19136_p6 }
 0x334   : > { %19144 = shalt.err (!%p19141_p8)
}
 0x335   : > { %s19145_s10 = scalar_lea.vmem %s1416_s6, 32  ;;  %p19152_p12 = scmp.lt.s32.totalorder %s1416_s6, %s1416_s6 }
 0x336   : > { %p19146_p9 = scmp.ne.s32.totalorder %s1416_s6, %s19145_s10  ;;  %p19153_p13 = scmp.lt.s32.totalorder %s19145_s10, %s19145_s10 }
 0x338   : > { %p19147_p10 = pnand %p19146_p9, %p17904_p3  ;;  %p19154_p0 = por %p19153_p13, %p19152_p12 }
 0x33a   : > { %p19148_p11 = pneg %p19147_p10 }
 0x33c   : > { %p19155_p1 = pnand %p19154_p0, %p19148_p11 }
 0x33e   : > { %19158 = shalt.err (!%p19155_p1)
}
 0x33f   : > { %s21455_s4 = sld [smem:[#allocation97_spill]] }
 0x340   : > { %17813 = dma.hbm_to_vmem [thread:$0]  (%p17904_p3), %s21454_s7, 32, %s1416_s6, [#allocation38], %s21434_s23, %s21434_s23, %s21440_s22  }
 0x345   : > { %s19159_s26 = scalar_lea.hbm %s21455_s4, 32 }
 0x346   : > { %p19160_p4 = scmp.ne.s32.totalorder %s21455_s4, %s19159_s26  ;;  %p19165_p7 = scmp.lt.u32.totalorder %s19159_s26, %s21455_s4 }
 0x348   : > { %p19161_p5 = pnand %p19160_p4, %p17904_p3 }
 0x34a   : > { %p19162_p6 = pneg %p19161_p5 }
 0x34c   : > { %p19167_p8 = pnand %p19165_p7, %p19162_p6 }
 0x34e   : > { %19170 = shalt.err (!%p19167_p8)
}
 0x34f   : > { %s19171_s8 = scalar_lea.vmem %s1442_s9, 32  ;;  %p19178_p12 = scmp.lt.s32.totalorder %s1442_s9, %s1442_s9 }
 0x350   : > { %p19172_p9 = scmp.ne.s32.totalorder %s1442_s9, %s19171_s8  ;;  %p19179_p13 = scmp.lt.s32.totalorder %s19171_s8, %s19171_s8 }
 0x352   : > { %p19173_p10 = pnand %p19172_p9, %p17904_p3  ;;  %p19180_p0 = por %p19179_p13, %p19178_p12 }
 0x354   : > { %p19174_p11 = pneg %p19173_p10 }
 0x356   : > { %p19181_p1 = pnand %p19180_p0, %p19174_p11 }
 0x358   : > { %19184 = shalt.err (!%p19181_p1)
}
 0x359   : > { %s21456_s6 = sld [smem:[#allocation98_spill]]  ;;  %s19450_s2 = smov [#allocation45]  }
 0x35a   : > { %17817 = dma.hbm_to_vmem [thread:$0]  (%p17904_p3), %s21455_s4, 32, %s1442_s9, [#allocation41], %s21434_s23, %s21434_s23, %s21440_s22  }
 0x35b   : > { %s1467_s10 = sshll.u32 %s19450_s2, 4  ;;  %s19451_s26 = smov [#allocation48]   ;;  %s1468_s10 = int_to_ptr.vmem [resolvable:$true] %s1467_s10 }
 0x35c   : > { %s1493_s5 = sshll.u32 %s19451_s26, 4  ;;  %s1494_s5 = int_to_ptr.vmem [resolvable:$true] %s1493_s5 }
 0x35f   : > { %s19185_s8 = scalar_lea.hbm %s21456_s6, 512 }
 0x360   : > { %p19186_p4 = scmp.ne.s32.totalorder %s21456_s6, %s19185_s8  ;;  %p19191_p7 = scmp.lt.u32.totalorder %s19185_s8, %s21456_s6 }
 0x362   : > { %p19187_p5 = pnand %p19186_p4, %p17904_p3 }
 0x364   : > { %p19188_p6 = pneg %p19187_p5 }
 0x366   : > { %p19193_p8 = pnand %p19191_p7, %p19188_p6 }
 0x368   : > { %19196 = shalt.err (!%p19193_p8)
}
 0x369   : > { %s19197_s7 = scalar_lea.vmem %s1468_s10, 512  ;;  %p19204_p12 = scmp.lt.s32.totalorder %s1468_s10, %s1468_s10 }
 0x36a   : > { %p19198_p9 = scmp.ne.s32.totalorder %s1468_s10, %s19197_s7  ;;  %p19205_p13 = scmp.lt.s32.totalorder %s19197_s7, %s19197_s7 }
 0x36c   : > { %p19199_p10 = pnand %p19198_p9, %p17904_p3  ;;  %p19206_p0 = por %p19205_p13, %p19204_p12 }
 0x36e   : > { %p19200_p11 = pneg %p19199_p10 }
 0x370   : > { %p19207_p1 = pnand %p19206_p0, %p19200_p11 }
 0x372   : > { %19210 = shalt.err (!%p19207_p1)
}
 0x373   : > { %s21457_s9 = smov 256   ;;  %s21458_s2 = sld [smem:[#allocation100_spill]] }
 0x374   : > { %17821 = dma.hbm_to_vmem [thread:$0]  (%p17904_p3), %s21456_s6, 512, %s1468_s10, [#allocation44], %s21457_s9, %s21457_s9, %s21434_s23  }
 0x379   : > { %s19211_s26 = scalar_lea.hbm %s21458_s2, 32 }
 0x37a   : > { %p19212_p4 = scmp.ne.s32.totalorder %s21458_s2, %s19211_s26  ;;  %p19217_p7 = scmp.lt.u32.totalorder %s19211_s26, %s21458_s2 }
 0x37c   : > { %p19213_p5 = pnand %p19212_p4, %p17904_p3 }
 0x37e   : > { %p19214_p6 = pneg %p19213_p5 }
 0x380   : > { %p19219_p8 = pnand %p19217_p7, %p19214_p6 }
 0x382   : > { %19222 = shalt.err (!%p19219_p8)
}
 0x383   : > { %s19223_s7 = scalar_lea.vmem %s1494_s5, 32  ;;  %p19230_p12 = scmp.lt.s32.totalorder %s1494_s5, %s1494_s5 }
 0x384   : > { %p19224_p9 = scmp.ne.s32.totalorder %s1494_s5, %s19223_s7  ;;  %p19231_p13 = scmp.lt.s32.totalorder %s19223_s7, %s19223_s7 }
 0x386   : > { %p19225_p10 = pnand %p19224_p9, %p17904_p3  ;;  %p19232_p0 = por %p19231_p13, %p19230_p12 }
 0x388   : > { %p19226_p11 = pneg %p19225_p10 }
 0x38a   : > { %p19233_p1 = pnand %p19232_p0, %p19226_p11 }
 0x38c   : > { %19236 = shalt.err (!%p19233_p1)
}
 0x38d   : > { %s21459_s10 = sld [smem:[#allocation102_spill]]  ;;  %s19452_s8 = smov [#allocation51]  }
 0x38e   : > { %17825 = dma.hbm_to_vmem [thread:$0]  (%p17904_p3), %s21458_s2, 32, %s1494_s5, [#allocation47], %s21434_s23, %s21434_s23, %s21440_s22  }
 0x38f   : > { %s1519_s9 = sshll.u32 %s19452_s8, 4  ;;  %s19453_s26 = smov [#allocation54]   ;;  %s1520_s9 = int_to_ptr.vmem [resolvable:$true] %s1519_s9 }
 0x390   : > { %s1550_s4 = sshll.u32 %s19453_s26, 4  ;;  %s1551_s4 = int_to_ptr.vmem [resolvable:$true] %s1550_s4 }
 0x393   : > { %s19237_s7 = scalar_lea.hbm %s21459_s10, 32 }
 0x394   : > { %p19238_p4 = scmp.ne.s32.totalorder %s21459_s10, %s19237_s7  ;;  %p19243_p7 = scmp.lt.u32.totalorder %s19237_s7, %s21459_s10 }
 0x396   : > { %p19239_p5 = pnand %p19238_p4, %p17904_p3 }
 0x398   : > { %p19240_p6 = pneg %p19239_p5 }
 0x39a   : > { %p19245_p8 = pnand %p19243_p7, %p19240_p6 }
 0x39c   : > { %19248 = shalt.err (!%p19245_p8)
}
 0x39d   : > { %s19249_s6 = scalar_lea.vmem %s1520_s9, 32  ;;  %p19256_p12 = scmp.lt.s32.totalorder %s1520_s9, %s1520_s9 }
 0x39e   : > { %p19250_p9 = scmp.ne.s32.totalorder %s1520_s9, %s19249_s6  ;;  %p19257_p13 = scmp.lt.s32.totalorder %s19249_s6, %s19249_s6 }
 0x3a0   : > { %p19251_p10 = pnand %p19250_p9, %p17904_p3  ;;  %p19258_p0 = por %p19257_p13, %p19256_p12 }
 0x3a2   : > { %p19252_p11 = pneg %p19251_p10 }
 0x3a4   : > { %p19259_p1 = pnand %p19258_p0, %p19252_p11 }
 0x3a6   : > { %19262 = shalt.err (!%p19259_p1)
}
 0x3a7   : > { %17829 = dma.hbm_to_vmem [thread:$0]  (%p17904_p3), %s21459_s10, 32, %s1520_s9, [#allocation50], %s21434_s23, %s21434_s23, %s21440_s22  }
 0x3a8   : > { %s19263_s5 = scalar_lea.hbm %s19677_s17, 16 }
 0x3a9   : > { %p19264_p4 = scmp.ne.s32.totalorder %s19677_s17, %s19263_s5  ;;  %p19269_p7 = scmp.lt.u32.totalorder %s19263_s5, %s19677_s17 }
 0x3ab   : > { %p19265_p5 = pnand %p19264_p4, %p17904_p3 }
 0x3ad   : > { %p19266_p6 = pneg %p19265_p5 }
 0x3af   : > { %p19271_p8 = pnand %p19269_p7, %p19266_p6 }
 0x3b1   : > { %19274 = shalt.err (!%p19271_p8)
}
 0x3b2   : > { %s19275_s6 = scalar_lea.vmem %s1551_s4, 16  ;;  %s19281_s8 = scalar_lea.vmem %s1551_s4, 32 }
 0x3b3   : > { %p19276_p9 = scmp.ne.s32.totalorder %s1551_s4, %s19275_s6  ;;  %p19282_p12 = scmp.lt.s32.totalorder %s1551_s4, %s1551_s4 }
 0x3b4   : > { %p19283_p13 = scmp.lt.s32.totalorder %s19281_s8, %s19275_s6 }
 0x3b5   : > { %p19277_p10 = pnand %p19276_p9, %p17904_p3 }
 0x3b6   : > { %p19284_p0 = por %p19283_p13, %p19282_p12 }
 0x3b7   : > { %p19278_p11 = pneg %p19277_p10 }
 0x3b9   : > { %p19285_p1 = pnand %p19284_p0, %p19278_p11 }
 0x3bb   : > { %19288 = shalt.err (!%p19285_p1)
}
 0x3bc   : > { %17833 = dma.hbm_to_vmem [thread:$0]  (%p17904_p3), %s19677_s17, 16, %s1551_s4, [#allocation53]  }
 0x3bd PF: > { %1584 = sbr.rel (%p19704_p2) target bundleno = 22631 (0x5867), region = 196  ;;  %p17939_p4 = scmp.eq.s32.totalorder (!%p19704_p2), %s19700_s28, 0 }
 0x3c4   : > { %19294 = dma.done.wait (%p17939_p4), [#allocation3], 32  }
 0x3c5   : > { %19296 = vsyncadd (%p17939_p4), [#allocation3], 4294967264 }
 0x3c6   : > { %19298 = dma.done.wait (%p17939_p4), [#allocation5], 64  }
 0x3c7   : > { %19300 = vsyncadd (%p17939_p4), [#allocation5], 4294967232 }
 0x3c8   : > { %19302 = dma.done.wait (%p17939_p4), [#allocation8], 64  }
 0x3c9   : > { %19304 = vsyncadd (%p17939_p4), [#allocation8], 4294967232 }
 0x3ca   : > { %19306 = dma.done.wait (%p17939_p4), [#allocation11], 16896  }
 0x3cb   : > { %19308 = vsyncadd (%p17939_p4), [#allocation11], 4294950400 }
 0x3cc   : > { %19310 = dma.done.wait (%p17939_p4), [#allocation14], 16416  }
 0x3cd   : > { %19312 = vsyncadd (%p17939_p4), [#allocation14], 4294950880 }
 0x3ce   : > { %19314 = dma.done.wait (%p17939_p4), [#allocation17], 64  }
 0x3cf   : > { %19316 = vsyncadd (%p17939_p4), [#allocation17], 4294967232 }
 0x3d0   : > { %19318 = dma.done.wait (%p17939_p4), [#allocation20], 2048  }
 0x3d1   : > { %19320 = vsyncadd (%p17939_p4), [#allocation20], 4294965248 }
 0x3d2   : > { %19322 = dma.done.wait (%p17939_p4), [#allocation23], 64  }
 0x3d3   : > { %19324 = vsyncadd (%p17939_p4), [#allocation23], 4294967232 }
 0x3d4   : > { %19326 = dma.done.wait (%p17939_p4), [#allocation26], 1056  }
 0x3d5   : > { %19328 = vsyncadd (%p17939_p4), [#allocation26], 4294966240 }
 0x3d6   : > { %19330 = dma.done.wait (%p17939_p4), [#allocation29], 64  }
 0x3d7   : > { %19332 = vsyncadd (%p17939_p4), [#allocation29], 4294967232 }
 0x3d8   : > { %19334 = dma.done.wait (%p17939_p4), [#allocation32], 2048  }
 0x3d9   : > { %19336 = vsyncadd (%p17939_p4), [#allocation32], 4294965248 }
 0x3da   : > { %19338 = dma.done.wait (%p17939_p4), [#allocation35], 64  }
 0x3db   : > { %19340 = vsyncadd (%p17939_p4), [#allocation35], 4294967232 }
 0x3dc   : > { %19342 = dma.done.wait (%p17939_p4), [#allocation38], 1056  }
 0x3dd   : > { %19344 = vsyncadd (%p17939_p4), [#allocation38], 4294966240 }
 0x3de   : > { %19346 = dma.done.wait (%p17939_p4), [#allocation41], 64  }
 0x3df   : > { %19348 = vsyncadd (%p17939_p4), [#allocation41], 4294967232 }
 0x3e0   : > { %19350 = dma.done.wait (%p17939_p4), [#allocation44], 16896  }
 0x3e1   : > { %19352 = vsyncadd (%p17939_p4), [#allocation44], 4294950400 }
 0x3e2   : > { %19354 = dma.done.wait (%p17939_p4), [#allocation47], 16416  }
 0x3e3   : > { %19356 = vsyncadd (%p17939_p4), [#allocation47], 4294950880 }
 0x3e4   : > { %19358 = dma.done.wait (%p17939_p4), [#allocation50], 64  }
 0x3e5   : > { %19360 = vsyncadd (%p17939_p4), [#allocation50], 4294967232 }
 0x3e6   : > { %19362 = dma.done.wait (%p17939_p4), [#allocation53], 32  }
 0x3e7   : > { %19364 = vsyncadd (%p17939_p4), [#allocation53], 4294967264  ;;  %s21460_s1 = sld [smem:[#allocation73_spill]]  ;;  %s21461_s23 = sld [smem:[#allocation76_spill]]  ;;  %vm1855_vm0 = vcmask 261120   ;;  %vm2023_vm1 = vcmask 64512  }
 0x3e8   : > { %s21462_s22 = sld [smem:[#allocation75_spill]]  ;;  %p1829_p2 = scmp.lt.s32.totalorder %s19700_s28, 1  ;;  %v15911_v14 = vld [vmem:[#allocation4] ss:$0 sm:$0xff]  ;;  %v15908_v18 = vld [vmem:[#allocation2] ss:$0 sm:$0xff]  ;;  %vm20284_vm2 = vmpackc.low %vm2023_vm1, %vm2023_vm1 }
 0x3e9   : > { %s19454_s26 = smov 120   ;;  %vm2113_vm3 = vcmask 130048   ;;  %s19455_s7 = smov 96   ;;  %vm19463_vm4 = vmmov 0  }
 0x3ea   : > { %s21476_s28 = smov (!%p1829_p2, %s19700_s28), 1  ;;  %s21390_s5 = smov 112  }
 0x3eb   : > { %s16175_s4 = sshll.u32 %s21476_s28, 4  ;;  %s21385_s6 = smov 104  }
 0x3ec   : > { %s21392_s8 = smov 88  }
 0x3ed   : > { %s1833_s9 = scalar_lea.vmem %s21460_s1, %s16175_s4  ;;  %v1937_v0 = vld [vmem:[%s21461_s23] sm:$0xff]  ;;  %v1938_v1 = vld [vmem:[%s21461_s23 + $0x8] sm:$0xff]  ;;  %v1939_v2 = vld [vmem:[%s21461_s23 + $0x10] sm:$0xff]  ;;  %s21465_s1 = sld [smem:[#allocation78_spill]] }
 0x3ee   : > { %v17022_v3 = vpack.c.bf16 %v1938_v1, %v1937_v0  ;;  %v1940_v4 = vld [vmem:[%s21461_s23 + $0x18] sm:$0xff]  ;;  %v20266_v5 = vld [vmem:[%s1833_s9] sm:$0xff]  ;;  %v1845_v8 = vld [vmem:[%s21462_s22 + $0x8] sm:$0xff]  ;;  %s21387_s4 = smov 80  }
 0x3ef   : > { %v1844_v6 = vld [vmem:[%s21462_s22] sm:$0xff]  ;;  %v17026_v7 = vpack.c.bf16 %v1940_v4, %v1939_v2  ;;  %16466 = vmatprep.mubr.msk.f32.mxu1 %vm1855_vm0, %v20266_v5  ;;  %v1846_v9 = vld [vmem:[%s21462_s22 + $0x10] sm:$0xff]  ;;  %16455 = vmatprep.mubr.msk.f32.mxu0 %vm1855_vm0, %v20266_v5  ;;  %v1847_v11 = vld [vmem:[%s21462_s22 + $0x18] sm:$0xff] }
 0x3f0   : > { %17023 = vmatprep.subr.bf16.mxu1 %v17022_v3  ;;  %v17014_v10 = vpack.c.bf16 %v1845_v8, %v1844_v6  ;;  %v17018_v12 = vpack.c.bf16 %v1847_v11, %v1846_v9  ;;  %v20276_v13 = vld [vmem:[%s1833_s9 + $0x8] sm:$0xff]  ;;  %s21383_s9 = smov 72  }
 0x3f1   : > { %17025 = vmatpush3.bf16.msra.mxu1 %v17022_v3 }
 0x3f2   : > { %17027 = vmatprep.subr.bf16.mxu1 %v17026_v7  ;;  %17015 = vmatprep.subr.bf16.mxu0 %v17014_v10 }
 0x3f3   : > { %17017 = vmatpush3.bf16.msra.mxu0 %v17014_v10 }
 0x3f4   : > { %17019 = vmatprep.subr.bf16.mxu0 %v17018_v12 }
 0x3f5   : > { %17029 = vmatpush3.bf16.msra.mxu1 %v17026_v7 }
 0x3f7   : > { %17021 = vmatpush3.bf16.msra.mxu0 %v17018_v12 }
 0x3f8   : > { %16467 = vmatmul.mubr.msk.f32.vlgmr.msra.gmra.mrb[0].mxu1 %vm1855_vm0, %v20276_v13 }
 0x3fa   : > { %16456 = vmatmul.mubr.msk.f32.vlgmr.msra.gmra.mrb[0].mxu0 %vm1855_vm0, %v20276_v13 }
 0x4cb   : > { %v16468_v15 = vpop.f32.mrb[0].mxu1 }
 0x4cc   : > { %v2020_v16 = vadd.f32 %v16468_v15, %v15911_v14  ;;  %v2014_v17 = vpop.f32.mrb[1].mxu1 }
 0x4cd   : > { %v2015_v19 = vadd.f32 %v15911_v14, %v2014_v17  ;;  %v16457_v20 = vpop.f32.mrb[0].mxu0 }
 0x4ce   : > { %v1928_v22 = vpop.f32.mrb[1].mxu0  ;;  %v20302_v26 = vadd.f32 %v16457_v20, %v15908_v18 }
 0x4cf   : > { %v20288_v23 = vpack.i.bf16 %v2020_v16, %v2015_v19  ;;  %v17030_v24 = vpack.c.bf16 %v2020_v16, %v2015_v19  ;;  %v20290_v25 = vadd.f32 %v15908_v18, %v1928_v22 }
 0x4d1   : > { %18083 = vrot.lane.b32.xlu1 %v20288_v23, %s19454_s26  ;;  %17032 = vmatprep.subr.msk.bf16.mxu0 %vm20284_vm2, %v17030_v24 }
 0x4d2   : > { %17035 = vmatpush3.bf16.xpose.msk.msra.mxu0 %vm20284_vm2, %v17030_v24  ;;  %16473 = vmatprep.mubr.msk.f32.mxu0 %vm2023_vm1, %v20290_v25 }
 0x4d5   : > { %2224 = vrot.lane.b32.xlu1 %v20290_v25, %s19454_s26 }
 0x4d9   : > { %16474 = vmatmul.mubr.msk.f32.vlgmr.msra.gmra.mrb[2].mxu0 %vm2023_vm1, %v20302_v26 }
 0x543   : > { %v18084_v36 = vpop.permute.xlu1 %18083 }
 0x544   : > { %v18086_v40 = vunpack.i.h.bf16 %v18084_v36  ;;  %v18085_v42 = vunpack.i.l.bf16 %v18084_v36 }
 0x546   : > { %v17040_v46 = vpack.c.bf16 %v18086_v40, %v18085_v42  ;;  %v2223_v40 = vld [vmem:[%s21465_s1] sm:$0xff] }
 0x547   : > { %v2225_v51 = vpop.permute.xlu1 %2224 }
 0x5ac   : > { %v16475_v27 = vpop.f32.mrb[2].mxu0 }
 0x5ad   : > { %v2102_v28 = vpop.f32.mrb[3].mxu0  ;;  %v2112_v30 = vmul.f32 0.35355338, %v16475_v27 }
 0x5ae   : > { %v2111_v29 = vmul.f32 0.35355338, %v2102_v28 }
 0x5af   : > { %v2117_v32 = vsel %vm2113_vm3, %v2112_v30, -inf }
 0x5b0   : > { %v2114_v31 = vsel %vm2113_vm3, %v2111_v29, -inf }
 0x5b1   : > { %2115 = vmax.xlane.f32.xlu0 %v2114_v31 }
 0x5b5   : > { %2118 = vmax.xlane.f32.xlu0 %v2117_v32 }
 0x5cb   : > { %18078 = vrot.lane.b32.xlu0 %v20288_v23, %s19455_s7 }
 0x63e   : > { %v2116_v33 = vpop.xlane.xlu0 %2115 }
 0x63f   : > { %v2120_v34 = vsub.f32 %v2111_v29, %v2116_v33 }
 0x641   : > { %v2122_v38 = vmul.f32 1.442695, %v2120_v34 }
 0x642   : > { %v2119_v35 = vpop.xlane.xlu0 %2118 }
 0x643   : > { %v2121_v37 = vsub.f32 %v2112_v30, %v2119_v35 }
 0x645   : > { %v2124_v39 = vmul.f32 1.442695, %v2121_v37 }
 0x646   : > { %v18079_v41 = vpop.permute.xlu0 %18078 }
 0x647   : > { %18217 = vpow2.f32 %v2124_v39  ;;  %v18081_v43 = vunpack.i.h.bf16 %v18079_v41  ;;  %v18080_v44 = vunpack.i.l.bf16 %v18079_v41  ;;  %v15926_v39 = vld [vmem:[%s21465_s1 + $0x8] sm:$0xff] }
 0x648   : > { %18219 = vpow2.f32 %v2122_v38  ;;  %16497 = vmatprep.subr.mxu0 %v15926_v39 }
 0x649   : > { %v17036_v45 = vpack.c.bf16 %v18081_v43, %v18080_v44  ;;  %16498 = vmatpush3.msra.mxu0 %v15926_v39 }
 0x64a   : > { %16502 = vmatprep.subr.mxu0 %v2223_v40 }
 0x64b   : > { %17037 = vmatprep.subr.bf16.mxu1 %v17036_v45 }
 0x64c   : > { %17039 = vmatpush3.bf16.msra.mxu1 %v17036_v45 }
 0x64d   : > { %17042 = vmatprep.subr.msk.bf16.mxu1 %vm20284_vm2, %v17040_v46 }
 0x651   : > { %v18218_v47 = vpop.eup %18217 }
 0x652   : > { %v2129_v48 = vsel %vm2113_vm3, %v18218_v47, 0.0  ;;  %v18220_v49 = vpop.eup %18219 }
 0x653   : > { %2130 = vadd.xlane.f32.xlu1 %v2129_v48  ;;  %v2126_v50 = vsel %vm2113_vm3, %v18220_v49, 0.0 }
 0x657   : > { %2127 = vadd.xlane.f32.xlu1 %v2126_v50 }
 0x668   : > { %2226 = vrot.lane.b32.xlu1 %v20302_v26, %s19454_s26 }
 0x6e0   : > { %v2131_v52 = vpop.xlane.xlu1 %2130 }
 0x6e1   : > { %18221 = vrcp.f32 %v2131_v52 }
 0x6e4   : > { %v2128_v53 = vpop.xlane.xlu1 %2127 }
 0x6e5   : > { %18223 = vrcp.f32 %v2128_v53 }
 0x6e8   : > { %v2227_v58 = vpop.permute.xlu1 %2226 }
 0x6eb   : > { %v18222_v54 = vpop.eup %18221 }
 0x6ec   : > { %v2135_v57 = vmul.f32 %v18222_v54, %v18218_v47 }
 0x6ef   : > { %v18224_v55 = vpop.eup %18223 }
 0x6f0   : > { %v2134_v56 = vmul.f32 %v18224_v55, %v18220_v49 }
 0x6f2   : > { %16480 = vmatprep.mubr.msk.f32.mxu1 %vm2113_vm3, %v2134_v56 }
 0x6f3   : > { %16481 = vmatmul.mubr.msk.f32.vlgmr.msra.gmra.mrb[2].mxu1 %vm2113_vm3, %v2135_v57 }
 0x6f4   : > { %17045 = vmatpush3.bf16.xpose.msk.msra.mxu1 %vm20284_vm2, %v17040_v46  ;;  %16487 = vmatprep.mubr.msk.f32.mxu1 %vm2023_vm1, %v2225_v51 }
 0x6fb   : > { %16488 = vmatmul.mubr.msk.f32.vlgmr.msra.gmra.mrb[4].mxu1 %vm2023_vm1, %v2227_v58 }
 0x7c6   : > { %v20322_v59 = vpop.f32.mrb[2].mxu1 }
 0x7c7   : > { %v20324_v60 = vpop.f32.mrb[3].mxu1 }
 0x7ce   : > { %v16489_v61 = vpop.f32.mrb[4].mxu1 }
 0x7cf   : > { %v2316_v62 = vmul.f32 0.35355338, %v16489_v61  ;;  %v2306_v63 = vpop.f32.mrb[5].mxu1 }
 0x7d0   : > { %v2315_v0 = vmul.f32 0.35355338, %v2306_v63 }
 0x7d1   : > { %v2320_v1 = vsel %vm2113_vm3, %v2316_v62, -inf }
 0x7d2   : > { %2321 = vmax.xlane.f32.xlu1 %v2320_v1  ;;  %v2317_v2 = vsel %vm2113_vm3, %v2315_v0, -inf }
 0x7d3   : > { %2318 = vmax.xlane.f32.xlu0 %v2317_v2 }
 0x7e3   : > { %18093 = vrot.lane.b32.xlu1 %v20288_v23, %s21390_s5 }
 0x7e7   : > { %2590 = vrot.lane.b32.xlu1 %v20290_v25, %s21390_s5 }
 0x7eb   : > { %2592 = vrot.lane.b32.xlu1 %v20302_v26, %s21390_s5 }
 0x7ef   : > { %2877 = vrot.lane.b32.xlu1 %v20290_v25, %s21385_s6 }
 0x85f   : > { %v2322_v3 = vpop.xlane.xlu1 %2321 }
 0x860   : > { %v2324_v4 = vsub.f32 %v2316_v62, %v2322_v3  ;;  %v2319_v6 = vpop.xlane.xlu0 %2318 }
 0x861   : > { %v2323_v7 = vsub.f32 %v2315_v0, %v2319_v6 }
 0x862   : > { %v2327_v8 = vmul.f32 1.442695, %v2324_v4  ;;  %v15937_v4 = vld [vmem:[%s21465_s1 + $0x10] sm:$0xff] }
 0x863   : > { %v2325_v9 = vmul.f32 1.442695, %v2323_v7  ;;  %v18094_v17 = vpop.permute.xlu1 %18093 }
 0x864   : > { %18225 = vpow2.f32 %v2327_v8  ;;  %v18096_v19 = vunpack.i.h.bf16 %v18094_v17  ;;  %v18095_v20 = vunpack.i.l.bf16 %v18094_v17 }
 0x865   : > { %18227 = vpow2.f32 %v2325_v9 }
 0x866   : > { %v17050_v27 = vpack.c.bf16 %v18096_v19, %v18095_v20 }
 0x867   : > { %v2591_v32 = vpop.permute.xlu1 %2590 }
 0x86b   : > { %v2593_v36 = vpop.permute.xlu1 %2592 }
 0x86e   : > { %v18226_v10 = vpop.eup %18225 }
 0x86f   : > { %v2332_v11 = vsel %vm2113_vm3, %v18226_v10, 0.0  ;;  %v18228_v12 = vpop.eup %18227  ;;  %v2878_v37 = vpop.permute.xlu1 %2877 }
 0x870   : > { %2333 = vadd.xlane.f32.xlu0 %v2332_v11  ;;  %v2329_v14 = vsel %vm2113_vm3, %v18228_v12, 0.0 }
 0x874   : > { %2330 = vadd.xlane.f32.xlu0 %v2329_v14 }
 0x88a   : > { %18088 = vrot.lane.b32.xlu0 %v20288_v23, %s21392_s8 }
 0x88e   : > { %18098 = vrot.lane.b32.xlu0 %v20288_v23, %s21385_s6 }
 0x892   : > { %2879 = vrot.lane.b32.xlu0 %v20302_v26, %s21385_s6 }
 0x8fd   : > { %v2334_v15 = vpop.xlane.xlu0 %2333 }
 0x8fe   : > { %18229 = vrcp.f32 %v2334_v15 }
 0x901   : > { %v2331_v16 = vpop.xlane.xlu0 %2330 }
 0x902   : > { %18231 = vrcp.f32 %v2331_v16 }
 0x905   : > { %v18089_v18 = vpop.permute.xlu0 %18088 }
 0x906   : > { %v18091_v22 = vunpack.i.h.bf16 %v18089_v18  ;;  %v18090_v24 = vunpack.i.l.bf16 %v18089_v18 }
 0x908   : > { %v17046_v25 = vpack.c.bf16 %v18091_v22, %v18090_v24  ;;  %v18230_v28 = vpop.eup %18229 }
 0x909   : > { %v18099_v30 = vpop.permute.xlu0 %18098  ;;  %v2338_v31 = vmul.f32 %v18230_v28, %v18226_v10 }
 0x90a   : > { %17047 = vmatprep.subr.bf16.mxu1 %v17046_v25  ;;  %v18101_v33 = vunpack.i.h.bf16 %v18099_v30  ;;  %v18100_v34 = vunpack.i.l.bf16 %v18099_v30 }
 0x90b   : > { %17049 = vmatpush3.bf16.msra.mxu1 %v17046_v25 }
 0x90c   : > { %v18232_v29 = vpop.eup %18231  ;;  %17052 = vmatprep.subr.msk.bf16.mxu1 %vm20284_vm2, %v17050_v27  ;;  %v17060_v35 = vpack.c.bf16 %v18101_v33, %v18100_v34 }
 0x90d   : > { %v2337_v26 = vmul.f32 %v18232_v29, %v18228_v12  ;;  %v2880_v38 = vpop.permute.xlu0 %2879 }
 0x90f   : > { %16494 = vmatprep.mubr.msk.f32.mxu1 %vm2113_vm3, %v2337_v26 }
 0x910   : > { %16495 = vmatmul.mubr.msk.f32.vlgmr.msra.gmra.mrb[6].mxu1 %vm2113_vm3, %v2338_v31 }
 0x911   : > { %16511 = vmatprep.mubr.msk.f32.mxu1 %vm2023_vm1, %v2591_v32 }
 0x914   : > { %17055 = vmatpush3.bf16.xpose.msk.msra.mxu1 %vm20284_vm2, %v17050_v27 }
 0x915   : > { %17062 = vmatprep.subr.msk.bf16.mxu1 %vm20284_vm2, %v17060_v35 }
 0x91b   : > { %16512 = vmatmul.mubr.msk.f32.vlgmr.msra.gmra.mrb[8].mxu1 %vm2023_vm1, %v2593_v36  ;;  %v15946_v36 = vld [vmem:[%s21465_s1 + $0x18] sm:$0xff] }
 0x91c   : > { %17065 = vmatpush3.bf16.xpose.msk.msra.mxu1 %vm20284_vm2, %v17060_v35  ;;  %16530 = vmatprep.mubr.msk.f32.mxu1 %vm2023_vm1, %v2878_v37 }
 0x923   : > { %16531 = vmatmul.mubr.msk.f32.vlgmr.msra.gmra.mrb[10].mxu1 %vm2023_vm1, %v2880_v38 }
 0x9e3   : > { %v16496_v41 = vpop.f32.mrb[6].mxu1 }
 0x9e4   : > { %v2417_v42 = vpop.f32.mrb[7].mxu1 }
 0x9e5   : > { %16499 = vmatprep.mubr.msk.f32.mxu0 %vm2023_vm1, %v2417_v42 }
 0x9e6   : > { %16500 = vmatmul.mubr.msk.f32.vlgmr.msra.gmra.mrb[4].mxu0 %vm2023_vm1, %v16496_v41 }
 0x9e7   : > { %16504 = vmatprep.mubr.msk.f32.mxu0 %vm2023_vm1, %v20324_v60  ;;  %16503 = vmatpush3.msra.mxu0 %v2223_v40  ;;  %v15949_v40 = vld [vmem:[#allocation6] ss:$0 sm:$0xff] }
 0x9ee   : > { %16505 = vmatmul.mubr.msk.f32.vlgmr.msra.gmra.mrb[4].mxu0 %vm2023_vm1, %v20322_v59  ;;  %v16513_v43 = vpop.f32.mrb[8].mxu1 }
 0x9ef   : > { %v2682_v44 = vmul.f32 0.35355338, %v16513_v43  ;;  %v2672_v45 = vpop.f32.mrb[9].mxu1 }
 0x9f0   : > { %v2681_v46 = vmul.f32 0.35355338, %v2672_v45 }
 0x9f1   : > { %v2686_v47 = vsel %vm2113_vm3, %v2682_v44, -inf }
 0x9f2   : > { %2687 = vmax.xlane.f32.xlu0 %v2686_v47  ;;  %v2683_v48 = vsel %vm2113_vm3, %v2681_v46, -inf }
 0x9f3   : > { %2684 = vmax.xlane.f32.xlu1 %v2683_v48 }
 0x9f6   : > { %v16532_v49 = vpop.f32.mrb[10].mxu1 }
 0x9f7   : > { %v2959_v50 = vpop.f32.mrb[11].mxu1  ;;  %v2969_v1 = vmul.f32 0.35355338, %v16532_v49 }
 0x9f9   : > { %v2973_v3 = vsel %vm2113_vm3, %v2969_v1, -inf }
 0xa04   : > { %18103 = vrot.lane.b32.xlu1 %v20288_v23, %s21387_s4 }
 0xa08   : > { %18108 = vrot.lane.b32.xlu1 %v20288_v23, %s21383_s9  ;;  %v2968_v23 = vmul.f32 0.35355338, %v2959_v50 }
 0xa0a   : > { %v2970_v2 = vsel %vm2113_vm3, %v2968_v23, -inf }
 0xa7f   : > { %v2688_v51 = vpop.xlane.xlu0 %2687 }
 0xa80   : > { %v2690_v52 = vsub.f32 %v2682_v44, %v2688_v51  ;;  %v2685_v53 = vpop.xlane.xlu1 %2684 }
 0xa81   : > { %v2689_v54 = vsub.f32 %v2681_v46, %v2685_v53 }
 0xa82   : > { %v2693_v55 = vmul.f32 1.442695, %v2690_v52 }
 0xa83   : > { %v2691_v56 = vmul.f32 1.442695, %v2689_v54 }
 0xa84   : > { %v18104_v57 = vpop.permute.xlu1 %18103 }
 0xa85   : > { %18233 = vpow2.f32 %v2691_v56  ;;  %v18106_v58 = vunpack.i.h.bf16 %v18104_v57  ;;  %v18105_v59 = vunpack.i.l.bf16 %v18104_v57  ;;  %v3221_v57 = vld [vmem:[#allocation10 + $0x8] sm:$0xff] }
 0xa86   : > { %18235 = vpow2.f32 %v2693_v55 }
 0xa87   : > { %v17056_v60 = vpack.c.bf16 %v18106_v58, %v18105_v59  ;;  %v3225_v58 = vld [vmem:[#allocation10 + $0x88] sm:$0xff]  ;;  %v3223_v59 = vld [vmem:[#allocation10 + $0x18] sm:$0xff] }
 0xa88   : > { %v18109_v11 = vpop.permute.xlu1 %18108 }
 0xa89   : > { %17057 = vmatprep.subr.bf16.mxu0 %v17056_v60  ;;  %v18111_v17 = vunpack.i.h.bf16 %v18109_v11  ;;  %v18110_v18 = vunpack.i.l.bf16 %v18109_v11  ;;  %v3232_v11 = vld [vmem:[#allocation10 + $0x180] sm:$0xff] }
 0xa8a   : > { %17059 = vmatpush3.bf16.msra.mxu0 %v17056_v60  ;;  %v17070_v60 = vpack.c.bf16 %v3225_v58, %v3221_v57  ;;  %v3647_v58 = vld [vmem:[#allocation13 + $0xa8] sm:$0xff] }
 0xa8b   : > { %16521 = vmatprep.subr.mxu0 %v15937_v4  ;;  %v17066_v24 = vpack.c.bf16 %v18111_v17, %v18110_v18  ;;  %v3443_v18 = vld [vmem:[#allocation10 + $0x28] sm:$0xff] }
 0xa8c   : > { %17071 = vmatprep.subr.bf16.mxu1 %v17070_v60  ;;  %v3649_v60 = vld [vmem:[#allocation13 + $0xb8] sm:$0xff] }
 0xa8f   : > { %v18234_v61 = vpop.eup %18233 }
 0xa90   : > { %v2695_v62 = vsel %vm2113_vm3, %v18234_v61, 0.0  ;;  %v18236_v63 = vpop.eup %18235 }
 0xa91   : > { %2696 = vadd.xlane.f32.xlu0 %v2695_v62  ;;  %v2698_v0 = vsel %vm2113_vm3, %v18236_v63, 0.0  ;;  %v3220_v62 = vld [vmem:[#allocation10] sm:$0xff] }
 0xa95   : > { %2699 = vadd.xlane.f32.xlu0 %v2698_v0 }
 0xa99   : > { %2971 = vmax.xlane.f32.xlu0 %v2970_v2  ;;  %v3226_v2 = vld [vmem:[#allocation10 + $0x90] sm:$0xff] }
 0xa9d   : > { %2974 = vmax.xlane.f32.xlu0 %v2973_v3 }
 0xb1e   : > { %v2697_v6 = vpop.xlane.xlu0 %2696 }
 0xb1f   : > { %18237 = vrcp.f32 %v2697_v6  ;;  %v3233_v6 = vld [vmem:[#allocation10 + $0x188] sm:$0xff] }
 0xb22   : > { %v2700_v7 = vpop.xlane.xlu0 %2699 }
 0xb23   : > { %18239 = vrcp.f32 %v2700_v7  ;;  %v3231_v7 = vld [vmem:[#allocation10 + $0x118] sm:$0xff] }
 0xb26   : > { %v2972_v8 = vpop.xlane.xlu0 %2971 }
 0xb27   : > { %v2976_v9 = vsub.f32 %v2968_v23, %v2972_v8 }
 0xb29   : > { %v18238_v10 = vpop.eup %18237  ;;  %v2978_v12 = vmul.f32 1.442695, %v2976_v9  ;;  %v3235_v9 = vld [vmem:[#allocation10 + $0x198] sm:$0xff] }
 0xb2a   : > { %v2975_v14 = vpop.xlane.xlu0 %2974  ;;  %v2703_v15 = vmul.f32 %v18238_v10, %v18234_v61  ;;  %v3227_v61 = vld [vmem:[#allocation10 + $0x98] sm:$0xff]  ;;  %v3228_v10 = vld [vmem:[#allocation10 + $0x100] sm:$0xff] }
 0xb2b   : > { %18241 = vpow2.f32 %v2978_v12  ;;  %v2977_v16 = vsub.f32 %v2969_v1, %v2975_v14  ;;  %v17078_v23 = vpack.c.bf16 %v3227_v61, %v3223_v59  ;;  %v3222_v1 = vld [vmem:[#allocation10 + $0x10] sm:$0xff]  ;;  %v17082_v12 = vpack.c.bf16 %v3235_v9, %v3231_v7  ;;  %v3645_v59 = vld [vmem:[#allocation13 + $0x38] sm:$0xff]  ;;  %v3651_v7 = vld [vmem:[#allocation13 + $0x128] sm:$0xff] }
 0xb2c   : > { %16518 = vmatprep.mubr.msk.f32.mxu0 %vm2113_vm3, %v2703_v15  ;;  %v17080_v3 = vpack.c.bf16 %v3226_v2, %v3222_v1  ;;  %v17076_v14 = vpack.c.bf16 %v3232_v11, %v3228_v10  ;;  %v3230_v15 = vld [vmem:[#allocation10 + $0x110] sm:$0xff]  ;;  %v3646_v1 = vld [vmem:[#allocation13 + $0xa0] sm:$0xff]  ;;  %v3653_v9 = vld [vmem:[#allocation13 + $0x138] sm:$0xff] }
 0xb2d   : > { %v18240_v19 = vpop.eup %18239  ;;  %v2980_v20 = vmul.f32 1.442695, %v2977_v16  ;;  %v3234_v16 = vld [vmem:[#allocation10 + $0x190] sm:$0xff]  ;;  %v3657_v11 = vld [vmem:[#allocation13 + $0x1b8] sm:$0xff] }
 0xb2e   : > { %v2704_v22 = vmul.f32 %v18240_v19, %v18236_v63  ;;  %v3224_v63 = vld [vmem:[#allocation10 + $0x80] sm:$0xff]  ;;  %v17084_v17 = vpack.c.bf16 %v3234_v16, %v3230_v15  ;;  %v3447_v19 = vld [vmem:[#allocation10 + $0xa8] sm:$0xff]  ;;  %v3644_v2 = vld [vmem:[#allocation13 + $0x30] sm:$0xff]  ;;  %v17114_v15 = vpack.c.bf16 %v3657_v11, %v3653_v9 }
 0xb2f   : > { %18243 = vpow2.f32 %v2980_v20  ;;  %v17072_v0 = vpack.c.bf16 %v3224_v63, %v3220_v62  ;;  %v3445_v20 = vld [vmem:[#allocation10 + $0x38] sm:$0xff] }
 0xb30   : > { %16519 = vmatmul.mubr.msk.f32.vlgmr.msra.gmra.mrb[6].mxu0 %vm2113_vm3, %v2704_v22  ;;  %v17086_v22 = vpack.c.bf16 %v3447_v19, %v3443_v18  ;;  %v3656_v18 = vld [vmem:[#allocation13 + $0x1b0] sm:$0xff] }
 0xb31   : > { %16522 = vmatpush3.msra.mxu0 %v15937_v4  ;;  %17073 = vmatpush1.bf16.msra.mxu1 %v17072_v0  ;;  %v3229_v4 = vld [vmem:[#allocation10 + $0x108] sm:$0xff]  ;;  %v3642_v0 = vld [vmem:[#allocation13 + $0x20] sm:$0xff] }
 0xb32   : > { %17067 = vmatprep.subr.bf16.mxu0 %v17066_v24  ;;  %v17074_v8 = vpack.c.bf16 %v3233_v6, %v3229_v4  ;;  %v17104_v4 = vpack.c.bf16 %v3646_v1, %v3642_v0 }
 0xb34   : > { %17075 = vmatprep.subr.bf16.mxu1 %v17074_v8  ;;  %v3655_v8 = vld [vmem:[#allocation13 + $0x1a8] sm:$0xff] }
 0xb35   : > { %v18242_v25 = vpop.eup %18241  ;;  %17077 = vmatpush1.bf16.msra.mxu1 %v17076_v14  ;;  %v17106_v10 = vpack.c.bf16 %v3655_v8, %v3651_v7  ;;  %v3654_v14 = vld [vmem:[#allocation13 + $0x1a0] sm:$0xff] }
 0xb36   : > { %v2982_v27 = vsel %vm2113_vm3, %v18242_v25, 0.0  ;;  %17087 = vmatprep.subr.bf16.mxu1 %v17086_v22  ;;  %v3431_v22 = vld [vmem:[#allocation13 + $0x88] sm:$0xff] }
 0xb37   : > { %2983 = vadd.xlane.f32.xlu0 %v2982_v27 }
 0xb39   : > { %v18244_v28 = vpop.eup %18243 }
 0xb3a   : > { %v2985_v29 = vsel %vm2113_vm3, %v18244_v28, 0.0 }
 0xb3b   : > { %2986 = vadd.xlane.f32.xlu0 %v2985_v29 }
 0xbc4   : > { %v2984_v30 = vpop.xlane.xlu0 %2983 }
 0xbc5   : > { %18245 = vrcp.f32 %v2984_v30 }
 0xbc8   : > { %v2987_v26 = vpop.xlane.xlu0 %2986 }
 0xbc9   : > { %18247 = vrcp.f32 %v2987_v26 }
 0xbcf   : > { %v18246_v31 = vpop.eup %18245 }
 0xbd0   : > { %v2990_v35 = vmul.f32 %v18246_v31, %v18242_v25  ;;  %v19461_v25 = vmov 0.0  }
 0xbd1   : > { %3328 = vmatprep.mubr.f32.mxu1 %v19461_v25 }
 0xbd3   : > { %v18248_v34 = vpop.eup %18247 }
 0xbd4   : > { %v2991_v37 = vmul.f32 %v18248_v34, %v18244_v28  ;;  %v15950_v34 = vld [vmem:[#allocation7] ss:$0 sm:$0xff] }
 0xc03   : > { %v16520_v32 = vpop.f32.mrb[6].mxu0 }
 0xc04   : > { %v2783_v33 = vpop.f32.mrb[7].mxu0 }
 0xc05   : > { %16523 = vmatprep.mubr.msk.f32.mxu0 %vm2023_vm1, %v2783_v33 }
 0xc06   : > { %16524 = vmatmul.mubr.msk.f32.vlgmr.msra.gmra.mrb[4].mxu0 %vm2023_vm1, %v16520_v32 }
 0xc07   : > { %17069 = vmatpush3.bf16.msra.mxu0 %v17066_v24  ;;  %16537 = vmatprep.mubr.msk.f32.mxu0 %vm2113_vm3, %v2990_v35  ;;  %v3449_v24 = vld [vmem:[#allocation10 + $0xb8] sm:$0xff]  ;;  %v3442_v35 = vld [vmem:[#allocation10 + $0x20] sm:$0xff] }
 0xc08   : > { %16540 = vmatprep.subr.mxu0 %v15946_v36  ;;  %v17094_v27 = vpack.c.bf16 %v3449_v24, %v3445_v20  ;;  %v3427_v20 = vld [vmem:[#allocation13 + $0x8] sm:$0xff]  ;;  %v3429_v24 = vld [vmem:[#allocation13 + $0x18] sm:$0xff] }
 0xc0a   : > { %16538 = vmatmul.mubr.msk.f32.vlgmr.msra.gmra.mrb[8].mxu0 %vm2113_vm3, %v2991_v37  ;;  %v3446_v37 = vld [vmem:[#allocation10 + $0xa0] sm:$0xff] }
 0xc0b   : > { %16541 = vmatpush3.msra.mxu0 %v15946_v36 }
 0xc0c   : > { %17079 = vmatprep.subr.bf16.mxu0 %v17078_v23  ;;  %v17110_v23 = vpack.c.bf16 %v3649_v60, %v3645_v59 }
 0xcdd   : > { %v16539_v38 = vpop.f32.mrb[8].mxu0 }
 0xcde   : > { %v3070_v39 = vpop.f32.mrb[9].mxu0 }
 0xcdf   : > { %16542 = vmatprep.mubr.msk.f32.mxu0 %vm2023_vm1, %v3070_v39  ;;  %v3448_v39 = vld [vmem:[#allocation10 + $0xb0] sm:$0xff] }
 0xce0   : > { %16543 = vmatmul.mubr.msk.f32.vlgmr.msra.gmra.mrb[4].mxu0 %vm2023_vm1, %v16539_v38  ;;  %v3444_v38 = vld [vmem:[#allocation10 + $0x30] sm:$0xff] }
 0xce1   : > { %17081 = vmatpush1.bf16.msra.mxu0 %v17080_v3  ;;  %3405 = vmatprep.mubr.f32.mxu0 %v19461_v25  ;;  %v3648_v3 = vld [vmem:[#allocation13 + $0xb0] sm:$0xff] }
 0xce2   : > { %17083 = vmatprep.subr.bf16.mxu0 %v17082_v12  ;;  %v17112_v6 = vpack.c.bf16 %v3648_v3, %v3644_v2  ;;  %v3650_v12 = vld [vmem:[#allocation13 + $0x120] sm:$0xff] }
 0xce3   : > { %v17108_v16 = vpack.c.bf16 %v3654_v14, %v3650_v12 }
 0xce5   : > { %17085 = vmatpush1.bf16.msra.mxu0 %v17084_v17  ;;  %v3652_v17 = vld [vmem:[#allocation13 + $0x130] sm:$0xff] }
 0xce6   : > { %17095 = vmatprep.subr.bf16.mxu0 %v17094_v27  ;;  %v17116_v19 = vpack.c.bf16 %v3656_v18, %v3652_v17  ;;  %v17118_v27 = vpack.c.bf16 %v3431_v22, %v3427_v20 }
 0xdb3   : > { %v16544_v41 = vpop.f32.mrb[4].mxu0 }
 0xdb4   : > { %v3172_v42 = vadd.f32 %v16544_v41, %v15949_v40  ;;  %v3153_v43 = vpop.f32.mrb[5].mxu0  ;;  %v3451_v41 = vld [vmem:[#allocation10 + $0x128] sm:$0xff] }
 0xdb5   : > { %v3171_v44 = vadd.f32 %v15949_v40, %v3153_v43  ;;  %v15951_v40 = vld [vmem:[#allocation9] ss:$0 sm:$0xff]  ;;  %v3455_v43 = vld [vmem:[#allocation10 + $0x1a8] sm:$0xff] }
 0xdb6   : > { %v3174_v45 = vadd.f32 %v3172_v42, %v20276_v13 }
 0xdb7   : > { %v3173_v46 = vadd.f32 %v3171_v44, %v20266_v5  ;;  %v3453_v44 = vld [vmem:[#allocation10 + $0x138] sm:$0xff] }
 0xdb8   : > { %v3180_v47 = vsel %vm1855_vm0, %v3174_v45, 0.0 }
 0xdb9   : > { %3181 = vadd.xlane.f32.xlu1 %v3180_v47  ;;  %v3177_v48 = vsel %vm1855_vm0, %v3173_v46, 0.0  ;;  %v17088_v47 = vpack.c.bf16 %v3446_v37, %v3442_v35  ;;  %v3458_v35 = vld [vmem:[#allocation12 + $0x4] sm:$0xf] }
 0xdba   : > { %3178 = vadd.xlane.f32.xlu0 %v3177_v48  ;;  %v17096_v48 = vpack.c.bf16 %v3448_v39, %v3444_v38 }
 0xe46   : > { %v3182_v49 = vpop.xlane.xlu1 %3181 }
 0xe47   : > { %v3185_v50 = vmul.f32 0.03125, %v3182_v49  ;;  %v3179_v51 = vpop.xlane.xlu0 %3178  ;;  %v3450_v49 = vld [vmem:[#allocation10 + $0x120] sm:$0xff] }
 0xe48   : > { %v3184_v52 = vmul.f32 0.03125, %v3179_v51 }
 0xe49   : > { %v20392_v53 = vsub.f32 %v3174_v45, %v3185_v50  ;;  %v3457_v45 = vld [vmem:[#allocation10 + $0x1b8] sm:$0xff] }
 0xe4a   : > { %v3186_v54 = vsub.f32 %v3173_v46, %v3184_v52  ;;  %v3454_v52 = vld [vmem:[#allocation10 + $0x1a0] sm:$0xff] }
 0xe4b   : > { %v3189_v13 = vmul.f32 %v20392_v53, %v20392_v53  ;;  %v17092_v61 = vpack.c.bf16 %v3454_v52, %v3450_v49  ;;  %v3426_v49 = vld [vmem:[#allocation13] sm:$0xff]  ;;  %v3428_v52 = vld [vmem:[#allocation13 + $0x10] sm:$0xff] }
 0xe4c   : > { %v3188_v55 = vmul.f32 %v3186_v54, %v3186_v54 }
 0xe4d   : > { %v3193_v5 = vsel %vm1855_vm0, %v3189_v13, 0.0  ;;  %v17098_v13 = vpack.c.bf16 %v3457_v45, %v3453_v44 }
 0xe4e   : > { %v3190_v56 = vsel %vm1855_vm0, %v3188_v55, 0.0  ;;  %v3452_v55 = vld [vmem:[#allocation10 + $0x130] sm:$0xff] }
 0xe4f   : > { %3191 = vadd.xlane.f32.xlu0 %v3190_v56  ;;  %v17090_v56 = vpack.c.bf16 %v3455_v43, %v3451_v41 }
 0xe53   : > { %3194 = vadd.xlane.f32.xlu0 %v3193_v5  ;;  %v3643_v5 = vld [vmem:[#allocation13 + $0x28] sm:$0xff] }
 0xe54   : > { %v17102_v63 = vpack.c.bf16 %v3647_v58, %v3643_v5  ;;  %v3435_v5 = vld [vmem:[#allocation13 + $0x108] sm:$0xff] }
 0xedc   : > { %v3192_v28 = vpop.xlane.xlu0 %3191 }
 0xedd   : > { %v3196_v29 = vmul.f32 0.03125, %v3192_v28  ;;  %v3433_v28 = vld [vmem:[#allocation13 + $0x98] sm:$0xff] }
 0xedf   : > { %v3198_v30 = vadd.f32 1e-05, %v3196_v29  ;;  %v17126_v29 = vpack.c.bf16 %v3433_v28, %v3429_v24  ;;  %v3434_v28 = vld [vmem:[#allocation13 + $0x100] sm:$0xff] }
 0xee0   : > { %v3195_v26 = vpop.xlane.xlu0 %3194 }
 0xee1   : > { %18249 = vrsqrt.f32 %v3198_v30  ;;  %v3197_v31 = vmul.f32 0.03125, %v3195_v26  ;;  %v3238_v30 = vlaneseq }
 0xee3   : > { %v3199_v32 = vadd.f32 1e-05, %v3197_v31  ;;  %v3239_v26 = vshrl.u32 %v3238_v30, 7 }
 0xee5   : > { %18251 = vrsqrt.f32 %v3199_v32  ;;  %v20433_v37 = vsub.s32 2, %v3239_v26  ;;  %v20435_v38 = vsub.s32 1, %v3239_v26  ;;  %v20437_v39 = vsub.s32 3, %v3239_v26 }
 0xeeb   : > { %v18250_v33 = vpop.eup %18249 }
 0xeec   : > { %v3202_v36 = vmul.f32 %v18250_v33, %v3186_v54  ;;  %v3456_v54 = vld [vmem:[#allocation10 + $0x1b0] sm:$0xff] }
 0xeee   : > { %v3210_v42 = vmul.f32 %v15950_v34, %v3202_v36  ;;  %v20431_v36 = vsub.s32 0, %v3239_v26 }
 0xeef   : > { %v18252_v46 = vpop.eup %18251 }
 0xef0   : > { %v20400_v50 = vadd.f32 %v15951_v40, %v3210_v42  ;;  %v3203_v51 = vmul.f32 %v18252_v46, %v20392_v53  ;;  %v17100_v53 = vpack.c.bf16 %v3456_v54, %v3452_v55  ;;  %v20443_v42 = vld [vmem:[#allocation12] sm:$0xf]  ;;  %v3463_v45 = vrot.slane %v3458_v35, %v20431_v36 }
 0xef1   : > { %v3471_v46 = vrot.slane %v3458_v35, %v20433_v37  ;;  %v20455_v55 = vrot.slane %v20443_v42, %v20435_v38 }
 0xef2   : > { %v3211_v57 = vmul.f32 %v15950_v34, %v3203_v51  ;;  %15952 = vmatmul.mubr.msk.f32.vlgmr.msra.gmra.mrb[12].mxu1 %vm1855_vm0, %v20400_v50  ;;  %15954 = vmatmul.mubr.msk.f32.vlgmr.msra.gmra.mrb[10].mxu0 %vm1855_vm0, %v20400_v50  ;;  %v3430_v51 = vld [vmem:[#allocation13 + $0x80] sm:$0xff] }
 0xef3   : > { %17089 = vmatpush1.bf16.msra.mxu1 %v17088_v47  ;;  %17097 = vmatpush1.bf16.msra.mxu0 %v17096_v48  ;;  %v3467_v47 = vrot.slane %v3458_v35, %v20435_v38  ;;  %v3475_v48 = vrot.slane %v3458_v35, %v20437_v39  ;;  %v17120_v2 = vpack.c.bf16 %v3430_v51, %v3426_v49  ;;  %v3440_v35 = vld [vmem:[#allocation13 + $0x190] sm:$0xff]  ;;  %v3965_v49 = vld [vmem:[#allocation10 + $0xd8] sm:$0xff] }
 0xef4   : > { %v20407_v62 = vadd.f32 %v15951_v40, %v3211_v57  ;;  %3334 = vmatprep.mubr.f32.mxu1 %v19461_v25  ;;  %3411 = vmatprep.mubr.f32.mxu0 %v19461_v25  ;;  %v3439_v57 = vld [vmem:[#allocation13 + $0x188] sm:$0xff] }
 0xef5   : > { %17091 = vmatprep.subr.bf16.mxu1 %v17090_v56  ;;  %17099 = vmatprep.subr.bf16.mxu0 %v17098_v13  ;;  %v3432_v13 = vld [vmem:[#allocation13 + $0x90] sm:$0xff] }
 0xef6   : > { %15953 = vmatmul.mubr.msk.f32.gmra.mrb[14].mxu1 %vm1855_vm0, %v20407_v62  ;;  %15955 = vmatmul.mubr.msk.f32.gmra.mrb[12].mxu0 %vm1855_vm0, %v20407_v62  ;;  %v17128_v3 = vpack.c.bf16 %v3432_v13, %v3428_v52 }
 0xef7   : > { %17093 = vmatpush1.bf16.msra.mxu1 %v17092_v61  ;;  %17101 = vmatpush1.bf16.msra.mxu0 %v17100_v53  ;;  %v3437_v53 = vld [vmem:[#allocation13 + $0x118] sm:$0xff] }
 0xef8   : > { %3544 = vmatprep.mubr.f32.mxu1 %v19461_v25  ;;  %3621 = vmatprep.mubr.f32.mxu0 %v19461_v25 }
 0xef9   : > { %17103 = vmatprep.subr.bf16.mxu1 %v17102_v63  ;;  %17111 = vmatprep.subr.bf16.mxu0 %v17110_v23  ;;  %v3441_v63 = vld [vmem:[#allocation13 + $0x198] sm:$0xff]  ;;  %v20459_v23 = vrot.slane %v20443_v42, %v20437_v39 }
 0xefa   : > { %15956 = vmatmul.mubr.msk.f32.vlgmr.msra.gmra.mrb[16].mxu1 %vm1855_vm0, %v20400_v50  ;;  %15958 = vmatmul.mubr.msk.f32.vlgmr.msra.gmra.mrb[14].mxu0 %vm1855_vm0, %v20400_v50  ;;  %v17130_v11 = vpack.c.bf16 %v3441_v63, %v3437_v53  ;;  %v3964_v53 = vld [vmem:[#allocation10 + $0xd0] sm:$0xff] }
 0xefb   : > { %3550 = vmatprep.mubr.f32.mxu1 %v19461_v25  ;;  %3627 = vmatprep.mubr.f32.mxu0 %v19461_v25 }
 0xefe   : > { %15957 = vmatmul.mubr.msk.f32.gmra.mrb[18].mxu1 %vm1855_vm0, %v20407_v62  ;;  %15959 = vmatmul.mubr.msk.f32.gmra.mrb[16].mxu0 %vm1855_vm0, %v20407_v62 }
 0xf00   : > { %17105 = vmatpush1.bf16.xpose.msra.mxu1 %v17104_v4  ;;  %17113 = vmatpush1.bf16.xpose.msra.mxu0 %v17112_v6  ;;  %v17122_v4 = vpack.c.bf16 %v3439_v57, %v3435_v5  ;;  %v3958_v57 = vld [vmem:[#allocation10 + $0x40] sm:$0xff] }
 0xf01   : > { %17107 = vmatprep.subr.bf16.mxu1 %v17106_v10  ;;  %17115 = vmatprep.subr.bf16.mxu0 %v17114_v15 }
 0xf08   : > { %17109 = vmatpush1.bf16.xpose.msra.mxu1 %v17108_v16  ;;  %17117 = vmatpush1.bf16.xpose.msra.mxu0 %v17116_v19 }
 0xf09   : > { %17119 = vmatprep.subr.bf16.mxu1 %v17118_v27  ;;  %17127 = vmatprep.subr.bf16.mxu0 %v17126_v29  ;;  %v3438_v29 = vld [vmem:[#allocation13 + $0x180] sm:$0xff] }
 0xf0a   : > { %v17124_v51 = vpack.c.bf16 %v3438_v29, %v3434_v28  ;;  %v4160_v28 = vld [vmem:[#allocation13 + $0x50] sm:$0xff] }
 0xfc5   : > { %v20427_v31 = vpop.f32.mrb[12].mxu1  ;;  %v20429_v32 = vpop.f32.mrb[10].mxu0 }
 0xfc6   : > { %v3332_v33 = vpop.f32.mrb[13].mxu1  ;;  %v3409_v34 = vpop.f32.mrb[11].mxu0 }
 0xfc7   : > { %v3333_v6 = vadd.f32 %v3332_v33, %v20455_v55  ;;  %v3410_v19 = vadd.f32 %v3409_v34, %v20459_v23  ;;  %v3436_v33 = vld [vmem:[#allocation13 + $0x110] sm:$0xff] }
 0xfc8   : > { %v17132_v52 = vpack.c.bf16 %v3440_v35, %v3436_v33  ;;  %v4167_v33 = vld [vmem:[#allocation13 + $0x148] sm:$0xff] }
 0xfc9   : > { %v20439_v40 = vpop.f32.mrb[14].mxu1  ;;  %v20441_v41 = vpop.f32.mrb[12].mxu0  ;;  %v3419_v34 = vmax.f32 %v3333_v6, 0.0  ;;  %v4171_v35 = vld [vmem:[#allocation13 + $0x1c8] sm:$0xff] }
 0xfca   : > { %v20445_v43 = vpop.f32.mrb[15].mxu1  ;;  %v20447_v44 = vpop.f32.mrb[13].mxu0 }
 0xfcb   : > { %v3339_v63 = vadd.f32 %v20445_v43, %v20455_v55  ;;  %v3970_v55 = vld [vmem:[#allocation10 + $0x1c0] sm:$0xff] }
 0xfcd   : > { %v3546_v54 = vpop.f32.mrb[16].mxu1  ;;  %v3623_v56 = vpop.f32.mrb[14].mxu0 }
 0xfce   : > { %v3547_v58 = vadd.f32 %v3546_v54, %v3463_v45  ;;  %v3624_v59 = vadd.f32 %v3623_v56, %v3471_v46  ;;  %v3548_v60 = vpop.f32.mrb[17].mxu1  ;;  %v3625_v61 = vpop.f32.mrb[15].mxu0  ;;  %v3241_v54 = vrot.slane %v20443_v42, %v20431_v36  ;;  %v3249_v56 = vrot.slane %v20443_v42, %v20433_v37 }
 0xfcf   : > { %v3549_v0 = vadd.f32 %v3548_v60, %v3467_v47  ;;  %v3626_v1 = vadd.f32 %v3625_v61, %v3475_v48  ;;  %v3962_v60 = vld [vmem:[#allocation10 + $0xc0] sm:$0xff]  ;;  %v3960_v61 = vld [vmem:[#allocation10 + $0x50] sm:$0xff]  ;;  %v3416_v42 = vadd.f32 %v20447_v44, %v20459_v23 }
 0xfd0   : > { %v3634_v12 = vmax.f32 %v3547_v58, 0.0  ;;  %v3636_v14 = vmax.f32 %v3624_v59, 0.0  ;;  %v3331_v58 = vadd.f32 %v20427_v31, %v3241_v54  ;;  %v3408_v59 = vadd.f32 %v20429_v32, %v3249_v56  ;;  %v3972_v44 = vld [vmem:[#allocation10 + $0x1d0] sm:$0xff] }
 0xfd1   : > { %v3635_v7 = vmax.f32 %v3549_v0, 0.0  ;;  %v3637_v8 = vmax.f32 %v3626_v1, 0.0  ;;  %v3552_v9 = vpop.f32.mrb[18].mxu1  ;;  %v3629_v10 = vpop.f32.mrb[16].mxu0  ;;  %v3967_v0 = vld [vmem:[#allocation10 + $0x148] sm:$0xff]  ;;  %v17144_v6 = vpack.c.bf16 %v3964_v53, %v3960_v61  ;;  %v3337_v32 = vadd.f32 %v20439_v40, %v3241_v54  ;;  %v4172_v54 = vld [vmem:[#allocation13 + $0x1d0] sm:$0xff] }
 0xfd2   : > { %v3553_v15 = vadd.f32 %v3552_v9, %v3463_v45  ;;  %v3630_v16 = vadd.f32 %v3629_v10, %v3471_v46  ;;  %v3554_v17 = vpop.f32.mrb[19].mxu1  ;;  %v3631_v18 = vpop.f32.mrb[17].mxu0  ;;  %v3959_v45 = vld [vmem:[#allocation10 + $0x48] sm:$0xff]  ;;  %v3421_v46 = vmax.f32 %v3410_v19, 0.0  ;;  %v3418_v31 = vmax.f32 %v3331_v58, 0.0  ;;  %v3966_v9 = vld [vmem:[#allocation10 + $0x140] sm:$0xff] }
 0xfd3   : > { %v3555_v20 = vadd.f32 %v3554_v17, %v3467_v47  ;;  %v3632_v22 = vadd.f32 %v3631_v18, %v3475_v48  ;;  %3722 = vmatprep.mubr.f32.mxu1 %v3635_v7  ;;  %3797 = vmatprep.mubr.f32.mxu0 %v3637_v8  ;;  %v3963_v47 = vld [vmem:[#allocation10 + $0xc8] sm:$0xff]  ;;  %v3961_v48 = vld [vmem:[#allocation10 + $0x58] sm:$0xff]  ;;  %v3420_v7 = vmax.f32 %v3408_v59, 0.0  ;;  %v3414_v8 = vadd.f32 %v20441_v41, %v3249_v56 }
 0xfd4   : > { %3723 = vmatmul.mubr.f32.vlgmr.msra.gmra.mrb[20].mxu1 %v3634_v12  ;;  %3798 = vmatmul.mubr.f32.vlgmr.msra.gmra.mrb[18].mxu0 %v3636_v14  ;;  %v3638_v30 = vmax.f32 %v3553_v15, 0.0  ;;  %v3640_v26 = vmax.f32 %v3630_v16, 0.0  ;;  %v17134_v13 = vpack.c.bf16 %v3963_v47, %v3959_v45  ;;  %v17142_v5 = vpack.c.bf16 %v3965_v49, %v3961_v48  ;;  %v3971_v1 = vld [vmem:[#allocation10 + $0x1c8] sm:$0xff]  ;;  %v3968_v14 = vld [vmem:[#allocation10 + $0x150] sm:$0xff]  ;;  %v4161_v18 = vld [vmem:[#allocation13 + $0x58] sm:$0xff] }
 0xfd5   : > { %v3639_v24 = vmax.f32 %v3555_v20, 0.0  ;;  %v3641_v27 = vmax.f32 %v3632_v22, 0.0  ;;  %17121 = vmatpush1.bf16.xpose.msra.mxu1 %v17120_v2  ;;  %17129 = vmatpush1.bf16.xpose.msra.mxu0 %v17128_v3  ;;  %v3969_v2 = vld [vmem:[#allocation10 + $0x158] sm:$0xff]  ;;  %v3423_v10 = vmax.f32 %v3339_v63, 0.0  ;;  %v17138_v12 = vpack.c.bf16 %v3971_v1, %v3967_v0  ;;  %v4159_v41 = vld [vmem:[#allocation13 + $0x48] sm:$0xff]  ;;  %v4166_v47 = vld [vmem:[#allocation13 + $0x140] sm:$0xff] }
 0xfd6   : > { %17123 = vmatprep.subr.bf16.mxu1 %v17122_v4  ;;  %17131 = vmatprep.subr.bf16.mxu0 %v17130_v11  ;;  %v3973_v3 = vld [vmem:[#allocation10 + $0x1d8] sm:$0xff]  ;;  %v17136_v4 = vpack.c.bf16 %v3962_v60, %v3958_v57  ;;  %v3425_v11 = vmax.f32 %v3416_v42, 0.0  ;;  %v3422_v23 = vmax.f32 %v3337_v32, 0.0  ;;  %v3424_v15 = vmax.f32 %v3414_v8, 0.0  ;;  %v4163_v17 = vld [vmem:[#allocation13 + $0xc8] sm:$0xff]  ;;  %v4170_v48 = vld [vmem:[#allocation13 + $0x1c0] sm:$0xff] }
 0xfd7   : > { %3727 = vmatprep.mubr.f32.mxu1 %v3639_v24  ;;  %3802 = vmatprep.mubr.f32.mxu0 %v3641_v27  ;;  %v17146_v43 = vpack.c.bf16 %v3973_v3, %v3969_v2  ;;  %v17140_v16 = vpack.c.bf16 %v3970_v55, %v3966_v9  ;;  %v17148_v40 = vpack.c.bf16 %v3972_v44, %v3968_v14  ;;  %v4165_v20 = vld [vmem:[#allocation13 + $0xd8] sm:$0xff]  ;;  %v4158_v24 = vld [vmem:[#allocation13 + $0x40] sm:$0xff] }
 0xfd8   : > { %3728 = vmatmul.mubr.f32.gmra.mrb[22].mxu1 %v3638_v30  ;;  %3803 = vmatmul.mubr.f32.gmra.mrb[20].mxu0 %v3640_v26  ;;  %v17150_v19 = vpack.c.bf16 %v4163_v17, %v4159_v41  ;;  %v17158_v22 = vpack.c.bf16 %v4165_v20, %v4161_v18  ;;  %v4162_v27 = vld [vmem:[#allocation13 + $0xc0] sm:$0xff]  ;;  %v4164_v30 = vld [vmem:[#allocation13 + $0xd0] sm:$0xff]  ;;  %v4169_v45 = vld [vmem:[#allocation13 + $0x158] sm:$0xff] }
 0xfd9   : > { %3872 = vmatprep.mubr.f32.mxu1 %v3419_v34  ;;  %3947 = vmatprep.mubr.f32.mxu0 %v3421_v46  ;;  %v17152_v29 = vpack.c.bf16 %v4162_v27, %v4158_v24  ;;  %v17160_v26 = vpack.c.bf16 %v4164_v30, %v4160_v28  ;;  %v17154_v34 = vpack.c.bf16 %v4171_v35, %v4167_v33  ;;  %v4173_v46 = vld [vmem:[#allocation13 + $0x1d8] sm:$0xff]  ;;  %v4326_v17 = vld [vmem:[#allocation10 + $0x60] sm:$0xff]  ;;  %v4332_v24 = vld [vmem:[#allocation10 + $0xf0] sm:$0xff] }
 0xfda   : > { %v17162_v49 = vpack.c.bf16 %v4173_v46, %v4169_v45  ;;  %v4329_v57 = vld [vmem:[#allocation10 + $0x78] sm:$0xff]  ;;  %v4330_v18 = vld [vmem:[#allocation10 + $0xe0] sm:$0xff]  ;;  %v4335_v27 = vld [vmem:[#allocation10 + $0x168] sm:$0xff] }
 0xfdb   : > { %v4333_v59 = vld [vmem:[#allocation10 + $0xf8] sm:$0xff]  ;;  %v4339_v33 = vld [vmem:[#allocation10 + $0x1e8] sm:$0xff] }
 0xfdc   : > { %v17174_v60 = vpack.c.bf16 %v4333_v59, %v4329_v57  ;;  %v4337_v35 = vld [vmem:[#allocation10 + $0x178] sm:$0xff]  ;;  %v4338_v57 = vld [vmem:[#allocation10 + $0x1e0] sm:$0xff] }
 0xfdd   : > { %17125 = vmatpush1.bf16.xpose.msra.mxu1 %v17124_v51  ;;  %17133 = vmatpush1.bf16.xpose.msra.mxu0 %v17132_v52  ;;  %v17156_v51 = vpack.c.bf16 %v4170_v48, %v4166_v47  ;;  %v4168_v52 = vld [vmem:[#allocation13 + $0x150] sm:$0xff]  ;;  %v4341_v45 = vld [vmem:[#allocation10 + $0x1f8] sm:$0xff]  ;;  %v17168_v47 = vpack.c.bf16 %v4330_v18, %v4326_v17  ;;  %v4535_v17 = vld [vmem:[#allocation13 + $0x168] sm:$0xff] }
 0xfde   : > { %17135 = vmatprep.subr.bf16.mxu1 %v17134_v13  ;;  %17143 = vmatprep.subr.bf16.mxu0 %v17142_v5  ;;  %v17164_v56 = vpack.c.bf16 %v4172_v54, %v4168_v52  ;;  %v4327_v13 = vld [vmem:[#allocation10 + $0x68] sm:$0xff] }
 0xfdf   : > { %v4331_v5 = vld [vmem:[#allocation10 + $0xe8] sm:$0xff] }
 0xfe0   : > { %v17166_v58 = vpack.c.bf16 %v4331_v5, %v4327_v13  ;;  %v17178_v13 = vpack.c.bf16 %v4341_v45, %v4337_v35  ;;  %v4334_v5 = vld [vmem:[#allocation10 + $0x160] sm:$0xff]  ;;  %v4539_v18 = vld [vmem:[#allocation13 + $0x1e8] sm:$0xff] }
 0xfe4   : > { %3873 = vmatmul.mubr.f32.vlgmr.msra.gmra.mrb[24].mxu1 %v3418_v31  ;;  %3948 = vmatmul.mubr.f32.vlgmr.msra.gmra.mrb[22].mxu0 %v3420_v7 }
 0xfe5   : > { %3877 = vmatprep.mubr.f32.mxu1 %v3423_v10  ;;  %3952 = vmatprep.mubr.f32.mxu0 %v3425_v11  ;;  %v3974_v11 = vld [vmem:[#allocation12 + $0x8] sm:$0xf] }
 0xfe6   : > { %17137 = vmatpush1.bf16.msra.mxu1 %v17136_v4  ;;  %17145 = vmatpush1.bf16.msra.mxu0 %v17144_v6  ;;  %v3991_v41 = vrot.slane %v3974_v11, %v20437_v39 }
 0xfe7   : > { %17139 = vmatprep.subr.bf16.mxu1 %v17138_v12  ;;  %17147 = vmatprep.subr.bf16.mxu0 %v17146_v43 }
 0xfe8   : > { %3878 = vmatmul.mubr.f32.gmra.mrb[26].mxu1 %v3422_v23  ;;  %3953 = vmatmul.mubr.f32.gmra.mrb[24].mxu0 %v3424_v15  ;;  %v3979_v23 = vrot.slane %v3974_v11, %v20431_v36  ;;  %v3987_v15 = vrot.slane %v3974_v11, %v20433_v37 }
 0xfe9   : > { %4060 = vmatprep.mubr.f32.mxu1 %v19461_v25  ;;  %4137 = vmatprep.mubr.f32.mxu0 %v19461_v25 }
 0xfea   : > { %17141 = vmatpush1.bf16.msra.mxu1 %v17140_v16  ;;  %17149 = vmatpush1.bf16.msra.mxu0 %v17148_v40  ;;  %v3983_v40 = vrot.slane %v3974_v11, %v20435_v38 }
 0xfeb   : > { %17151 = vmatprep.subr.bf16.mxu1 %v17150_v19  ;;  %17159 = vmatprep.subr.bf16.mxu0 %v17158_v22  ;;  %v4328_v22 = vld [vmem:[#allocation10 + $0x70] sm:$0xff] }
 0xfec   : > { %v17176_v48 = vpack.c.bf16 %v4332_v24, %v4328_v22  ;;  %v4541_v22 = vld [vmem:[#allocation13 + $0x1f8] sm:$0xff]  ;;  %v4534_v24 = vld [vmem:[#allocation13 + $0x160] sm:$0xff] }
 0xfed   : > { %15960 = vmatmul.mubr.msk.f32.vlgmr.msra.gmra.mrb[28].mxu1 %vm1855_vm0, %v20400_v50  ;;  %15962 = vmatmul.mubr.msk.f32.vlgmr.msra.gmra.mrb[26].mxu0 %vm1855_vm0, %v20400_v50 }
 0xfee   : > { %4066 = vmatprep.mubr.f32.mxu1 %v19461_v25  ;;  %4143 = vmatprep.mubr.f32.mxu0 %v19461_v25 }
 0xff1   : > { %15961 = vmatmul.mubr.msk.f32.gmra.mrb[30].mxu1 %vm1855_vm0, %v20407_v62  ;;  %15963 = vmatmul.mubr.msk.f32.gmra.mrb[28].mxu0 %vm1855_vm0, %v20407_v62 }
 0xff3   : > { %17153 = vmatpush1.bf16.xpose.msra.mxu1 %v17152_v29  ;;  %17161 = vmatpush1.bf16.xpose.msra.mxu0 %v17160_v26 }
 0xff4   : > { %17155 = vmatprep.subr.bf16.mxu1 %v17154_v34  ;;  %17163 = vmatprep.subr.bf16.mxu0 %v17162_v49 }
 0xffb   : > { %17157 = vmatpush1.bf16.xpose.msra.mxu1 %v17156_v51  ;;  %17165 = vmatpush1.bf16.xpose.msra.mxu0 %v17164_v56  ;;  %v17170_v56 = vpack.c.bf16 %v4339_v33, %v4335_v27  ;;  %v4538_v27 = vld [vmem:[#allocation13 + $0x1e0] sm:$0xff] }
 0xffc   : > { %17167 = vmatprep.subr.bf16.mxu1 %v17166_v58  ;;  %17175 = vmatprep.subr.bf16.mxu0 %v17174_v60 }
0x10a7   : > { %v3724_v61 = vpop.f32.mrb[20].mxu1  ;;  %v3799_v53 = vpop.f32.mrb[18].mxu0 }
0x10a8   : > { %v3800_v63 = vadd.f32 %v3799_v53, %v3724_v61  ;;  %v3726_v42 = vpop.f32.mrb[21].mxu1  ;;  %v3801_v0 = vpop.f32.mrb[19].mxu0 }
0x10a9   : > { %v4336_v42 = vld [vmem:[#allocation10 + $0x170] sm:$0xff] }
0x10aa   : > { %v4340_v0 = vld [vmem:[#allocation10 + $0x1f0] sm:$0xff] }
0x10ab   : > { %v3729_v1 = vpop.f32.mrb[22].mxu1  ;;  %v3804_v2 = vpop.f32.mrb[20].mxu0 }
0x10ac   : > { %v3805_v3 = vadd.f32 %v3804_v2, %v3729_v1  ;;  %v3731_v4 = vpop.f32.mrb[23].mxu1  ;;  %v3806_v6 = vpop.f32.mrb[21].mxu0 }
0x10ad   : > { %v4531_v4 = vld [vmem:[#allocation13 + $0xe8] sm:$0xff]  ;;  %v4529_v6 = vld [vmem:[#allocation13 + $0x78] sm:$0xff] }
0x10b7   : > { %v3874_v31 = vpop.f32.mrb[24].mxu1  ;;  %v3949_v7 = vpop.f32.mrb[22].mxu0 }
0x10b8   : > { %v3875_v32 = vadd.f32 %v3874_v31, %v3800_v63  ;;  %v3876_v8 = vpop.f32.mrb[25].mxu1  ;;  %v3951_v9 = vpop.f32.mrb[23].mxu0  ;;  %v4533_v31 = vld [vmem:[#allocation13 + $0xf8] sm:$0xff] }
0x10b9   : > { %v17172_v8 = vpack.c.bf16 %v4338_v57, %v4334_v5  ;;  %v17180_v9 = vpack.c.bf16 %v4340_v0, %v4336_v42 }
0x10ba   : > { %v20487_v10 = vadd.f32 %v3949_v7, %v3875_v32 }
0x10bb   : > { %v3879_v12 = vpop.f32.mrb[26].mxu1  ;;  %v3954_v43 = vpop.f32.mrb[24].mxu0 }
0x10bc   : > { %v3880_v55 = vadd.f32 %v3879_v12, %v3805_v3  ;;  %v3881_v14 = vpop.f32.mrb[27].mxu1  ;;  %v3956_v44 = vpop.f32.mrb[25].mxu0  ;;  %v4527_v3 = vld [vmem:[#allocation13 + $0x68] sm:$0xff] }
0x10bd   : > { %v4526_v14 = vld [vmem:[#allocation13 + $0x60] sm:$0xff] }
0x10be   : > { %v20491_v16 = vadd.f32 %v3954_v43, %v3880_v55  ;;  %v17182_v43 = vpack.c.bf16 %v4531_v4, %v4527_v3  ;;  %v17190_v55 = vpack.c.bf16 %v4533_v31, %v4529_v6  ;;  %v4530_v44 = vld [vmem:[#allocation13 + $0xe0] sm:$0xff] }
0x10c0   : > { %v4062_v19 = vpop.f32.mrb[28].mxu1  ;;  %v4139_v20 = vpop.f32.mrb[26].mxu0 }
0x10c1   : > { %v4063_v28 = vadd.f32 %v4062_v19, %v3979_v23  ;;  %v4140_v29 = vadd.f32 %v4139_v20, %v3987_v15  ;;  %v4064_v30 = vpop.f32.mrb[29].mxu1  ;;  %v4141_v26 = vpop.f32.mrb[27].mxu0  ;;  %v4537_v19 = vld [vmem:[#allocation13 + $0x178] sm:$0xff]  ;;  %v17186_v20 = vpack.c.bf16 %v4539_v18, %v4535_v17 }
0x10c2   : > { %v4065_v34 = vadd.f32 %v4064_v30, %v3983_v40  ;;  %v4142_v46 = vadd.f32 %v4141_v26, %v3991_v41  ;;  %v4536_v30 = vld [vmem:[#allocation13 + $0x170] sm:$0xff] }
0x10c3   : > { %v4150_v58 = vmax.f32 %v4063_v28, 0.0  ;;  %v4152_v59 = vmax.f32 %v4140_v29, 0.0  ;;  %v17194_v28 = vpack.c.bf16 %v4541_v22, %v4537_v19  ;;  %v17188_v29 = vpack.c.bf16 %v4538_v27, %v4534_v24  ;;  %v4540_v26 = vld [vmem:[#allocation13 + $0x1f0] sm:$0xff]  ;;  %v15968_v19 = vld [vmem:[#allocation15] ss:$0 sm:$0xff] }
0x10c4   : > { %v4151_v49 = vmax.f32 %v4065_v34, 0.0  ;;  %v4153_v51 = vmax.f32 %v4142_v46, 0.0  ;;  %v4068_v52 = vpop.f32.mrb[30].mxu1  ;;  %v4145_v54 = vpop.f32.mrb[28].mxu0  ;;  %v17196_v33 = vpack.c.bf16 %v4540_v26, %v4536_v30 }
0x10c5   : > { %v4069_v60 = vadd.f32 %v4068_v52, %v3979_v23  ;;  %v4146_v61 = vadd.f32 %v4145_v54, %v3987_v15  ;;  %v4070_v53 = vpop.f32.mrb[31].mxu1  ;;  %v4147_v63 = vpop.f32.mrb[29].mxu0  ;;  %v4528_v23 = vld [vmem:[#allocation13 + $0x70] sm:$0xff]  ;;  %v17184_v15 = vpack.c.bf16 %v4530_v44, %v4526_v14 }
0x10c6   : > { %v4071_v1 = vadd.f32 %v4070_v53, %v3983_v40  ;;  %v4148_v2 = vadd.f32 %v4147_v63, %v3991_v41  ;;  %4238 = vmatprep.mubr.f32.mxu1 %v4151_v49  ;;  %4313 = vmatprep.mubr.f32.mxu0 %v4153_v51  ;;  %v4532_v40 = vld [vmem:[#allocation13 + $0xf0] sm:$0xff] }
0x10c7   : > { %4239 = vmatmul.mubr.f32.vlgmr.msra.gmra.mrb[32].mxu1 %v4150_v58  ;;  %4314 = vmatmul.mubr.f32.vlgmr.msra.gmra.mrb[30].mxu0 %v4152_v59  ;;  %v4154_v11 = vmax.f32 %v4069_v60, 0.0  ;;  %v4156_v12 = vmax.f32 %v4146_v61, 0.0  ;;  %v17192_v41 = vpack.c.bf16 %v4532_v40, %v4528_v23 }
0x10c8   : > { %v4155_v7 = vmax.f32 %v4071_v1, 0.0  ;;  %v4157_v32 = vmax.f32 %v4148_v2, 0.0  ;;  %17169 = vmatpush1.bf16.msra.mxu1 %v17168_v47  ;;  %17177 = vmatpush1.bf16.msra.mxu0 %v17176_v48  ;;  %v4342_v48 = vld [vmem:[#allocation12 + $0xc] sm:$0xf] }
0x10c9   : > { %17171 = vmatprep.subr.bf16.mxu1 %v17170_v56  ;;  %17179 = vmatprep.subr.bf16.mxu0 %v17178_v13  ;;  %v4347_v5 = vrot.slane %v4342_v48, %v20431_v36  ;;  %v4355_v57 = vrot.slane %v4342_v48, %v20433_v37  ;;  %v4351_v58 = vrot.slane %v4342_v48, %v20435_v38 }
0x10ca   : > { %4243 = vmatprep.mubr.f32.mxu1 %v4155_v7  ;;  %4318 = vmatprep.mubr.f32.mxu0 %v4157_v32  ;;  %v4359_v59 = vrot.slane %v4342_v48, %v20437_v39 }
0x10cb   : > { %4244 = vmatmul.mubr.f32.gmra.mrb[34].mxu1 %v4154_v11  ;;  %4319 = vmatmul.mubr.f32.gmra.mrb[32].mxu0 %v4156_v12 }
0x10cc   : > { %17173 = vmatpush1.bf16.msra.mxu1 %v17172_v8  ;;  %17181 = vmatpush1.bf16.msra.mxu0 %v17180_v9 }
0x10cd   : > { %4428 = vmatprep.mubr.f32.mxu1 %v19461_v25  ;;  %4505 = vmatprep.mubr.f32.mxu0 %v19461_v25 }
0x10ce   : > { %17183 = vmatprep.subr.bf16.mxu1 %v17182_v43  ;;  %17191 = vmatprep.subr.bf16.mxu0 %v17190_v55 }
0x10cf   : > { %15964 = vmatmul.mubr.msk.f32.vlgmr.msra.gmra.mrb[36].mxu1 %vm1855_vm0, %v20400_v50  ;;  %15966 = vmatmul.mubr.msk.f32.vlgmr.msra.gmra.mrb[34].mxu0 %vm1855_vm0, %v20400_v50 }
0x10d0   : > { %4434 = vmatprep.mubr.f32.mxu1 %v19461_v25  ;;  %4511 = vmatprep.mubr.f32.mxu0 %v19461_v25 }
0x10d3   : > { %15965 = vmatmul.mubr.msk.f32.gmra.mrb[38].mxu1 %vm1855_vm0, %v20407_v62  ;;  %15967 = vmatmul.mubr.msk.f32.gmra.mrb[36].mxu0 %vm1855_vm0, %v20407_v62 }
0x10d5   : > { %17185 = vmatpush1.bf16.xpose.msra.mxu1 %v17184_v15  ;;  %17193 = vmatpush1.bf16.xpose.msra.mxu0 %v17192_v41 }
0x10d6   : > { %17187 = vmatprep.subr.bf16.mxu1 %v17186_v20  ;;  %17195 = vmatprep.subr.bf16.mxu0 %v17194_v28 }
0x10dd   : > { %17189 = vmatpush1.bf16.xpose.msra.mxu1 %v17188_v29  ;;  %17197 = vmatpush1.bf16.xpose.msra.mxu0 %v17196_v33 }
0x119a   : > { %v4240_v35 = vpop.f32.mrb[32].mxu1  ;;  %v4315_v45 = vpop.f32.mrb[30].mxu0 }
0x119b   : > { %v4316_v34 = vadd.f32 %v4315_v45, %v4240_v35  ;;  %v4242_v46 = vpop.f32.mrb[33].mxu1  ;;  %v4317_v47 = vpop.f32.mrb[31].mxu0 }
0x119d   : > { %v4324_v49 = vadd.f32 %v4316_v34, %v20487_v10 }
0x119e   : > { %v4245_v51 = vpop.f32.mrb[34].mxu1  ;;  %v4320_v52 = vpop.f32.mrb[32].mxu0 }
0x119f   : > { %v4321_v54 = vadd.f32 %v4320_v52, %v4245_v51  ;;  %v4247_v56 = vpop.f32.mrb[35].mxu1  ;;  %v4322_v13 = vpop.f32.mrb[33].mxu0 }
0x11a1   : > { %v4325_v60 = vadd.f32 %v4321_v54, %v20491_v16 }
0x11a2   : > { %v4430_v61 = vpop.f32.mrb[36].mxu1  ;;  %v4507_v53 = vpop.f32.mrb[34].mxu0 }
0x11a3   : > { %v4431_v63 = vadd.f32 %v4430_v61, %v4347_v5  ;;  %v4508_v42 = vadd.f32 %v4507_v53, %v4355_v57  ;;  %v4432_v10 = vpop.f32.mrb[37].mxu1  ;;  %v4509_v0 = vpop.f32.mrb[35].mxu0  ;;  %v15973_v61 = vld [vmem:[%s21462_s22 + $0x30] sm:$0xff]  ;;  %v15974_v53 = vld [vmem:[%s21462_s22 + $0x38] sm:$0xff] }
0x11a4   : > { %v4433_v1 = vadd.f32 %v4432_v10, %v4351_v58  ;;  %v4510_v2 = vadd.f32 %v4509_v0, %v4359_v59  ;;  %v15980_v10 = vld [vmem:[%s21461_s23 + $0x30] sm:$0xff]  ;;  %v15981_v0 = vld [vmem:[%s21461_s23 + $0x38] sm:$0xff] }
0x11a5   : > { %v4518_v7 = vmax.f32 %v4431_v63, 0.0  ;;  %v4520_v32 = vmax.f32 %v4508_v42, 0.0  ;;  %v17202_v42 = vpack.c.bf16 %v15974_v53, %v15973_v61 }
0x11a6   : > { %v4519_v3 = vmax.f32 %v4433_v1, 0.0  ;;  %v4521_v4 = vmax.f32 %v4510_v2, 0.0  ;;  %v4436_v6 = vpop.f32.mrb[38].mxu1  ;;  %v4513_v31 = vpop.f32.mrb[36].mxu0  ;;  %v17210_v1 = vpack.c.bf16 %v15981_v0, %v15980_v10 }
0x11a7   : > { %v4437_v8 = vadd.f32 %v4436_v6, %v4347_v5  ;;  %v4514_v9 = vadd.f32 %v4513_v31, %v4355_v57  ;;  %v4438_v11 = vpop.f32.mrb[39].mxu1  ;;  %v4515_v12 = vpop.f32.mrb[37].mxu0  ;;  %v15971_v5 = vld [vmem:[%s21462_s22 + $0x20] sm:$0xff]  ;;  %v15972_v57 = vld [vmem:[%s21462_s22 + $0x28] sm:$0xff] }
0x11a8   : > { %v4439_v43 = vadd.f32 %v4438_v11, %v4351_v58  ;;  %v4516_v16 = vadd.f32 %v4515_v12, %v4359_v59  ;;  %4606 = vmatprep.mubr.f32.mxu1 %v4519_v3  ;;  %4681 = vmatprep.mubr.f32.mxu0 %v4521_v4  ;;  %v15978_v58 = vld [vmem:[%s21461_s23 + $0x20] sm:$0xff]  ;;  %v17198_v59 = vpack.c.bf16 %v15972_v57, %v15971_v5  ;;  %v15970_v11 = vld [vmem:[#allocation18] ss:$0 sm:$0xff] }
0x11a9   : > { %4607 = vmatmul.mubr.f32.vlgmr.msra.gmra.mrb[40].mxu1 %v4518_v7  ;;  %4682 = vmatmul.mubr.f32.vlgmr.msra.gmra.mrb[38].mxu0 %v4520_v32  ;;  %v4522_v44 = vmax.f32 %v4437_v8, 0.0  ;;  %v4524_v23 = vmax.f32 %v4514_v9, 0.0  ;;  %v15969_v8 = vld [vmem:[#allocation16] ss:$0 sm:$0xff] }
0x11aa   : > { %v4523_v55 = vmax.f32 %v4439_v43, 0.0  ;;  %v4525_v14 = vmax.f32 %v4516_v16, 0.0  ;;  %17199 = vmatprep.subr.bf16.mxu1 %v17198_v59 }
0x11ab   : > { %17201 = vmatpush3.bf16.msra.mxu1 %v17198_v59 }
0x11ac   : > { %4611 = vmatprep.mubr.f32.mxu1 %v4523_v55  ;;  %4686 = vmatprep.mubr.f32.mxu0 %v4525_v14 }
0x11ad   : > { %4612 = vmatmul.mubr.f32.gmra.mrb[42].mxu1 %v4522_v44  ;;  %4687 = vmatmul.mubr.f32.gmra.mrb[40].mxu0 %v4524_v23  ;;  %v15982_v23 = vld [vmem:[#allocation4 + $0x1] ss:$0 sm:$0xff] }
0x11ae   : > { %17203 = vmatprep.subr.bf16.mxu1 %v17202_v42 }
0x11af   : > { %17205 = vmatpush3.bf16.msra.mxu1 %v17202_v42 }
0x127c   : > { %v4608_v15 = vpop.f32.mrb[40].mxu1  ;;  %v4683_v40 = vpop.f32.mrb[38].mxu0 }
0x127d   : > { %v4684_v41 = vadd.f32 %v4683_v40, %v4608_v15  ;;  %v4610_v17 = vpop.f32.mrb[41].mxu1  ;;  %v4685_v18 = vpop.f32.mrb[39].mxu0  ;;  %v15975_v15 = vld [vmem:[#allocation2 + $0x1] ss:$0 sm:$0xff] }
0x127f   : > { %v4692_v20 = vadd.f32 %v4684_v41, %v4324_v49 }
0x1280   : > { %v4613_v22 = vpop.f32.mrb[42].mxu1  ;;  %v4688_v24 = vpop.f32.mrb[40].mxu0 }
0x1281   : > { %v4689_v27 = vadd.f32 %v4688_v24, %v4613_v22  ;;  %v4615_v28 = vpop.f32.mrb[43].mxu1  ;;  %v4690_v29 = vpop.f32.mrb[41].mxu0  ;;  %v4701_v30 = vadd.f32 %v15968_v19, %v4692_v20 }
0x1283   : > { %v4693_v26 = vadd.f32 %v4689_v27, %v4325_v60  ;;  %v4703_v33 = vadd.f32 %v4701_v30, %v20400_v50  ;;  %v15979_v60 = vld [vmem:[%s21461_s23 + $0x28] sm:$0xff] }
0x1284   : > { %v17206_v63 = vpack.c.bf16 %v15979_v60, %v15978_v58 }
0x1285   : > { %v4707_v35 = vsel %vm1855_vm0, %v4703_v33, 0.0  ;;  %v4702_v45 = vadd.f32 %v15968_v19, %v4693_v26 }
0x1286   : > { %4708 = vadd.xlane.f32.xlu0 %v4707_v35  ;;  %17207 = vmatprep.subr.bf16.mxu0 %v17206_v63 }
0x1287   : > { %v4704_v34 = vadd.f32 %v4702_v45, %v20407_v62  ;;  %17209 = vmatpush3.bf16.msra.mxu0 %v17206_v63 }
0x1288   : > { %17211 = vmatprep.subr.bf16.mxu0 %v17210_v1 }
0x1289   : > { %v4710_v46 = vsel %vm1855_vm0, %v4704_v34, 0.0 }
0x128a   : > { %4711 = vadd.xlane.f32.xlu0 %v4710_v46 }
0x128b   : > { %17213 = vmatpush3.bf16.msra.mxu0 %v17210_v1 }
0x1313   : > { %v4709_v47 = vpop.xlane.xlu0 %4708 }
0x1314   : > { %v4713_v48 = vmul.f32 0.03125, %v4709_v47 }
0x1316   : > { %v4715_v49 = vsub.f32 %v4703_v33, %v4713_v48 }
0x1317   : > { %v4712_v51 = vpop.xlane.xlu0 %4711 }
0x1318   : > { %v4714_v50 = vmul.f32 0.03125, %v4712_v51  ;;  %v4717_v52 = vmul.f32 %v4715_v49, %v4715_v49 }
0x131a   : > { %v4716_v54 = vsub.f32 %v4704_v34, %v4714_v50  ;;  %v4719_v56 = vsel %vm1855_vm0, %v4717_v52, 0.0 }
0x131b   : > { %4720 = vadd.xlane.f32.xlu0 %v4719_v56 }
0x131c   : > { %v4718_v13 = vmul.f32 %v4716_v54, %v4716_v54 }
0x131e   : > { %v4722_v62 = vsel %vm1855_vm0, %v4718_v13, 0.0 }
0x131f   : > { %4723 = vadd.xlane.f32.xlu0 %v4722_v62 }
0x13a8   : > { %v4721_v2 = vpop.xlane.xlu0 %4720 }
0x13a9   : > { %v4725_v3 = vmul.f32 0.03125, %v4721_v2 }
0x13ab   : > { %v4727_v4 = vadd.f32 1e-05, %v4725_v3 }
0x13ac   : > { %v4724_v6 = vpop.xlane.xlu0 %4723 }
0x13ad   : > { %18253 = vrsqrt.f32 %v4727_v4  ;;  %v4726_v31 = vmul.f32 0.03125, %v4724_v6 }
0x13af   : > { %v4728_v7 = vadd.f32 1e-05, %v4726_v31 }
0x13b1   : > { %18255 = vrsqrt.f32 %v4728_v7 }
0x13b7   : > { %v18254_v32 = vpop.eup %18253 }
0x13b8   : > { %v4731_v9 = vmul.f32 %v18254_v32, %v4715_v49 }
0x13ba   : > { %v4739_v12 = vmul.f32 %v15969_v8, %v4731_v9 }
0x13bb   : > { %v18256_v43 = vpop.eup %18255 }
0x13bc   : > { %v4732_v16 = vmul.f32 %v18256_v43, %v4716_v54  ;;  %v20527_v55 = vadd.f32 %v15970_v11, %v4739_v12 }
0x13be   : > { %v4740_v14 = vmul.f32 %v15969_v8, %v4732_v16  ;;  %16553 = vmatprep.mubr.msk.f32.mxu1 %vm1855_vm0, %v20527_v55  ;;  %16564 = vmatprep.mubr.msk.f32.mxu0 %vm1855_vm0, %v20527_v55 }
0x13c0   : > { %v20533_v44 = vadd.f32 %v15970_v11, %v4740_v14 }
0x13c2   : > { %16554 = vmatmul.mubr.msk.f32.vlgmr.msra.gmra.mrb[44].mxu1 %vm1855_vm0, %v20533_v44  ;;  %16565 = vmatmul.mubr.msk.f32.vlgmr.msra.gmra.mrb[42].mxu0 %vm1855_vm0, %v20533_v44 }
0x1495   : > { %v16555_v40 = vpop.f32.mrb[44].mxu1  ;;  %v16566_v41 = vpop.f32.mrb[42].mxu0 }
0x1496   : > { %v4928_v17 = vadd.f32 %v16566_v41, %v15982_v23  ;;  %v4834_v18 = vpop.f32.mrb[45].mxu1  ;;  %v4922_v19 = vpop.f32.mrb[43].mxu0  ;;  %v20553_v28 = vadd.f32 %v16555_v40, %v15975_v15 }
0x1497   : > { %v20539_v20 = vadd.f32 %v15975_v15, %v4834_v18  ;;  %v4923_v22 = vadd.f32 %v15982_v23, %v4922_v19 }
0x1499   : > { %5131 = vrot.lane.b32.xlu1 %v20539_v20, %s19454_s26  ;;  %16571 = vmatprep.mubr.msk.f32.mxu1 %vm2023_vm1, %v20539_v20  ;;  %v20545_v24 = vpack.i.bf16 %v4928_v17, %v4923_v22  ;;  %v17214_v27 = vpack.c.bf16 %v4928_v17, %v4923_v22 }
0x149b   : > { %18113 = vrot.lane.b32.xlu0 %v20545_v24, %s19454_s26  ;;  %17216 = vmatprep.subr.msk.bf16.mxu1 %vm20284_vm2, %v17214_v27 }
0x149c   : > { %17219 = vmatpush3.bf16.xpose.msk.msra.mxu1 %vm20284_vm2, %v17214_v27 }
0x149d   : > { %5497 = vrot.lane.b32.xlu1 %v20539_v20, %s21390_s5 }
0x149f   : > { %5133 = vrot.lane.b32.xlu0 %v20553_v28, %s19454_s26 }
0x14a3   : > { %18118 = vrot.lane.b32.xlu0 %v20545_v24, %s21390_s5  ;;  %16572 = vmatmul.mubr.msk.f32.vlgmr.msra.gmra.mrb[46].mxu1 %vm2023_vm1, %v20553_v28 }
0x14a7   : > { %5499 = vrot.lane.b32.xlu0 %v20553_v28, %s21390_s5 }
0x150b   : > { %v5132_v29 = vpop.permute.xlu1 %5131 }
0x150c   : > { %16585 = vmatprep.mubr.msk.f32.mxu1 %vm2023_vm1, %v5132_v29 }
0x150d   : > { %v18114_v30 = vpop.permute.xlu0 %18113 }
0x150e   : > { %v18116_v26 = vunpack.i.h.bf16 %v18114_v30  ;;  %v18115_v33 = vunpack.i.l.bf16 %v18114_v30 }
0x150f   : > { %v5498_v49 = vpop.permute.xlu1 %5497 }
0x1510   : > { %v17224_v35 = vpack.c.bf16 %v18116_v26, %v18115_v33 }
0x1511   : > { %v5134_v45 = vpop.permute.xlu0 %5133 }
0x1512   : > { %17226 = vmatprep.subr.msk.bf16.mxu1 %vm20284_vm2, %v17224_v35 }
0x1513   : > { %17229 = vmatpush3.bf16.xpose.msk.msra.mxu1 %vm20284_vm2, %v17224_v35 }
0x1515   : > { %v18119_v34 = vpop.permute.xlu0 %18118 }
0x1516   : > { %v18121_v46 = vunpack.i.h.bf16 %v18119_v34  ;;  %v18120_v47 = vunpack.i.l.bf16 %v18119_v34 }
0x1518   : > { %v17234_v48 = vpack.c.bf16 %v18121_v46, %v18120_v47 }
0x1519   : > { %v5500_v51 = vpop.permute.xlu0 %5499 }
0x151a   : > { %16586 = vmatmul.mubr.msk.f32.vlgmr.msra.gmra.mrb[48].mxu1 %vm2023_vm1, %v5134_v45  ;;  %17236 = vmatprep.subr.msk.bf16.mxu1 %vm20284_vm2, %v17234_v48 }
0x151b   : > { %17239 = vmatpush3.bf16.xpose.msk.msra.mxu1 %vm20284_vm2, %v17234_v48  ;;  %16609 = vmatprep.mubr.msk.f32.mxu1 %vm2023_vm1, %v5498_v49 }
0x1522   : > { %16610 = vmatmul.mubr.msk.f32.vlgmr.msra.gmra.mrb[50].mxu1 %vm2023_vm1, %v5500_v51 }
0x1576   : > { %v16573_v50 = vpop.f32.mrb[46].mxu1 }
0x1577   : > { %v5019_v52 = vmul.f32 0.35355338, %v16573_v50  ;;  %v5009_v54 = vpop.f32.mrb[47].mxu1 }
0x1578   : > { %v5018_v56 = vmul.f32 0.35355338, %v5009_v54 }
0x1579   : > { %v5023_v13 = vsel %vm2113_vm3, %v5019_v52, -inf }
0x157a   : > { %5024 = vmax.xlane.f32.xlu0 %v5023_v13  ;;  %v5020_v62 = vsel %vm2113_vm3, %v5018_v56, -inf }
0x157b   : > { %5021 = vmax.xlane.f32.xlu1 %v5020_v62 }
0x15ed   : > { %v16587_v5 = vpop.f32.mrb[48].mxu1 }
0x15ee   : > { %v5223_v57 = vmul.f32 0.35355338, %v16587_v5  ;;  %v5213_v58 = vpop.f32.mrb[49].mxu1 }
0x15ef   : > { %v5222_v59 = vmul.f32 0.35355338, %v5213_v58 }
0x15f0   : > { %v5227_v60 = vsel %vm2113_vm3, %v5223_v57, -inf }
0x15f1   : > { %5228 = vmax.xlane.f32.xlu1 %v5227_v60  ;;  %v5224_v61 = vsel %vm2113_vm3, %v5222_v59, -inf }
0x15f2   : > { %5225 = vmax.xlane.f32.xlu0 %v5224_v61 }
0x15f5   : > { %v16611_v53 = vpop.f32.mrb[50].mxu1 }
0x15f6   : > { %v5579_v63 = vpop.f32.mrb[51].mxu1  ;;  %v5589_v19 = vmul.f32 0.35355338, %v16611_v53 }
0x15f7   : > { %v5588_v18 = vmul.f32 0.35355338, %v5579_v63 }
0x15f8   : > { %v5593_v27 = vsel %vm2113_vm3, %v5589_v19, -inf }
0x15f9   : > { %v5590_v22 = vsel %vm2113_vm3, %v5588_v18, -inf }
0x1607   : > { %v5025_v42 = vpop.xlane.xlu0 %5024 }
0x1608   : > { %v5027_v10 = vsub.f32 %v5019_v52, %v5025_v42  ;;  %v5022_v0 = vpop.xlane.xlu1 %5021 }
0x1609   : > { %v5026_v1 = vsub.f32 %v5018_v56, %v5022_v0 }
0x160a   : > { %v5030_v2 = vmul.f32 1.442695, %v5027_v10 }
0x160b   : > { %v5028_v3 = vmul.f32 1.442695, %v5026_v1 }
0x160c   : > { %18257 = vpow2.f32 %v5030_v2  ;;  %v15998_v2 = vld [vmem:[%s21465_s1 + $0x28] sm:$0xff] }
0x160d   : > { %18259 = vpow2.f32 %v5028_v3  ;;  %v15991_v3 = vld [vmem:[%s21465_s1 + $0x20] sm:$0xff] }
0x1616   : > { %v20581_v4 = vpop.eup %18257 }
0x1617   : > { %v18260_v6 = vpop.eup %18259  ;;  %v5035_v31 = vsel %vm2113_vm3, %v20581_v4, 0.0 }
0x1618   : > { %5036 = vadd.xlane.f32.xlu1 %v5035_v31  ;;  %v5032_v7 = vsel %vm2113_vm3, %v18260_v6, 0.0 }
0x1619   : > { %5033 = vadd.xlane.f32.xlu0 %v5032_v7 }
0x167e   : > { %v5229_v32 = vpop.xlane.xlu1 %5228 }
0x167f   : > { %v5231_v8 = vsub.f32 %v5223_v57, %v5229_v32  ;;  %v5226_v9 = vpop.xlane.xlu0 %5225 }
0x1680   : > { %v5230_v11 = vsub.f32 %v5222_v59, %v5226_v9 }
0x1681   : > { %v5234_v12 = vmul.f32 1.442695, %v5231_v8 }
0x1682   : > { %v5232_v43 = vmul.f32 1.442695, %v5230_v11 }
0x1683   : > { %18261 = vpow2.f32 %v5234_v12 }
0x1684   : > { %18263 = vpow2.f32 %v5232_v43 }
0x168d   : > { %v18262_v16 = vpop.eup %18261 }
0x168e   : > { %v18264_v14 = vpop.eup %18263  ;;  %v5239_v23 = vsel %vm2113_vm3, %v18262_v16, 0.0 }
0x168f   : > { %5240 = vadd.xlane.f32.xlu1 %v5239_v23  ;;  %v5236_v15 = vsel %vm2113_vm3, %v18264_v14, 0.0 }
0x1690   : > { %5237 = vadd.xlane.f32.xlu0 %v5236_v15 }
0x16a0   : > { %18128 = vrot.lane.b32.xlu1 %v20545_v24, %s21392_s8 }
0x16a4   : > { %18133 = vrot.lane.b32.xlu1 %v20545_v24, %s21385_s6 }
0x16a6   : > { %18123 = vrot.lane.b32.xlu0 %v20545_v24, %s19455_s7  ;;  %v5034_v40 = vpop.xlane.xlu0 %5033 }
0x16a7   : > { %18265 = vrcp.f32 %v5034_v40 }
0x16a8   : > { %5786 = vrot.lane.b32.xlu1 %v20553_v28, %s21385_s6  ;;  %v5037_v28 = vpop.xlane.xlu1 %5036 }
0x16a9   : > { %18267 = vrcp.f32 %v5037_v28 }
0x16aa   : > { %5784 = vrot.lane.b32.xlu0 %v20539_v20, %s21385_s6  ;;  %s21389_s6 = sshll.u32 %s21476_s28, 3 }
0x16b1   : > { %v18266_v41 = vpop.eup %18265 }
0x16b2   : > { %v5040_v17 = vmul.f32 %v18266_v41, %v18260_v6 }
0x16b3   : > { %v18268_v48 = vpop.eup %18267 }
0x16b4   : > { %16578 = vmatprep.mubr.msk.f32.mxu0 %vm2113_vm3, %v5040_v17  ;;  %v5041_v56 = vmul.f32 %v18268_v48, %v20581_v4 }
0x16c9   : > { %5591 = vmax.xlane.f32.xlu0 %v5590_v22 }
0x16cc   : > { %5594 = vmax.xlane.f32.xlu1 %v5593_v27 }
0x16dd   : > { %18138 = vrot.lane.b32.xlu1 %v20545_v24, %s21387_s4 }
0x16e1   : > { %18143 = vrot.lane.b32.xlu1 %v20545_v24, %s21383_s9  ;;  %s21466_s9 = sld [smem:[#allocation74_spill]] }
0x16e7   : > { %s1837_s4 = scalar_lea.vmem %s21466_s9, %s21389_s6  ;;  %s21468_s9 = smov 104  }
0x16e8   : > { %s21469_s6 = smov 72  }
0x171c   : > { %v5241_v20 = vpop.xlane.xlu1 %5240 }
0x171d   : > { %v5238_v29 = vpop.xlane.xlu0 %5237 }
0x171e   : > { %18269 = vrcp.f32 %v5238_v29 }
0x171f   : > { %18271 = vrcp.f32 %v5241_v20 }
0x1720   : > { %v18129_v30 = vpop.permute.xlu1 %18128 }
0x1721   : > { %v18124_v26 = vpop.permute.xlu0 %18123  ;;  %v18131_v33 = vunpack.i.h.bf16 %v18129_v30  ;;  %v18130_v35 = vunpack.i.l.bf16 %v18129_v30 }
0x1722   : > { %v18126_v45 = vunpack.i.h.bf16 %v18124_v26  ;;  %v18125_v34 = vunpack.i.l.bf16 %v18124_v26 }
0x1723   : > { %v17230_v24 = vpack.c.bf16 %v18131_v33, %v18130_v35 }
0x1724   : > { %v18134_v46 = vpop.permute.xlu1 %18133  ;;  %v17220_v47 = vpack.c.bf16 %v18126_v45, %v18125_v34 }
0x1725   : > { %v18136_v49 = vunpack.i.h.bf16 %v18134_v46  ;;  %v18135_v51 = vunpack.i.l.bf16 %v18134_v46  ;;  %v5785_v50 = vpop.permute.xlu0 %5784 }
0x1726   : > { %17221 = vmatprep.subr.bf16.mxu0 %v17220_v47  ;;  %16628 = vmatprep.mubr.msk.f32.mxu1 %vm2023_vm1, %v5785_v50 }
0x1727   : > { %v17244_v52 = vpack.c.bf16 %v18136_v49, %v18135_v51  ;;  %17223 = vmatpush3.bf16.msra.mxu0 %v17220_v47 }
0x1728   : > { %v18270_v54 = vpop.eup %18269  ;;  %17231 = vmatprep.subr.bf16.mxu0 %v17230_v24  ;;  %v5787_v57 = vpop.permute.xlu1 %5786 }
0x1729   : > { %v18272_v13 = vpop.eup %18271  ;;  %17246 = vmatprep.subr.msk.bf16.mxu1 %vm20284_vm2, %v17244_v52  ;;  %v5244_v62 = vmul.f32 %v18270_v54, %v18264_v14 }
0x172a   : > { %16579 = vmatmul.mubr.msk.f32.vlgmr.msra.gmra.mrb[44].mxu0 %vm2113_vm3, %v5041_v56  ;;  %17249 = vmatpush3.bf16.xpose.msk.msra.mxu1 %vm20284_vm2, %v17244_v52  ;;  %v5245_v5 = vmul.f32 %v18272_v13, %v18262_v16  ;;  %v16018_v52 = vld [vmem:[%s21465_s1 + $0x38] sm:$0xff] }
0x172b   : > { %17233 = vmatpush3.bf16.msra.mxu0 %v17230_v24  ;;  %16592 = vmatprep.mubr.msk.f32.mxu0 %vm2113_vm3, %v5244_v62 }
0x172c   : > { %16595 = vmatprep.subr.mxu0 %v15998_v2 }
0x172e   : > { %16593 = vmatmul.mubr.msk.f32.vlgmr.msra.gmra.mrb[46].mxu0 %vm2113_vm3, %v5245_v5 }
0x172f   : > { %16596 = vmatpush3.msra.mxu0 %v15998_v2 }
0x1730   : > { %16600 = vmatprep.subr.mxu0 %v15991_v3 }
0x1731   : > { %16629 = vmatmul.mubr.msk.f32.vlgmr.msra.gmra.mrb[52].mxu1 %vm2023_vm1, %v5787_v57 }
0x1732   : > { %6239 = vmatprep.mubr.f32.mxu1 %v19461_v25 }
0x1756   : > { %v5592_v58 = vpop.xlane.xlu0 %5591 }
0x1757   : > { %v5596_v59 = vsub.f32 %v5588_v18, %v5592_v58 }
0x1759   : > { %v5598_v60 = vmul.f32 1.442695, %v5596_v59  ;;  %v5595_v61 = vpop.xlane.xlu1 %5594 }
0x175a   : > { %v5597_v53 = vsub.f32 %v5589_v19, %v5595_v61  ;;  %v16009_v19 = vld [vmem:[%s21465_s1 + $0x30] sm:$0xff] }
0x175b   : > { %18273 = vpow2.f32 %v5598_v60  ;;  %v16021_v60 = vld [vmem:[#allocation6 + $0x1] ss:$0 sm:$0xff] }
0x175c   : > { %v5600_v63 = vmul.f32 1.442695, %v5597_v53 }
0x175d   : > { %v18139_v6 = vpop.permute.xlu1 %18138 }
0x175e   : > { %18275 = vpow2.f32 %v5600_v63  ;;  %v18141_v8 = vunpack.i.h.bf16 %v18139_v6  ;;  %v18140_v9 = vunpack.i.l.bf16 %v18139_v6 }
0x1760   : > { %v17240_v43 = vpack.c.bf16 %v18141_v8, %v18140_v9 }
0x1761   : > { %v18144_v17 = vpop.permute.xlu1 %18143 }
0x1762   : > { %v18146_v22 = vunpack.i.h.bf16 %v18144_v17  ;;  %v18145_v27 = vunpack.i.l.bf16 %v18144_v17  ;;  %v6132_v17 = vld [vmem:[#allocation10 + $0x210] sm:$0xff] }
0x1764   : > { %v17250_v30 = vpack.c.bf16 %v18146_v22, %v18145_v27  ;;  %v6139_v22 = vld [vmem:[#allocation10 + $0x308] sm:$0xff] }
0x1765   : > { %v18274_v42 = vpop.eup %18273  ;;  %v6143_v27 = vld [vmem:[#allocation10 + $0x388] sm:$0xff] }
0x1766   : > { %v5602_v10 = vsel %vm2113_vm3, %v18274_v42, 0.0 }
0x1767   : > { %5603 = vadd.xlane.f32.xlu0 %v5602_v10 }
0x1768   : > { %v18276_v0 = vpop.eup %18275 }
0x1769   : > { %v5605_v1 = vsel %vm2113_vm3, %v18276_v0, 0.0 }
0x176b   : > { %5606 = vadd.xlane.f32.xlu0 %v5605_v1 }
0x17f4   : > { %v5604_v4 = vpop.xlane.xlu0 %5603 }
0x17f5   : > { %18277 = vrcp.f32 %v5604_v4 }
0x17f8   : > { %v5607_v7 = vpop.xlane.xlu0 %5606 }
0x17f9   : > { %18279 = vrcp.f32 %v5607_v7 }
0x17fd   : > { %v16580_v31 = vpop.f32.mrb[44].mxu0 }
0x17fe   : > { %v5120_v32 = vpop.f32.mrb[45].mxu0 }
0x17ff   : > { %v18278_v41 = vpop.eup %18277 }
0x1800   : > { %v5610_v20 = vmul.f32 %v18278_v41, %v18274_v42 }
0x1801   : > { %v16594_v11 = vpop.f32.mrb[46].mxu0 }
0x1802   : > { %v5324_v12 = vpop.f32.mrb[47].mxu0 }
0x1803   : > { %16597 = vmatprep.mubr.msk.f32.mxu0 %vm2023_vm1, %v5324_v12  ;;  %v18280_v18 = vpop.eup %18279  ;;  %v6135_v12 = vld [vmem:[#allocation10 + $0x288] sm:$0xff] }
0x1804   : > { %16598 = vmatmul.mubr.msk.f32.vlgmr.msra.gmra.mrb[48].mxu0 %vm2023_vm1, %v16594_v11  ;;  %v16630_v16 = vpop.f32.mrb[52].mxu1  ;;  %v5611_v29 = vmul.f32 %v18280_v18, %v18276_v0  ;;  %v6131_v11 = vld [vmem:[#allocation10 + $0x208] sm:$0xff]  ;;  %v6136_v18 = vld [vmem:[#allocation10 + $0x290] sm:$0xff] }
0x1805   : > { %16601 = vmatpush3.msra.mxu0 %v15991_v3  ;;  %16602 = vmatprep.mubr.msk.f32.mxu0 %vm2023_vm1, %v5120_v32  ;;  %v5866_v14 = vpop.f32.mrb[53].mxu1  ;;  %v5876_v15 = vmul.f32 0.35355338, %v16630_v16  ;;  %v17254_v16 = vpack.c.bf16 %v6135_v12, %v6131_v11  ;;  %v6364_v11 = vld [vmem:[#allocation10 + $0x330] sm:$0xff] }
0x1806   : > { %17241 = vmatprep.subr.bf16.mxu0 %v17240_v43  ;;  %v5875_v23 = vmul.f32 0.35355338, %v5866_v14  ;;  %v6137_v14 = vld [vmem:[#allocation10 + $0x298] sm:$0xff] }
0x1807   : > { %v5880_v28 = vsel %vm2113_vm3, %v5876_v15, -inf  ;;  %17255 = vmatprep.subr.bf16.mxu1 %v17254_v16  ;;  %v6555_v16 = vld [vmem:[#allocation13 + $0x228] sm:$0xff] }
0x1808   : > { %v5877_v40 = vsel %vm2113_vm3, %v5875_v23, -inf }
0x1809   : > { %5878 = vmax.xlane.f32.xlu0 %v5877_v40 }
0x180c   : > { %16603 = vmatmul.mubr.msk.f32.vlgmr.msra.gmra.mrb[48].mxu0 %vm2023_vm1, %v16580_v31 }
0x180d   : > { %17243 = vmatpush3.bf16.msra.mxu0 %v17240_v43  ;;  %5881 = vmax.xlane.f32.xlu0 %v5880_v28  ;;  %v6133_v43 = vld [vmem:[#allocation10 + $0x218] sm:$0xff] }
0x180e   : > { %16616 = vmatprep.mubr.msk.f32.mxu0 %vm2113_vm3, %v5610_v20  ;;  %16619 = vmatprep.subr.mxu0 %v16009_v19  ;;  %v17262_v40 = vpack.c.bf16 %v6137_v14, %v6133_v43  ;;  %v6141_v28 = vld [vmem:[#allocation10 + $0x318] sm:$0xff]  ;;  %v17258_v20 = vpack.c.bf16 %v6143_v27, %v6139_v22  ;;  %v6554_v22 = vld [vmem:[#allocation13 + $0x220] sm:$0xff] }
0x180f   : > { %v6558_v27 = vld [vmem:[#allocation13 + $0x2a0] sm:$0xff] }
0x1810   : > { %16617 = vmatmul.mubr.msk.f32.vlgmr.msra.gmra.mrb[50].mxu0 %vm2113_vm3, %v5611_v29  ;;  %v6145_v29 = vld [vmem:[#allocation10 + $0x398] sm:$0xff] }
0x1811   : > { %16620 = vmatpush3.msra.mxu0 %v16009_v19  ;;  %v17264_v19 = vpack.c.bf16 %v6136_v18, %v6132_v17 }
0x1812   : > { %17251 = vmatprep.subr.bf16.mxu0 %v17250_v30 }
0x1896   : > { %v5879_v26 = vpop.xlane.xlu0 %5878 }
0x1897   : > { %v5883_v33 = vsub.f32 %v5875_v23, %v5879_v26  ;;  %v6130_v23 = vld [vmem:[#allocation10 + $0x200] sm:$0xff] }
0x1898   : > { %v6142_v26 = vld [vmem:[#allocation10 + $0x380] sm:$0xff] }
0x1899   : > { %v5885_v35 = vmul.f32 1.442695, %v5883_v33  ;;  %v17266_v33 = vpack.c.bf16 %v6145_v29, %v6141_v28  ;;  %v6556_v28 = vld [vmem:[#allocation13 + $0x230] sm:$0xff]  ;;  %v17288_v29 = vpack.c.bf16 %v6558_v27, %v6554_v22 }
0x189a   : > { %v5882_v45 = vpop.xlane.xlu0 %5881 }
0x189b   : > { %18281 = vpow2.f32 %v5885_v35  ;;  %v5884_v34 = vsub.f32 %v5876_v15, %v5882_v45  ;;  %v6134_v15 = vld [vmem:[#allocation10 + $0x280] sm:$0xff]  ;;  %v6140_v45 = vld [vmem:[#allocation10 + $0x310] sm:$0xff] }
0x189c   : > { %v17256_v41 = vpack.c.bf16 %v6134_v15, %v6130_v23  ;;  %v6559_v23 = vld [vmem:[#allocation13 + $0x2a8] sm:$0xff]  ;;  %v6557_v15 = vld [vmem:[#allocation13 + $0x238] sm:$0xff] }
0x189d   : > { %v5887_v46 = vmul.f32 1.442695, %v5884_v34  ;;  %v6144_v34 = vld [vmem:[#allocation10 + $0x390] sm:$0xff]  ;;  %v17286_v18 = vpack.c.bf16 %v6559_v23, %v6555_v16 }
0x189e   : > { %17257 = vmatpush1.bf16.msra.mxu1 %v17256_v41 }
0x189f   : > { %18283 = vpow2.f32 %v5887_v46  ;;  %17259 = vmatprep.subr.bf16.mxu1 %v17258_v20  ;;  %v17268_v46 = vpack.c.bf16 %v6144_v34, %v6140_v45  ;;  %v6560_v20 = vld [vmem:[#allocation13 + $0x2b0] sm:$0xff]  ;;  %v6569_v34 = vld [vmem:[#allocation13 + $0x3b8] sm:$0xff] }
0x18a5   : > { %v18282_v47 = vpop.eup %18281 }
0x18a6   : > { %v5889_v48 = vsel %vm2113_vm3, %v18282_v47, 0.0 }
0x18a7   : > { %5890 = vadd.xlane.f32.xlu0 %v5889_v48  ;;  %v6359_v48 = vld [vmem:[#allocation10 + $0x2a8] sm:$0xff] }
0x18a9   : > { %v18284_v49 = vpop.eup %18283 }
0x18aa   : > { %v5892_v51 = vsel %vm2113_vm3, %v18284_v49, 0.0 }
0x18ab   : > { %5893 = vadd.xlane.f32.xlu0 %v5892_v51 }
0x18e3   : > { %v16618_v50 = vpop.f32.mrb[50].mxu0 }
0x18e4   : > { %v5690_v24 = vpop.f32.mrb[51].mxu0 }
0x18e5   : > { %16621 = vmatprep.mubr.msk.f32.mxu0 %vm2023_vm1, %v5690_v24 }
0x18e6   : > { %16622 = vmatmul.mubr.msk.f32.vlgmr.msra.gmra.mrb[48].mxu0 %vm2023_vm1, %v16618_v50  ;;  %v6361_v50 = vld [vmem:[#allocation10 + $0x2b8] sm:$0xff] }
0x18e7   : > { %17253 = vmatpush3.bf16.msra.mxu0 %v17250_v30  ;;  %v6138_v30 = vld [vmem:[#allocation10 + $0x300] sm:$0xff] }
0x18e8   : > { %16638 = vmatprep.subr.mxu0 %v16018_v52  ;;  %v17260_v35 = vpack.c.bf16 %v6142_v26, %v6138_v30  ;;  %v17296_v30 = vpack.c.bf16 %v6560_v20, %v6556_v28  ;;  %v6563_v26 = vld [vmem:[#allocation13 + $0x328] sm:$0xff] }
0x18ea   : > { %17261 = vmatpush1.bf16.msra.mxu1 %v17260_v35  ;;  %v6565_v35 = vld [vmem:[#allocation13 + $0x338] sm:$0xff] }
0x1934   : > { %v5891_v54 = vpop.xlane.xlu0 %5890 }
0x1935   : > { %18285 = vrcp.f32 %v5891_v54 }
0x1938   : > { %v5894_v56 = vpop.xlane.xlu0 %5893 }
0x1939   : > { %18287 = vrcp.f32 %v5894_v56 }
0x193f   : > { %v18286_v13 = vpop.eup %18285 }
0x1940   : > { %v5897_v62 = vmul.f32 %v18286_v13, %v18282_v47  ;;  %v6355_v47 = vld [vmem:[#allocation10 + $0x228] sm:$0xff] }
0x1941   : > { %v17270_v51 = vpack.c.bf16 %v6359_v48, %v6355_v47  ;;  %v6566_v47 = vld [vmem:[#allocation13 + $0x3a0] sm:$0xff]  ;;  %v17298_v48 = vpack.c.bf16 %v6569_v34, %v6565_v35 }
0x1942   : > { %16635 = vmatprep.mubr.msk.f32.mxu0 %vm2113_vm3, %v5897_v62 }
0x1943   : > { %v18288_v5 = vpop.eup %18287  ;;  %17271 = vmatprep.subr.bf16.mxu1 %v17270_v51  ;;  %v6564_v51 = vld [vmem:[#allocation13 + $0x330] sm:$0xff] }
0x1944   : > { %v5898_v57 = vmul.f32 %v18288_v5, %v18284_v49  ;;  %v6357_v49 = vld [vmem:[#allocation10 + $0x238] sm:$0xff] }
0x1945   : > { %v17278_v24 = vpack.c.bf16 %v6361_v50, %v6357_v49  ;;  %v6568_v50 = vld [vmem:[#allocation13 + $0x3b0] sm:$0xff] }
0x1946   : > { %16636 = vmatmul.mubr.msk.f32.vlgmr.msra.gmra.mrb[52].mxu0 %vm2113_vm3, %v5898_v57 }
0x1947   : > { %16639 = vmatpush3.msra.mxu0 %v16018_v52 }
0x1948   : > { %17263 = vmatprep.subr.bf16.mxu0 %v17262_v40  ;;  %v6561_v40 = vld [vmem:[#allocation13 + $0x2b8] sm:$0xff] }
0x1a19   : > { %v16637_v58 = vpop.f32.mrb[52].mxu0 }
0x1a1a   : > { %v5977_v59 = vpop.f32.mrb[53].mxu0 }
0x1a1b   : > { %16640 = vmatprep.mubr.msk.f32.mxu0 %vm2023_vm1, %v5977_v59  ;;  %v6354_v59 = vld [vmem:[#allocation10 + $0x220] sm:$0xff] }
0x1a1c   : > { %16641 = vmatmul.mubr.msk.f32.vlgmr.msra.gmra.mrb[48].mxu0 %vm2023_vm1, %v16637_v58  ;;  %v16022_v58 = vld [vmem:[#allocation7 + $0x1] ss:$0 sm:$0xff] }
0x1a1d   : > { %6316 = vmatprep.mubr.f32.mxu0 %v19461_v25  ;;  %17265 = vmatpush1.bf16.msra.mxu0 %v17264_v19  ;;  %v17294_v19 = vpack.c.bf16 %v6561_v40, %v6557_v15  ;;  %v6349_v40 = vld [vmem:[#allocation13 + $0x318] sm:$0xff] }
0x1a1e   : > { %17267 = vmatprep.subr.bf16.mxu0 %v17266_v33  ;;  %v6567_v33 = vld [vmem:[#allocation13 + $0x3a8] sm:$0xff] }
0x1a1f   : > { %v17290_v45 = vpack.c.bf16 %v6567_v33, %v6563_v26 }
0x1a21   : > { %17269 = vmatpush1.bf16.msra.mxu0 %v17268_v46  ;;  %v6562_v46 = vld [vmem:[#allocation13 + $0x320] sm:$0xff] }
0x1a22   : > { %17279 = vmatprep.subr.bf16.mxu0 %v17278_v24  ;;  %v17292_v49 = vpack.c.bf16 %v6566_v47, %v6562_v46  ;;  %v17300_v24 = vpack.c.bf16 %v6568_v50, %v6564_v51 }
0x1aef   : > { %v16642_v61 = vpop.f32.mrb[48].mxu0 }
0x1af0   : > { %v6080_v53 = vadd.f32 %v16642_v61, %v16021_v60  ;;  %v6060_v63 = vpop.f32.mrb[49].mxu0  ;;  %v6358_v61 = vld [vmem:[#allocation10 + $0x2a0] sm:$0xff] }
0x1af1   : > { %v6079_v42 = vadd.f32 %v16021_v60, %v6060_v63  ;;  %v6360_v63 = vld [vmem:[#allocation10 + $0x2b0] sm:$0xff] }
0x1af2   : > { %v6082_v10 = vadd.f32 %v6080_v53, %v20533_v44  ;;  %v6356_v53 = vld [vmem:[#allocation10 + $0x230] sm:$0xff] }
0x1af3   : > { %v6081_v0 = vadd.f32 %v6079_v42, %v20527_v55  ;;  %v16023_v42 = vld [vmem:[#allocation9 + $0x1] ss:$0 sm:$0xff] }
0x1af4   : > { %v6090_v1 = vsel %vm1855_vm0, %v6082_v10, 0.0 }
0x1af5   : > { %6091 = vadd.xlane.f32.xlu1 %v6090_v1  ;;  %v6087_v2 = vsel %vm1855_vm0, %v6081_v0, 0.0  ;;  %v6367_v1 = vld [vmem:[#allocation10 + $0x3a8] sm:$0xff] }
0x1af6   : > { %6088 = vadd.xlane.f32.xlu0 %v6087_v2  ;;  %v6365_v2 = vld [vmem:[#allocation10 + $0x338] sm:$0xff] }
0x1b82   : > { %v6092_v3 = vpop.xlane.xlu1 %6091 }
0x1b83   : > { %v6094_v4 = vmul.f32 0.03125, %v6092_v3  ;;  %v6089_v6 = vpop.xlane.xlu0 %6088  ;;  %v6369_v3 = vld [vmem:[#allocation10 + $0x3b8] sm:$0xff] }
0x1b84   : > { %v6093_v31 = vmul.f32 0.03125, %v6089_v6  ;;  %v17272_v6 = vpack.c.bf16 %v6358_v61, %v6354_v59  ;;  %v17282_v43 = vpack.c.bf16 %v6369_v3, %v6365_v2  ;;  %v6370_v61 = vld [vmem:[#allocation12 + $0x14] sm:$0xf] }
0x1b85   : > { %v20643_v7 = vsub.f32 %v6082_v10, %v6094_v4  ;;  %v6363_v10 = vld [vmem:[#allocation10 + $0x328] sm:$0xff]  ;;  %v6383_v2 = vrot.slane %v6370_v61, %v20433_v37  ;;  %v6379_v3 = vrot.slane %v6370_v61, %v20435_v38 }
0x1b86   : > { %v6095_v32 = vsub.f32 %v6081_v0, %v6093_v31  ;;  %v17280_v31 = vpack.c.bf16 %v6360_v63, %v6356_v53  ;;  %v17274_v12 = vpack.c.bf16 %v6367_v1, %v6363_v10  ;;  %v6375_v1 = vrot.slane %v6370_v61, %v20431_v36 }
0x1b87   : > { %v6098_v44 = vmul.f32 %v20643_v7, %v20643_v7 }
0x1b88   : > { %v6097_v8 = vmul.f32 %v6095_v32, %v6095_v32 }
0x1b89   : > { %v6102_v55 = vsel %vm1855_vm0, %v6098_v44, 0.0 }
0x1b8a   : > { %v6099_v9 = vsel %vm1855_vm0, %v6097_v8, 0.0  ;;  %v6362_v8 = vld [vmem:[#allocation10 + $0x320] sm:$0xff] }
0x1b8b   : > { %6100 = vadd.xlane.f32.xlu0 %v6099_v9 }
0x1b8f   : > { %6103 = vadd.xlane.f32.xlu0 %v6102_v55  ;;  %v6366_v55 = vld [vmem:[#allocation10 + $0x3a0] sm:$0xff] }
0x1b90   : > { %v17276_v41 = vpack.c.bf16 %v6366_v55, %v6362_v8  ;;  %v6340_v8 = vld [vmem:[#allocation13 + $0x210] sm:$0xff] }
0x1c18   : > { %v6101_v52 = vpop.xlane.xlu0 %6100 }
0x1c19   : > { %v6105_v54 = vmul.f32 0.03125, %v6101_v52  ;;  %v6339_v52 = vld [vmem:[#allocation13 + $0x208] sm:$0xff] }
0x1c1b   : > { %v6107_v56 = vadd.f32 1e-05, %v6105_v54  ;;  %v6343_v54 = vld [vmem:[#allocation13 + $0x288] sm:$0xff] }
0x1c1c   : > { %v6104_v13 = vpop.xlane.xlu0 %6103 }
0x1c1d   : > { %18289 = vrsqrt.f32 %v6107_v56  ;;  %v6106_v62 = vmul.f32 0.03125, %v6104_v13  ;;  %v6341_v56 = vld [vmem:[#allocation13 + $0x218] sm:$0xff]  ;;  %v17302_v13 = vpack.c.bf16 %v6343_v54, %v6339_v52 }
0x1c1f   : > { %v6108_v5 = vadd.f32 1e-05, %v6106_v62  ;;  %v6345_v62 = vld [vmem:[#allocation13 + $0x298] sm:$0xff] }
0x1c21   : > { %18291 = vrsqrt.f32 %v6108_v5  ;;  %v17310_v5 = vpack.c.bf16 %v6345_v62, %v6341_v56  ;;  %v6346_v56 = vld [vmem:[#allocation13 + $0x300] sm:$0xff] }
0x1c27   : > { %v18290_v57 = vpop.eup %18289 }
0x1c28   : > { %v6111_v60 = vmul.f32 %v18290_v57, %v6095_v32  ;;  %v6368_v32 = vld [vmem:[#allocation10 + $0x3b0] sm:$0xff] }
0x1c2a   : > { %v6119_v0 = vmul.f32 %v16022_v58, %v6111_v60 }
0x1c2b   : > { %v18292_v4 = vpop.eup %18291 }
0x1c2c   : > { %v20649_v9 = vadd.f32 %v16023_v42, %v6119_v0  ;;  %v6112_v44 = vmul.f32 %v18292_v4, %v20643_v7  ;;  %v17284_v7 = vpack.c.bf16 %v6368_v32, %v6364_v11  ;;  %v6387_v4 = vrot.slane %v6370_v61, %v20437_v39  ;;  %v6344_v32 = vld [vmem:[#allocation13 + $0x290] sm:$0xff] }
0x1c2d   : > { %v17312_v27 = vpack.c.bf16 %v6344_v32, %v6340_v8  ;;  %v6352_v61 = vld [vmem:[#allocation13 + $0x390] sm:$0xff] }
0x1c2e   : > { %v6120_v14 = vmul.f32 %v16022_v58, %v6112_v44  ;;  %16024 = vmatmul.mubr.msk.f32.vlgmr.msra.gmra.mrb[54].mxu1 %vm1855_vm0, %v20649_v9  ;;  %16026 = vmatmul.mubr.msk.f32.vlgmr.msra.gmra.mrb[54].mxu0 %vm1855_vm0, %v20649_v9 }
0x1c2f   : > { %17273 = vmatpush1.bf16.msra.mxu1 %v17272_v6  ;;  %17281 = vmatpush1.bf16.msra.mxu0 %v17280_v31  ;;  %v6338_v6 = vld [vmem:[#allocation13 + $0x200] sm:$0xff] }
0x1c30   : > { %v20656_v17 = vadd.f32 %v16023_v42, %v6120_v14  ;;  %6245 = vmatprep.mubr.f32.mxu1 %v19461_v25  ;;  %6322 = vmatprep.mubr.f32.mxu0 %v19461_v25  ;;  %v20684_v42 = vld [vmem:[#allocation12 + $0x10] sm:$0xf]  ;;  %v6342_v31 = vld [vmem:[#allocation13 + $0x280] sm:$0xff] }
0x1c31   : > { %17275 = vmatprep.subr.bf16.mxu1 %v17274_v12  ;;  %17283 = vmatprep.subr.bf16.mxu0 %v17282_v43  ;;  %v20696_v44 = vrot.slane %v20684_v42, %v20435_v38  ;;  %v6347_v12 = vld [vmem:[#allocation13 + $0x308] sm:$0xff]  ;;  %v17304_v22 = vpack.c.bf16 %v6342_v31, %v6338_v6  ;;  %v6877_v6 = vld [vmem:[#allocation10 + $0x2d8] sm:$0xff] }
0x1c32   : > { %16025 = vmatmul.mubr.msk.f32.gmra.mrb[56].mxu1 %vm1855_vm0, %v20656_v17  ;;  %16027 = vmatmul.mubr.msk.f32.gmra.mrb[56].mxu0 %vm1855_vm0, %v20656_v17  ;;  %v6351_v43 = vld [vmem:[#allocation13 + $0x388] sm:$0xff] }
0x1c33   : > { %17277 = vmatpush1.bf16.msra.mxu1 %v17276_v41  ;;  %17285 = vmatpush1.bf16.msra.mxu0 %v17284_v7  ;;  %v6353_v41 = vld [vmem:[#allocation13 + $0x398] sm:$0xff]  ;;  %v20700_v7 = vrot.slane %v20684_v42, %v20437_v39  ;;  %v17306_v28 = vpack.c.bf16 %v6351_v43, %v6347_v12  ;;  %v6870_v43 = vld [vmem:[#allocation10 + $0x240] sm:$0xff] }
0x1c34   : > { %6456 = vmatprep.mubr.f32.mxu1 %v19461_v25  ;;  %6533 = vmatprep.mubr.f32.mxu0 %v19461_v25  ;;  %v17314_v35 = vpack.c.bf16 %v6353_v41, %v6349_v40  ;;  %v6876_v40 = vld [vmem:[#allocation10 + $0x2d0] sm:$0xff] }
0x1c35   : > { %17287 = vmatprep.subr.bf16.mxu1 %v17286_v18  ;;  %17295 = vmatprep.subr.bf16.mxu0 %v17294_v19 }
0x1c36   : > { %16028 = vmatmul.mubr.msk.f32.vlgmr.msra.gmra.mrb[58].mxu1 %vm1855_vm0, %v20649_v9  ;;  %16030 = vmatmul.mubr.msk.f32.vlgmr.msra.gmra.mrb[58].mxu0 %vm1855_vm0, %v20649_v9 }
0x1c37   : > { %6462 = vmatprep.mubr.f32.mxu1 %v19461_v25  ;;  %6539 = vmatprep.mubr.f32.mxu0 %v19461_v25 }
0x1c3a   : > { %16029 = vmatmul.mubr.msk.f32.gmra.mrb[60].mxu1 %vm1855_vm0, %v20656_v17  ;;  %16031 = vmatmul.mubr.msk.f32.gmra.mrb[60].mxu0 %vm1855_vm0, %v20656_v17 }
0x1c3c   : > { %17289 = vmatpush1.bf16.xpose.msra.mxu1 %v17288_v29  ;;  %17297 = vmatpush1.bf16.xpose.msra.mxu0 %v17296_v30 }
0x1c3d   : > { %17291 = vmatprep.subr.bf16.mxu1 %v17290_v45  ;;  %17299 = vmatprep.subr.bf16.mxu0 %v17298_v48 }
0x1c44   : > { %17293 = vmatpush1.bf16.xpose.msra.mxu1 %v17292_v49  ;;  %17301 = vmatpush1.bf16.xpose.msra.mxu0 %v17300_v24 }
0x1c45   : > { %17303 = vmatprep.subr.bf16.mxu1 %v17302_v13  ;;  %17311 = vmatprep.subr.bf16.mxu0 %v17310_v5  ;;  %v6350_v13 = vld [vmem:[#allocation13 + $0x380] sm:$0xff] }
0x1c46   : > { %v17308_v31 = vpack.c.bf16 %v6350_v13, %v6346_v56  ;;  %v7072_v56 = vld [vmem:[#allocation13 + $0x250] sm:$0xff] }
0x1d01   : > { %v20676_v57 = vpop.f32.mrb[54].mxu1  ;;  %v20678_v58 = vpop.f32.mrb[54].mxu0 }
0x1d02   : > { %v6243_v59 = vpop.f32.mrb[55].mxu1  ;;  %v6320_v60 = vpop.f32.mrb[55].mxu0 }
0x1d03   : > { %v6244_v20 = vadd.f32 %v6243_v59, %v20696_v44  ;;  %v6321_v51 = vadd.f32 %v6320_v60, %v20700_v7  ;;  %v6348_v59 = vld [vmem:[#allocation13 + $0x310] sm:$0xff] }
0x1d04   : > { %v17316_v8 = vpack.c.bf16 %v6352_v61, %v6348_v59  ;;  %v7079_v59 = vld [vmem:[#allocation13 + $0x348] sm:$0xff] }
0x1d05   : > { %v20680_v53 = vpop.f32.mrb[56].mxu1  ;;  %v20682_v63 = vpop.f32.mrb[56].mxu0  ;;  %v6330_v60 = vmax.f32 %v6244_v20, 0.0  ;;  %v7083_v61 = vld [vmem:[#allocation13 + $0x3c8] sm:$0xff] }
0x1d06   : > { %v20686_v10 = vpop.f32.mrb[57].mxu1  ;;  %v20688_v0 = vpop.f32.mrb[57].mxu0 }
0x1d07   : > { %v6250_v41 = vadd.f32 %v20686_v10, %v20696_v44  ;;  %v6882_v44 = vld [vmem:[#allocation10 + $0x3c0] sm:$0xff] }
0x1d09   : > { %v6458_v55 = vpop.f32.mrb[58].mxu1  ;;  %v6535_v11 = vpop.f32.mrb[58].mxu0 }
0x1d0a   : > { %v6459_v16 = vadd.f32 %v6458_v55, %v6375_v1  ;;  %v6536_v14 = vadd.f32 %v6535_v11, %v6383_v2  ;;  %v6460_v23 = vpop.f32.mrb[59].mxu1  ;;  %v6537_v15 = vpop.f32.mrb[59].mxu0  ;;  %v6152_v55 = vrot.slane %v20684_v42, %v20431_v36  ;;  %v6160_v11 = vrot.slane %v20684_v42, %v20433_v37 }
0x1d0b   : > { %v6461_v18 = vadd.f32 %v6460_v23, %v6379_v3  ;;  %v6538_v19 = vadd.f32 %v6537_v15, %v6387_v4  ;;  %v6874_v23 = vld [vmem:[#allocation10 + $0x2c0] sm:$0xff]  ;;  %v6872_v15 = vld [vmem:[#allocation10 + $0x250] sm:$0xff]  ;;  %v6327_v42 = vadd.f32 %v20688_v0, %v20700_v7 }
0x1d0c   : > { %v6546_v45 = vmax.f32 %v6459_v16, 0.0  ;;  %v6548_v34 = vmax.f32 %v6536_v14, 0.0  ;;  %v6242_v16 = vadd.f32 %v20676_v57, %v6152_v55  ;;  %v6319_v14 = vadd.f32 %v20678_v58, %v6160_v11  ;;  %v6884_v0 = vld [vmem:[#allocation10 + $0x3d0] sm:$0xff] }
0x1d0d   : > { %v6547_v29 = vmax.f32 %v6461_v18, 0.0  ;;  %v6549_v30 = vmax.f32 %v6538_v19, 0.0  ;;  %v6464_v26 = vpop.f32.mrb[60].mxu1  ;;  %v6541_v33 = vpop.f32.mrb[60].mxu0  ;;  %v6879_v18 = vld [vmem:[#allocation10 + $0x348] sm:$0xff]  ;;  %v17328_v20 = vpack.c.bf16 %v6876_v40, %v6872_v15  ;;  %v6248_v58 = vadd.f32 %v20680_v53, %v6152_v55  ;;  %v7084_v55 = vld [vmem:[#allocation13 + $0x3d0] sm:$0xff] }
0x1d0e   : > { %v6465_v46 = vadd.f32 %v6464_v26, %v6375_v1  ;;  %v6542_v47 = vadd.f32 %v6541_v33, %v6383_v2  ;;  %v6466_v48 = vpop.f32.mrb[61].mxu1  ;;  %v6543_v49 = vpop.f32.mrb[61].mxu0  ;;  %v6871_v1 = vld [vmem:[#allocation10 + $0x248] sm:$0xff]  ;;  %v6332_v2 = vmax.f32 %v6321_v51, 0.0  ;;  %v6329_v57 = vmax.f32 %v6242_v16, 0.0  ;;  %v6878_v26 = vld [vmem:[#allocation10 + $0x340] sm:$0xff] }
0x1d0f   : > { %v6467_v50 = vadd.f32 %v6466_v48, %v6379_v3  ;;  %v6544_v24 = vadd.f32 %v6543_v49, %v6387_v4  ;;  %6634 = vmatprep.mubr.f32.mxu1 %v6547_v29  ;;  %6709 = vmatprep.mubr.f32.mxu0 %v6549_v30  ;;  %v6875_v3 = vld [vmem:[#allocation10 + $0x2c8] sm:$0xff]  ;;  %v6873_v4 = vld [vmem:[#allocation10 + $0x258] sm:$0xff]  ;;  %v6331_v29 = vmax.f32 %v6319_v14, 0.0  ;;  %v6325_v30 = vadd.f32 %v20682_v63, %v6160_v11 }
0x1d10   : > { %6635 = vmatmul.mubr.f32.vlgmr.msra.gmra.mrb[62].mxu1 %v6546_v45  ;;  %6710 = vmatmul.mubr.f32.vlgmr.msra.gmra.mrb[62].mxu0 %v6548_v34  ;;  %v6550_v62 = vmax.f32 %v6465_v46, 0.0  ;;  %v6552_v5 = vmax.f32 %v6542_v47, 0.0  ;;  %v17318_v32 = vpack.c.bf16 %v6875_v3, %v6871_v1  ;;  %v17326_v12 = vpack.c.bf16 %v6877_v6, %v6873_v4  ;;  %v6883_v19 = vld [vmem:[#allocation10 + $0x3c8] sm:$0xff]  ;;  %v6880_v34 = vld [vmem:[#allocation10 + $0x350] sm:$0xff]  ;;  %v7073_v49 = vld [vmem:[#allocation13 + $0x258] sm:$0xff] }
0x1d11   : > { %v6551_v52 = vmax.f32 %v6467_v50, 0.0  ;;  %v6553_v54 = vmax.f32 %v6544_v24, 0.0  ;;  %17305 = vmatpush1.bf16.xpose.msra.mxu1 %v17304_v22  ;;  %17313 = vmatpush1.bf16.xpose.msra.mxu0 %v17312_v27  ;;  %v6881_v22 = vld [vmem:[#allocation10 + $0x358] sm:$0xff]  ;;  %v6334_v33 = vmax.f32 %v6250_v41, 0.0  ;;  %v17322_v45 = vpack.c.bf16 %v6883_v19, %v6879_v18  ;;  %v7071_v63 = vld [vmem:[#allocation13 + $0x248] sm:$0xff]  ;;  %v7078_v3 = vld [vmem:[#allocation13 + $0x340] sm:$0xff] }
0x1d12   : > { %17307 = vmatprep.subr.bf16.mxu1 %v17306_v28  ;;  %17315 = vmatprep.subr.bf16.mxu0 %v17314_v35  ;;  %v6885_v27 = vld [vmem:[#allocation10 + $0x3d8] sm:$0xff]  ;;  %v17320_v28 = vpack.c.bf16 %v6874_v23, %v6870_v43  ;;  %v6336_v35 = vmax.f32 %v6327_v42, 0.0  ;;  %v6333_v7 = vmax.f32 %v6248_v58, 0.0  ;;  %v6335_v46 = vmax.f32 %v6325_v30, 0.0  ;;  %v7075_v48 = vld [vmem:[#allocation13 + $0x2c8] sm:$0xff]  ;;  %v7082_v4 = vld [vmem:[#allocation13 + $0x3c0] sm:$0xff] }
0x1d13   : > { %6639 = vmatprep.mubr.f32.mxu1 %v6551_v52  ;;  %6714 = vmatprep.mubr.f32.mxu0 %v6553_v54  ;;  %v17330_v10 = vpack.c.bf16 %v6885_v27, %v6881_v22  ;;  %v17324_v47 = vpack.c.bf16 %v6882_v44, %v6878_v26  ;;  %v17332_v53 = vpack.c.bf16 %v6884_v0, %v6880_v34  ;;  %v7077_v50 = vld [vmem:[#allocation13 + $0x2d8] sm:$0xff]  ;;  %v7070_v52 = vld [vmem:[#allocation13 + $0x240] sm:$0xff] }
0x1d14   : > { %6640 = vmatmul.mubr.f32.gmra.mrb[64].mxu1 %v6550_v62  ;;  %6715 = vmatmul.mubr.f32.gmra.mrb[64].mxu0 %v6552_v5  ;;  %v17334_v51 = vpack.c.bf16 %v7075_v48, %v7071_v63  ;;  %v17342_v24 = vpack.c.bf16 %v7077_v50, %v7073_v49  ;;  %v7074_v54 = vld [vmem:[#allocation13 + $0x2c0] sm:$0xff]  ;;  %v7076_v62 = vld [vmem:[#allocation13 + $0x2d0] sm:$0xff]  ;;  %v7081_v1 = vld [vmem:[#allocation13 + $0x358] sm:$0xff] }
0x1d15   : > { %6784 = vmatprep.mubr.f32.mxu1 %v6330_v60  ;;  %6859 = vmatprep.mubr.f32.mxu0 %v6332_v2  ;;  %v17336_v13 = vpack.c.bf16 %v7074_v54, %v7070_v52  ;;  %v17344_v5 = vpack.c.bf16 %v7076_v62, %v7072_v56  ;;  %v17338_v60 = vpack.c.bf16 %v7083_v61, %v7079_v59  ;;  %v7085_v2 = vld [vmem:[#allocation13 + $0x3d8] sm:$0xff]  ;;  %v7238_v48 = vld [vmem:[#allocation10 + $0x260] sm:$0xff]  ;;  %v7244_v52 = vld [vmem:[#allocation10 + $0x2f0] sm:$0xff] }
0x1d16   : > { %v17346_v6 = vpack.c.bf16 %v7085_v2, %v7081_v1  ;;  %v7241_v43 = vld [vmem:[#allocation10 + $0x278] sm:$0xff]  ;;  %v7242_v49 = vld [vmem:[#allocation10 + $0x2e0] sm:$0xff]  ;;  %v7247_v54 = vld [vmem:[#allocation10 + $0x368] sm:$0xff] }
0x1d17   : > { %v7245_v14 = vld [vmem:[#allocation10 + $0x2f8] sm:$0xff]  ;;  %v7251_v59 = vld [vmem:[#allocation10 + $0x3e8] sm:$0xff] }
0x1d18   : > { %v17358_v23 = vpack.c.bf16 %v7245_v14, %v7241_v43  ;;  %v7249_v61 = vld [vmem:[#allocation10 + $0x378] sm:$0xff]  ;;  %v7250_v43 = vld [vmem:[#allocation10 + $0x3e0] sm:$0xff] }
0x1d19   : > { %17309 = vmatpush1.bf16.xpose.msra.mxu1 %v17308_v31  ;;  %17317 = vmatpush1.bf16.xpose.msra.mxu0 %v17316_v8  ;;  %v17340_v31 = vpack.c.bf16 %v7082_v4, %v7078_v3  ;;  %v7080_v8 = vld [vmem:[#allocation13 + $0x350] sm:$0xff]  ;;  %v7253_v1 = vld [vmem:[#allocation10 + $0x3f8] sm:$0xff]  ;;  %v17352_v3 = vpack.c.bf16 %v7242_v49, %v7238_v48  ;;  %v7447_v48 = vld [vmem:[#allocation13 + $0x368] sm:$0xff] }
0x1d1a   : > { %17319 = vmatprep.subr.bf16.mxu1 %v17318_v32  ;;  %17327 = vmatprep.subr.bf16.mxu0 %v17326_v12  ;;  %v17348_v11 = vpack.c.bf16 %v7084_v55, %v7080_v8  ;;  %v7239_v32 = vld [vmem:[#allocation10 + $0x268] sm:$0xff] }
0x1d1b   : > { %v7243_v12 = vld [vmem:[#allocation10 + $0x2e8] sm:$0xff] }
0x1d1c   : > { %v17350_v16 = vpack.c.bf16 %v7243_v12, %v7239_v32  ;;  %v17362_v32 = vpack.c.bf16 %v7253_v1, %v7249_v61  ;;  %v7246_v12 = vld [vmem:[#allocation10 + $0x360] sm:$0xff]  ;;  %v7451_v49 = vld [vmem:[#allocation13 + $0x3e8] sm:$0xff]  ;;  %v19462_v61 = vmov 0.0|0.0  }
0x1d20   : > { %6785 = vmatmul.mubr.f32.vlgmr.msra.gmra.mrb[66].mxu1 %v6329_v57  ;;  %6860 = vmatmul.mubr.f32.vlgmr.msra.gmra.mrb[66].mxu0 %v6331_v29 }
0x1d21   : > { %6789 = vmatprep.mubr.f32.mxu1 %v6334_v33  ;;  %6864 = vmatprep.mubr.f32.mxu0 %v6336_v35  ;;  %v6886_v35 = vld [vmem:[#allocation12 + $0x18] sm:$0xf] }
0x1d22   : > { %17321 = vmatpush1.bf16.msra.mxu1 %v17320_v28  ;;  %17329 = vmatpush1.bf16.msra.mxu0 %v17328_v20  ;;  %v6903_v63 = vrot.slane %v6886_v35, %v20437_v39 }
0x1d23   : > { %17323 = vmatprep.subr.bf16.mxu1 %v17322_v45  ;;  %17331 = vmatprep.subr.bf16.mxu0 %v17330_v10 }
0x1d24   : > { %6790 = vmatmul.mubr.f32.gmra.mrb[68].mxu1 %v6333_v7  ;;  %6865 = vmatmul.mubr.f32.gmra.mrb[68].mxu0 %v6335_v46  ;;  %v6891_v7 = vrot.slane %v6886_v35, %v20431_v36  ;;  %v6899_v46 = vrot.slane %v6886_v35, %v20433_v37 }
0x1d25   : > { %6972 = vmatprep.mubr.f32.mxu1 %v19461_v25  ;;  %7049 = vmatprep.mubr.f32.mxu0 %v19461_v25 }
0x1d26   : > { %17325 = vmatpush1.bf16.msra.mxu1 %v17324_v47  ;;  %17333 = vmatpush1.bf16.msra.mxu0 %v17332_v53  ;;  %v6895_v53 = vrot.slane %v6886_v35, %v20435_v38 }
0x1d27   : > { %17335 = vmatprep.subr.bf16.mxu1 %v17334_v51  ;;  %17343 = vmatprep.subr.bf16.mxu0 %v17342_v24  ;;  %v7240_v24 = vld [vmem:[#allocation10 + $0x270] sm:$0xff] }
0x1d28   : > { %v17360_v4 = vpack.c.bf16 %v7244_v52, %v7240_v24  ;;  %v7453_v24 = vld [vmem:[#allocation13 + $0x3f8] sm:$0xff]  ;;  %v7446_v52 = vld [vmem:[#allocation13 + $0x360] sm:$0xff] }
0x1d29   : > { %16032 = vmatmul.mubr.msk.f32.vlgmr.msra.gmra.mrb[70].mxu1 %vm1855_vm0, %v20649_v9  ;;  %16034 = vmatmul.mubr.msk.f32.vlgmr.msra.gmra.mrb[70].mxu0 %vm1855_vm0, %v20649_v9 }
0x1d2a   : > { %6978 = vmatprep.mubr.f32.mxu1 %v19461_v25  ;;  %7055 = vmatprep.mubr.f32.mxu0 %v19461_v25 }
0x1d2d   : > { %16033 = vmatmul.mubr.msk.f32.gmra.mrb[72].mxu1 %vm1855_vm0, %v20656_v17  ;;  %16035 = vmatmul.mubr.msk.f32.gmra.mrb[72].mxu0 %vm1855_vm0, %v20656_v17 }
0x1d2f   : > { %17337 = vmatpush1.bf16.xpose.msra.mxu1 %v17336_v13  ;;  %17345 = vmatpush1.bf16.xpose.msra.mxu0 %v17344_v5 }
0x1d30   : > { %17339 = vmatprep.subr.bf16.mxu1 %v17338_v60  ;;  %17347 = vmatprep.subr.bf16.mxu0 %v17346_v6 }
0x1d37   : > { %17341 = vmatpush1.bf16.xpose.msra.mxu1 %v17340_v31  ;;  %17349 = vmatpush1.bf16.xpose.msra.mxu0 %v17348_v11  ;;  %v17354_v11 = vpack.c.bf16 %v7251_v59, %v7247_v54  ;;  %v7450_v54 = vld [vmem:[#allocation13 + $0x3e0] sm:$0xff] }
0x1d38   : > { %17351 = vmatprep.subr.bf16.mxu1 %v17350_v16  ;;  %17359 = vmatprep.subr.bf16.mxu0 %v17358_v23 }
0x1de3   : > { %v6636_v15 = vpop.f32.mrb[62].mxu1  ;;  %v6711_v40 = vpop.f32.mrb[62].mxu0 }
0x1de4   : > { %v6712_v41 = vadd.f32 %v6711_v40, %v6636_v15  ;;  %v6638_v42 = vpop.f32.mrb[63].mxu1  ;;  %v6713_v18 = vpop.f32.mrb[63].mxu0 }
0x1de5   : > { %v7248_v42 = vld [vmem:[#allocation10 + $0x370] sm:$0xff] }
0x1de6   : > { %v7252_v18 = vld [vmem:[#allocation10 + $0x3f0] sm:$0xff] }
0x1de7   : > { %v6641_v19 = vpop.f32.mrb[64].mxu1  ;;  %v6716_v22 = vpop.f32.mrb[64].mxu0 }
0x1de8   : > { %v6717_v27 = vadd.f32 %v6716_v22, %v6641_v19  ;;  %v6643_v28 = vpop.f32.mrb[65].mxu1  ;;  %v6718_v20 = vpop.f32.mrb[65].mxu0 }
0x1de9   : > { %v7443_v28 = vld [vmem:[#allocation13 + $0x2e8] sm:$0xff]  ;;  %v7441_v20 = vld [vmem:[#allocation13 + $0x278] sm:$0xff] }
0x1df3   : > { %v6786_v57 = vpop.f32.mrb[66].mxu1  ;;  %v6861_v29 = vpop.f32.mrb[66].mxu0 }
0x1df4   : > { %v6787_v58 = vadd.f32 %v6786_v57, %v6712_v41  ;;  %v6788_v30 = vpop.f32.mrb[67].mxu1  ;;  %v6863_v26 = vpop.f32.mrb[67].mxu0  ;;  %v7445_v57 = vld [vmem:[#allocation13 + $0x2f8] sm:$0xff] }
0x1df5   : > { %v17356_v30 = vpack.c.bf16 %v7250_v43, %v7246_v12  ;;  %v17364_v26 = vpack.c.bf16 %v7252_v18, %v7248_v42 }
0x1df6   : > { %v20728_v33 = vadd.f32 %v6861_v29, %v6787_v58 }
0x1df7   : > { %v6791_v45 = vpop.f32.mrb[68].mxu1  ;;  %v6866_v10 = vpop.f32.mrb[68].mxu0 }
0x1df8   : > { %v6792_v44 = vadd.f32 %v6791_v45, %v6717_v27  ;;  %v6793_v34 = vpop.f32.mrb[69].mxu1  ;;  %v6868_v0 = vpop.f32.mrb[69].mxu0  ;;  %v7439_v27 = vld [vmem:[#allocation13 + $0x268] sm:$0xff] }
0x1df9   : > { %v7438_v34 = vld [vmem:[#allocation13 + $0x260] sm:$0xff] }
0x1dfa   : > { %v20732_v47 = vadd.f32 %v6866_v10, %v6792_v44  ;;  %v17366_v10 = vpack.c.bf16 %v7443_v28, %v7439_v27  ;;  %v17374_v44 = vpack.c.bf16 %v7445_v57, %v7441_v20  ;;  %v7442_v0 = vld [vmem:[#allocation13 + $0x2e0] sm:$0xff]  ;;  %v7794_v27 = vld [vmem:[#allocation21 + $0x8] sm:$0xff] }
0x1dfb   : > { %v7709_v28 = vld [vmem:[#allocation19] sm:$0xff]  ;;  %v7710_v20 = vld [vmem:[#allocation19 + $0x8] sm:$0xff] }
0x1dfc   : > { %v6974_v51 = vpop.f32.mrb[70].mxu1  ;;  %v7051_v50 = vpop.f32.mrb[70].mxu0 }
0x1dfd   : > { %v6975_v56 = vadd.f32 %v6974_v51, %v6891_v7  ;;  %v7052_v13 = vadd.f32 %v7051_v50, %v6899_v46  ;;  %v6976_v62 = vpop.f32.mrb[71].mxu1  ;;  %v7053_v5 = vpop.f32.mrb[71].mxu0  ;;  %v7449_v51 = vld [vmem:[#allocation13 + $0x378] sm:$0xff]  ;;  %v17370_v50 = vpack.c.bf16 %v7451_v49, %v7447_v48 }
0x1dfe   : > { %v6977_v60 = vadd.f32 %v6976_v62, %v6895_v53  ;;  %v7054_v2 = vadd.f32 %v7053_v5, %v6903_v63  ;;  %v7448_v62 = vld [vmem:[#allocation13 + $0x370] sm:$0xff] }
0x1dff   : > { %v7062_v16 = vmax.f32 %v6975_v56, 0.0  ;;  %v7064_v14 = vmax.f32 %v7052_v13, 0.0  ;;  %v17378_v56 = vpack.c.bf16 %v7453_v24, %v7449_v51  ;;  %v17372_v13 = vpack.c.bf16 %v7450_v54, %v7446_v52  ;;  %v7452_v5 = vld [vmem:[#allocation13 + $0x3f0] sm:$0xff] }
0x1e00   : > { %v7063_v6 = vmax.f32 %v6977_v60, 0.0  ;;  %v7065_v31 = vmax.f32 %v7054_v2, 0.0  ;;  %v6980_v8 = vpop.f32.mrb[72].mxu1  ;;  %v7057_v55 = vpop.f32.mrb[72].mxu0  ;;  %v17380_v59 = vpack.c.bf16 %v7452_v5, %v7448_v62  ;;  %v7711_v51 = vld [vmem:[#allocation19 + $0x10] sm:$0xff] }
0x1e01   : > { %v6981_v23 = vadd.f32 %v6980_v8, %v6891_v7  ;;  %v7058_v15 = vadd.f32 %v7057_v55, %v6899_v46  ;;  %v6982_v40 = vpop.f32.mrb[73].mxu1  ;;  %v7059_v41 = vpop.f32.mrb[73].mxu0  ;;  %v7440_v7 = vld [vmem:[#allocation13 + $0x270] sm:$0xff]  ;;  %v17368_v46 = vpack.c.bf16 %v7442_v0, %v7438_v34 }
0x1e02   : > { %v6983_v19 = vadd.f32 %v6982_v40, %v6895_v53  ;;  %v7060_v22 = vadd.f32 %v7059_v41, %v6903_v63  ;;  %7150 = vmatprep.mubr.f32.mxu1 %v7063_v6  ;;  %7225 = vmatprep.mubr.f32.mxu0 %v7065_v31  ;;  %v7444_v53 = vld [vmem:[#allocation13 + $0x2f0] sm:$0xff]  ;;  %v7254_v6 = vld [vmem:[#allocation12 + $0x1c] sm:$0xf] }
0x1e03   : > { %7151 = vmatmul.mubr.f32.vlgmr.msra.gmra.mrb[74].mxu1 %v7062_v16  ;;  %7226 = vmatmul.mubr.f32.vlgmr.msra.gmra.mrb[74].mxu0 %v7064_v14  ;;  %v7066_v35 = vmax.f32 %v6981_v23, 0.0  ;;  %v7068_v45 = vmax.f32 %v7058_v15, 0.0  ;;  %v17376_v63 = vpack.c.bf16 %v7444_v53, %v7440_v7  ;;  %v7259_v43 = vrot.slane %v7254_v6, %v20431_v36  ;;  %v7795_v53 = vld [vmem:[#allocation21 + $0x10] sm:$0xff] }
0x1e04   : > { %v7067_v29 = vmax.f32 %v6983_v19, 0.0  ;;  %v7069_v58 = vmax.f32 %v7060_v22, 0.0  ;;  %17353 = vmatpush1.bf16.msra.mxu1 %v17352_v3  ;;  %17361 = vmatpush1.bf16.msra.mxu0 %v17360_v4  ;;  %v7267_v16 = vrot.slane %v7254_v6, %v20433_v37  ;;  %v7263_v14 = vrot.slane %v7254_v6, %v20435_v38  ;;  %v20768_v5 = vld [vmem:[%s1837_s4] sm:$0xff]  ;;  %s21467_s4 = smov 80  }
0x1e05   : > { %17355 = vmatprep.subr.bf16.mxu1 %v17354_v11  ;;  %17363 = vmatprep.subr.bf16.mxu0 %v17362_v32  ;;  %v7271_v23 = vrot.slane %v7254_v6, %v20437_v39 }
0x1e06   : > { %7155 = vmatprep.mubr.f32.mxu1 %v7067_v29  ;;  %7230 = vmatprep.mubr.f32.mxu0 %v7069_v58 }
0x1e07   : > { %7156 = vmatmul.mubr.f32.gmra.mrb[76].mxu1 %v7066_v35  ;;  %7231 = vmatmul.mubr.f32.gmra.mrb[76].mxu0 %v7068_v45 }
0x1e08   : > { %17357 = vmatpush1.bf16.msra.mxu1 %v17356_v30  ;;  %17365 = vmatpush1.bf16.msra.mxu0 %v17364_v26 }
0x1e09   : > { %7340 = vmatprep.mubr.f32.mxu1 %v19461_v25  ;;  %7417 = vmatprep.mubr.f32.mxu0 %v19461_v25 }
0x1e0a   : > { %17367 = vmatprep.subr.bf16.mxu1 %v17366_v10  ;;  %17375 = vmatprep.subr.bf16.mxu0 %v17374_v44 }
0x1e0b   : > { %16036 = vmatmul.mubr.msk.f32.vlgmr.msra.gmra.mrb[78].mxu1 %vm1855_vm0, %v20649_v9  ;;  %16038 = vmatmul.mubr.msk.f32.vlgmr.msra.gmra.mrb[78].mxu0 %vm1855_vm0, %v20649_v9 }
0x1e0c   : > { %7346 = vmatprep.mubr.f32.mxu1 %v19461_v25  ;;  %7423 = vmatprep.mubr.f32.mxu0 %v19461_v25 }
0x1e0f   : > { %16037 = vmatmul.mubr.msk.f32.gmra.mrb[80].mxu1 %vm1855_vm0, %v20656_v17  ;;  %16039 = vmatmul.mubr.msk.f32.gmra.mrb[80].mxu0 %vm1855_vm0, %v20656_v17 }
0x1e11   : > { %17369 = vmatpush1.bf16.xpose.msra.mxu1 %v17368_v46  ;;  %17377 = vmatpush1.bf16.xpose.msra.mxu0 %v17376_v63  ;;  %v7796_v63 = vld [vmem:[#allocation21 + $0x18] sm:$0xff] }
0x1e12   : > { %17371 = vmatprep.subr.bf16.mxu1 %v17370_v50  ;;  %17379 = vmatprep.subr.bf16.mxu0 %v17378_v56  ;;  %v7712_v50 = vld [vmem:[#allocation19 + $0x18] sm:$0xff]  ;;  %v17392_v54 = vpack.c.bf16 %v7796_v63, %v7795_v53 }
0x1e13   : > { %v17386_v62 = vpack.c.bf16 %v7712_v50, %v7711_v51 }
0x1e19   : > { %17373 = vmatpush1.bf16.xpose.msra.mxu1 %v17372_v13  ;;  %17381 = vmatpush1.bf16.xpose.msra.mxu0 %v17380_v59 }
0x1e1a   : > { %17388 = vmatprep.subr.bf16.mxu0 %v19462_v61  ;;  %17382 = vmatprep.subr.bf16.mxu1 %v19462_v61 }
0x1ed6   : > { %v7152_v1 = vpop.f32.mrb[74].mxu1  ;;  %v7227_v60 = vpop.f32.mrb[74].mxu0 }
0x1ed7   : > { %v7228_v2 = vadd.f32 %v7227_v60, %v7152_v1  ;;  %v7154_v3 = vpop.f32.mrb[75].mxu1  ;;  %v7229_v4 = vpop.f32.mrb[75].mxu0 }
0x1ed9   : > { %v20751_v31 = vadd.f32 %v7228_v2, %v20728_v33  ;;  %v7793_v33 = vld [vmem:[#allocation21] sm:$0xff] }
0x1eda   : > { %v7157_v8 = vpop.f32.mrb[76].mxu1  ;;  %v7232_v55 = vpop.f32.mrb[76].mxu0  ;;  %v17389_v45 = vpack.c.bf16 %v7794_v27, %v7793_v33 }
0x1edb   : > { %v7233_v11 = vadd.f32 %v7232_v55, %v7157_v8  ;;  %v7159_v32 = vpop.f32.mrb[77].mxu1  ;;  %v7234_v12 = vpop.f32.mrb[77].mxu0 }
0x1edc   : > { %v16047_v12 = vld [vmem:[#allocation24] ss:$0 sm:$0xff] }
0x1edd   : > { %v20758_v15 = vadd.f32 %v7233_v11, %v20732_v47  ;;  %v17383_v47 = vpack.c.bf16 %v7710_v20, %v7709_v28 }
0x1ede   : > { %v7342_v40 = vpop.f32.mrb[78].mxu1  ;;  %v7419_v41 = vpop.f32.mrb[78].mxu0 }
0x1edf   : > { %v7343_v42 = vadd.f32 %v7342_v40, %v7259_v43  ;;  %v7420_v18 = vadd.f32 %v7419_v41, %v7267_v16  ;;  %v7344_v19 = vpop.f32.mrb[79].mxu1  ;;  %v7421_v22 = vpop.f32.mrb[79].mxu0 }
0x1ee0   : > { %v7345_v57 = vadd.f32 %v7344_v19, %v7263_v14  ;;  %v7422_v29 = vadd.f32 %v7421_v22, %v7271_v23 }
0x1ee1   : > { %v7430_v10 = vmax.f32 %v7343_v42, 0.0  ;;  %v7432_v44 = vmax.f32 %v7420_v18, 0.0 }
0x1ee2   : > { %v7431_v58 = vmax.f32 %v7345_v57, 0.0  ;;  %v7433_v30 = vmax.f32 %v7422_v29, 0.0  ;;  %v7348_v26 = vpop.f32.mrb[80].mxu1  ;;  %v7425_v35 = vpop.f32.mrb[80].mxu0 }
0x1ee3   : > { %v7349_v34 = vadd.f32 %v7348_v26, %v7259_v43  ;;  %v7426_v0 = vadd.f32 %v7425_v35, %v7267_v16  ;;  %v7350_v7 = vpop.f32.mrb[81].mxu1  ;;  %v7427_v46 = vpop.f32.mrb[81].mxu0  ;;  %v16045_v16 = vld [vmem:[#allocation22] ss:$0 sm:$0xff] }
0x1ee4   : > { %v7351_v48 = vadd.f32 %v7350_v7, %v7263_v14  ;;  %v7428_v49 = vadd.f32 %v7427_v46, %v7271_v23  ;;  %7518 = vmatprep.mubr.f32.mxu1 %v7431_v58  ;;  %7593 = vmatprep.mubr.f32.mxu0 %v7433_v30 }
0x1ee5   : > { %7519 = vmatmul.mubr.f32.vlgmr.msra.gmra.mrb[82].mxu1 %v7430_v10  ;;  %7594 = vmatmul.mubr.f32.vlgmr.msra.gmra.mrb[82].mxu0 %v7432_v44  ;;  %v7434_v56 = vmax.f32 %v7349_v34, 0.0  ;;  %v7436_v13 = vmax.f32 %v7426_v0, 0.0 }
0x1ee6   : > { %v7435_v24 = vmax.f32 %v7351_v48, 0.0  ;;  %v7437_v52 = vmax.f32 %v7428_v49, 0.0  ;;  %17390 = vmatpush3.bf16.msra.mxu0 %v17389_v45  ;;  %17384 = vmatpush3.bf16.msra.mxu1 %v17383_v47  ;;  %v8206_v48 = vld [vmem:[#allocation25 + $0x8] sm:$0xff] }
0x1ee7   : > { %17391 = vmatprep.subr.bf16.mxu0 %v19462_v61  ;;  %17385 = vmatprep.subr.bf16.mxu1 %v19462_v61 }
0x1ee8   : > { %7523 = vmatprep.mubr.f32.mxu1 %v7435_v24  ;;  %7598 = vmatprep.mubr.f32.mxu0 %v7437_v52  ;;  %v8038_v52 = vld [vmem:[#allocation25] sm:$0xff] }
0x1ee9   : > { %7524 = vmatmul.mubr.f32.gmra.mrb[84].mxu1 %v7434_v56  ;;  %7599 = vmatmul.mubr.f32.gmra.mrb[84].mxu0 %v7436_v13 }
0x1eea   : > { %17393 = vmatpush3.bf16.msra.mxu0 %v17392_v54  ;;  %16662 = vmatprep.mubr.msk.f32.mxu0 %vm19463_vm4, %v19461_v25 }
0x1eeb   : > { %17387 = vmatpush3.bf16.msra.mxu1 %v17386_v62  ;;  %16651 = vmatprep.mubr.msk.f32.mxu1 %vm19463_vm4, %v19461_v25 }
0x1eec   : > { %16665 = vmatprep.subr.mxu1 %v19461_v25  ;;  %16675 = vmatprep.subr.mxu0 %v19461_v25 }
0x1eed   : > { %16663 = vmatmul.mubr.msk.f32.vlgmr.msra.gmra.mrb[86].mxu0 %vm1855_vm0, %v20768_v5 }
0x1eee   : > { %16652 = vmatmul.mubr.msk.f32.vlgmr.msra.gmra.mrb[86].mxu1 %vm1855_vm0, %v20768_v5  ;;  %16677 = vmatprep.mubr.msk.f32.mxu0 %vm19463_vm4, %v19461_v25 }
0x1eef   : > { %16667 = vmatprep.mubr.msk.f32.mxu1 %vm19463_vm4, %v19461_v25 }
0x1fb8   : > { %v7520_v59 = vpop.f32.mrb[82].mxu1  ;;  %v7595_v1 = vpop.f32.mrb[82].mxu0 }
0x1fb9   : > { %v7596_v60 = vadd.f32 %v7595_v1, %v7520_v59  ;;  %v7522_v2 = vpop.f32.mrb[83].mxu1  ;;  %v7597_v3 = vpop.f32.mrb[83].mxu0 }
0x1fbb   : > { %v20783_v4 = vadd.f32 %v7596_v60, %v20751_v31 }
0x1fbc   : > { %v7525_v6 = vpop.f32.mrb[84].mxu1  ;;  %v7600_v8 = vpop.f32.mrb[84].mxu0 }
0x1fbd   : > { %v7601_v55 = vadd.f32 %v7600_v8, %v7525_v6  ;;  %v7527_v11 = vpop.f32.mrb[85].mxu1  ;;  %v7602_v32 = vpop.f32.mrb[85].mxu0 }
0x1fbf   : > { %v20786_v43 = vadd.f32 %v7601_v55, %v20758_v15 }
0x1fc0   : > { %v7870_v14 = vpop.f32.mrb[86].mxu0 }
0x1fc1   : > { %v20788_v23 = vadd.f32 %v16047_v12, %v7870_v14  ;;  %v16664_v40 = vpop.f32.mrb[87].mxu0  ;;  %v7789_v41 = vpop.f32.mrb[86].mxu1 }
0x1fc2   : > { %v20790_v33 = vadd.f32 %v16045_v16, %v7789_v41  ;;  %v16653_v42 = vpop.f32.mrb[87].mxu1 }
0x1fc3   : > { %8041 = vrot.lane.b32.xlu0 %v20788_v23, %s19454_s26  ;;  %16666 = vmatpush3.xpose.msk.msra.mxu1 %vm2023_vm1, %v20788_v23 }
0x1fc4   : > { %16670 = vmatprep.subr.mxu1 %v19461_v25 }
0x1fc6   : > { %16668 = vmatmul.mubr.msk.f32.vlgmr.msra.gmra.mrb[88].mxu1 %vm2023_vm1, %v20790_v33 }
0x1fc7   : > { %8039 = vrot.lane.b32.xlu0 %v20790_v33, %s19454_s26  ;;  %16672 = vmatprep.mubr.msk.f32.mxu1 %vm19463_vm4, %v19461_v25 }
0x2035   : > { %v8042_v31 = vpop.permute.xlu0 %8041 }
0x2036   : > { %16676 = vmatpush3.xpose.msk.msra.mxu0 %vm2023_vm1, %v8042_v31 }
0x2037   : > { %16685 = vmatprep.subr.mxu0 %v19461_v25 }
0x2039   : > { %v8040_v15 = vpop.permute.xlu0 %8039 }
0x203a   : > { %16678 = vmatmul.mubr.msk.f32.vlgmr.msra.gmra.mrb[88].mxu0 %vm2023_vm1, %v8040_v15 }
0x203b   : > { %16687 = vmatprep.mubr.msk.f32.mxu0 %vm19463_vm4, %v19461_v25  ;;  %16686 = vmatpush3.msra.mxu0 %v8206_v48 }
0x203c   : > { %16695 = vmatprep.subr.mxu0 %v19461_v25 }
0x2099   : > { %v7946_v18 = vpop.f32.mrb[88].mxu1 }
0x209a   : > { %v7950_v19 = vmul.f32 0.35355338, %v7946_v18  ;;  %v16669_v22 = vpop.f32.mrb[89].mxu1 }
0x209c   : > { %v7951_v27 = vsel %vm2023_vm1, %v7950_v19, -inf }
0x209d   : > { %7952 = vmax.xlane.f32.xlu0 %v7951_v27  ;;  %v8520_v27 = vld [vmem:[#allocation25 + $0x10] sm:$0xff] }
0x20b3   : > { %8355 = vrot.lane.b32.xlu0 %v20788_v23, %s21390_s5 }
0x210d   : > { %v8113_v28 = vpop.f32.mrb[88].mxu0 }
0x210e   : > { %v8117_v20 = vmul.f32 0.35355338, %v8113_v28  ;;  %v16679_v57 = vpop.f32.mrb[89].mxu0 }
0x2110   : > { %v8118_v29 = vsel %vm2023_vm1, %v8117_v20, -inf }
0x2111   : > { %8119 = vmax.xlane.f32.xlu1 %v8118_v29 }
0x2122   : > { %7962 = vrot.lane.b32.xlu1 %v20788_v23, %s19455_s7 }
0x212a   : > { %v7953_v58 = vpop.xlane.xlu0 %7952 }
0x212b   : > { %v7954_v30 = vsub.f32 %v7950_v19, %v7953_v58 }
0x212d   : > { %v7955_v26 = vmul.f32 1.442695, %v7954_v30 }
0x212e   : > { %v8356_v62 = vpop.permute.xlu0 %8355 }
0x212f   : > { %18293 = vpow2.f32 %v7955_v26 }
0x2139   : > { %v18294_v35 = vpop.eup %18293 }
0x213a   : > { %v7957_v45 = vsel %vm2023_vm1, %v18294_v35, 0.0 }
0x2146   : > { %7958 = vadd.xlane.f32.xlu1 %v7957_v45 }
0x219e   : > { %v8120_v47 = vpop.xlane.xlu1 %8119 }
0x219f   : > { %v8121_v10 = vsub.f32 %v8117_v20, %v8120_v47 }
0x21a1   : > { %v8122_v44 = vmul.f32 1.442695, %v8121_v10  ;;  %v16040_v10 = vld [vmem:[#allocation15 + $0x1] ss:$0 sm:$0xff] }
0x21a2   : > { %v7963_v34 = vpop.permute.xlu1 %7962 }
0x21a3   : > { %18295 = vpow2.f32 %v8122_v44  ;;  %16671 = vmatpush3.msra.mxu1 %v7963_v34  ;;  %v7614_v44 = vadd.f32 %v16040_v10, %v20783_v4 }
0x21a4   : > { %16680 = vmatprep.subr.mxu1 %v19461_v25 }
0x21ad   : > { %v18296_v0 = vpop.eup %18295 }
0x21ae   : > { %v8124_v7 = vsel %vm2023_vm1, %v18296_v0, 0.0 }
0x21af   : > { %8125 = vadd.xlane.f32.xlu1 %v8124_v7 }
0x21c0   : > { %8129 = vrot.lane.b32.xlu1 %v20788_v23, %s21392_s8  ;;  %s21471_s8 = sld [smem:[#allocation104_spill]] }
0x21c4   : > { %8353 = vrot.lane.b32.xlu1 %v20790_v33, %s21390_s5  ;;  %s21470_s5 = sld [smem:[#allocation103_spill]] }
0x21d3   : > { %v7959_v46 = vpop.xlane.xlu1 %7958 }
0x21d4   : > { %18297 = vrcp.f32 %v7959_v46  ;;  %v7616_v46 = vadd.f32 %v7614_v44, %v20649_v9 }
0x21de   : > { %v18298_v53 = vpop.eup %18297 }
0x21df   : > { %v7961_v63 = vmul.f32 %v18298_v53, %v18294_v35 }
0x21e1   : > { %16673 = vmatmul.mubr.msk.f32.vlgmr.msra.gmra.mrb[90].mxu1 %vm2023_vm1, %v7961_v63 }
0x21e2   : > { %16682 = vmatprep.mubr.msk.f32.mxu1 %vm19463_vm4, %v19461_v25 }
0x223c   : > { %v8126_v49 = vpop.xlane.xlu1 %8125 }
0x223d   : > { %18299 = vrcp.f32 %v8126_v49 }
0x2240   : > { %v8130_v51 = vpop.permute.xlu1 %8129 }
0x2241   : > { %16681 = vmatpush3.msra.mxu1 %v8130_v51 }
0x2242   : > { %16690 = vmatprep.subr.mxu1 %v19461_v25 }
0x2244   : > { %v8354_v1 = vpop.permute.xlu1 %8353 }
0x2247   : > { %v18300_v50 = vpop.eup %18299 }
0x2248   : > { %v8128_v24 = vmul.f32 %v18300_v50, %v18296_v0  ;;  %v7615_v0 = vadd.f32 %v16040_v10, %v20786_v43 }
0x224a   : > { %16683 = vmatmul.mubr.msk.f32.vlgmr.msra.gmra.mrb[92].mxu1 %vm2023_vm1, %v8128_v24  ;;  %v7617_v53 = vadd.f32 %v7615_v0, %v20656_v17 }
0x224b   : > { %16691 = vmatpush3.msra.mxu1 %v8038_v52  ;;  %16692 = vmatprep.mubr.msk.f32.mxu1 %vm19463_vm4, %v19461_v25 }
0x224c   : > { %16700 = vmatprep.subr.mxu1 %v19461_v25  ;;  %v7625_v63 = vsel %vm1855_vm0, %v7617_v53, 0.0 }
0x22b4   : > { %v8034_v54 = vpop.f32.mrb[90].mxu1 }
0x22b5   : > { %v16674_v56 = vpop.f32.mrb[91].mxu1  ;;  %16693 = vmatmul.mubr.msk.f32.vlgmr.msra.gmra.mrb[94].mxu1 %vm2023_vm1, %v8034_v54 }
0x22b6   : > { %16702 = vmatprep.mubr.msk.f32.mxu1 %vm19463_vm4, %v19461_v25 }
0x231d   : > { %v8201_v13 = vpop.f32.mrb[92].mxu1 }
0x231e   : > { %v16684_v59 = vpop.f32.mrb[93].mxu1  ;;  %16688 = vmatmul.mubr.msk.f32.vlgmr.msra.gmra.mrb[90].mxu0 %vm2023_vm1, %v8201_v13 }
0x231f   : > { %16696 = vmatpush3.xpose.msk.msra.mxu0 %vm2023_vm1, %v8356_v62  ;;  %16697 = vmatprep.mubr.msk.f32.mxu0 %vm19463_vm4, %v19461_v25 }
0x2320   : > { %16705 = vmatprep.subr.mxu0 %v19461_v25 }
0x2322   : > { %16698 = vmatmul.mubr.msk.f32.vlgmr.msra.gmra.mrb[92].mxu0 %vm2023_vm1, %v8354_v1 }
0x2323   : > { %16707 = vmatprep.mubr.msk.f32.mxu0 %vm19463_vm4, %v19461_v25  ;;  %16706 = vmatpush3.msra.mxu0 %v8520_v27 }
0x2324   : > { %16715 = vmatprep.subr.mxu0 %v19461_v25 }
0x2388   : > { %v8349_v60 = vpop.f32.mrb[94].mxu1 }
0x2389   : > { %v16694_v2 = vpop.f32.mrb[95].mxu1 }
0x23f1   : > { %v8276_v3 = vpop.f32.mrb[90].mxu0 }
0x23f2   : > { %v20841_v6 = vadd.f32 %v8349_v60, %v8276_v3  ;;  %v16689_v8 = vpop.f32.mrb[91].mxu0  ;;  %v8762_v60 = vld [vmem:[#allocation25 + $0x18] sm:$0xff] }
0x23f5   : > { %v8427_v55 = vpop.f32.mrb[92].mxu0 }
0x23f6   : > { %v8431_v11 = vmul.f32 0.35355338, %v8427_v55  ;;  %v16699_v32 = vpop.f32.mrb[93].mxu0 }
0x23f8   : > { %v8432_v12 = vsel %vm2023_vm1, %v8431_v11, -inf }
0x23f9   : > { %8433 = vmax.xlane.f32.xlu1 %v8432_v12  ;;  %v16041_v12 = vld [vmem:[#allocation16 + $0x1] ss:$0 sm:$0xff] }
0x240a   : > { %8443 = vrot.lane.b32.xlu1 %v20788_v23, %s21467_s4 }
0x240e   : > { %8595 = vrot.lane.b32.xlu1 %v20790_v33, %s21468_s9 }
0x2486   : > { %v8434_v16 = vpop.xlane.xlu1 %8433 }
0x2487   : > { %v8435_v14 = vsub.f32 %v8431_v11, %v8434_v16 }
0x2489   : > { %v8436_v40 = vmul.f32 1.442695, %v8435_v14  ;;  %v16042_v14 = vld [vmem:[#allocation18 + $0x1] ss:$0 sm:$0xff] }
0x248a   : > { %v8444_v41 = vpop.permute.xlu1 %8443 }
0x248b   : > { %18301 = vpow2.f32 %v8436_v40  ;;  %16701 = vmatpush3.msra.mxu1 %v8444_v41 }
0x248c   : > { %16710 = vmatprep.subr.mxu1 %v19461_v25 }
0x248e   : > { %v8596_v22 = vpop.permute.xlu1 %8595 }
0x2495   : > { %v18302_v42 = vpop.eup %18301 }
0x2496   : > { %v8438_v31 = vsel %vm2023_vm1, %v18302_v42, 0.0 }
0x2497   : > { %8439 = vadd.xlane.f32.xlu0 %v8438_v31 }
0x24ad   : > { %8597 = vrot.lane.b32.xlu0 %v20788_v23, %s21468_s9 }
0x2524   : > { %v8440_v15 = vpop.xlane.xlu0 %8439 }
0x2525   : > { %18303 = vrcp.f32 %v8440_v15 }
0x2528   : > { %v8598_v33 = vpop.permute.xlu0 %8597 }
0x252f   : > { %v18304_v18 = vpop.eup %18303 }
0x2530   : > { %v8442_v19 = vmul.f32 %v18304_v18, %v18302_v42 }
0x2532   : > { %16703 = vmatmul.mubr.msk.f32.vlgmr.msra.gmra.mrb[96].mxu1 %vm2023_vm1, %v8442_v19 }
0x2533   : > { %16711 = vmatpush3.xpose.msk.msra.mxu1 %vm2023_vm1, %v8598_v33  ;;  %16712 = vmatprep.mubr.msk.f32.mxu1 %vm19463_vm4, %v19461_v25 }
0x2534   : > { %16720 = vmatprep.subr.mxu1 %v19461_v25 }
0x2536   : > { %16713 = vmatmul.mubr.msk.f32.vlgmr.msra.gmra.mrb[98].mxu1 %vm2023_vm1, %v8596_v22 }
0x2537   : > { %16722 = vmatprep.mubr.msk.f32.mxu1 %vm19463_vm4, %v19461_v25  ;;  %16721 = vmatpush3.msra.mxu1 %v8762_v60 }
0x2605   : > { %v8515_v28 = vpop.f32.mrb[96].mxu1 }
0x2606   : > { %v16704_v20 = vpop.f32.mrb[97].mxu1  ;;  %16708 = vmatmul.mubr.msk.f32.vlgmr.msra.gmra.mrb[94].mxu0 %vm2023_vm1, %v8515_v28 }
0x2607   : > { %16717 = vmatprep.mubr.msk.f32.mxu0 %vm19463_vm4, %v19461_v25 }
0x2609   : > { %v8669_v57 = vpop.f32.mrb[98].mxu1 }
0x260a   : > { %v8673_v29 = vmul.f32 0.35355338, %v8669_v57  ;;  %v16714_v58 = vpop.f32.mrb[99].mxu1 }
0x260b   : > { %v16065_v58 = vld [vmem:[#allocation27] ss:$0 sm:$0xff] }
0x260c   : > { %v8674_v30 = vsel %vm2023_vm1, %v8673_v29, -inf }
0x260d   : > { %8675 = vmax.xlane.f32.xlu1 %v8674_v30 }
0x261e   : > { %8685 = vrot.lane.b32.xlu1 %v20788_v23, %s21469_s6  ;;  %v7622_v23 = vsel %vm1855_vm0, %v7616_v46, 0.0 }
0x269a   : > { %v8676_v26 = vpop.xlane.xlu1 %8675 }
0x269b   : > { %v8677_v35 = vsub.f32 %v8673_v29, %v8676_v26 }
0x269d   : > { %v8678_v45 = vmul.f32 1.442695, %v8677_v35 }
0x269e   : > { %v8686_v47 = vpop.permute.xlu1 %8685 }
0x269f   : > { %18305 = vpow2.f32 %v8678_v45  ;;  %16716 = vmatpush3.msra.mxu0 %v8686_v47 }
0x26a0   : > { %17394 = vmatprep.subr.bf16.mxu0 %v19462_v61 }
0x26a9   : > { %v18306_v34 = vpop.eup %18305 }
0x26aa   : > { %v8680_v7 = vsel %vm2023_vm1, %v18306_v34, 0.0 }
0x26ab   : > { %8681 = vadd.xlane.f32.xlu0 %v8680_v7 }
0x26af   : > { %7623 = vadd.xlane.f32.xlu0 %v7622_v23 }
0x26b3   : > { %7626 = vadd.xlane.f32.xlu0 %v7625_v63  ;;  %v8960_v63 = vld [vmem:[#allocation33 + $0x8] sm:$0xff] }
0x26d9   : > { %v8590_v48 = vpop.f32.mrb[94].mxu0 }
0x26da   : > { %v8594_v49 = vadd.f32 %v8590_v48, %v20841_v6  ;;  %v16709_v4 = vpop.f32.mrb[95].mxu0 }
0x26db   : > { %v8962_v4 = vld [vmem:[#allocation33 + $0x18] sm:$0xff] }
0x2738   : > { %v8682_v51 = vpop.xlane.xlu0 %8681 }
0x2739   : > { %18307 = vrcp.f32 %v8682_v51 }
0x273c   : > { %v7624_v43 = vpop.xlane.xlu0 %7623 }
0x273d   : > { %v7628_v50 = vmul.f32 0.03125, %v7624_v43 }
0x273f   : > { %v7630_v24 = vsub.f32 %v7616_v46, %v7628_v50 }
0x2740   : > { %v7627_v52 = vpop.xlane.xlu0 %7626 }
0x2741   : > { %v7629_v9 = vmul.f32 0.03125, %v7627_v52  ;;  %v7632_v54 = vmul.f32 %v7630_v24, %v7630_v24 }
0x2743   : > { %v18308_v56 = vpop.eup %18307  ;;  %v7631_v13 = vsub.f32 %v7617_v53, %v7629_v9  ;;  %v7634_v17 = vsel %vm1855_vm0, %v7632_v54, 0.0  ;;  %v8959_v53 = vld [vmem:[#allocation33] sm:$0xff] }
0x2744   : > { %v8684_v62 = vmul.f32 %v18308_v56, %v18306_v34  ;;  %7635 = vadd.xlane.f32.xlu0 %v7634_v17  ;;  %v17400_v48 = vpack.c.bf16 %v8960_v63, %v8959_v53 }
0x2745   : > { %v7633_v59 = vmul.f32 %v7631_v13, %v7631_v13 }
0x2746   : > { %16718 = vmatmul.mubr.msk.f32.vlgmr.msra.gmra.mrb[96].mxu0 %vm2023_vm1, %v8684_v62  ;;  %17401 = vmatprep.subr.bf16.mxu1 %v17400_v48 }
0x2747   : > { %v7637_v1 = vsel %vm1855_vm0, %v7633_v59, 0.0  ;;  %16733 = vmatprep.mubr.msk.f32.mxu0 %vm19463_vm4, %v19461_v25 }
0x2748   : > { %7638 = vadd.xlane.f32.xlu1 %v7637_v1  ;;  %v16043_v1 = vld [vmem:[%s21470_s5] ss:$0 sm:$0xff]  ;;  %s21472_s5 = smov 88  }
0x27d1   : > { %v7636_v2 = vpop.xlane.xlu0 %7635 }
0x27d2   : > { %v7640_v3 = vmul.f32 0.03125, %v7636_v2  ;;  %v16044_v2 = vld [vmem:[%s21471_s8] ss:$0 sm:$0xff]  ;;  %s21473_s8 = smov 112  }
0x27d4   : > { %v7642_v6 = vadd.f32 1e-05, %v7640_v3 }
0x27d5   : > { %v7639_v8 = vpop.xlane.xlu1 %7638 }
0x27d6   : > { %18309 = vrsqrt.f32 %v7642_v6  ;;  %v7641_v55 = vmul.f32 0.03125, %v7639_v8 }
0x27d8   : > { %v7643_v11 = vadd.f32 1e-05, %v7641_v55 }
0x27da   : > { %18311 = vrsqrt.f32 %v7643_v11 }
0x27e0   : > { %v18310_v32 = vpop.eup %18309 }
0x27e1   : > { %v7646_v16 = vmul.f32 %v18310_v32, %v7630_v24 }
0x27e3   : > { %v7654_v40 = vmul.f32 %v16041_v12, %v7646_v16  ;;  %v8876_v16 = vld [vmem:[#allocation31 + $0x8] sm:$0xff] }
0x27e4   : > { %v18312_v41 = vpop.eup %18311 }
0x27e5   : > { %v7662_v42 = vadd.f32 %v16042_v14, %v7654_v40  ;;  %v7647_v31 = vmul.f32 %v18312_v41, %v7631_v13  ;;  %v8877_v40 = vld [vmem:[#allocation31 + $0x10] sm:$0xff]  ;;  %v8878_v41 = vld [vmem:[#allocation31 + $0x18] sm:$0xff] }
0x27e7   : > { %v7666_v15 = vsel %vm1855_vm0, %v7662_v42, 0.0  ;;  %v7655_v18 = vmul.f32 %v16041_v12, %v7647_v31  ;;  %v8875_v12 = vld [vmem:[#allocation31] sm:$0xff] }
0x27e8   : > { %7667 = vadd.xlane.f32.xlu0 %v7666_v15 }
0x27e9   : > { %v7663_v19 = vadd.f32 %v16042_v14, %v7655_v18  ;;  %v17395_v14 = vpack.c.bf16 %v8876_v16, %v8875_v12 }
0x27eb   : > { %v7669_v33 = vsel %vm1855_vm0, %v7663_v19, 0.0  ;;  %17396 = vmatpush3.bf16.msra.mxu0 %v17395_v14 }
0x27ec   : > { %7670 = vadd.xlane.f32.xlu0 %v7669_v33  ;;  %17397 = vmatprep.subr.bf16.mxu0 %v19462_v61  ;;  %v16066_v33 = vld [vmem:[#allocation28] ss:$0 sm:$0xff] }
0x2819   : > { %v8757_v22 = vpop.f32.mrb[96].mxu0 }
0x281a   : > { %v16719_v27 = vpop.f32.mrb[97].mxu0  ;;  %16723 = vmatmul.mubr.msk.f32.vlgmr.msra.gmra.mrb[100].mxu1 %vm2023_vm1, %v8757_v22 }
0x281b   : > { %17403 = vmatpush3.bf16.msra.mxu1 %v17400_v48  ;;  %v16067_v27 = vld [vmem:[#allocation30] ss:$0 sm:$0xff] }
0x2875   : > { %v7668_v28 = vpop.xlane.xlu0 %7667 }
0x2876   : > { %v7672_v20 = vmul.f32 0.03125, %v7668_v28 }
0x2878   : > { %v7674_v35 = vsub.f32 %v7662_v42, %v7672_v20  ;;  %v17398_v42 = vpack.c.bf16 %v8878_v41, %v8877_v40 }
0x2879   : > { %v7671_v57 = vpop.xlane.xlu0 %7670 }
0x287a   : > { %v7673_v45 = vmul.f32 0.03125, %v7671_v57  ;;  %v7676_v0 = vmul.f32 %v7674_v35, %v7674_v35  ;;  %17399 = vmatpush3.bf16.msra.mxu0 %v17398_v42  ;;  %v16070_v57 = vld [vmem:[#allocation36] ss:$0 sm:$0xff] }
0x287b   : > { %17408 = vmatprep.subr.bf16.mxu0 %v19462_v61 }
0x287c   : > { %v7675_v44 = vsub.f32 %v7663_v19, %v7673_v45  ;;  %v7678_v7 = vsel %vm1855_vm0, %v7676_v0, 0.0 }
0x287e   : > { %v7677_v46 = vmul.f32 %v7675_v44, %v7675_v44 }
0x2880   : > { %v7681_v23 = vsel %vm1855_vm0, %v7677_v46, 0.0 }
0x28ed   : > { %v8832_v29 = vpop.f32.mrb[100].mxu1 }
0x28ee   : > { %v8836_v30 = vadd.f32 %v8832_v29, %v8594_v49  ;;  %v16724_v26 = vpop.f32.mrb[101].mxu1  ;;  %v8961_v49 = vld [vmem:[#allocation33 + $0x10] sm:$0xff] }
0x28f0   : > { %v8844_v47 = vadd.f32 %v16065_v58, %v8836_v30 }
0x28f2   : > { %v8845_v10 = vadd.f32 %v8844_v47, %v20768_v5  ;;  %v17404_v5 = vpack.c.bf16 %v8962_v4, %v8961_v49  ;;  %v16068_v47 = vld [vmem:[#allocation34] ss:$0 sm:$0xff] }
0x28f4   : > { %v8848_v34 = vsel %vm1855_vm0, %v8845_v10, 0.0  ;;  %17405 = vmatprep.subr.bf16.mxu1 %v17404_v5 }
0x28f5   : > { %8849 = vadd.xlane.f32.xlu0 %v8848_v34  ;;  %17407 = vmatpush3.bf16.msra.mxu1 %v17404_v5 }
0x28f6   : > { %17412 = vmatprep.subr.bf16.mxu1 %v19462_v61 }
0x28f9   : > { %7679 = vadd.xlane.f32.xlu0 %v7678_v7 }
0x28fd   : > { %7682 = vadd.xlane.f32.xlu0 %v7681_v23 }
0x2982   : > { %v8850_v51 = vpop.xlane.xlu0 %8849 }
0x2983   : > { %v8851_v43 = vmul.f32 0.03125, %v8850_v51 }
0x2985   : > { %v8852_v50 = vsub.f32 %v8845_v10, %v8851_v43 }
0x2986   : > { %v7680_v24 = vpop.xlane.xlu0 %7679 }
0x2987   : > { %v7684_v52 = vmul.f32 0.03125, %v7680_v24  ;;  %v8853_v9 = vmul.f32 %v8852_v50, %v8852_v50 }
0x2989   : > { %v7686_v54 = vadd.f32 1e-05, %v7684_v52  ;;  %v8854_v56 = vsel %vm1855_vm0, %v8853_v9, 0.0 }
0x298a   : > { %8855 = vadd.xlane.f32.xlu0 %v8854_v56  ;;  %v7683_v13 = vpop.xlane.xlu0 %7682 }
0x298b   : > { %18313 = vrsqrt.f32 %v7686_v54  ;;  %v7685_v17 = vmul.f32 0.03125, %v7683_v13 }
0x298d   : > { %v7687_v62 = vadd.f32 1e-05, %v7685_v17 }
0x298f   : > { %18315 = vrsqrt.f32 %v7687_v62 }
0x2995   : > { %v18314_v59 = vpop.eup %18313 }
0x2996   : > { %v7690_v60 = vmul.f32 %v18314_v59, %v7674_v35  ;;  %v9221_v59 = vld [vmem:[#allocation37] sm:$0xff] }
0x2998   : > { %v7698_v3 = vmul.f32 %v16043_v1, %v7690_v60 }
0x2999   : > { %v18316_v6 = vpop.eup %18315 }
0x299a   : > { %v7691_v8 = vmul.f32 %v18316_v6, %v7675_v44  ;;  %v20892_v55 = vadd.f32 %v16044_v2, %v7698_v3 }
0x299c   : > { %v7699_v11 = vmul.f32 %v16043_v1, %v7691_v8  ;;  %16744 = vmatprep.mubr.msk.f32.mxu1 %vm1855_vm0, %v20892_v55 }
0x299e   : > { %v20896_v32 = vadd.f32 %v16044_v2, %v7699_v11 }
0x29a0   : > { %16745 = vmatmul.mubr.msk.f32.vlgmr.msra.gmra.mrb[102].mxu1 %vm1855_vm0, %v20896_v32 }
0x29a1   : > { %16758 = vmatprep.mubr.msk.f32.mxu1 %vm19463_vm4, %v19461_v25 }
0x2a17   : > { %v8856_v31 = vpop.xlane.xlu0 %8855 }
0x2a18   : > { %v8857_v15 = vmul.f32 0.03125, %v8856_v31 }
0x2a1a   : > { %v8858_v18 = vadd.f32 1e-05, %v8857_v15 }
0x2a1c   : > { %18317 = vrsqrt.f32 %v8858_v18 }
0x2a26   : > { %v18318_v19 = vpop.eup %18317 }
0x2a27   : > { %v8860_v22 = vmul.f32 %v18318_v19, %v8852_v50 }
0x2a29   : > { %v8867_v28 = vmul.f32 %v16066_v33, %v8860_v22 }
0x2a2b   : > { %v20904_v20 = vadd.f32 %v16067_v27, %v8867_v28  ;;  %v9396_v28 = vld [vmem:[#allocation37 + $0x8] sm:$0xff] }
0x2a2d   : > { %16734 = vmatmul.mubr.msk.f32.vlgmr.msra.gmra.mrb[98].mxu0 %vm1855_vm0, %v20904_v20 }
0x2a2e   : > { %16751 = vmatprep.mubr.msk.f32.mxu0 %vm19463_vm4, %v19461_v25 }
0x2a73   : > { %v16746_v29 = vpop.f32.mrb[102].mxu1 }
0x2a74   : > { %v9048_v58 = vadd.f32 %v16746_v29, %v16070_v57  ;;  %v9042_v30 = vpop.f32.mrb[103].mxu1 }
0x2a75   : > { %v9043_v26 = vadd.f32 %v16070_v57, %v9042_v30 }
0x2a77   : > { %v20910_v35 = vpack.i.bf16 %v9048_v58, %v9043_v26  ;;  %v17409_v45 = vpack.c.bf16 %v9048_v58, %v9043_v26 }
0x2a79   : > { %18153 = vrot.lane.b32.xlu1 %v20910_v35, %s19454_s26  ;;  %17411 = vmatpush3.bf16.xpose.msk.msra.mxu0 %vm20284_vm2, %v17409_v45 }
0x2a7a   : > { %17419 = vmatprep.subr.bf16.mxu0 %v19462_v61 }
0x2aeb   : > { %v18154_v52 = vpop.permute.xlu1 %18153 }
0x2aec   : > { %v18156_v54 = vunpack.i.h.bf16 %v18154_v52  ;;  %v18155_v56 = vunpack.i.l.bf16 %v18154_v52 }
0x2aee   : > { %v17416_v17 = vpack.c.bf16 %v18156_v54, %v18155_v56 }
0x2b00   : > { %v8955_v10 = vpop.f32.mrb[98].mxu0 }
0x2b01   : > { %v8956_v44 = vadd.f32 %v16068_v47, %v8955_v10  ;;  %v16735_v34 = vpop.f32.mrb[99].mxu0 }
0x2b03   : > { %9222 = vrot.lane.b32.xlu1 %v8956_v44, %s19454_s26  ;;  %16752 = vmatmul.mubr.msk.f32.vlgmr.msra.gmra.mrb[100].mxu0 %vm2023_vm1, %v8956_v44 }
0x2b04   : > { %16772 = vmatprep.mubr.msk.f32.mxu0 %vm19463_vm4, %v19461_v25 }
0x2b75   : > { %v9223_v62 = vpop.permute.xlu1 %9222 }
0x2bd6   : > { %v9126_v0 = vpop.f32.mrb[100].mxu0 }
0x2bd7   : > { %v9130_v7 = vmul.f32 0.35355338, %v9126_v0  ;;  %v16753_v46 = vpop.f32.mrb[101].mxu0 }
0x2bd9   : > { %v9131_v23 = vsel %vm2113_vm3, %v9130_v7, -inf }
0x2bda   : > { %9132 = vmax.xlane.f32.xlu0 %v9131_v23 }
0x2c67   : > { %v9133_v53 = vpop.xlane.xlu0 %9132 }
0x2c68   : > { %v9134_v63 = vsub.f32 %v9130_v7, %v9133_v53 }
0x2c6a   : > { %v9135_v48 = vmul.f32 1.442695, %v9134_v63 }
0x2c6c   : > { %18319 = vpow2.f32 %v9135_v48 }
0x2c76   : > { %v18320_v49 = vpop.eup %18319 }
0x2c77   : > { %v9137_v4 = vsel %vm2113_vm3, %v18320_v49, 0.0 }
0x2c78   : > { %9138 = vadd.xlane.f32.xlu0 %v9137_v4 }
0x2c8e   : > { %18148 = vrot.lane.b32.xlu0 %v20910_v35, %s19455_s7 }
0x2d05   : > { %v9139_v5 = vpop.xlane.xlu0 %9138 }
0x2d06   : > { %18321 = vrcp.f32 %v9139_v5 }
0x2d09   : > { %v18149_v51 = vpop.permute.xlu0 %18148 }
0x2d0a   : > { %v18151_v43 = vunpack.i.h.bf16 %v18149_v51  ;;  %v18150_v50 = vunpack.i.l.bf16 %v18149_v51 }
0x2d0c   : > { %v17413_v24 = vpack.c.bf16 %v18151_v43, %v18150_v50 }
0x2d0e   : > { %17414 = vmatpush3.bf16.msra.mxu1 %v17413_v24 }
0x2d0f   : > { %17415 = vmatprep.subr.bf16.mxu1 %v19462_v61 }
0x2d10   : > { %v18322_v9 = vpop.eup %18321 }
0x2d11   : > { %v9141_v13 = vmul.f32 %v18322_v9, %v18320_v49 }
0x2d13   : > { %16759 = vmatmul.mubr.msk.f32.vlgmr.msra.gmra.mrb[104].mxu1 %vm2113_vm3, %v9141_v13 }
0x2d14   : > { %16765 = vmatprep.mubr.msk.f32.mxu1 %vm19463_vm4, %v19461_v25 }
0x2d17   : > { %17418 = vmatpush3.bf16.xpose.msk.msra.mxu1 %vm20284_vm2, %v17416_v17 }
0x2d18   : > { %16780 = vmatprep.subr.mxu1 %v19461_v25 }
0x2d1e   : > { %16766 = vmatmul.mubr.msk.f32.vlgmr.msra.gmra.mrb[106].mxu1 %vm2023_vm1, %v9223_v62 }
0x2d1f   : > { %16782 = vmatprep.mubr.msk.f32.mxu1 %vm19463_vm4, %v19461_v25  ;;  %16781 = vmatpush3.msra.mxu1 %v9221_v59 }
0x2d20   : > { %17426 = vmatprep.subr.bf16.mxu1 %v19462_v61 }
0x2de6   : > { %v9217_v1 = vpop.f32.mrb[104].mxu1 }
0x2de7   : > { %v16760_v60 = vpop.f32.mrb[105].mxu1  ;;  %16783 = vmatmul.mubr.msk.f32.vlgmr.msra.gmra.mrb[108].mxu1 %vm2023_vm1, %v9217_v1 }
0x2de8   : > { %16796 = vmatprep.mubr.msk.f32.mxu1 %vm19463_vm4, %v19461_v25 }
0x2df1   : > { %v9300_v2 = vpop.f32.mrb[106].mxu1 }
0x2df2   : > { %v9304_v3 = vmul.f32 0.35355338, %v9300_v2  ;;  %v16767_v6 = vpop.f32.mrb[107].mxu1 }
0x2df4   : > { %v9305_v8 = vsel %vm2113_vm3, %v9304_v3, -inf }
0x2df5   : > { %9306 = vmax.xlane.f32.xlu0 %v9305_v8 }
0x2e0b   : > { %18158 = vrot.lane.b32.xlu0 %v20910_v35, %s21472_s5 }
0x2e0f   : > { %9543 = vrot.lane.b32.xlu0 %v8956_v44, %s21473_s8 }
0x2e13   : > { %9792 = vrot.lane.b32.xlu0 %v8956_v44, %s21468_s9 }
0x2e82   : > { %v9307_v11 = vpop.xlane.xlu0 %9306 }
0x2e83   : > { %v9308_v12 = vsub.f32 %v9304_v3, %v9307_v11 }
0x2e85   : > { %v9309_v16 = vmul.f32 1.442695, %v9308_v12 }
0x2e86   : > { %v18159_v14 = vpop.permute.xlu0 %18158 }
0x2e87   : > { %18323 = vpow2.f32 %v9309_v16  ;;  %v18161_v40 = vunpack.i.h.bf16 %v18159_v14  ;;  %v18160_v41 = vunpack.i.l.bf16 %v18159_v14  ;;  %v9717_v16 = vld [vmem:[#allocation37 + $0x10] sm:$0xff] }
0x2e89   : > { %v17420_v42 = vpack.c.bf16 %v18161_v40, %v18160_v41 }
0x2e8a   : > { %v9544_v34 = vpop.permute.xlu0 %9543 }
0x2e8b   : > { %17421 = vmatpush3.bf16.msra.mxu0 %v17420_v42 }
0x2e8c   : > { %16775 = vmatprep.subr.mxu0 %v19461_v25 }
0x2e8e   : > { %v9793_v7 = vpop.permute.xlu0 %9792 }
0x2e91   : > { %v18324_v31 = vpop.eup %18323 }
0x2e92   : > { %v9311_v15 = vsel %vm2113_vm3, %v18324_v31, 0.0 }
0x2e93   : > { %9312 = vadd.xlane.f32.xlu1 %v9311_v15 }
0x2ea4   : > { %18163 = vrot.lane.b32.xlu1 %v20910_v35, %s21473_s8 }
0x2ea8   : > { %18168 = vrot.lane.b32.xlu1 %v20910_v35, %s21468_s9 }
0x2eba   : > { %v9539_v18 = vpop.f32.mrb[108].mxu1 }
0x2ebb   : > { %v16784_v19 = vpop.f32.mrb[109].mxu1 }
0x2f20   : > { %v9313_v33 = vpop.xlane.xlu1 %9312 }
0x2f21   : > { %18325 = vrcp.f32 %v9313_v33  ;;  %v9966_v33 = vld [vmem:[#allocation37 + $0x18] sm:$0xff] }
0x2f24   : > { %v18164_v57 = vpop.permute.xlu1 %18163 }
0x2f25   : > { %v18166_v29 = vunpack.i.h.bf16 %v18164_v57  ;;  %v18165_v58 = vunpack.i.l.bf16 %v18164_v57 }
0x2f27   : > { %v17423_v30 = vpack.c.bf16 %v18166_v29, %v18165_v58 }
0x2f28   : > { %v18169_v45 = vpop.permute.xlu1 %18168 }
0x2f29   : > { %v18171_v10 = vunpack.i.h.bf16 %v18169_v45  ;;  %v18170_v44 = vunpack.i.l.bf16 %v18169_v45 }
0x2f2b   : > { %v18326_v22 = vpop.eup %18325  ;;  %v17430_v0 = vpack.c.bf16 %v18171_v10, %v18170_v44 }
0x2f2c   : > { %v9315_v27 = vmul.f32 %v18326_v22, %v18324_v31 }
0x2f2e   : > { %16773 = vmatmul.mubr.msk.f32.vlgmr.msra.gmra.mrb[102].mxu0 %vm2113_vm3, %v9315_v27 }
0x2f2f   : > { %16776 = vmatpush3.msra.mxu0 %v9396_v28  ;;  %16777 = vmatprep.mubr.msk.f32.mxu0 %vm19463_vm4, %v19461_v25 }
0x2f30   : > { %17422 = vmatprep.subr.bf16.mxu0 %v19462_v61 }
0x3001   : > { %v9391_v26 = vpop.f32.mrb[102].mxu0 }
0x3002   : > { %v16774_v47 = vpop.f32.mrb[103].mxu0  ;;  %16778 = vmatmul.mubr.msk.f32.vlgmr.msra.gmra.mrb[104].mxu0 %vm2023_vm1, %v9391_v26 }
0x3003   : > { %17425 = vmatpush3.bf16.xpose.msk.msra.mxu0 %vm20284_vm2, %v17423_v30  ;;  %16789 = vmatprep.mubr.msk.f32.mxu0 %vm19463_vm4, %v19461_v25  ;;  %v16093_v30 = vld [vmem:[#allocation39] ss:$0 sm:$0xff] }
0x3004   : > { %17429 = vmatprep.subr.bf16.mxu0 %v19462_v61 }
0x300a   : > { %16790 = vmatmul.mubr.msk.f32.vlgmr.msra.gmra.mrb[106].mxu0 %vm2023_vm1, %v9544_v34 }
0x300b   : > { %17432 = vmatpush3.bf16.xpose.msk.msra.mxu0 %vm20284_vm2, %v17430_v0  ;;  %16808 = vmatprep.mubr.msk.f32.mxu0 %vm19463_vm4, %v19461_v25 }
0x3012   : > { %16809 = vmatmul.mubr.msk.f32.vlgmr.msra.gmra.mrb[108].mxu0 %vm2023_vm1, %v9793_v7 }
0x3013   : > { %10184 = vmatprep.mubr.f32.mxu0 %v19461_v25 }
0x30d5   : > { %v9466_v46 = vpop.f32.mrb[104].mxu0 }
0x30d6   : > { %v9540_v23 = vadd.f32 %v9539_v18, %v9466_v46  ;;  %v16779_v53 = vpop.f32.mrb[105].mxu0 }
0x30d7   : > { %v10080_v53 = vld [vmem:[#allocation43 + $0x8] sm:$0xff] }
0x30dd   : > { %v9621_v63 = vpop.f32.mrb[106].mxu0 }
0x30de   : > { %v9625_v48 = vmul.f32 0.35355338, %v9621_v63  ;;  %v16791_v49 = vpop.f32.mrb[107].mxu0  ;;  %v10084_v63 = vld [vmem:[#allocation43 + $0x88] sm:$0xff] }
0x30df   : > { %v17436_v49 = vpack.c.bf16 %v10084_v63, %v10080_v53  ;;  %v10296_v53 = vld [vmem:[#allocation43 + $0x1b0] sm:$0xff]  ;;  %v10467_v63 = vld [vmem:[#allocation46 + $0x28] sm:$0xff] }
0x30e0   : > { %v9626_v4 = vsel %vm2113_vm3, %v9625_v48, -inf }
0x30e1   : > { %9627 = vmax.xlane.f32.xlu1 %v9626_v4  ;;  %v10086_v4 = vld [vmem:[#allocation43 + $0x98] sm:$0xff]  ;;  %17437 = vmatprep.subr.bf16.mxu0 %v17436_v49 }
0x30e2   : > { %v10473_v49 = vld [vmem:[#allocation46 + $0xb8] sm:$0xff] }
0x30e5   : > { %v9870_v5 = vpop.f32.mrb[108].mxu0 }
0x30e6   : > { %v9874_v51 = vmul.f32 0.35355338, %v9870_v5  ;;  %v16810_v43 = vpop.f32.mrb[109].mxu0  ;;  %v10079_v5 = vld [vmem:[#allocation43] sm:$0xff] }
0x30e8   : > { %v9875_v50 = vsel %vm2113_vm3, %v9874_v51, -inf }
0x30e9   : > { %9876 = vmax.xlane.f32.xlu1 %v9875_v50 }
0x316e   : > { %v9628_v24 = vpop.xlane.xlu1 %9627 }
0x316f   : > { %v9629_v52 = vsub.f32 %v9625_v48, %v9628_v24  ;;  %v10082_v48 = vld [vmem:[#allocation43 + $0x18] sm:$0xff]  ;;  %v10085_v24 = vld [vmem:[#allocation43 + $0x90] sm:$0xff] }
0x3170   : > { %v17444_v43 = vpack.c.bf16 %v10086_v4, %v10082_v48  ;;  %v10471_v48 = vld [vmem:[#allocation46 + $0xa8] sm:$0xff] }
0x3171   : > { %v9630_v9 = vmul.f32 1.442695, %v9629_v52 }
0x3173   : > { %18327 = vpow2.f32 %v9630_v9  ;;  %v10088_v9 = vld [vmem:[#allocation43 + $0x108] sm:$0xff] }
0x3176   : > { %v9877_v54 = vpop.xlane.xlu1 %9876 }
0x3177   : > { %v9878_v56 = vsub.f32 %v9874_v51, %v9877_v54  ;;  %v10083_v51 = vld [vmem:[#allocation43 + $0x80] sm:$0xff]  ;;  %v10092_v54 = vld [vmem:[#allocation43 + $0x188] sm:$0xff] }
0x3178   : > { %v17438_v50 = vpack.c.bf16 %v10083_v51, %v10079_v5  ;;  %v17468_v51 = vpack.c.bf16 %v10471_v48, %v10467_v63 }
0x3179   : > { %v9879_v13 = vmul.f32 1.442695, %v9878_v56  ;;  %v10090_v56 = vld [vmem:[#allocation43 + $0x118] sm:$0xff] }
0x317a   : > { %17439 = vmatpush1.bf16.msra.mxu0 %v17438_v50  ;;  %v10466_v50 = vld [vmem:[#allocation46 + $0x20] sm:$0xff] }
0x317b   : > { %18329 = vpow2.f32 %v9879_v13  ;;  %v17440_v13 = vpack.c.bf16 %v10092_v54, %v10088_v9 }
0x317d   : > { %v18328_v17 = vpop.eup %18327  ;;  %17441 = vmatprep.subr.bf16.mxu0 %v17440_v13  ;;  %v10479_v13 = vld [vmem:[#allocation46 + $0x1a8] sm:$0xff] }
0x317e   : > { %v9632_v62 = vsel %vm2113_vm3, %v18328_v17, 0.0 }
0x317f   : > { %9633 = vadd.xlane.f32.xlu0 %v9632_v62  ;;  %v10087_v62 = vld [vmem:[#allocation43 + $0x100] sm:$0xff] }
0x3185   : > { %v18330_v59 = vpop.eup %18329 }
0x3186   : > { %v9881_v1 = vsel %vm2113_vm3, %v18330_v59, 0.0 }
0x3187   : > { %9882 = vadd.xlane.f32.xlu1 %v9881_v1 }
0x3195   : > { %18173 = vrot.lane.b32.xlu0 %v20910_v35, %s21467_s4 }
0x3198   : > { %18178 = vrot.lane.b32.xlu1 %v20910_v35, %s21469_s6 }
0x320c   : > { %v9634_v60 = vpop.xlane.xlu0 %9633 }
0x320d   : > { %18331 = vrcp.f32 %v9634_v60 }
0x3210   : > { %v18174_v2 = vpop.permute.xlu0 %18173 }
0x3211   : > { %v18176_v3 = vunpack.i.h.bf16 %v18174_v2  ;;  %v18175_v6 = vunpack.i.l.bf16 %v18174_v2  ;;  %v10089_v2 = vld [vmem:[#allocation43 + $0x110] sm:$0xff] }
0x3213   : > { %v17427_v8 = vpack.c.bf16 %v18176_v3, %v18175_v6  ;;  %v10093_v3 = vld [vmem:[#allocation43 + $0x190] sm:$0xff] }
0x3214   : > { %v9883_v35 = vpop.xlane.xlu1 %9882  ;;  %v17450_v6 = vpack.c.bf16 %v10093_v3, %v10089_v2 }
0x3215   : > { %17428 = vmatpush3.bf16.msra.mxu1 %v17427_v8  ;;  %18333 = vrcp.f32 %v9883_v35  ;;  %v10283_v8 = vld [vmem:[#allocation43 + $0x28] sm:$0xff]  ;;  %v10289_v35 = vld [vmem:[#allocation43 + $0xb8] sm:$0xff] }
0x3216   : > { %16799 = vmatprep.subr.mxu1 %v19461_v25 }
0x3217   : > { %v18332_v11 = vpop.eup %18331 }
0x3218   : > { %v9636_v12 = vmul.f32 %v18332_v11, %v18328_v17  ;;  %v18179_v14 = vpop.permute.xlu1 %18178  ;;  %v10094_v17 = vld [vmem:[#allocation43 + $0x198] sm:$0xff]  ;;  %v10287_v11 = vld [vmem:[#allocation43 + $0xa8] sm:$0xff] }
0x3219   : > { %v18181_v40 = vunpack.i.h.bf16 %v18179_v14  ;;  %v18180_v41 = vunpack.i.l.bf16 %v18179_v14  ;;  %v17448_v1 = vpack.c.bf16 %v10094_v17, %v10090_v56  ;;  %v10475_v56 = vld [vmem:[#allocation46 + $0x128] sm:$0xff]  ;;  %v10477_v17 = vld [vmem:[#allocation46 + $0x138] sm:$0xff] }
0x321a   : > { %16797 = vmatmul.mubr.msk.f32.vlgmr.msra.gmra.mrb[110].mxu1 %vm2113_vm3, %v9636_v12  ;;  %v10285_v12 = vld [vmem:[#allocation43 + $0x38] sm:$0xff] }
0x321b   : > { %16800 = vmatpush3.msra.mxu1 %v9717_v16  ;;  %16801 = vmatprep.mubr.msk.f32.mxu1 %vm19463_vm4, %v19461_v25  ;;  %v17434_v31 = vpack.c.bf16 %v18181_v40, %v18180_v41  ;;  %v17452_v16 = vpack.c.bf16 %v10287_v11, %v10283_v8  ;;  %v17460_v14 = vpack.c.bf16 %v10289_v35, %v10285_v12  ;;  %v10480_v8 = vld [vmem:[#allocation46 + $0x1b0] sm:$0xff]  ;;  %v10267_v12 = vld [vmem:[#allocation46 + $0x8] sm:$0xff]  ;;  %v10269_v35 = vld [vmem:[#allocation46 + $0x18] sm:$0xff] }
0x321c   : > { %17433 = vmatprep.subr.bf16.mxu1 %v19462_v61 }
0x321f   : > { %v18334_v42 = vpop.eup %18333 }
0x3220   : > { %v9885_v19 = vmul.f32 %v18334_v42, %v18330_v59  ;;  %v10091_v59 = vld [vmem:[#allocation43 + $0x180] sm:$0xff] }
0x3221   : > { %v17442_v60 = vpack.c.bf16 %v10091_v59, %v10087_v62  ;;  %v17472_v62 = vpack.c.bf16 %v10479_v13, %v10475_v56  ;;  %v10481_v59 = vld [vmem:[#allocation46 + $0x1b8] sm:$0xff] }
0x3222   : > { %v17480_v2 = vpack.c.bf16 %v10481_v59, %v10477_v17  ;;  %v10274_v59 = vld [vmem:[#allocation46 + $0x100] sm:$0xff] }
0x3223   : > { %17443 = vmatpush1.bf16.msra.mxu0 %v17442_v60  ;;  %v10478_v60 = vld [vmem:[#allocation46 + $0x1a0] sm:$0xff] }
0x3224   : > { %17453 = vmatprep.subr.bf16.mxu0 %v17452_v16  ;;  %v10271_v16 = vld [vmem:[#allocation46 + $0x88] sm:$0xff] }
0x32ed   : > { %v9712_v15 = vpop.f32.mrb[110].mxu1 }
0x32ee   : > { %v16798_v18 = vpop.f32.mrb[111].mxu1  ;;  %16802 = vmatmul.mubr.msk.f32.vlgmr.msra.gmra.mrb[112].mxu1 %vm2023_vm1, %v9712_v15 }
0x32ef   : > { %17435 = vmatpush3.bf16.msra.mxu1 %v17434_v31  ;;  %16815 = vmatprep.mubr.msk.f32.mxu1 %vm19463_vm4, %v19461_v25  ;;  %v16094_v31 = vld [vmem:[#allocation40] ss:$0 sm:$0xff]  ;;  %v16095_v18 = vld [vmem:[#allocation42] ss:$0 sm:$0xff] }
0x32f0   : > { %16818 = vmatprep.subr.mxu1 %v19461_v25 }
0x32f2   : > { %16816 = vmatmul.mubr.msk.f32.vlgmr.msra.gmra.mrb[114].mxu1 %vm2113_vm3, %v9885_v19  ;;  %v10282_v19 = vld [vmem:[#allocation43 + $0x20] sm:$0xff] }
0x32f3   : > { %16820 = vmatprep.mubr.msk.f32.mxu1 %vm19463_vm4, %v19461_v25  ;;  %16819 = vmatpush3.msra.mxu1 %v9966_v33  ;;  %v10286_v33 = vld [vmem:[#allocation43 + $0xa0] sm:$0xff] }
0x32f4   : > { %17445 = vmatprep.subr.bf16.mxu1 %v17444_v43 }
0x33c1   : > { %v9787_v22 = vpop.f32.mrb[112].mxu1 }
0x33c2   : > { %v9791_v27 = vadd.f32 %v9787_v22, %v9540_v23  ;;  %v16803_v28 = vpop.f32.mrb[113].mxu1 }
0x33c3   : > { %v10288_v28 = vld [vmem:[#allocation43 + $0xb0] sm:$0xff] }
0x33c5   : > { %v9961_v57 = vpop.f32.mrb[114].mxu1 }
0x33c6   : > { %v16817_v29 = vpop.f32.mrb[115].mxu1  ;;  %16821 = vmatmul.mubr.msk.f32.vlgmr.msra.gmra.mrb[116].mxu1 %vm2023_vm1, %v9961_v57  ;;  %v10291_v57 = vld [vmem:[#allocation43 + $0x128] sm:$0xff] }
0x33c7   : > { %10255 = vmatprep.mubr.f32.mxu1 %v19461_v25  ;;  %v10295_v29 = vld [vmem:[#allocation43 + $0x1a8] sm:$0xff] }
0x3499   : > { %v10036_v58 = vpop.f32.mrb[116].mxu1 }
0x349a   : > { %v10040_v26 = vadd.f32 %v10036_v58, %v9791_v27  ;;  %v16822_v45 = vpop.f32.mrb[117].mxu1  ;;  %v10284_v27 = vld [vmem:[#allocation43 + $0x30] sm:$0xff]  ;;  %v10293_v58 = vld [vmem:[#allocation43 + $0x138] sm:$0xff] }
0x349b   : > { %v17454_v45 = vpack.c.bf16 %v10286_v33, %v10282_v19  ;;  %v10298_v19 = vld [vmem:[#allocation45 + $0x4] sm:$0xf]  ;;  %v21008_v33 = vld [vmem:[#allocation45] sm:$0xf] }
0x349c   : > { %v10048_v47 = vadd.f32 %v16093_v30, %v10040_v26  ;;  %v10297_v30 = vld [vmem:[#allocation43 + $0x1b8] sm:$0xff] }
0x349e   : > { %v10049_v10 = vadd.f32 %v10048_v47, %v20904_v20  ;;  %v10081_v20 = vld [vmem:[#allocation43 + $0x10] sm:$0xff]  ;;  %v17462_v47 = vpack.c.bf16 %v10288_v28, %v10284_v27  ;;  %v10311_v27 = vrot.slane %v10298_v19, %v20433_v37  ;;  %v10307_v28 = vrot.slane %v10298_v19, %v20435_v38 }
0x349f   : > { %v17446_v52 = vpack.c.bf16 %v10085_v24, %v10081_v20  ;;  %v10470_v20 = vld [vmem:[#allocation46 + $0xa0] sm:$0xff]  ;;  %v10468_v24 = vld [vmem:[#allocation46 + $0x30] sm:$0xff] }
0x34a0   : > { %v10052_v44 = vsel %vm1855_vm0, %v10049_v10, 0.0  ;;  %v17470_v9 = vpack.c.bf16 %v10470_v20, %v10466_v50 }
0x34a1   : > { %10053 = vadd.xlane.f32.xlu0 %v10052_v44  ;;  %17447 = vmatpush1.bf16.msra.mxu1 %v17446_v52  ;;  %v10294_v44 = vld [vmem:[#allocation43 + $0x1a0] sm:$0xff]  ;;  %v10472_v52 = vld [vmem:[#allocation46 + $0xb0] sm:$0xff] }
0x34a2   : > { %17449 = vmatprep.subr.bf16.mxu1 %v17448_v1  ;;  %v17478_v54 = vpack.c.bf16 %v10472_v52, %v10468_v24  ;;  %v10474_v1 = vld [vmem:[#allocation46 + $0x120] sm:$0xff] }
0x34a3   : > { %v17474_v3 = vpack.c.bf16 %v10478_v60, %v10474_v1  ;;  %v10278_v1 = vld [vmem:[#allocation46 + $0x180] sm:$0xff]  ;;  %v10276_v60 = vld [vmem:[#allocation46 + $0x110] sm:$0xff] }
0x34a5   : > { %17451 = vmatpush1.bf16.msra.mxu1 %v17450_v6  ;;  %v10476_v6 = vld [vmem:[#allocation46 + $0x130] sm:$0xff] }
0x34a6   : > { %17461 = vmatprep.subr.bf16.mxu1 %v17460_v14  ;;  %v17482_v11 = vpack.c.bf16 %v10480_v8, %v10476_v6  ;;  %v17484_v14 = vpack.c.bf16 %v10271_v16, %v10267_v12  ;;  %v10767_v6 = vld [vmem:[#allocation43 + $0xc8] sm:$0xff]  ;;  %v10765_v8 = vld [vmem:[#allocation43 + $0x58] sm:$0xff]  ;;  %v17490_v12 = vpack.c.bf16 %v10278_v1, %v10274_v59  ;;  %v10958_v59 = vld [vmem:[#allocation46 + $0x1c0] sm:$0xff] }
0x352e   : > { %v10054_v34 = vpop.xlane.xlu0 %10053 }
0x352f   : > { %v10055_v0 = vmul.f32 0.03125, %v10054_v34 }
0x3531   : > { %v10056_v7 = vsub.f32 %v10049_v10, %v10055_v0  ;;  %v10290_v10 = vld [vmem:[#allocation43 + $0x120] sm:$0xff]  ;;  %v17456_v0 = vpack.c.bf16 %v10295_v29, %v10291_v57  ;;  %v10315_v57 = vrot.slane %v10298_v19, %v20437_v39  ;;  %v10104_v29 = vrot.slane %v21008_v33, %v20435_v38 }
0x3532   : > { %v17458_v4 = vpack.c.bf16 %v10294_v44, %v10290_v10 }
0x3533   : > { %v10057_v46 = vmul.f32 %v10056_v7, %v10056_v7 }
0x3535   : > { %v10058_v23 = vsel %vm1855_vm0, %v10057_v46, 0.0  ;;  %v17464_v46 = vpack.c.bf16 %v10297_v30, %v10293_v58  ;;  %v10112_v58 = vrot.slane %v21008_v33, %v20437_v39 }
0x3536   : > { %10059 = vadd.xlane.f32.xlu1 %v10058_v23  ;;  %v10292_v23 = vld [vmem:[#allocation43 + $0x130] sm:$0xff] }
0x3537   : > { %v17466_v5 = vpack.c.bf16 %v10296_v53, %v10292_v23  ;;  %v10268_v23 = vld [vmem:[#allocation46 + $0x10] sm:$0xff] }
0x3538   : > { %v10272_v53 = vld [vmem:[#allocation46 + $0x90] sm:$0xff] }
0x3539   : > { %v17494_v52 = vpack.c.bf16 %v10272_v53, %v10268_v23  ;;  %v10772_v23 = vld [vmem:[#allocation43 + $0x150] sm:$0xff] }
0x35c3   : > { %v10060_v40 = vpop.xlane.xlu1 %10059 }
0x35c4   : > { %v10061_v41 = vmul.f32 0.03125, %v10060_v40  ;;  %v10273_v40 = vld [vmem:[#allocation46 + $0x98] sm:$0xff] }
0x35c6   : > { %v10062_v42 = vadd.f32 1e-05, %v10061_v41  ;;  %v17492_v41 = vpack.c.bf16 %v10273_v40, %v10269_v35  ;;  %v10100_v35 = vrot.slane %v21008_v33, %v20431_v36 }
0x35c8   : > { %18335 = vrsqrt.f32 %v10062_v42 }
0x35d2   : > { %v18336_v15 = vpop.eup %18335 }
0x35d3   : > { %v10064_v22 = vmul.f32 %v18336_v15, %v10056_v7  ;;  %v10469_v7 = vld [vmem:[#allocation46 + $0x38] sm:$0xff] }
0x35d4   : > { %v17476_v43 = vpack.c.bf16 %v10473_v49, %v10469_v7  ;;  %v10275_v7 = vld [vmem:[#allocation46 + $0x108] sm:$0xff] }
0x35d5   : > { %v10071_v26 = vmul.f32 %v16094_v31, %v10064_v22  ;;  %v10303_v22 = vrot.slane %v10298_v19, %v20431_v36 }
0x35d7   : > { %v20992_v34 = vadd.f32 %v16095_v18, %v10071_v26 }
0x35d9   : > { %16096 = vmatmul.mubr.msk.f32.vlgmr.msra.gmra.mrb[110].mxu0 %vm1855_vm0, %v20992_v34  ;;  %16097 = vmatmul.mubr.msk.f32.vlgmr.msra.gmra.mrb[118].mxu1 %vm1855_vm0, %v20992_v34 }
0x35da   : > { %17455 = vmatpush1.bf16.msra.mxu0 %v17454_v45  ;;  %17463 = vmatpush1.bf16.msra.mxu1 %v17462_v47  ;;  %v10266_v45 = vld [vmem:[#allocation46] sm:$0xff] }
0x35db   : > { %17457 = vmatprep.subr.bf16.mxu0 %v17456_v0  ;;  %17465 = vmatprep.subr.bf16.mxu1 %v17464_v46  ;;  %v10270_v46 = vld [vmem:[#allocation46 + $0x80] sm:$0xff] }
0x35dc   : > { %10384 = vmatprep.mubr.f32.mxu0 %v19461_v25  ;;  %10455 = vmatprep.mubr.f32.mxu1 %v19461_v25  ;;  %v17486_v24 = vpack.c.bf16 %v10270_v46, %v10266_v45  ;;  %v10770_v45 = vld [vmem:[#allocation43 + $0x140] sm:$0xff] }
0x35dd   : > { %v10774_v46 = vld [vmem:[#allocation43 + $0x1c0] sm:$0xff] }
0x35de   : > { %17459 = vmatpush1.bf16.msra.mxu0 %v17458_v4  ;;  %17467 = vmatpush1.bf16.msra.mxu1 %v17466_v5  ;;  %v10279_v5 = vld [vmem:[#allocation46 + $0x188] sm:$0xff] }
0x35df   : > { %17469 = vmatprep.subr.bf16.mxu0 %v17468_v51  ;;  %17477 = vmatprep.subr.bf16.mxu1 %v17476_v43  ;;  %v10277_v51 = vld [vmem:[#allocation46 + $0x118] sm:$0xff]  ;;  %v17488_v56 = vpack.c.bf16 %v10279_v5, %v10275_v7  ;;  %v10946_v5 = vld [vmem:[#allocation46 + $0x40] sm:$0xff] }
0x35e0   : > { %v10281_v43 = vld [vmem:[#allocation46 + $0x198] sm:$0xff] }
0x35e1   : > { %16098 = vmatmul.mubr.msk.f32.vlgmr.msra.gmra.mrb[112].mxu0 %vm1855_vm0, %v20992_v34  ;;  %16099 = vmatmul.mubr.msk.f32.vlgmr.msra.gmra.mrb[120].mxu1 %vm1855_vm0, %v20992_v34  ;;  %v17496_v13 = vpack.c.bf16 %v10281_v43, %v10277_v51  ;;  %v10949_v7 = vld [vmem:[#allocation46 + $0x58] sm:$0xff]  ;;  %v10950_v51 = vld [vmem:[#allocation46 + $0xc0] sm:$0xff] }
0x35e7   : > { %17471 = vmatpush1.bf16.xpose.msra.mxu0 %v17470_v9  ;;  %17479 = vmatpush1.bf16.xpose.msra.mxu1 %v17478_v54 }
0x35e8   : > { %17473 = vmatprep.subr.bf16.mxu0 %v17472_v62  ;;  %17481 = vmatprep.subr.bf16.mxu1 %v17480_v2  ;;  %v10280_v2 = vld [vmem:[#allocation46 + $0x190] sm:$0xff] }
0x35e9   : > { %v17498_v16 = vpack.c.bf16 %v10280_v2, %v10276_v60  ;;  %v10956_v2 = vld [vmem:[#allocation46 + $0x150] sm:$0xff] }
0x35ef   : > { %17475 = vmatpush1.bf16.xpose.msra.mxu0 %v17474_v3  ;;  %17483 = vmatpush1.bf16.xpose.msra.mxu1 %v17482_v11  ;;  %v10763_v3 = vld [vmem:[#allocation43 + $0x48] sm:$0xff]  ;;  %v10769_v11 = vld [vmem:[#allocation43 + $0xd8] sm:$0xff] }
0x35f0   : > { %17485 = vmatprep.subr.bf16.mxu0 %v17484_v14  ;;  %17493 = vmatprep.subr.bf16.mxu1 %v17492_v41  ;;  %v10108_v14 = vrot.slane %v21008_v33, %v20433_v37  ;;  %v17500_v40 = vpack.c.bf16 %v10767_v6, %v10763_v3  ;;  %v17508_v41 = vpack.c.bf16 %v10769_v11, %v10765_v8  ;;  %v10960_v3 = vld [vmem:[#allocation46 + $0x1d0] sm:$0xff]  ;;  %v11104_v8 = vld [vmem:[#allocation43 + $0x68] sm:$0xff] }
0x35f1   : > { %v17530_v6 = vpack.c.bf16 %v10960_v3, %v10956_v2  ;;  %v11108_v11 = vld [vmem:[#allocation43 + $0xe8] sm:$0xff]  ;;  %v11290_v3 = vld [vmem:[#allocation46 + $0x78] sm:$0xff] }
0x35f2   : > { %v11292_v2 = vld [vmem:[#allocation46 + $0xe8] sm:$0xff] }
0x36ac   : > { %v21004_v42 = vpop.f32.mrb[110].mxu0  ;;  %v21006_v31 = vpop.f32.mrb[118].mxu1 }
0x36ad   : > { %v10188_v15 = vpop.f32.mrb[111].mxu0  ;;  %v10259_v18 = vpop.f32.mrb[119].mxu1  ;;  %v10187_v19 = vadd.f32 %v21004_v42, %v10100_v35  ;;  %v10776_v42 = vld [vmem:[#allocation43 + $0x1d0] sm:$0xff]  ;;  %v11110_v35 = vld [vmem:[#allocation43 + $0xf8] sm:$0xff] }
0x36ae   : > { %v10189_v49 = vadd.f32 %v10188_v15, %v10104_v29  ;;  %v10260_v4 = vadd.f32 %v10259_v18, %v10112_v58  ;;  %v10762_v15 = vld [vmem:[#allocation43 + $0x40] sm:$0xff]  ;;  %v10775_v29 = vld [vmem:[#allocation43 + $0x1c8] sm:$0xff]  ;;  %v10773_v58 = vld [vmem:[#allocation43 + $0x158] sm:$0xff]  ;;  %v17514_v53 = vpack.c.bf16 %v10776_v42, %v10772_v23 }
0x36af   : > { %v10766_v18 = vld [vmem:[#allocation43 + $0xc0] sm:$0xff] }
0x36b0   : > { %v10263_v17 = vmax.f32 %v10189_v49, 0.0  ;;  %v10265_v62 = vmax.f32 %v10260_v4, 0.0  ;;  %v10953_v4 = vld [vmem:[#allocation46 + $0xd8] sm:$0xff] }
0x36b1   : > { %v17524_v43 = vpack.c.bf16 %v10953_v4, %v10949_v7  ;;  %v11112_v7 = vld [vmem:[#allocation43 + $0x168] sm:$0xff] }
0x36b4   : > { %v10386_v30 = vpop.f32.mrb[112].mxu0  ;;  %v10457_v26 = vpop.f32.mrb[120].mxu1 }
0x36b5   : > { %v10387_v47 = vadd.f32 %v10386_v30, %v10303_v22  ;;  %v10458_v10 = vadd.f32 %v10457_v26, %v10311_v27  ;;  %v10388_v44 = vpop.f32.mrb[113].mxu0  ;;  %v10459_v0 = vpop.f32.mrb[121].mxu1  ;;  %v10258_v22 = vadd.f32 %v21006_v31, %v10108_v14  ;;  %v10764_v27 = vld [vmem:[#allocation43 + $0x50] sm:$0xff]  ;;  %v10777_v30 = vld [vmem:[#allocation43 + $0x1d8] sm:$0xff]  ;;  %v17502_v26 = vpack.c.bf16 %v10766_v18, %v10762_v15 }
0x36b6   : > { %v10389_v63 = vadd.f32 %v10388_v44, %v10307_v28  ;;  %v10460_v48 = vadd.f32 %v10459_v0, %v10315_v57  ;;  %v10768_v28 = vld [vmem:[#allocation43 + $0xd0] sm:$0xff]  ;;  %v10771_v57 = vld [vmem:[#allocation43 + $0x148] sm:$0xff]  ;;  %v17512_v0 = vpack.c.bf16 %v10777_v30, %v10773_v58  ;;  %v17506_v31 = vpack.c.bf16 %v10774_v46, %v10770_v45  ;;  %v11107_v46 = vld [vmem:[#allocation43 + $0xe0] sm:$0xff] }
0x36b7   : > { %v10462_v9 = vmax.f32 %v10387_v47, 0.0  ;;  %v10464_v54 = vmax.f32 %v10458_v10, 0.0  ;;  %v17510_v33 = vpack.c.bf16 %v10768_v28, %v10764_v27  ;;  %v10262_v47 = vmax.f32 %v10187_v19, 0.0  ;;  %v10778_v58 = vld [vmem:[#allocation45 + $0x8] sm:$0xf] }
0x36b8   : > { %v10463_v50 = vmax.f32 %v10389_v63, 0.0  ;;  %v10465_v20 = vmax.f32 %v10460_v48, 0.0  ;;  %v10264_v10 = vmax.f32 %v10258_v22, 0.0  ;;  %v17504_v44 = vpack.c.bf16 %v10775_v29, %v10771_v57  ;;  %v10947_v63 = vld [vmem:[#allocation46 + $0x48] sm:$0xff] }
0x36b9   : > { %v10951_v48 = vld [vmem:[#allocation46 + $0xc8] sm:$0xff]  ;;  %v10787_v45 = vrot.slane %v10778_v58, %v20435_v38 }
0x36ba   : > { %10546 = vmatprep.mubr.f32.mxu0 %v10463_v50  ;;  %10616 = vmatprep.mubr.f32.mxu1 %v10465_v20  ;;  %v17516_v49 = vpack.c.bf16 %v10951_v48, %v10947_v63  ;;  %v17518_v50 = vpack.c.bf16 %v10950_v51, %v10946_v5  ;;  %v10948_v20 = vld [vmem:[#allocation46 + $0x50] sm:$0xff]  ;;  %v11116_v5 = vld [vmem:[#allocation43 + $0x1e8] sm:$0xff]  ;;  %v11114_v51 = vld [vmem:[#allocation43 + $0x178] sm:$0xff] }
0x36bb   : > { %10547 = vmatmul.mubr.f32.vlgmr.msra.gmra.mrb[114].mxu0 %v10462_v9  ;;  %10617 = vmatmul.mubr.f32.vlgmr.msra.gmra.mrb[122].mxu1 %v10464_v54  ;;  %v10955_v9 = vld [vmem:[#allocation46 + $0x148] sm:$0xff]  ;;  %v11105_v63 = vld [vmem:[#allocation43 + $0x70] sm:$0xff] }
0x36bc   : > { %17487 = vmatpush1.bf16.xpose.msra.mxu0 %v17486_v24  ;;  %17495 = vmatpush1.bf16.xpose.msra.mxu1 %v17494_v52  ;;  %v10952_v24 = vld [vmem:[#allocation46 + $0xd0] sm:$0xff]  ;;  %v10959_v54 = vld [vmem:[#allocation46 + $0x1c8] sm:$0xff] }
0x36bd   : > { %10686 = vmatprep.mubr.f32.mxu0 %v10263_v17  ;;  %10756 = vmatprep.mubr.f32.mxu1 %v10265_v62  ;;  %v17526_v52 = vpack.c.bf16 %v10952_v24, %v10948_v20  ;;  %v10961_v17 = vld [vmem:[#allocation46 + $0x1d8] sm:$0xff]  ;;  %v10954_v62 = vld [vmem:[#allocation46 + $0x140] sm:$0xff]  ;;  %v11109_v48 = vld [vmem:[#allocation43 + $0xf0] sm:$0xff] }
0x36be   : > { %17489 = vmatprep.subr.bf16.mxu0 %v17488_v56  ;;  %17497 = vmatprep.subr.bf16.mxu1 %v17496_v13  ;;  %v10957_v56 = vld [vmem:[#allocation46 + $0x158] sm:$0xff]  ;;  %v17520_v13 = vpack.c.bf16 %v10959_v54, %v10955_v9  ;;  %v17522_v60 = vpack.c.bf16 %v10958_v59, %v10954_v62  ;;  %v11111_v9 = vld [vmem:[#allocation43 + $0x160] sm:$0xff]  ;;  %v11113_v59 = vld [vmem:[#allocation43 + $0x170] sm:$0xff] }
0x36bf   : > { %v17528_v1 = vpack.c.bf16 %v10961_v17, %v10957_v56  ;;  %v11115_v54 = vld [vmem:[#allocation43 + $0x1e0] sm:$0xff]  ;;  %v17536_v17 = vpack.c.bf16 %v11116_v5, %v11112_v7 }
0x36c4   : > { %17491 = vmatpush1.bf16.xpose.msra.mxu0 %v17490_v12  ;;  %17499 = vmatpush1.bf16.xpose.msra.mxu1 %v17498_v16  ;;  %v11106_v12 = vld [vmem:[#allocation43 + $0x78] sm:$0xff]  ;;  %v17532_v16 = vpack.c.bf16 %v11108_v11, %v11104_v8  ;;  %v17538_v8 = vpack.c.bf16 %v11115_v54, %v11111_v9 }
0x36c5   : > { %17501 = vmatprep.subr.bf16.mxu0 %v17500_v40  ;;  %17509 = vmatprep.subr.bf16.mxu1 %v17508_v41  ;;  %v17540_v14 = vpack.c.bf16 %v11110_v35, %v11106_v12  ;;  %v11287_v35 = vld [vmem:[#allocation46 + $0x60] sm:$0xff] }
0x36cb   : > { %10687 = vmatmul.mubr.f32.vlgmr.msra.gmra.mrb[116].mxu0 %v10262_v47  ;;  %10757 = vmatmul.mubr.f32.vlgmr.msra.gmra.mrb[124].mxu1 %v10264_v10  ;;  %v10795_v47 = vrot.slane %v10778_v58, %v20437_v39 }
0x36cc   : > { %17503 = vmatpush1.bf16.msra.mxu0 %v17502_v26  ;;  %17511 = vmatpush1.bf16.msra.mxu1 %v17510_v33  ;;  %v10783_v26 = vrot.slane %v10778_v58, %v20431_v36  ;;  %v10791_v33 = vrot.slane %v10778_v58, %v20433_v37  ;;  %v11295_v58 = vld [vmem:[#allocation46 + $0x160] sm:$0xff] }
0x36cd   : > { %17505 = vmatprep.subr.bf16.mxu0 %v17504_v44  ;;  %17513 = vmatprep.subr.bf16.mxu1 %v17512_v0  ;;  %v11103_v0 = vld [vmem:[#allocation43 + $0x60] sm:$0xff] }
0x36ce   : > { %10864 = vmatprep.mubr.f32.mxu0 %v19461_v25  ;;  %10935 = vmatprep.mubr.f32.mxu1 %v19461_v25  ;;  %v17534_v24 = vpack.c.bf16 %v11107_v46, %v11103_v0 }
0x36d0   : > { %17507 = vmatpush1.bf16.msra.mxu0 %v17506_v31  ;;  %17515 = vmatpush1.bf16.msra.mxu1 %v17514_v53 }
0x36d1   : > { %17517 = vmatprep.subr.bf16.mxu0 %v17516_v49  ;;  %17525 = vmatprep.subr.bf16.mxu1 %v17524_v43  ;;  %v11118_v43 = vld [vmem:[#allocation43 + $0x1f8] sm:$0xff] }
0x36d2   : > { %v17544_v62 = vpack.c.bf16 %v11118_v43, %v11114_v51 }
0x36d3   : > { %16100 = vmatmul.mubr.msk.f32.vlgmr.msra.gmra.mrb[118].mxu0 %vm1855_vm0, %v20992_v34  ;;  %16101 = vmatmul.mubr.msk.f32.vlgmr.msra.gmra.mrb[126].mxu1 %vm1855_vm0, %v20992_v34 }
0x36d9   : > { %17519 = vmatpush1.bf16.xpose.msra.mxu0 %v17518_v50  ;;  %17527 = vmatpush1.bf16.xpose.msra.mxu1 %v17526_v52  ;;  %v17542_v52 = vpack.c.bf16 %v11109_v48, %v11105_v63 }
0x36da   : > { %17521 = vmatprep.subr.bf16.mxu0 %v17520_v13  ;;  %17529 = vmatprep.subr.bf16.mxu1 %v17528_v1  ;;  %v11117_v1 = vld [vmem:[#allocation43 + $0x1f0] sm:$0xff] }
0x36db   : > { %v17546_v11 = vpack.c.bf16 %v11117_v1, %v11113_v59 }
0x36e1   : > { %17523 = vmatpush1.bf16.xpose.msra.mxu0 %v17522_v60  ;;  %17531 = vmatpush1.bf16.xpose.msra.mxu1 %v17530_v6  ;;  %v11288_v60 = vld [vmem:[#allocation46 + $0x68] sm:$0xff]  ;;  %v11294_v6 = vld [vmem:[#allocation46 + $0xf8] sm:$0xff] }
0x36e2   : > { %17533 = vmatprep.subr.bf16.mxu0 %v17532_v16  ;;  %17541 = vmatprep.subr.bf16.mxu1 %v17540_v14  ;;  %v17548_v12 = vpack.c.bf16 %v11292_v2, %v11288_v60  ;;  %v17556_v16 = vpack.c.bf16 %v11294_v6, %v11290_v3  ;;  %v11291_v14 = vld [vmem:[#allocation46 + $0xe0] sm:$0xff] }
0x36e3   : > { %v16104_v60 = vld [vmem:[#allocation48] ss:$0 sm:$0xff] }
0x378e   : > { %v10548_v40 = vpop.f32.mrb[114].mxu0  ;;  %v10618_v41 = vpop.f32.mrb[122].mxu1 }
0x378f   : > { %v10619_v15 = vadd.f32 %v10618_v41, %v10548_v40  ;;  %v10550_v18 = vpop.f32.mrb[115].mxu0  ;;  %v10620_v19 = vpop.f32.mrb[123].mxu1  ;;  %v11289_v40 = vld [vmem:[#allocation46 + $0x70] sm:$0xff] }
0x3790   : > { %v11293_v41 = vld [vmem:[#allocation46 + $0xf0] sm:$0xff]  ;;  %v11296_v19 = vld [vmem:[#allocation46 + $0x168] sm:$0xff] }
0x3791   : > { %v17558_v18 = vpack.c.bf16 %v11293_v41, %v11289_v40  ;;  %v11483_v40 = vld [vmem:[#allocation19 + $0x20] sm:$0xff]  ;;  %v11484_v41 = vld [vmem:[#allocation19 + $0x28] sm:$0xff] }
0x379e   : > { %v10688_v22 = vpop.f32.mrb[116].mxu0  ;;  %v10758_v27 = vpop.f32.mrb[124].mxu1 }
0x379f   : > { %v10689_v28 = vadd.f32 %v10688_v22, %v10619_v15  ;;  %v10690_v57 = vpop.f32.mrb[117].mxu0  ;;  %v10760_v29 = vpop.f32.mrb[125].mxu1  ;;  %v17550_v15 = vpack.c.bf16 %v11291_v14, %v11287_v35  ;;  %v11300_v22 = vld [vmem:[#allocation46 + $0x1e8] sm:$0xff] }
0x37a0   : > { %v11302_v57 = vld [vmem:[#allocation46 + $0x1f8] sm:$0xff] }
0x37a1   : > { %v21030_v30 = vadd.f32 %v10758_v27, %v10689_v28  ;;  %v11298_v27 = vld [vmem:[#allocation46 + $0x178] sm:$0xff]  ;;  %v17552_v28 = vpack.c.bf16 %v11300_v22, %v11296_v19 }
0x37a2   : > { %v17560_v29 = vpack.c.bf16 %v11302_v57, %v11298_v27  ;;  %v11570_v19 = vld [vmem:[#allocation21 + $0x28] sm:$0xff]  ;;  %v11486_v27 = vld [vmem:[#allocation19 + $0x38] sm:$0xff] }
0x37a6   : > { %v10866_v10 = vpop.f32.mrb[118].mxu0  ;;  %v10937_v44 = vpop.f32.mrb[126].mxu1 }
0x37a7   : > { %v10867_v23 = vadd.f32 %v10866_v10, %v10783_v26  ;;  %v10938_v42 = vadd.f32 %v10937_v44, %v10791_v33  ;;  %v10868_v31 = vpop.f32.mrb[119].mxu0  ;;  %v10939_v53 = vpop.f32.mrb[127].mxu1  ;;  %v11299_v26 = vld [vmem:[#allocation46 + $0x1e0] sm:$0xff]  ;;  %v11297_v33 = vld [vmem:[#allocation46 + $0x170] sm:$0xff] }
0x37a8   : > { %v10869_v49 = vadd.f32 %v10868_v31, %v10787_v45  ;;  %v10940_v4 = vadd.f32 %v10939_v53, %v10795_v47  ;;  %v17554_v45 = vpack.c.bf16 %v11299_v26, %v11295_v58  ;;  %v11301_v47 = vld [vmem:[#allocation46 + $0x1f0] sm:$0xff]  ;;  %v11119_v31 = vld [vmem:[#allocation45 + $0xc] sm:$0xf] }
0x37a9   : > { %v10942_v56 = vmax.f32 %v10867_v23, 0.0  ;;  %v10944_v13 = vmax.f32 %v10938_v42, 0.0  ;;  %v17562_v10 = vpack.c.bf16 %v11301_v47, %v11297_v33  ;;  %v11124_v63 = vrot.slane %v11119_v31, %v20431_v36 }
0x37aa   : > { %v10943_v50 = vmax.f32 %v10869_v49, 0.0  ;;  %v10945_v20 = vmax.f32 %v10940_v4, 0.0  ;;  %v11132_v48 = vrot.slane %v11119_v31, %v20433_v37  ;;  %v11128_v7 = vrot.slane %v11119_v31, %v20435_v38 }
0x37ab   : > { %v11136_v49 = vrot.slane %v11119_v31, %v20437_v39  ;;  %v16109_v31 = vld [vmem:[#allocation24 + $0x1] ss:$0 sm:$0xff] }
0x37ac   : > { %11026 = vmatprep.mubr.f32.mxu0 %v10943_v50  ;;  %11096 = vmatprep.mubr.f32.mxu1 %v10945_v20 }
0x37ad   : > { %11027 = vmatmul.mubr.f32.vlgmr.msra.gmra.mrb[120].mxu0 %v10942_v56  ;;  %11097 = vmatmul.mubr.f32.vlgmr.msra.gmra.mrb[128].mxu1 %v10944_v13 }
0x37ae   : > { %17535 = vmatpush1.bf16.msra.mxu0 %v17534_v24  ;;  %17543 = vmatpush1.bf16.msra.mxu1 %v17542_v52 }
0x37af   : > { %17537 = vmatprep.subr.bf16.mxu0 %v17536_v17  ;;  %17545 = vmatprep.subr.bf16.mxu1 %v17544_v62 }
0x37b0   : > { %11205 = vmatprep.mubr.f32.mxu0 %v19461_v25  ;;  %11276 = vmatprep.mubr.f32.mxu1 %v19461_v25 }
0x37b2   : > { %17539 = vmatpush1.bf16.msra.mxu0 %v17538_v8  ;;  %17547 = vmatpush1.bf16.msra.mxu1 %v17546_v11 }
0x37b3   : > { %17549 = vmatprep.subr.bf16.mxu0 %v17548_v12  ;;  %17557 = vmatprep.subr.bf16.mxu1 %v17556_v16 }
0x37b5   : > { %16102 = vmatmul.mubr.msk.f32.vlgmr.msra.gmra.mrb[122].mxu0 %vm1855_vm0, %v20992_v34  ;;  %16103 = vmatmul.mubr.msk.f32.vlgmr.msra.gmra.mrb[130].mxu1 %vm1855_vm0, %v20992_v34 }
0x37bb   : > { %17551 = vmatpush1.bf16.xpose.msra.mxu0 %v17550_v15  ;;  %17559 = vmatpush1.bf16.xpose.msra.mxu1 %v17558_v18  ;;  %v11569_v15 = vld [vmem:[#allocation21 + $0x20] sm:$0xff]  ;;  %v17565_v18 = vpack.c.bf16 %v11484_v41, %v11483_v40 }
0x37bc   : > { %17553 = vmatprep.subr.bf16.mxu0 %v17552_v28  ;;  %17561 = vmatprep.subr.bf16.mxu1 %v17560_v29  ;;  %v17571_v22 = vpack.c.bf16 %v11570_v19, %v11569_v15  ;;  %v11571_v28 = vld [vmem:[#allocation21 + $0x30] sm:$0xff]  ;;  %v11572_v29 = vld [vmem:[#allocation21 + $0x38] sm:$0xff] }
0x37bd   : > { %v17574_v58 = vpack.c.bf16 %v11572_v29, %v11571_v28 }
0x37c3   : > { %17555 = vmatpush1.bf16.xpose.msra.mxu0 %v17554_v45  ;;  %17563 = vmatpush1.bf16.xpose.msra.mxu1 %v17562_v10  ;;  %v16105_v10 = vld [vmem:[#allocation49] ss:$0 sm:$0xff] }
0x37c4   : > { %17564 = vmatprep.subr.bf16.mxu0 %v19462_v61  ;;  %17570 = vmatprep.subr.bf16.mxu1 %v19462_v61 }
0x3880   : > { %v11028_v44 = vpop.f32.mrb[120].mxu0  ;;  %v11098_v0 = vpop.f32.mrb[128].mxu1 }
0x3881   : > { %v11099_v46 = vadd.f32 %v11098_v0, %v11028_v44  ;;  %v11030_v23 = vpop.f32.mrb[121].mxu0  ;;  %v11100_v42 = vpop.f32.mrb[129].mxu1  ;;  %v16106_v0 = vld [vmem:[#allocation51] ss:$0 sm:$0xff] }
0x3882   : > { %v16107_v42 = vld [vmem:[#allocation22 + $0x1] ss:$0 sm:$0xff] }
0x3883   : > { %v11102_v53 = vadd.f32 %v11099_v46, %v21030_v30 }
0x3888   : > { %v11207_v4 = vpop.f32.mrb[122].mxu0  ;;  %v11278_v5 = vpop.f32.mrb[130].mxu1 }
0x3889   : > { %v11208_v51 = vadd.f32 %v11207_v4, %v11124_v63  ;;  %v11279_v43 = vadd.f32 %v11278_v5, %v11132_v48  ;;  %v11209_v50 = vpop.f32.mrb[123].mxu0  ;;  %v11280_v20 = vpop.f32.mrb[131].mxu1 }
0x388a   : > { %v11210_v24 = vadd.f32 %v11209_v50, %v11128_v7  ;;  %v11281_v52 = vadd.f32 %v11280_v20, %v11136_v49 }
0x388b   : > { %v11283_v56 = vmax.f32 %v11208_v51, 0.0  ;;  %v11285_v30 = vmax.f32 %v11279_v43, 0.0 }
0x388c   : > { %v11284_v9 = vmax.f32 %v11210_v24, 0.0  ;;  %v11286_v54 = vmax.f32 %v11281_v52, 0.0 }
0x388e   : > { %11367 = vmatprep.mubr.f32.mxu0 %v11284_v9  ;;  %11437 = vmatprep.mubr.f32.mxu1 %v11286_v54 }
0x388f   : > { %11368 = vmatmul.mubr.f32.vlgmr.msra.gmra.mrb[124].mxu0 %v11283_v56  ;;  %11438 = vmatmul.mubr.f32.vlgmr.msra.gmra.mrb[132].mxu1 %v11285_v30 }
0x3890   : > { %16831 = vmatprep.mubr.msk.f32.mxu0 %vm19463_vm4, %v19461_v25  ;;  %16842 = vmatprep.mubr.msk.f32.mxu1 %vm19463_vm4, %v19461_v25 }
0x3891   : > { %17566 = vmatpush3.bf16.msra.mxu0 %v17565_v18  ;;  %17572 = vmatpush3.bf16.msra.mxu1 %v17571_v22  ;;  %v11816_v18 = vld [vmem:[#allocation25 + $0x20] sm:$0xff] }
0x3892   : > { %17567 = vmatprep.subr.bf16.mxu0 %v19462_v61  ;;  %17573 = vmatprep.subr.bf16.mxu1 %v19462_v61 }
0x3895   : > { %17575 = vmatpush3.bf16.msra.mxu1 %v17574_v58 }
0x3896   : > { %16850 = vmatprep.subr.mxu1 %v19461_v25 }
0x3962   : > { %v11369_v13 = vpop.f32.mrb[124].mxu0  ;;  %v11439_v17 = vpop.f32.mrb[132].mxu1 }
0x3963   : > { %v11440_v62 = vadd.f32 %v11439_v17, %v11369_v13  ;;  %v11371_v59 = vpop.f32.mrb[125].mxu0  ;;  %v11441_v1 = vpop.f32.mrb[133].mxu1 }
0x3965   : > { %v11443_v2 = vadd.f32 %v11440_v62, %v11102_v53 }
0x3967   : > { %v11451_v3 = vadd.f32 %v16104_v60, %v11443_v2 }
0x3969   : > { %v11452_v6 = vadd.f32 %v11451_v3, %v20992_v34  ;;  %v11485_v34 = vld [vmem:[#allocation19 + $0x30] sm:$0xff] }
0x396a   : > { %v17568_v57 = vpack.c.bf16 %v11486_v27, %v11485_v34 }
0x396b   : > { %v11455_v8 = vsel %vm1855_vm0, %v11452_v6, 0.0 }
0x396c   : > { %11456 = vadd.xlane.f32.xlu0 %v11455_v8  ;;  %17569 = vmatpush3.bf16.msra.mxu0 %v17568_v57 }
0x396d   : > { %16845 = vmatprep.subr.mxu0 %v19461_v25 }
0x39f9   : > { %v11457_v11 = vpop.xlane.xlu0 %11456 }
0x39fa   : > { %v11458_v12 = vmul.f32 0.03125, %v11457_v11 }
0x39fc   : > { %v11459_v16 = vsub.f32 %v11452_v6, %v11458_v12 }
0x39fe   : > { %v11460_v35 = vmul.f32 %v11459_v16, %v11459_v16 }
0x3a00   : > { %v11461_v14 = vsel %vm1855_vm0, %v11460_v35, 0.0  ;;  %v11984_v35 = vld [vmem:[#allocation25 + $0x28] sm:$0xff] }
0x3a01   : > { %11462 = vadd.xlane.f32.xlu0 %v11461_v14 }
0x3a8e   : > { %v11463_v26 = vpop.xlane.xlu0 %11462 }
0x3a8f   : > { %v11464_v33 = vmul.f32 0.03125, %v11463_v26 }
0x3a91   : > { %v11465_v45 = vadd.f32 1e-05, %v11464_v33 }
0x3a93   : > { %18337 = vrsqrt.f32 %v11465_v45 }
0x3a9d   : > { %v18338_v47 = vpop.eup %18337 }
0x3a9e   : > { %v11467_v44 = vmul.f32 %v18338_v47, %v11459_v16 }
0x3aa0   : > { %v11474_v46 = vmul.f32 %v16105_v10, %v11467_v44 }
0x3aa2   : > { %v21060_v23 = vadd.f32 %v16106_v0, %v11474_v46 }
0x3aa4   : > { %16832 = vmatmul.mubr.msk.f32.vlgmr.msra.gmra.mrb[126].mxu0 %vm1855_vm0, %v21060_v23  ;;  %16843 = vmatmul.mubr.msk.f32.vlgmr.msra.gmra.mrb[134].mxu1 %vm1855_vm0, %v21060_v23 }
0x3aa5   : > { %16847 = vmatprep.mubr.msk.f32.mxu0 %vm19463_vm4, %v19461_v25  ;;  %16852 = vmatprep.mubr.msk.f32.mxu1 %vm19463_vm4, %v19461_v25 }
0x3b77   : > { %v11564_v53 = vpop.f32.mrb[126].mxu0  ;;  %v11647_v63 = vpop.f32.mrb[134].mxu1 }
0x3b78   : > { %v21070_v48 = vadd.f32 %v16107_v42, %v11564_v53  ;;  %v21072_v7 = vadd.f32 %v16109_v31, %v11647_v63  ;;  %v16833_v49 = vpop.f32.mrb[127].mxu0  ;;  %v16844_v4 = vpop.f32.mrb[135].mxu1 }
0x3b7a   : > { %11819 = vrot.lane.b32.xlu0 %v21072_v7, %s19454_s26  ;;  %16846 = vmatpush3.xpose.msk.msra.mxu0 %vm2023_vm1, %v21072_v7 }
0x3b7b   : > { %11817 = vrot.lane.b32.xlu1 %v21070_v48, %s19454_s26  ;;  %16855 = vmatprep.subr.mxu0 %v19461_v25 }
0x3b7d   : > { %16848 = vmatmul.mubr.msk.f32.vlgmr.msra.gmra.mrb[128].mxu0 %vm2023_vm1, %v21070_v48 }
0x3b7e   : > { %16857 = vmatprep.mubr.msk.f32.mxu0 %vm19463_vm4, %v19461_v25 }
0x3bec   : > { %v11820_v5 = vpop.permute.xlu0 %11819 }
0x3bed   : > { %16856 = vmatpush3.xpose.msk.msra.mxu0 %vm2023_vm1, %v11820_v5  ;;  %v11818_v51 = vpop.permute.xlu1 %11817 }
0x3bee   : > { %16865 = vmatprep.subr.mxu0 %v19461_v25 }
0x3bf0   : > { %16858 = vmatmul.mubr.msk.f32.vlgmr.msra.gmra.mrb[130].mxu0 %vm2023_vm1, %v11818_v51 }
0x3bf1   : > { %16867 = vmatprep.mubr.msk.f32.mxu0 %vm19463_vm4, %v19461_v25  ;;  %16866 = vmatpush3.msra.mxu0 %v11984_v35 }
0x3bf2   : > { %16875 = vmatprep.subr.mxu0 %v19461_v25 }
0x3c50   : > { %v11723_v43 = vpop.f32.mrb[128].mxu0 }
0x3c51   : > { %v11727_v50 = vmul.f32 0.35355338, %v11723_v43  ;;  %v16849_v20 = vpop.f32.mrb[129].mxu0 }
0x3c53   : > { %v11728_v24 = vsel %vm2023_vm1, %v11727_v50, -inf }
0x3c54   : > { %11729 = vmax.xlane.f32.xlu1 %v11728_v24 }
0x3cc3   : > { %v11891_v52 = vpop.f32.mrb[130].mxu0 }
0x3cc4   : > { %v11895_v9 = vmul.f32 0.35355338, %v11891_v52  ;;  %v16859_v54 = vpop.f32.mrb[131].mxu0 }
0x3cc6   : > { %v11896_v56 = vsel %vm2023_vm1, %v11895_v9, -inf }
0x3cc7   : > { %11897 = vmax.xlane.f32.xlu0 %v11896_v56 }
0x3ce1   : > { %v11730_v30 = vpop.xlane.xlu1 %11729 }
0x3ce2   : > { %v11731_v13 = vsub.f32 %v11727_v50, %v11730_v30  ;;  %v12298_v50 = vld [vmem:[#allocation25 + $0x30] sm:$0xff] }
0x3ce4   : > { %v11732_v17 = vmul.f32 1.442695, %v11731_v13 }
0x3ce6   : > { %18339 = vpow2.f32 %v11732_v17 }
0x3cf0   : > { %v18340_v62 = vpop.eup %18339 }
0x3cf1   : > { %v11734_v59 = vsel %vm2023_vm1, %v18340_v62, 0.0 }
0x3cf2   : > { %11735 = vadd.xlane.f32.xlu0 %v11734_v59 }
0x3d08   : > { %11739 = vrot.lane.b32.xlu0 %v21072_v7, %s19455_s7 }
0x3d0c   : > { %12131 = vrot.lane.b32.xlu0 %v21070_v48, %s21473_s8 }
0x3d54   : > { %v11898_v1 = vpop.xlane.xlu0 %11897 }
0x3d55   : > { %v11899_v60 = vsub.f32 %v11895_v9, %v11898_v1 }
0x3d57   : > { %v11900_v2 = vmul.f32 1.442695, %v11899_v60  ;;  %v12540_v60 = vld [vmem:[#allocation25 + $0x38] sm:$0xff] }
0x3d59   : > { %18341 = vpow2.f32 %v11900_v2 }
0x3d63   : > { %v18342_v3 = vpop.eup %18341 }
0x3d64   : > { %v11902_v6 = vsel %vm2023_vm1, %v18342_v3, 0.0 }
0x3d65   : > { %11903 = vadd.xlane.f32.xlu1 %v11902_v6 }
0x3d76   : > { %11907 = vrot.lane.b32.xlu1 %v21072_v7, %s21472_s5 }
0x3d7a   : > { %12133 = vrot.lane.b32.xlu1 %v21072_v7, %s21473_s8 }
0x3d7f   : > { %v11736_v8 = vpop.xlane.xlu0 %11735 }
0x3d80   : > { %18343 = vrcp.f32 %v11736_v8 }
0x3d83   : > { %v11740_v11 = vpop.permute.xlu0 %11739 }
0x3d84   : > { %16851 = vmatpush3.msra.mxu1 %v11740_v11 }
0x3d85   : > { %16860 = vmatprep.subr.mxu1 %v19461_v25 }
0x3d87   : > { %v12132_v57 = vpop.permute.xlu0 %12131 }
0x3d8a   : > { %v18344_v12 = vpop.eup %18343 }
0x3d8b   : > { %v11738_v16 = vmul.f32 %v18344_v12, %v18340_v62  ;;  %v12743_v12 = vld [vmem:[#allocation33 + $0x20] sm:$0xff] }
0x3d8d   : > { %16853 = vmatmul.mubr.msk.f32.vlgmr.msra.gmra.mrb[136].mxu1 %vm2023_vm1, %v11738_v16  ;;  %v12744_v16 = vld [vmem:[#allocation33 + $0x28] sm:$0xff] }
0x3d8e   : > { %16862 = vmatprep.mubr.msk.f32.mxu1 %vm19463_vm4, %v19461_v25  ;;  %v17582_v35 = vpack.c.bf16 %v12744_v16, %v12743_v12 }
0x3df2   : > { %v11904_v14 = vpop.xlane.xlu1 %11903 }
0x3df3   : > { %18345 = vrcp.f32 %v11904_v14  ;;  %v12745_v14 = vld [vmem:[#allocation33 + $0x30] sm:$0xff] }
0x3df6   : > { %v11908_v40 = vpop.permute.xlu1 %11907 }
0x3df7   : > { %16861 = vmatpush3.msra.mxu1 %v11908_v40  ;;  %v12746_v40 = vld [vmem:[#allocation33 + $0x38] sm:$0xff] }
0x3df8   : > { %16870 = vmatprep.subr.mxu1 %v19461_v25 }
0x3dfa   : > { %v12134_v27 = vpop.permute.xlu1 %12133 }
0x3dfd   : > { %v18346_v41 = vpop.eup %18345 }
0x3dfe   : > { %v11906_v15 = vmul.f32 %v18346_v41, %v18342_v3  ;;  %v17586_v41 = vpack.c.bf16 %v12746_v40, %v12745_v14 }
0x3e00   : > { %16863 = vmatmul.mubr.msk.f32.vlgmr.msra.gmra.mrb[138].mxu1 %vm2023_vm1, %v11906_v15 }
0x3e01   : > { %16871 = vmatpush3.msra.mxu1 %v11816_v18  ;;  %16872 = vmatprep.mubr.msk.f32.mxu1 %vm19463_vm4, %v19461_v25 }
0x3e02   : > { %16880 = vmatprep.subr.mxu1 %v19461_v25 }
0x3e60   : > { %v11811_v19 = vpop.f32.mrb[136].mxu1 }
0x3e61   : > { %v16854_v22 = vpop.f32.mrb[137].mxu1  ;;  %16873 = vmatmul.mubr.msk.f32.vlgmr.msra.gmra.mrb[140].mxu1 %vm2023_vm1, %v11811_v19 }
0x3e62   : > { %16882 = vmatprep.mubr.msk.f32.mxu1 %vm19463_vm4, %v19461_v25  ;;  %v16127_v22 = vld [vmem:[#allocation27 + $0x1] ss:$0 sm:$0xff] }
0x3ed3   : > { %v11979_v34 = vpop.f32.mrb[138].mxu1 }
0x3ed4   : > { %v16864_v28 = vpop.f32.mrb[139].mxu1  ;;  %16868 = vmatmul.mubr.msk.f32.vlgmr.msra.gmra.mrb[132].mxu0 %vm2023_vm1, %v11979_v34 }
0x3ed5   : > { %16876 = vmatpush3.xpose.msk.msra.mxu0 %vm2023_vm1, %v12134_v27  ;;  %16877 = vmatprep.mubr.msk.f32.mxu0 %vm19463_vm4, %v19461_v25 }
0x3ed6   : > { %16885 = vmatprep.subr.mxu0 %v19461_v25 }
0x3ed8   : > { %16878 = vmatmul.mubr.msk.f32.vlgmr.msra.gmra.mrb[134].mxu0 %vm2023_vm1, %v12132_v57 }
0x3ed9   : > { %16887 = vmatprep.mubr.msk.f32.mxu0 %vm19463_vm4, %v19461_v25  ;;  %16886 = vmatpush3.msra.mxu0 %v12298_v50 }
0x3eda   : > { %16895 = vmatprep.subr.mxu0 %v19461_v25 }
0x3f34   : > { %v12127_v29 = vpop.f32.mrb[140].mxu1 }
0x3f35   : > { %v16874_v58 = vpop.f32.mrb[141].mxu1 }
0x3fa7   : > { %v12054_v26 = vpop.f32.mrb[132].mxu0 }
0x3fa8   : > { %v12128_v33 = vadd.f32 %v12127_v29, %v12054_v26  ;;  %v16869_v45 = vpop.f32.mrb[133].mxu0  ;;  %v16132_v29 = vld [vmem:[#allocation36 + $0x1] ss:$0 sm:$0xff] }
0x3fab   : > { %v12205_v47 = vpop.f32.mrb[134].mxu0 }
0x3fac   : > { %v12209_v10 = vmul.f32 0.35355338, %v12205_v47  ;;  %v16879_v44 = vpop.f32.mrb[135].mxu0 }
0x3fae   : > { %v12210_v0 = vsel %vm2023_vm1, %v12209_v10, -inf }
0x3faf   : > { %12211 = vmax.xlane.f32.xlu1 %v12210_v0 }
0x3fc0   : > { %12375 = vrot.lane.b32.xlu1 %v21072_v7, %s21468_s9 }
0x3fc4   : > { %12373 = vrot.lane.b32.xlu1 %v21070_v48, %s21468_s9 }
0x403c   : > { %v12212_v46 = vpop.xlane.xlu1 %12211 }
0x403d   : > { %v12213_v42 = vsub.f32 %v12209_v10, %v12212_v46 }
0x403f   : > { %v12214_v31 = vmul.f32 1.442695, %v12213_v42 }
0x4040   : > { %v12376_v51 = vpop.permute.xlu1 %12375 }
0x4041   : > { %18347 = vpow2.f32 %v12214_v31 }
0x4044   : > { %v12374_v43 = vpop.permute.xlu1 %12373 }
0x404b   : > { %v18348_v53 = vpop.eup %18347 }
0x404c   : > { %v12216_v63 = vsel %vm2023_vm1, %v18348_v53, 0.0 }
0x404d   : > { %12217 = vadd.xlane.f32.xlu0 %v12216_v63 }
0x4063   : > { %12221 = vrot.lane.b32.xlu0 %v21072_v7, %s21467_s4 }
0x40da   : > { %v12218_v49 = vpop.xlane.xlu0 %12217 }
0x40db   : > { %18349 = vrcp.f32 %v12218_v49  ;;  %v12657_v49 = vld [vmem:[#allocation31 + $0x20] sm:$0xff] }
0x40de   : > { %v12222_v4 = vpop.permute.xlu0 %12221 }
0x40df   : > { %16881 = vmatpush3.msra.mxu1 %v12222_v4  ;;  %v12658_v4 = vld [vmem:[#allocation31 + $0x28] sm:$0xff] }
0x40e0   : > { %16890 = vmatprep.subr.mxu1 %v19461_v25 }
0x40e5   : > { %v18350_v5 = vpop.eup %18349 }
0x40e6   : > { %v12220_v48 = vmul.f32 %v18350_v5, %v18348_v53  ;;  %v17577_v5 = vpack.c.bf16 %v12658_v4, %v12657_v49  ;;  %v13176_v4 = vld [vmem:[#allocation37 + $0x28] sm:$0xff] }
0x40e8   : > { %16883 = vmatmul.mubr.msk.f32.vlgmr.msra.gmra.mrb[142].mxu1 %vm2023_vm1, %v12220_v48  ;;  %v12660_v48 = vld [vmem:[#allocation31 + $0x38] sm:$0xff] }
0x40e9   : > { %16891 = vmatpush3.xpose.msk.msra.mxu1 %vm2023_vm1, %v12376_v51  ;;  %16892 = vmatprep.mubr.msk.f32.mxu1 %vm19463_vm4, %v19461_v25  ;;  %v12659_v51 = vld [vmem:[#allocation31 + $0x30] sm:$0xff] }
0x40ea   : > { %16900 = vmatprep.subr.mxu1 %v19461_v25 }
0x40ec   : > { %16893 = vmatmul.mubr.msk.f32.vlgmr.msra.gmra.mrb[144].mxu1 %vm2023_vm1, %v12374_v43  ;;  %v17580_v43 = vpack.c.bf16 %v12660_v48, %v12659_v51 }
0x40ed   : > { %16902 = vmatprep.mubr.msk.f32.mxu1 %vm19463_vm4, %v19461_v25  ;;  %16901 = vmatpush3.msra.mxu1 %v12540_v60 }
0x40ee   : > { %17583 = vmatprep.subr.bf16.mxu1 %v17582_v35 }
0x41bb   : > { %v12293_v20 = vpop.f32.mrb[142].mxu1 }
0x41bc   : > { %v16884_v24 = vpop.f32.mrb[143].mxu1  ;;  %16888 = vmatmul.mubr.msk.f32.vlgmr.msra.gmra.mrb[136].mxu0 %vm2023_vm1, %v12293_v20 }
0x41bd   : > { %16897 = vmatprep.mubr.msk.f32.mxu0 %vm19463_vm4, %v19461_v25 }
0x41bf   : > { %v12447_v52 = vpop.f32.mrb[144].mxu1 }
0x41c0   : > { %v12451_v9 = vmul.f32 0.35355338, %v12447_v52  ;;  %v16894_v54 = vpop.f32.mrb[145].mxu1 }
0x41c2   : > { %v12452_v56 = vsel %vm2023_vm1, %v12451_v9, -inf }
0x41c3   : > { %12453 = vmax.xlane.f32.xlu0 %v12452_v56  ;;  %v16129_v56 = vld [vmem:[#allocation30 + $0x1] ss:$0 sm:$0xff] }
0x41d9   : > { %12463 = vrot.lane.b32.xlu0 %v21072_v7, %s21469_s6 }
0x4250   : > { %v12454_v30 = vpop.xlane.xlu0 %12453 }
0x4251   : > { %v12455_v13 = vsub.f32 %v12451_v9, %v12454_v30  ;;  %v16128_v9 = vld [vmem:[#allocation28 + $0x1] ss:$0 sm:$0xff] }
0x4253   : > { %v12456_v17 = vmul.f32 1.442695, %v12455_v13 }
0x4254   : > { %v12464_v62 = vpop.permute.xlu0 %12463 }
0x4255   : > { %18351 = vpow2.f32 %v12456_v17  ;;  %16896 = vmatpush3.msra.mxu0 %v12464_v62  ;;  %v16130_v17 = vld [vmem:[#allocation34 + $0x1] ss:$0 sm:$0xff] }
0x4256   : > { %17576 = vmatprep.subr.bf16.mxu0 %v19462_v61 }
0x425f   : > { %v18352_v59 = vpop.eup %18351 }
0x4260   : > { %v12458_v1 = vsel %vm2023_vm1, %v18352_v59, 0.0 }
0x4261   : > { %12459 = vadd.xlane.f32.xlu1 %v12458_v1 }
0x428f   : > { %v12368_v2 = vpop.f32.mrb[136].mxu0 }
0x4290   : > { %v12372_v3 = vadd.f32 %v12368_v2, %v12128_v33  ;;  %v16889_v6 = vpop.f32.mrb[137].mxu0 }
0x42ee   : > { %v12460_v8 = vpop.xlane.xlu1 %12459 }
0x42ef   : > { %18353 = vrcp.f32 %v12460_v8 }
0x42f9   : > { %v18354_v7 = vpop.eup %18353 }
0x42fa   : > { %v12462_v11 = vmul.f32 %v18354_v7, %v18352_v59 }
0x42fc   : > { %16898 = vmatmul.mubr.msk.f32.vlgmr.msra.gmra.mrb[138].mxu0 %vm2023_vm1, %v12462_v11 }
0x42fd   : > { %16913 = vmatprep.mubr.msk.f32.mxu0 %vm19463_vm4, %v19461_v25  ;;  %17578 = vmatpush3.bf16.msra.mxu0 %v17577_v5 }
0x42fe   : > { %17579 = vmatprep.subr.bf16.mxu0 %v19462_v61 }
0x4301   : > { %17581 = vmatpush3.bf16.msra.mxu0 %v17580_v43 }
0x4302   : > { %17590 = vmatprep.subr.bf16.mxu0 %v19462_v61 }
0x43cf   : > { %v12535_v15 = vpop.f32.mrb[138].mxu0 }
0x43d0   : > { %v16899_v18 = vpop.f32.mrb[139].mxu0  ;;  %16903 = vmatmul.mubr.msk.f32.vlgmr.msra.gmra.mrb[146].mxu1 %vm2023_vm1, %v12535_v15 }
0x43d1   : > { %17585 = vmatpush3.bf16.msra.mxu1 %v17582_v35  ;;  %16924 = vmatprep.mubr.msk.f32.mxu1 %vm1855_vm0, %v20892_v55 }
0x43d2   : > { %17587 = vmatprep.subr.bf16.mxu1 %v17586_v41 }
0x43d5   : > { %17589 = vmatpush3.bf16.msra.mxu1 %v17586_v41 }
0x43d6   : > { %17594 = vmatprep.subr.bf16.mxu1 %v19462_v61 }
0x43d8   : > { %16925 = vmatmul.mubr.msk.f32.vlgmr.msra.gmra.mrb[148].mxu1 %vm1855_vm0, %v20896_v32 }
0x43d9   : > { %16938 = vmatprep.mubr.msk.f32.mxu1 %vm19463_vm4, %v19461_v25 }
0x44a3   : > { %v12610_v19 = vpop.f32.mrb[146].mxu1 }
0x44a4   : > { %v12614_v34 = vadd.f32 %v12610_v19, %v12372_v3  ;;  %v16904_v27 = vpop.f32.mrb[147].mxu1 }
0x44a6   : > { %v12623_v28 = vadd.f32 %v16127_v22, %v12614_v34  ;;  %v13001_v34 = vld [vmem:[#allocation37 + $0x20] sm:$0xff] }
0x44a8   : > { %v12624_v57 = vadd.f32 %v12623_v28, %v21060_v23 }
0x44aa   : > { %v12629_v55 = vsel %vm1855_vm0, %v12624_v57, 0.0 }
0x44ab   : > { %v16926_v58 = vpop.f32.mrb[148].mxu1  ;;  %12630 = vadd.xlane.f32.xlu1 %v12629_v55 }
0x44ac   : > { %v12827_v26 = vadd.f32 %v16926_v58, %v16132_v29  ;;  %v12821_v33 = vpop.f32.mrb[149].mxu1 }
0x44ad   : > { %v12822_v45 = vadd.f32 %v16132_v29, %v12821_v33 }
0x44af   : > { %v21162_v47 = vpack.i.bf16 %v12827_v26, %v12822_v45  ;;  %v17591_v32 = vpack.c.bf16 %v12827_v26, %v12822_v45 }
0x44b1   : > { %18183 = vrot.lane.b32.xlu0 %v21162_v47, %s19455_s7 }
0x4523   : > { %v18184_v10 = vpop.permute.xlu0 %18183 }
0x4524   : > { %v18186_v44 = vunpack.i.h.bf16 %v18184_v10  ;;  %v18185_v0 = vunpack.i.l.bf16 %v18184_v10 }
0x4526   : > { %v17595_v46 = vpack.c.bf16 %v18186_v44, %v18185_v0 }
0x4528   : > { %17596 = vmatpush3.bf16.msra.mxu1 %v17595_v46 }
0x4529   : > { %17597 = vmatprep.subr.bf16.mxu1 %v19462_v61 }
0x4538   : > { %v12631_v23 = vpop.xlane.xlu1 %12630 }
0x4539   : > { %v12632_v42 = vmul.f32 0.03125, %v12631_v23 }
0x453b   : > { %v12633_v31 = vsub.f32 %v12624_v57, %v12632_v42 }
0x453d   : > { %v12634_v53 = vmul.f32 %v12633_v31, %v12633_v31 }
0x453f   : > { %v12635_v63 = vsel %vm1855_vm0, %v12634_v53, 0.0 }
0x4540   : > { %12636 = vadd.xlane.f32.xlu1 %v12635_v63 }
0x45cd   : > { %v12637_v50 = vpop.xlane.xlu1 %12636 }
0x45ce   : > { %v12638_v20 = vmul.f32 0.03125, %v12637_v50 }
0x45d0   : > { %v12639_v24 = vadd.f32 1e-05, %v12638_v20 }
0x45d2   : > { %18355 = vrsqrt.f32 %v12639_v24 }
0x45dc   : > { %v18356_v52 = vpop.eup %18355 }
0x45dd   : > { %v12641_v54 = vmul.f32 %v18356_v52, %v12633_v31 }
0x45df   : > { %v12648_v30 = vmul.f32 %v16128_v9, %v12641_v54 }
0x45e1   : > { %v21170_v13 = vadd.f32 %v16129_v56, %v12648_v30 }
0x45e3   : > { %16914 = vmatmul.mubr.msk.f32.vlgmr.msra.gmra.mrb[140].mxu0 %vm1855_vm0, %v21170_v13 }
0x45e4   : > { %17593 = vmatpush3.bf16.xpose.msk.msra.mxu0 %vm20284_vm2, %v17591_v32  ;;  %16931 = vmatprep.mubr.msk.f32.mxu0 %vm19463_vm4, %v19461_v25 }
0x45e5   : > { %17601 = vmatprep.subr.bf16.mxu0 %v19462_v61 }
0x46b6   : > { %v12738_v62 = vpop.f32.mrb[140].mxu0 }
0x46b7   : > { %v12739_v59 = vadd.f32 %v16130_v17, %v12738_v62  ;;  %v16915_v1 = vpop.f32.mrb[141].mxu0 }
0x46b9   : > { %13002 = vrot.lane.b32.xlu0 %v12739_v59, %s19454_s26  ;;  %16932 = vmatmul.mubr.msk.f32.vlgmr.msra.gmra.mrb[142].mxu0 %vm2023_vm1, %v12739_v59 }
0x46ba   : > { %16952 = vmatprep.mubr.msk.f32.mxu0 %vm19463_vm4, %v19461_v25 }
0x472b   : > { %v13003_v22 = vpop.permute.xlu0 %13002 }
0x478c   : > { %v12905_v60 = vpop.f32.mrb[142].mxu0 }
0x478d   : > { %v12909_v2 = vmul.f32 0.35355338, %v12905_v60  ;;  %v16933_v3 = vpop.f32.mrb[143].mxu0 }
0x478f   : > { %v12910_v6 = vsel %vm2113_vm3, %v12909_v2, -inf }
0x4790   : > { %12911 = vmax.xlane.f32.xlu1 %v12910_v6 }
0x481d   : > { %v12912_v8 = vpop.xlane.xlu1 %12911 }
0x481e   : > { %v12913_v7 = vsub.f32 %v12909_v2, %v12912_v8 }
0x4820   : > { %v12914_v11 = vmul.f32 1.442695, %v12913_v7 }
0x4822   : > { %18357 = vpow2.f32 %v12914_v11 }
0x482c   : > { %v18358_v12 = vpop.eup %18357 }
0x482d   : > { %v12916_v16 = vsel %vm2113_vm3, %v18358_v12, 0.0 }
0x482e   : > { %12917 = vadd.xlane.f32.xlu1 %v12916_v16 }
0x483f   : > { %18188 = vrot.lane.b32.xlu1 %v21162_v47, %s19454_s26  ;;  %s21474_s26 = sshll.u32 %s21476_s28, 3 }
0x4840   : > { %s1841_s7 = scalar_lea.vmem %s19692_s21, %s21474_s26 }
0x48bb   : > { %v12918_v35 = vpop.xlane.xlu1 %12917 }
0x48bc   : > { %18359 = vrcp.f32 %v12918_v35 }
0x48bf   : > { %v18189_v14 = vpop.permute.xlu1 %18188 }
0x48c0   : > { %v18191_v40 = vunpack.i.h.bf16 %v18189_v14  ;;  %v18190_v41 = vunpack.i.l.bf16 %v18189_v14 }
0x48c2   : > { %v17598_v19 = vpack.c.bf16 %v18191_v40, %v18190_v41 }
0x48c6   : > { %v18360_v15 = vpop.eup %18359 }
0x48c7   : > { %v12920_v18 = vmul.f32 %v18360_v15, %v18358_v12 }
0x48c9   : > { %16939 = vmatmul.mubr.msk.f32.vlgmr.msra.gmra.mrb[150].mxu1 %vm2113_vm3, %v12920_v18 }
0x48ca   : > { %17600 = vmatpush3.bf16.xpose.msk.msra.mxu1 %vm20284_vm2, %v17598_v19  ;;  %16945 = vmatprep.mubr.msk.f32.mxu1 %vm19463_vm4, %v19461_v25 }
0x48cb   : > { %16960 = vmatprep.subr.mxu1 %v19461_v25 }
0x48d1   : > { %16946 = vmatmul.mubr.msk.f32.vlgmr.msra.gmra.mrb[152].mxu1 %vm2023_vm1, %v13003_v22 }
0x48d2   : > { %16962 = vmatprep.mubr.msk.f32.mxu1 %vm19463_vm4, %v19461_v25  ;;  %16961 = vmatpush3.msra.mxu1 %v13001_v34 }
0x48d3   : > { %17608 = vmatprep.subr.bf16.mxu1 %v19462_v61 }
0x499c   : > { %v12996_v27 = vpop.f32.mrb[150].mxu1 }
0x499d   : > { %v16940_v28 = vpop.f32.mrb[151].mxu1  ;;  %16963 = vmatmul.mubr.msk.f32.vlgmr.msra.gmra.mrb[154].mxu1 %vm2023_vm1, %v12996_v27 }
0x499e   : > { %16976 = vmatprep.mubr.msk.f32.mxu1 %vm19463_vm4, %v19461_v25 }
0x49a4   : > { %v13080_v57 = vpop.f32.mrb[152].mxu1 }
0x49a5   : > { %v13084_v29 = vmul.f32 0.35355338, %v13080_v57  ;;  %v16947_v55 = vpop.f32.mrb[153].mxu1 }
0x49a7   : > { %v13085_v58 = vsel %vm2113_vm3, %v13084_v29, -inf }
0x49a8   : > { %13086 = vmax.xlane.f32.xlu0 %v13085_v58  ;;  %v13497_v58 = vld [vmem:[#allocation37 + $0x30] sm:$0xff] }
0x49be   : > { %18193 = vrot.lane.b32.xlu0 %v21162_v47, %s21472_s5 }
0x49c2   : > { %13323 = vrot.lane.b32.xlu0 %v12739_v59, %s21473_s8 }
0x49c6   : > { %18203 = vrot.lane.b32.xlu0 %v21162_v47, %s21468_s9 }
0x49ca   : > { %13572 = vrot.lane.b32.xlu0 %v12739_v59, %s21468_s9 }
0x4a35   : > { %v13087_v26 = vpop.xlane.xlu0 %13086 }
0x4a36   : > { %v13088_v33 = vsub.f32 %v13084_v29, %v13087_v26 }
0x4a38   : > { %v13089_v45 = vmul.f32 1.442695, %v13088_v33 }
0x4a39   : > { %v18194_v32 = vpop.permute.xlu0 %18193 }
0x4a3a   : > { %18361 = vpow2.f32 %v13089_v45  ;;  %v18196_v10 = vunpack.i.h.bf16 %v18194_v32  ;;  %v18195_v44 = vunpack.i.l.bf16 %v18194_v32 }
0x4a3c   : > { %v17602_v0 = vpack.c.bf16 %v18196_v10, %v18195_v44 }
0x4a3d   : > { %v13324_v51 = vpop.permute.xlu0 %13323 }
0x4a3e   : > { %17603 = vmatpush3.bf16.msra.mxu0 %v17602_v0 }
0x4a3f   : > { %16955 = vmatprep.subr.mxu0 %v19461_v25 }
0x4a41   : > { %v18204_v24 = vpop.permute.xlu0 %18203 }
0x4a42   : > { %v18206_v9 = vunpack.i.h.bf16 %v18204_v24  ;;  %v18205_v54 = vunpack.i.l.bf16 %v18204_v24 }
0x4a44   : > { %v18362_v46 = vpop.eup %18361  ;;  %v17612_v56 = vpack.c.bf16 %v18206_v9, %v18205_v54 }
0x4a45   : > { %v13091_v23 = vsel %vm2113_vm3, %v18362_v46, 0.0  ;;  %v13573_v30 = vpop.permute.xlu0 %13572 }
0x4a46   : > { %13092 = vadd.xlane.f32.xlu1 %v13091_v23  ;;  %v13746_v23 = vld [vmem:[#allocation37 + $0x38] sm:$0xff] }
0x4a57   : > { %18198 = vrot.lane.b32.xlu1 %v21162_v47, %s21473_s8 }
0x4a70   : > { %v13319_v42 = vpop.f32.mrb[154].mxu1 }
0x4a71   : > { %v16964_v31 = vpop.f32.mrb[155].mxu1 }
0x4ad3   : > { %v13093_v53 = vpop.xlane.xlu1 %13092 }
0x4ad4   : > { %18363 = vrcp.f32 %v13093_v53 }
0x4ad7   : > { %v18199_v5 = vpop.permute.xlu1 %18198 }
0x4ad8   : > { %v18201_v48 = vunpack.i.h.bf16 %v18199_v5  ;;  %v18200_v43 = vunpack.i.l.bf16 %v18199_v5  ;;  %v16155_v5 = vld [vmem:[#allocation39 + $0x1] ss:$0 sm:$0xff] }
0x4ada   : > { %v17605_v50 = vpack.c.bf16 %v18201_v48, %v18200_v43 }
0x4ade   : > { %v18364_v63 = vpop.eup %18363 }
0x4adf   : > { %v13095_v49 = vmul.f32 %v18364_v63, %v18362_v46 }
0x4ae1   : > { %16953 = vmatmul.mubr.msk.f32.vlgmr.msra.gmra.mrb[144].mxu0 %vm2113_vm3, %v13095_v49 }
0x4ae2   : > { %16956 = vmatpush3.msra.mxu0 %v13176_v4  ;;  %16957 = vmatprep.mubr.msk.f32.mxu0 %vm19463_vm4, %v19461_v25 }
0x4ae3   : > { %17604 = vmatprep.subr.bf16.mxu0 %v19462_v61 }
0x4bb4   : > { %v13171_v20 = vpop.f32.mrb[144].mxu0 }
0x4bb5   : > { %v16954_v52 = vpop.f32.mrb[145].mxu0  ;;  %16958 = vmatmul.mubr.msk.f32.vlgmr.msra.gmra.mrb[146].mxu0 %vm2023_vm1, %v13171_v20 }
0x4bb6   : > { %17607 = vmatpush3.bf16.xpose.msk.msra.mxu0 %vm20284_vm2, %v17605_v50  ;;  %16969 = vmatprep.mubr.msk.f32.mxu0 %vm19463_vm4, %v19461_v25 }
0x4bb7   : > { %17611 = vmatprep.subr.bf16.mxu0 %v19462_v61 }
0x4bbd   : > { %16970 = vmatmul.mubr.msk.f32.vlgmr.msra.gmra.mrb[148].mxu0 %vm2023_vm1, %v13324_v51 }
0x4bbe   : > { %17614 = vmatpush3.bf16.xpose.msk.msra.mxu0 %vm20284_vm2, %v17612_v56  ;;  %16988 = vmatprep.mubr.msk.f32.mxu0 %vm19463_vm4, %v19461_v25 }
0x4bc5   : > { %16989 = vmatmul.mubr.msk.f32.vlgmr.msra.gmra.mrb[150].mxu0 %vm2023_vm1, %v13573_v30  ;;  %v13864_v30 = vld [vmem:[#allocation43 + $0x208] sm:$0xff] }
0x4bc6   : > { %13969 = vmatprep.mubr.f32.mxu0 %v19461_v25 }
0x4c88   : > { %v13246_v17 = vpop.f32.mrb[146].mxu0 }
0x4c89   : > { %v13320_v62 = vadd.f32 %v13319_v42, %v13246_v17  ;;  %v16959_v59 = vpop.f32.mrb[147].mxu0  ;;  %v13868_v17 = vld [vmem:[#allocation43 + $0x288] sm:$0xff] }
0x4c8a   : > { %v17618_v59 = vpack.c.bf16 %v13868_v17, %v13864_v30  ;;  %v14259_v30 = vld [vmem:[#allocation46 + $0x2b8] sm:$0xff] }
0x4c8c   : > { %17619 = vmatprep.subr.bf16.mxu0 %v17618_v59 }
0x4c90   : > { %v13401_v1 = vpop.f32.mrb[148].mxu0 }
0x4c91   : > { %v13405_v60 = vmul.f32 0.35355338, %v13401_v1  ;;  %v16971_v2 = vpop.f32.mrb[149].mxu0  ;;  %v13870_v1 = vld [vmem:[#allocation43 + $0x298] sm:$0xff] }
0x4c92   : > { %v13867_v2 = vld [vmem:[#allocation43 + $0x280] sm:$0xff] }
0x4c93   : > { %v13406_v3 = vsel %vm2113_vm3, %v13405_v60, -inf }
0x4c94   : > { %13407 = vmax.xlane.f32.xlu1 %v13406_v3 }
0x4c98   : > { %v13650_v6 = vpop.f32.mrb[150].mxu0 }
0x4c99   : > { %v13654_v21 = vmul.f32 0.35355338, %v13650_v6  ;;  %v16990_v8 = vpop.f32.mrb[151].mxu0 }
0x4c9b   : > { %v13655_v7 = vsel %vm2113_vm3, %v13654_v21, -inf }
0x4c9c   : > { %13656 = vmax.xlane.f32.xlu1 %v13655_v7  ;;  %v13872_v7 = vld [vmem:[#allocation43 + $0x308] sm:$0xff] }
0x4d21   : > { %v13408_v11 = vpop.xlane.xlu1 %13407 }
0x4d22   : > { %v13409_v12 = vsub.f32 %v13405_v60, %v13408_v11  ;;  %v13863_v60 = vld [vmem:[#allocation43 + $0x200] sm:$0xff]  ;;  %v13876_v11 = vld [vmem:[#allocation43 + $0x388] sm:$0xff] }
0x4d23   : > { %v17620_v6 = vpack.c.bf16 %v13867_v2, %v13863_v60  ;;  %v14252_v60 = vld [vmem:[#allocation46 + $0x220] sm:$0xff] }
0x4d24   : > { %v13410_v16 = vmul.f32 1.442695, %v13409_v12  ;;  %v13874_v12 = vld [vmem:[#allocation43 + $0x318] sm:$0xff]  ;;  %v14256_v2 = vld [vmem:[#allocation46 + $0x2a0] sm:$0xff] }
0x4d25   : > { %17621 = vmatpush1.bf16.msra.mxu0 %v17620_v6  ;;  %v14258_v6 = vld [vmem:[#allocation46 + $0x2b0] sm:$0xff] }
0x4d26   : > { %18365 = vpow2.f32 %v13410_v16  ;;  %v17622_v16 = vpack.c.bf16 %v13876_v11, %v13872_v7  ;;  %v14265_v7 = vld [vmem:[#allocation46 + $0x3a8] sm:$0xff]  ;;  %v14263_v11 = vld [vmem:[#allocation46 + $0x338] sm:$0xff] }
0x4d28   : > { %17623 = vmatprep.subr.bf16.mxu0 %v17622_v16  ;;  %v14267_v16 = vld [vmem:[#allocation46 + $0x3b8] sm:$0xff] }
0x4d29   : > { %v13657_v35 = vpop.xlane.xlu1 %13656 }
0x4d2a   : > { %v13658_v14 = vsub.f32 %v13654_v21, %v13657_v35  ;;  %v13869_v21 = vld [vmem:[#allocation43 + $0x290] sm:$0xff]  ;;  %v13878_v35 = vld [vmem:[#allocation43 + $0x398] sm:$0xff] }
0x4d2c   : > { %v13659_v40 = vmul.f32 1.442695, %v13658_v14  ;;  %v13871_v14 = vld [vmem:[#allocation43 + $0x300] sm:$0xff] }
0x4d2e   : > { %18367 = vpow2.f32 %v13659_v40  ;;  %v13875_v40 = vld [vmem:[#allocation43 + $0x380] sm:$0xff] }
0x4d30   : > { %v18366_v41 = vpop.eup %18365 }
0x4d31   : > { %v13412_v15 = vsel %vm2113_vm3, %v18366_v41, 0.0 }
0x4d32   : > { %13413 = vadd.xlane.f32.xlu0 %v13412_v15  ;;  %v17624_v15 = vpack.c.bf16 %v13875_v40, %v13871_v14  ;;  %v14264_v14 = vld [vmem:[#allocation46 + $0x3a0] sm:$0xff]  ;;  %v17662_v40 = vpack.c.bf16 %v14267_v16, %v14263_v11  ;;  %v14066_v16 = vld [vmem:[#allocation46 + $0x390] sm:$0xff] }
0x4d33   : > { %v14064_v11 = vld [vmem:[#allocation46 + $0x380] sm:$0xff] }
0x4d34   : > { %17625 = vmatpush1.bf16.msra.mxu0 %v17624_v15  ;;  %v14262_v15 = vld [vmem:[#allocation46 + $0x330] sm:$0xff] }
0x4d38   : > { %v18368_v18 = vpop.eup %18367 }
0x4d39   : > { %v13661_v19 = vsel %vm2113_vm3, %v18368_v18, 0.0 }
0x4d3a   : > { %13662 = vadd.xlane.f32.xlu1 %v13661_v19  ;;  %v13877_v19 = vld [vmem:[#allocation43 + $0x390] sm:$0xff] }
0x4d48   : > { %18208 = vrot.lane.b32.xlu0 %v21162_v47, %s21467_s4 }
0x4d4b   : > { %18213 = vrot.lane.b32.xlu1 %v21162_v47, %s21469_s6 }
0x4dbf   : > { %v13414_v22 = vpop.xlane.xlu0 %13413 }
0x4dc0   : > { %18369 = vrcp.f32 %v13414_v22 }
0x4dc3   : > { %v18209_v34 = vpop.permute.xlu0 %18208 }
0x4dc4   : > { %v18211_v27 = vunpack.i.h.bf16 %v18209_v34  ;;  %v18210_v28 = vunpack.i.l.bf16 %v18209_v34  ;;  %v14069_v34 = vld [vmem:[#allocation43 + $0x228] sm:$0xff] }
0x4dc6   : > { %v17609_v57 = vpack.c.bf16 %v18211_v27, %v18210_v28  ;;  %v14073_v27 = vld [vmem:[#allocation43 + $0x2a8] sm:$0xff]  ;;  %v14071_v28 = vld [vmem:[#allocation43 + $0x238] sm:$0xff] }
0x4dc7   : > { %v13663_v47 = vpop.xlane.xlu1 %13662 }
0x4dc8   : > { %17610 = vmatpush3.bf16.msra.mxu1 %v17609_v57  ;;  %18371 = vrcp.f32 %v13663_v47  ;;  %v17634_v57 = vpack.c.bf16 %v14073_v27, %v14069_v34  ;;  %v14057_v34 = vld [vmem:[#allocation46 + $0x288] sm:$0xff]  ;;  %v14055_v27 = vld [vmem:[#allocation46 + $0x218] sm:$0xff] }
0x4dc9   : > { %16979 = vmatprep.subr.mxu1 %v19461_v25 }
0x4dca   : > { %v18370_v29 = vpop.eup %18369  ;;  %17635 = vmatprep.subr.bf16.mxu0 %v17634_v57  ;;  %v14059_v57 = vld [vmem:[#allocation46 + $0x298] sm:$0xff] }
0x4dcb   : > { %v13416_v55 = vmul.f32 %v18370_v29, %v18366_v41  ;;  %v18214_v26 = vpop.permute.xlu1 %18213  ;;  %v17630_v41 = vpack.c.bf16 %v13878_v35, %v13874_v12  ;;  %v14075_v29 = vld [vmem:[#allocation43 + $0x2b8] sm:$0xff]  ;;  %v14260_v35 = vld [vmem:[#allocation46 + $0x320] sm:$0xff] }
0x4dcc   : > { %v18216_v33 = vunpack.i.h.bf16 %v18214_v26  ;;  %v18215_v45 = vunpack.i.l.bf16 %v18214_v26 }
0x4dcd   : > { %16977 = vmatmul.mubr.msk.f32.vlgmr.msra.gmra.mrb[156].mxu1 %vm2113_vm3, %v13416_v55  ;;  %v17642_v55 = vpack.c.bf16 %v14075_v29, %v14071_v28  ;;  %v17674_v29 = vpack.c.bf16 %v14059_v57, %v14055_v27  ;;  %v14552_v57 = vld [vmem:[#allocation43 + $0x2c0] sm:$0xff] }
0x4dce   : > { %16980 = vmatpush3.msra.mxu1 %v13497_v58  ;;  %16981 = vmatprep.mubr.msk.f32.mxu1 %vm19463_vm4, %v19461_v25  ;;  %v17616_v10 = vpack.c.bf16 %v18216_v33, %v18215_v45  ;;  %v16156_v33 = vld [vmem:[#allocation40 + $0x1] ss:$0 sm:$0xff] }
0x4dcf   : > { %17615 = vmatprep.subr.bf16.mxu1 %v19462_v61 }
0x4dd2   : > { %v18372_v32 = vpop.eup %18371 }
0x4dd3   : > { %v13665_v46 = vmul.f32 %v18372_v32, %v18368_v18  ;;  %v13873_v18 = vld [vmem:[#allocation43 + $0x310] sm:$0xff]  ;;  %v16157_v32 = vld [vmem:[#allocation42 + $0x1] ss:$0 sm:$0xff] }
0x4dd4   : > { %v17632_v22 = vpack.c.bf16 %v13877_v19, %v13873_v18  ;;  %v14266_v18 = vld [vmem:[#allocation46 + $0x3b0] sm:$0xff] }
0x4dd5   : > { %v17664_v19 = vpack.c.bf16 %v14266_v18, %v14262_v15 }
0x4ea0   : > { %v13492_v44 = vpop.f32.mrb[156].mxu1 }
0x4ea1   : > { %v16978_v0 = vpop.f32.mrb[157].mxu1  ;;  %16982 = vmatmul.mubr.msk.f32.vlgmr.msra.gmra.mrb[158].mxu1 %vm2023_vm1, %v13492_v44  ;;  %v14072_v44 = vld [vmem:[#allocation43 + $0x2a0] sm:$0xff] }
0x4ea2   : > { %17617 = vmatpush3.bf16.msra.mxu1 %v17616_v10  ;;  %16995 = vmatprep.mubr.msk.f32.mxu1 %vm19463_vm4, %v19461_v25  ;;  %v14068_v10 = vld [vmem:[#allocation43 + $0x220] sm:$0xff] }
0x4ea3   : > { %16998 = vmatprep.subr.mxu1 %v19461_v25 }
0x4ea5   : > { %16996 = vmatmul.mubr.msk.f32.vlgmr.msra.gmra.mrb[160].mxu1 %vm2113_vm3, %v13665_v46  ;;  %v14070_v46 = vld [vmem:[#allocation43 + $0x230] sm:$0xff] }
0x4ea6   : > { %17000 = vmatprep.mubr.msk.f32.mxu1 %vm19463_vm4, %v19461_v25  ;;  %16999 = vmatpush3.msra.mxu1 %v13746_v23  ;;  %v14074_v23 = vld [vmem:[#allocation43 + $0x2b0] sm:$0xff] }
0x4f74   : > { %v13567_v42 = vpop.f32.mrb[158].mxu1 }
0x4f75   : > { %v13571_v31 = vadd.f32 %v13567_v42, %v13320_v62  ;;  %v16983_v53 = vpop.f32.mrb[159].mxu1  ;;  %v13866_v62 = vld [vmem:[#allocation43 + $0x218] sm:$0xff]  ;;  %v14077_v42 = vld [vmem:[#allocation43 + $0x328] sm:$0xff] }
0x4f76   : > { %v17626_v3 = vpack.c.bf16 %v13870_v1, %v13866_v62  ;;  %v14079_v53 = vld [vmem:[#allocation43 + $0x338] sm:$0xff] }
0x4f78   : > { %v13741_v63 = vpop.f32.mrb[160].mxu1  ;;  %17627 = vmatprep.subr.bf16.mxu1 %v17626_v3  ;;  %v14254_v3 = vld [vmem:[#allocation46 + $0x230] sm:$0xff] }
0x4f79   : > { %v16997_v49 = vpop.f32.mrb[161].mxu1  ;;  %17001 = vmatmul.mubr.msk.f32.vlgmr.msra.gmra.mrb[162].mxu1 %vm2023_vm1, %v13741_v63  ;;  %v14083_v63 = vld [vmem:[#allocation43 + $0x3b8] sm:$0xff] }
0x4f7a   : > { %14040 = vmatprep.mubr.f32.mxu1 %v19461_v25 }
0x504c   : > { %v13816_v4 = vpop.f32.mrb[162].mxu1 }
0x504d   : > { %v13820_v51 = vadd.f32 %v13816_v4, %v13571_v31  ;;  %v17002_v48 = vpop.f32.mrb[163].mxu1  ;;  %v14081_v31 = vld [vmem:[#allocation43 + $0x3a8] sm:$0xff]  ;;  %v17636_v4 = vpack.c.bf16 %v14072_v44, %v14068_v10 }
0x504e   : > { %v14080_v48 = vld [vmem:[#allocation43 + $0x3a0] sm:$0xff] }
0x504f   : > { %v13829_v43 = vadd.f32 %v16155_v5, %v13820_v51  ;;  %v17644_v5 = vpack.c.bf16 %v14074_v23, %v14070_v46  ;;  %v14076_v51 = vld [vmem:[#allocation43 + $0x320] sm:$0xff] }
0x5050   : > { %v17640_v17 = vpack.c.bf16 %v14080_v48, %v14076_v51  ;;  %v14056_v51 = vld [vmem:[#allocation46 + $0x280] sm:$0xff]  ;;  %v14054_v48 = vld [vmem:[#allocation46 + $0x210] sm:$0xff] }
0x5051   : > { %v13830_v50 = vadd.f32 %v13829_v43, %v21170_v13  ;;  %v13865_v13 = vld [vmem:[#allocation43 + $0x210] sm:$0xff] }
0x5052   : > { %v17628_v8 = vpack.c.bf16 %v13869_v21, %v13865_v13  ;;  %v17652_v13 = vpack.c.bf16 %v14256_v2, %v14252_v60  ;;  %v17660_v21 = vpack.c.bf16 %v14258_v6, %v14254_v3 }
0x5053   : > { %v13835_v20 = vsel %vm1855_vm0, %v13830_v50, 0.0 }
0x5054   : > { %13836 = vadd.xlane.f32.xlu0 %v13835_v20  ;;  %17629 = vmatpush1.bf16.msra.mxu1 %v17628_v8  ;;  %v17646_v20 = vpack.c.bf16 %v14083_v63, %v14079_v53  ;;  %v14261_v8 = vld [vmem:[#allocation46 + $0x328] sm:$0xff]  ;;  %v14052_v53 = vld [vmem:[#allocation46 + $0x200] sm:$0xff] }
0x5055   : > { %17631 = vmatprep.subr.bf16.mxu1 %v17630_v41  ;;  %v17654_v12 = vpack.c.bf16 %v14265_v7, %v14261_v8  ;;  %v17656_v41 = vpack.c.bf16 %v14264_v14, %v14260_v35  ;;  %v14060_v7 = vld [vmem:[#allocation46 + $0x300] sm:$0xff]  ;;  %v14549_v35 = vld [vmem:[#allocation43 + $0x248] sm:$0xff] }
0x5056   : > { %v14553_v14 = vld [vmem:[#allocation43 + $0x2c8] sm:$0xff]  ;;  %v17672_v15 = vpack.c.bf16 %v14064_v11, %v14060_v7  ;;  %v14742_v7 = vld [vmem:[#allocation46 + $0x350] sm:$0xff] }
0x5057   : > { %v14746_v11 = vld [vmem:[#allocation46 + $0x3d0] sm:$0xff] }
0x5058   : > { %17633 = vmatpush1.bf16.msra.mxu1 %v17632_v22  ;;  %v14053_v22 = vld [vmem:[#allocation46 + $0x208] sm:$0xff] }
0x5059   : > { %17643 = vmatprep.subr.bf16.mxu1 %v17642_v55  ;;  %v17666_v28 = vpack.c.bf16 %v14057_v34, %v14053_v22  ;;  %v17682_v34 = vpack.c.bf16 %v14553_v14, %v14549_v35  ;;  %v14894_v35 = vld [vmem:[#allocation43 + $0x2e8] sm:$0xff]  ;;  %v14892_v14 = vld [vmem:[#allocation43 + $0x278] sm:$0xff] }
0x50e1   : > { %v13837_v24 = vpop.xlane.xlu0 %13836 }
0x50e2   : > { %v13838_v52 = vmul.f32 0.03125, %v13837_v24  ;;  %v14078_v24 = vld [vmem:[#allocation43 + $0x330] sm:$0xff] }
0x50e4   : > { %v13839_v9 = vsub.f32 %v13830_v50, %v13838_v52  ;;  %v17638_v50 = vpack.c.bf16 %v14081_v31, %v14077_v42  ;;  %v14082_v52 = vld [vmem:[#allocation43 + $0x3b0] sm:$0xff] }
0x50e5   : > { %v17648_v62 = vpack.c.bf16 %v14082_v52, %v14078_v24  ;;  %v14061_v52 = vld [vmem:[#allocation46 + $0x308] sm:$0xff] }
0x50e6   : > { %v13840_v54 = vmul.f32 %v13839_v9, %v13839_v9 }
0x50e8   : > { %v13841_v56 = vsel %vm1855_vm0, %v13840_v54, 0.0  ;;  %v14253_v54 = vld [vmem:[#allocation46 + $0x228] sm:$0xff] }
0x50e9   : > { %13842 = vadd.xlane.f32.xlu1 %v13841_v56  ;;  %v14257_v56 = vld [vmem:[#allocation46 + $0x2a8] sm:$0xff] }
0x50ea   : > { %v17650_v59 = vpack.c.bf16 %v14257_v56, %v14253_v54 }
0x5176   : > { %v13843_v58 = vpop.xlane.xlu1 %13842 }
0x5177   : > { %v13844_v47 = vmul.f32 0.03125, %v13843_v58 }
0x5179   : > { %v13845_v26 = vadd.f32 1e-05, %v13844_v47 }
0x517b   : > { %18373 = vrsqrt.f32 %v13845_v26 }
0x5185   : > { %v18374_v45 = vpop.eup %18373 }
0x5186   : > { %v13847_v0 = vmul.f32 %v18374_v45, %v13839_v9  ;;  %v14255_v9 = vld [vmem:[#allocation46 + $0x238] sm:$0xff]  ;;  %v21269_v45 = vld [vmem:[#allocation45 + $0x10] sm:$0xf] }
0x5187   : > { %v17658_v1 = vpack.c.bf16 %v14259_v30, %v14255_v9  ;;  %v13889_v46 = vrot.slane %v21269_v45, %v20435_v38  ;;  %v13897_v23 = vrot.slane %v21269_v45, %v20437_v39  ;;  %v14065_v9 = vld [vmem:[#allocation46 + $0x388] sm:$0xff]  ;;  %v14063_v30 = vld [vmem:[#allocation46 + $0x318] sm:$0xff]  ;;  %v13893_v22 = vrot.slane %v21269_v45, %v20433_v37 }
0x5188   : > { %v13854_v49 = vmul.f32 %v16156_v33, %v13847_v0  ;;  %v14084_v33 = vld [vmem:[#allocation45 + $0x14] sm:$0xf]  ;;  %v17670_v6 = vpack.c.bf16 %v14065_v9, %v14061_v52  ;;  %v14732_v52 = vld [vmem:[#allocation46 + $0x240] sm:$0xff] }
0x5189   : > { %v14097_v10 = vrot.slane %v14084_v33, %v20433_v37  ;;  %v14093_v44 = vrot.slane %v14084_v33, %v20435_v38  ;;  %v14101_v0 = vrot.slane %v14084_v33, %v20437_v39 }
0x518a   : > { %v21253_v43 = vadd.f32 %v16157_v32, %v13854_v49  ;;  %v14089_v32 = vrot.slane %v14084_v33, %v20431_v36  ;;  %v14554_v33 = vld [vmem:[#allocation43 + $0x2d0] sm:$0xff] }
0x518c   : > { %16158 = vmatmul.mubr.msk.f32.vlgmr.msra.gmra.mrb[152].mxu0 %vm1855_vm0, %v21253_v43  ;;  %16159 = vmatmul.mubr.msk.f32.vlgmr.msra.gmra.mrb[164].mxu1 %vm1855_vm0, %v21253_v43 }
0x518d   : > { %17637 = vmatpush1.bf16.msra.mxu0 %v17636_v4  ;;  %17645 = vmatpush1.bf16.msra.mxu1 %v17644_v5 }
0x518e   : > { %17639 = vmatprep.subr.bf16.mxu0 %v17638_v50  ;;  %17647 = vmatprep.subr.bf16.mxu1 %v17646_v20  ;;  %v14058_v50 = vld [vmem:[#allocation46 + $0x290] sm:$0xff] }
0x518f   : > { %14170 = vmatprep.mubr.f32.mxu0 %v19461_v25  ;;  %14241 = vmatprep.mubr.f32.mxu1 %v19461_v25  ;;  %v17676_v60 = vpack.c.bf16 %v14058_v50, %v14054_v48  ;;  %v14737_v48 = vld [vmem:[#allocation46 + $0x2c8] sm:$0xff]  ;;  %v14735_v50 = vld [vmem:[#allocation46 + $0x258] sm:$0xff] }
0x5191   : > { %17641 = vmatpush1.bf16.msra.mxu0 %v17640_v17  ;;  %17649 = vmatpush1.bf16.msra.mxu1 %v17648_v62  ;;  %v14067_v17 = vld [vmem:[#allocation46 + $0x398] sm:$0xff] }
0x5192   : > { %17651 = vmatprep.subr.bf16.mxu0 %v17650_v59  ;;  %17659 = vmatprep.subr.bf16.mxu1 %v17658_v1  ;;  %v17668_v1 = vpack.c.bf16 %v14056_v51, %v14052_v53  ;;  %v14733_v51 = vld [vmem:[#allocation46 + $0x248] sm:$0xff] }
0x5194   : > { %16160 = vmatmul.mubr.msk.f32.vlgmr.msra.gmra.mrb[154].mxu0 %vm1855_vm0, %v21253_v43  ;;  %16161 = vmatmul.mubr.msk.f32.vlgmr.msra.gmra.mrb[166].mxu1 %vm1855_vm0, %v21253_v43 }
0x519a   : > { %17653 = vmatpush1.bf16.xpose.msra.mxu0 %v17652_v13  ;;  %17661 = vmatpush1.bf16.xpose.msra.mxu1 %v17660_v21  ;;  %v17678_v13 = vpack.c.bf16 %v14067_v17, %v14063_v30  ;;  %v14734_v30 = vld [vmem:[#allocation46 + $0x250] sm:$0xff] }
0x519b   : > { %17655 = vmatprep.subr.bf16.mxu0 %v17654_v12  ;;  %17663 = vmatprep.subr.bf16.mxu1 %v17662_v40  ;;  %v14062_v12 = vld [vmem:[#allocation46 + $0x310] sm:$0xff]  ;;  %v14551_v40 = vld [vmem:[#allocation43 + $0x258] sm:$0xff] }
0x519c   : > { %v17680_v18 = vpack.c.bf16 %v14066_v16, %v14062_v12  ;;  %v14738_v17 = vld [vmem:[#allocation46 + $0x2d0] sm:$0xff]  ;;  %v17712_v12 = vpack.c.bf16 %v14746_v11, %v14742_v7  ;;  %v14890_v16 = vld [vmem:[#allocation43 + $0x268] sm:$0xff] }
0x51a2   : > { %17657 = vmatpush1.bf16.xpose.msra.mxu0 %v17656_v41  ;;  %17665 = vmatpush1.bf16.xpose.msra.mxu1 %v17664_v19  ;;  %v14555_v41 = vld [vmem:[#allocation43 + $0x2d8] sm:$0xff]  ;;  %v13885_v19 = vrot.slane %v21269_v45, %v20431_v36 }
0x51a3   : > { %17667 = vmatprep.subr.bf16.mxu0 %v17666_v28  ;;  %17675 = vmatprep.subr.bf16.mxu1 %v17674_v29  ;;  %v17690_v27 = vpack.c.bf16 %v14555_v41, %v14551_v40  ;;  %v14548_v28 = vld [vmem:[#allocation43 + $0x240] sm:$0xff]  ;;  %v17714_v40 = vpack.c.bf16 %v14894_v35, %v14890_v16  ;;  %v14896_v41 = vld [vmem:[#allocation43 + $0x2f8] sm:$0xff] }
0x51a4   : > { %v15073_v35 = vld [vmem:[#allocation46 + $0x260] sm:$0xff] }
0x525f   : > { %v21265_v55 = vpop.f32.mrb[152].mxu0  ;;  %v21267_v58 = vpop.f32.mrb[164].mxu1 }
0x5260   : > { %v13973_v47 = vpop.f32.mrb[153].mxu0  ;;  %v14044_v26 = vpop.f32.mrb[165].mxu1  ;;  %v13972_v29 = vadd.f32 %v21265_v55, %v13885_v19  ;;  %v14562_v55 = vld [vmem:[#allocation43 + $0x3d0] sm:$0xff] }
0x5261   : > { %v13974_v54 = vadd.f32 %v13973_v47, %v13889_v46  ;;  %v14045_v56 = vadd.f32 %v14044_v26, %v13897_v23  ;;  %v14043_v47 = vadd.f32 %v21267_v58, %v13893_v22  ;;  %v14550_v26 = vld [vmem:[#allocation43 + $0x250] sm:$0xff]  ;;  %v17684_v46 = vpack.c.bf16 %v14552_v57, %v14548_v28  ;;  %v14556_v23 = vld [vmem:[#allocation43 + $0x340] sm:$0xff] }
0x5262   : > { %v17692_v45 = vpack.c.bf16 %v14554_v33, %v14550_v26  ;;  %v14564_v33 = vld [vmem:[#allocation45 + $0x18] sm:$0xf] }
0x5263   : > { %v14048_v21 = vmax.f32 %v13974_v54, 0.0  ;;  %v14050_v8 = vmax.f32 %v14045_v56, 0.0  ;;  %v14736_v54 = vld [vmem:[#allocation46 + $0x2c0] sm:$0xff] }
0x5264   : > { %v17700_v9 = vpack.c.bf16 %v14736_v54, %v14732_v52 }
0x5267   : > { %v14172_v42 = vpop.f32.mrb[154].mxu0  ;;  %v14243_v31 = vpop.f32.mrb[166].mxu1 }
0x5268   : > { %v14173_v63 = vadd.f32 %v14172_v42, %v14089_v32  ;;  %v14244_v49 = vadd.f32 %v14243_v31, %v14097_v10  ;;  %v14174_v4 = vpop.f32.mrb[155].mxu0  ;;  %v14245_v5 = vpop.f32.mrb[167].mxu1  ;;  %v14557_v32 = vld [vmem:[#allocation43 + $0x348] sm:$0xff]  ;;  %v14047_v42 = vmax.f32 %v13972_v29, 0.0  ;;  %v14049_v31 = vmax.f32 %v14043_v47, 0.0 }
0x5269   : > { %v14175_v20 = vadd.f32 %v14174_v4, %v14093_v44  ;;  %v14246_v24 = vadd.f32 %v14245_v5, %v14101_v0  ;;  %v14561_v10 = vld [vmem:[#allocation43 + $0x3c8] sm:$0xff]  ;;  %v14559_v44 = vld [vmem:[#allocation43 + $0x358] sm:$0xff]  ;;  %v14558_v4 = vld [vmem:[#allocation43 + $0x350] sm:$0xff] }
0x526a   : > { %v14248_v2 = vmax.f32 %v14173_v63, 0.0  ;;  %v14250_v3 = vmax.f32 %v14244_v49, 0.0  ;;  %v14563_v0 = vld [vmem:[#allocation43 + $0x3d8] sm:$0xff]  ;;  %v17686_v53 = vpack.c.bf16 %v14561_v10, %v14557_v32  ;;  %v14560_v49 = vld [vmem:[#allocation43 + $0x3c0] sm:$0xff]  ;;  %v17696_v5 = vpack.c.bf16 %v14562_v55, %v14558_v4  ;;  %v14891_v55 = vld [vmem:[#allocation43 + $0x270] sm:$0xff] }
0x526b   : > { %v14249_v62 = vmax.f32 %v14175_v20, 0.0  ;;  %v14251_v59 = vmax.f32 %v14246_v24, 0.0  ;;  %v17694_v63 = vpack.c.bf16 %v14563_v0, %v14559_v44  ;;  %v17688_v58 = vpack.c.bf16 %v14560_v49, %v14556_v23  ;;  %v14739_v24 = vld [vmem:[#allocation46 + $0x2d8] sm:$0xff] }
0x526c   : > { %v17698_v20 = vpack.c.bf16 %v14737_v48, %v14733_v51  ;;  %v17706_v56 = vpack.c.bf16 %v14739_v24, %v14735_v50  ;;  %v14569_v10 = vrot.slane %v14564_v33, %v20431_v36  ;;  %v14577_v44 = vrot.slane %v14564_v33, %v20433_v37  ;;  %v14902_v50 = vld [vmem:[#allocation43 + $0x3e8] sm:$0xff]  ;;  %v14904_v24 = vld [vmem:[#allocation43 + $0x3f8] sm:$0xff] }
0x526d   : > { %14332 = vmatprep.mubr.f32.mxu0 %v14249_v62  ;;  %14402 = vmatprep.mubr.f32.mxu1 %v14251_v59  ;;  %v17708_v62 = vpack.c.bf16 %v14738_v17, %v14734_v30  ;;  %v14741_v59 = vld [vmem:[#allocation46 + $0x348] sm:$0xff]  ;;  %v14573_v0 = vrot.slane %v14564_v33, %v20435_v38  ;;  %v14897_v30 = vld [vmem:[#allocation43 + $0x360] sm:$0xff] }
0x526e   : > { %14333 = vmatmul.mubr.f32.vlgmr.msra.gmra.mrb[156].mxu0 %v14248_v2  ;;  %14403 = vmatmul.mubr.f32.vlgmr.msra.gmra.mrb[168].mxu1 %v14250_v3  ;;  %v14747_v3 = vld [vmem:[#allocation46 + $0x3d8] sm:$0xff]  ;;  %v14901_v17 = vld [vmem:[#allocation43 + $0x3e0] sm:$0xff] }
0x526f   : > { %17669 = vmatpush1.bf16.xpose.msra.mxu0 %v17668_v1  ;;  %17677 = vmatpush1.bf16.xpose.msra.mxu1 %v17676_v60  ;;  %v14745_v1 = vld [vmem:[#allocation46 + $0x3c8] sm:$0xff]  ;;  %v14743_v60 = vld [vmem:[#allocation46 + $0x358] sm:$0xff]  ;;  %v17720_v7 = vpack.c.bf16 %v14901_v17, %v14897_v30  ;;  %v16166_v17 = vld [vmem:[#allocation48 + $0x1] ss:$0 sm:$0xff] }
0x5270   : > { %14472 = vmatprep.mubr.f32.mxu0 %v14048_v21  ;;  %14542 = vmatprep.mubr.f32.mxu1 %v14050_v8  ;;  %v17702_v2 = vpack.c.bf16 %v14745_v1, %v14741_v59  ;;  %v17710_v21 = vpack.c.bf16 %v14747_v3, %v14743_v60  ;;  %v14903_v3 = vld [vmem:[#allocation43 + $0x3f0] sm:$0xff] }
0x5271   : > { %17671 = vmatprep.subr.bf16.mxu0 %v17670_v6  ;;  %17679 = vmatprep.subr.bf16.mxu1 %v17678_v13  ;;  %v14740_v6 = vld [vmem:[#allocation46 + $0x340] sm:$0xff] }
0x5272   : > { %v14744_v13 = vld [vmem:[#allocation46 + $0x3c0] sm:$0xff] }
0x5273   : > { %v17704_v8 = vpack.c.bf16 %v14744_v13, %v14740_v6  ;;  %v15074_v6 = vld [vmem:[#allocation46 + $0x268] sm:$0xff] }
0x5274   : > { %v15078_v13 = vld [vmem:[#allocation46 + $0x2e8] sm:$0xff] }
0x5277   : > { %17673 = vmatpush1.bf16.xpose.msra.mxu0 %v17672_v15  ;;  %17681 = vmatpush1.bf16.xpose.msra.mxu1 %v17680_v18  ;;  %v17722_v15 = vpack.c.bf16 %v14896_v41, %v14892_v14  ;;  %v15077_v14 = vld [vmem:[#allocation46 + $0x2e0] sm:$0xff]  ;;  %v15079_v41 = vld [vmem:[#allocation46 + $0x2f0] sm:$0xff] }
0x5278   : > { %17683 = vmatprep.subr.bf16.mxu0 %v17682_v34  ;;  %17691 = vmatprep.subr.bf16.mxu1 %v17690_v27 }
0x527e   : > { %14473 = vmatmul.mubr.f32.vlgmr.msra.gmra.mrb[158].mxu0 %v14047_v42  ;;  %14543 = vmatmul.mubr.f32.vlgmr.msra.gmra.mrb[170].mxu1 %v14049_v31  ;;  %v14889_v42 = vld [vmem:[#allocation43 + $0x260] sm:$0xff] }
0x527f   : > { %17685 = vmatpush1.bf16.msra.mxu0 %v17684_v46  ;;  %17693 = vmatpush1.bf16.msra.mxu1 %v17692_v45  ;;  %v14581_v46 = vrot.slane %v14564_v33, %v20437_v39  ;;  %v14893_v31 = vld [vmem:[#allocation43 + $0x2e0] sm:$0xff] }
0x5280   : > { %17687 = vmatprep.subr.bf16.mxu0 %v17686_v53  ;;  %17695 = vmatprep.subr.bf16.mxu1 %v17694_v63 }
0x5281   : > { %14650 = vmatprep.mubr.f32.mxu0 %v19461_v25  ;;  %14721 = vmatprep.mubr.f32.mxu1 %v19461_v25 }
0x5283   : > { %17689 = vmatpush1.bf16.msra.mxu0 %v17688_v58  ;;  %17697 = vmatpush1.bf16.msra.mxu1 %v17696_v5  ;;  %v14895_v58 = vld [vmem:[#allocation43 + $0x2f0] sm:$0xff]  ;;  %v14898_v5 = vld [vmem:[#allocation43 + $0x368] sm:$0xff] }
0x5284   : > { %17699 = vmatprep.subr.bf16.mxu0 %v17698_v20  ;;  %17707 = vmatprep.subr.bf16.mxu1 %v17706_v56  ;;  %v14900_v20 = vld [vmem:[#allocation43 + $0x378] sm:$0xff]  ;;  %v17716_v56 = vpack.c.bf16 %v14893_v31, %v14889_v42  ;;  %v17718_v1 = vpack.c.bf16 %v14902_v50, %v14898_v5 }
0x5285   : > { %v17726_v60 = vpack.c.bf16 %v14904_v24, %v14900_v20  ;;  %v14905_v31 = vld [vmem:[#allocation45 + $0x1c] sm:$0xf] }
0x5286   : > { %16162 = vmatmul.mubr.msk.f32.vlgmr.msra.gmra.mrb[160].mxu0 %vm1855_vm0, %v21253_v43  ;;  %16163 = vmatmul.mubr.msk.f32.vlgmr.msra.gmra.mrb[172].mxu1 %vm1855_vm0, %v21253_v43 }
0x528c   : > { %17701 = vmatpush1.bf16.xpose.msra.mxu0 %v17700_v9  ;;  %17709 = vmatpush1.bf16.xpose.msra.mxu1 %v17708_v62  ;;  %v17724_v9 = vpack.c.bf16 %v14895_v58, %v14891_v55  ;;  %v14922_v55 = vrot.slane %v14905_v31, %v20437_v39 }
0x528d   : > { %17703 = vmatprep.subr.bf16.mxu0 %v17702_v2  ;;  %17711 = vmatprep.subr.bf16.mxu1 %v17710_v21  ;;  %v14899_v2 = vld [vmem:[#allocation43 + $0x370] sm:$0xff]  ;;  %v15076_v21 = vld [vmem:[#allocation46 + $0x278] sm:$0xff] }
0x528e   : > { %v17728_v11 = vpack.c.bf16 %v14903_v3, %v14899_v2 }
0x5294   : > { %17705 = vmatpush1.bf16.xpose.msra.mxu0 %v17704_v8  ;;  %17713 = vmatpush1.bf16.xpose.msra.mxu1 %v17712_v12  ;;  %v15080_v8 = vld [vmem:[#allocation46 + $0x2f8] sm:$0xff]  ;;  %v17730_v12 = vpack.c.bf16 %v15078_v13, %v15074_v6 }
0x5295   : > { %17715 = vmatprep.subr.bf16.mxu0 %v17714_v40  ;;  %17723 = vmatprep.subr.bf16.mxu1 %v17722_v15  ;;  %v17738_v16 = vpack.c.bf16 %v15080_v8, %v15076_v21  ;;  %v15075_v40 = vld [vmem:[#allocation46 + $0x270] sm:$0xff]  ;;  %v17732_v15 = vpack.c.bf16 %v15077_v14, %v15073_v35 }
0x5341   : > { %v14334_v18 = vpop.f32.mrb[156].mxu0  ;;  %v14404_v19 = vpop.f32.mrb[168].mxu1 }
0x5342   : > { %v14405_v22 = vadd.f32 %v14404_v19, %v14334_v18  ;;  %v14336_v34 = vpop.f32.mrb[157].mxu0  ;;  %v14406_v27 = vpop.f32.mrb[169].mxu1  ;;  %v17740_v18 = vpack.c.bf16 %v15079_v41, %v15075_v40  ;;  %v15082_v19 = vld [vmem:[#allocation46 + $0x368] sm:$0xff] }
0x5343   : > { %v15084_v34 = vld [vmem:[#allocation46 + $0x378] sm:$0xff] }
0x5351   : > { %v14474_v28 = vpop.f32.mrb[158].mxu0  ;;  %v14544_v57 = vpop.f32.mrb[170].mxu1 }
0x5352   : > { %v14475_v29 = vadd.f32 %v14474_v28, %v14405_v22  ;;  %v14476_v47 = vpop.f32.mrb[159].mxu0  ;;  %v14546_v26 = vpop.f32.mrb[171].mxu1  ;;  %v15086_v22 = vld [vmem:[#allocation46 + $0x3e8] sm:$0xff]  ;;  %v15088_v28 = vld [vmem:[#allocation46 + $0x3f8] sm:$0xff] }
0x5353   : > { %v17734_v27 = vpack.c.bf16 %v15086_v22, %v15082_v19  ;;  %v15085_v47 = vld [vmem:[#allocation46 + $0x3e0] sm:$0xff]  ;;  %v15083_v26 = vld [vmem:[#allocation46 + $0x370] sm:$0xff] }
0x5354   : > { %v21291_v32 = vadd.f32 %v14544_v57, %v14475_v29  ;;  %v17742_v57 = vpack.c.bf16 %v15088_v28, %v15084_v34  ;;  %v15081_v29 = vld [vmem:[#allocation46 + $0x360] sm:$0xff] }
0x5355   : > { %v17736_v33 = vpack.c.bf16 %v15085_v47, %v15081_v29  ;;  %v15300_v34 = vld [vmem:[%s19682_s3] sm:$0xff]  ;;  %v15303_v29 = vld [vmem:[%s19682_s3 + $0x18] sm:$0xff] }
0x5359   : > { %v14652_v45 = vpop.f32.mrb[160].mxu0  ;;  %v14723_v23 = vpop.f32.mrb[172].mxu1 }
0x535a   : > { %v14653_v53 = vadd.f32 %v14652_v45, %v14569_v10  ;;  %v14724_v63 = vadd.f32 %v14723_v23, %v14577_v44  ;;  %v14654_v49 = vpop.f32.mrb[161].mxu0  ;;  %v14725_v4 = vpop.f32.mrb[173].mxu1  ;;  %v15087_v10 = vld [vmem:[#allocation46 + $0x3f0] sm:$0xff] }
0x535b   : > { %v14655_v51 = vadd.f32 %v14654_v49, %v14573_v0  ;;  %v14726_v48 = vadd.f32 %v14725_v4, %v14581_v46  ;;  %v17744_v44 = vpack.c.bf16 %v15087_v10, %v15083_v26  ;;  %v14918_v49 = vrot.slane %v14905_v31, %v20433_v37 }
0x535c   : > { %v14728_v62 = vmax.f32 %v14653_v53, 0.0  ;;  %v14730_v59 = vmax.f32 %v14724_v63, 0.0  ;;  %v14910_v63 = vrot.slane %v14905_v31, %v20431_v36  ;;  %v14914_v4 = vrot.slane %v14905_v31, %v20435_v38 }
0x535d   : > { %v14729_v52 = vmax.f32 %v14655_v51, 0.0  ;;  %v14731_v54 = vmax.f32 %v14726_v48, 0.0 }
0x535f   : > { %14812 = vmatprep.mubr.f32.mxu0 %v14729_v52  ;;  %14882 = vmatprep.mubr.f32.mxu1 %v14731_v54 }
0x5360   : > { %14813 = vmatmul.mubr.f32.vlgmr.msra.gmra.mrb[162].mxu0 %v14728_v62  ;;  %14883 = vmatmul.mubr.f32.vlgmr.msra.gmra.mrb[174].mxu1 %v14730_v59 }
0x5361   : > { %17717 = vmatpush1.bf16.msra.mxu0 %v17716_v56  ;;  %17725 = vmatpush1.bf16.msra.mxu1 %v17724_v9 }
0x5362   : > { %17719 = vmatprep.subr.bf16.mxu0 %v17718_v1  ;;  %17727 = vmatprep.subr.bf16.mxu1 %v17726_v60 }
0x5363   : > { %14991 = vmatprep.mubr.f32.mxu0 %v19461_v25  ;;  %15062 = vmatprep.mubr.f32.mxu1 %v19461_v25 }
0x5365   : > { %17721 = vmatpush1.bf16.msra.mxu0 %v17720_v7  ;;  %17729 = vmatpush1.bf16.msra.mxu1 %v17728_v11 }
0x5366   : > { %17731 = vmatprep.subr.bf16.mxu0 %v17730_v12  ;;  %17739 = vmatprep.subr.bf16.mxu1 %v17738_v16  ;;  %v16167_v12 = vld [vmem:[#allocation49 + $0x1] ss:$0 sm:$0xff] }
0x5368   : > { %16164 = vmatmul.mubr.msk.f32.vlgmr.msra.gmra.mrb[164].mxu0 %vm1855_vm0, %v21253_v43  ;;  %16165 = vmatmul.mubr.msk.f32.vlgmr.msra.gmra.mrb[176].mxu1 %vm1855_vm0, %v21253_v43 }
0x536e   : > { %17733 = vmatpush1.bf16.xpose.msra.mxu0 %v17732_v15  ;;  %17741 = vmatpush1.bf16.xpose.msra.mxu1 %v17740_v18 }
0x536f   : > { %17735 = vmatprep.subr.bf16.mxu0 %v17734_v27  ;;  %17743 = vmatprep.subr.bf16.mxu1 %v17742_v57  ;;  %v15301_v27 = vld [vmem:[%s19682_s3 + $0x8] sm:$0xff]  ;;  %v15302_v57 = vld [vmem:[%s19682_s3 + $0x10] sm:$0xff] }
0x5370   : > { %v17747_v28 = vpack.c.bf16 %v15301_v27, %v15300_v34  ;;  %v17750_v47 = vpack.c.bf16 %v15303_v29, %v15302_v57 }
0x5376   : > { %17737 = vmatpush1.bf16.xpose.msra.mxu0 %v17736_v33  ;;  %17745 = vmatpush1.bf16.xpose.msra.mxu1 %v17744_v44 }
0x5377   : > { %17746 = vmatprep.subr.bf16.mxu0 %v19462_v61 }
0x5433   : > { %v14814_v0 = vpop.f32.mrb[162].mxu0  ;;  %v14884_v46 = vpop.f32.mrb[174].mxu1 }
0x5434   : > { %v14885_v45 = vadd.f32 %v14884_v46, %v14814_v0  ;;  %v14816_v23 = vpop.f32.mrb[163].mxu0  ;;  %v14886_v42 = vpop.f32.mrb[175].mxu1  ;;  %v16169_v0 = vld [vmem:[#allocation52] ss:$0 sm:$0xff] }
0x5436   : > { %v14888_v53 = vadd.f32 %v14885_v45, %v21291_v32  ;;  %v16170_v45 = vld [vmem:[#allocation54] ss:$0 sm:$0xff] }
0x543b   : > { %v14993_v58 = vpop.f32.mrb[164].mxu0  ;;  %v15064_v5 = vpop.f32.mrb[176].mxu1 }
0x543c   : > { %v14994_v51 = vadd.f32 %v14993_v58, %v14910_v63  ;;  %v15065_v48 = vadd.f32 %v15064_v5, %v14918_v49  ;;  %v14995_v50 = vpop.f32.mrb[165].mxu0  ;;  %v15066_v20 = vpop.f32.mrb[177].mxu1 }
0x543d   : > { %v14996_v24 = vadd.f32 %v14995_v50, %v14914_v4  ;;  %v15067_v52 = vadd.f32 %v15066_v20, %v14922_v55 }
0x543e   : > { %v15069_v9 = vmax.f32 %v14994_v51, 0.0  ;;  %v15071_v32 = vmax.f32 %v15065_v48, 0.0 }
0x543f   : > { %v15070_v54 = vmax.f32 %v14996_v24, 0.0  ;;  %v15072_v56 = vmax.f32 %v15067_v52, 0.0 }
0x5441   : > { %15153 = vmatprep.mubr.f32.mxu0 %v15070_v54  ;;  %15223 = vmatprep.mubr.f32.mxu1 %v15072_v56 }
0x5442   : > { %15154 = vmatmul.mubr.f32.vlgmr.msra.gmra.mrb[166].mxu0 %v15069_v9  ;;  %15224 = vmatmul.mubr.f32.vlgmr.msra.gmra.mrb[178].mxu1 %v15071_v32 }
0x5443   : > { %17011 = vmatprep.mubr.msk.f32.mxu0 %vm19463_vm4, %v19461_v25  ;;  %17748 = vmatpush3.bf16.msra.mxu0 %v17747_v28 }
0x5444   : > { %17749 = vmatprep.subr.bf16.mxu0 %v19462_v61  ;;  %v16171_v61 = vld [vmem:[%s19687_s29] ss:$0 sm:$0xff] }
0x5447   : > { %17751 = vmatpush3.bf16.msra.mxu0 %v17750_v47 }
0x5515   : > { %v15155_v36 = vpop.f32.mrb[166].mxu0  ;;  %v15225_v37 = vpop.f32.mrb[178].mxu1 }
0x5516   : > { %v15226_v38 = vadd.f32 %v15225_v37, %v15155_v36  ;;  %v15157_v39 = vpop.f32.mrb[167].mxu0  ;;  %v15227_v30 = vpop.f32.mrb[179].mxu1 }
0x5518   : > { %v15229_v62 = vadd.f32 %v15226_v38, %v14888_v53 }
0x551a   : > { %v15238_v59 = vadd.f32 %v16166_v17, %v15229_v62 }
0x551c   : > { %v15239_v1 = vadd.f32 %v15238_v59, %v21253_v43  ;;  %v16168_v43 = vld [vmem:[#allocation51 + $0x1] ss:$0 sm:$0xff] }
0x551e   : > { %v15244_v60 = vsel %vm1855_vm0, %v15239_v1, 0.0 }
0x551f   : > { %15245 = vadd.xlane.f32.xlu0 %v15244_v60 }
0x55ac   : > { %v15246_v2 = vpop.xlane.xlu0 %15245 }
0x55ad   : > { %v15247_v3 = vmul.f32 0.03125, %v15246_v2 }
0x55af   : > { %v15248_v6 = vsub.f32 %v15239_v1, %v15247_v3 }
0x55b1   : > { %v15249_v13 = vmul.f32 %v15248_v6, %v15248_v6 }
0x55b3   : > { %v15250_v21 = vsel %vm1855_vm0, %v15249_v13, 0.0 }
0x55b4   : > { %15251 = vadd.xlane.f32.xlu0 %v15250_v21 }
0x5641   : > { %v15252_v25 = vpop.xlane.xlu0 %15251 }
0x5642   : > { %v15253_v8 = vmul.f32 0.03125, %v15252_v25 }
0x5644   : > { %v15254_v7 = vadd.f32 1e-05, %v15253_v8 }
0x5646   : > { %18375 = vrsqrt.f32 %v15254_v7 }
0x5650   : > { %v18376_v11 = vpop.eup %18375 }
0x5651   : > { %v15256_v16 = vmul.f32 %v18376_v11, %v15248_v6 }
0x5653   : > { %v15263_v35 = vmul.f32 %v16167_v12, %v15256_v16 }
0x5655   : > { %v15270_v14 = vadd.f32 %v16168_v43, %v15263_v35 }
0x5657   : > { %v15273_v40 = vsel %vm1855_vm0, %v15270_v14, 0.0 }
0x5658   : > { %15274 = vadd.xlane.f32.xlu0 %v15273_v40 }
0x56e5   : > { %v15275_v41 = vpop.xlane.xlu0 %15274 }
0x56e6   : > { %v15276_v15 = vmul.f32 0.03125, %v15275_v41 }
0x56e8   : > { %v15277_v18 = vsub.f32 %v15270_v14, %v15276_v15 }
0x56ea   : > { %v15278_v19 = vmul.f32 %v15277_v18, %v15277_v18 }
0x56ec   : > { %v15279_v22 = vsel %vm1855_vm0, %v15278_v19, 0.0 }
0x56ed   : > { %15280 = vadd.xlane.f32.xlu1 %v15279_v22 }
0x577a   : > { %v15281_v26 = vpop.xlane.xlu1 %15280 }
0x577b   : > { %v15282_v33 = vmul.f32 0.03125, %v15281_v26 }
0x577d   : > { %v15283_v10 = vadd.f32 1e-05, %v15282_v33 }
0x577f   : > { %18377 = vrsqrt.f32 %v15283_v10 }
0x5789   : > { %v18378_v44 = vpop.eup %18377 }
0x578a   : > { %v15285_v46 = vmul.f32 %v18378_v44, %v15277_v18 }
0x578c   : > { %v15292_v23 = vmul.f32 %v16169_v0, %v15285_v46 }
0x578e   : > { %v15299_v42 = vadd.f32 %v16170_v45, %v15292_v23 }
0x5790   : > { %17012 = vmatmul.mubr.msk.f32.vlgmr.msra.gmra.mrb[168].mxu0 %vm1855_vm0, %v15299_v42 }
0x5863   : > { %v15380_v31 = vpop.f32.mrb[168].mxu0 }
0x5864   : > { %v15381_v53 = vadd.f32 %v16171_v61, %v15380_v31  ;;  %v17013_v63 = vpop.f32.mrb[169].mxu0 }
0x5866   : > { %15384 = vst [vmem:[%s1841_s7] sm:$0xff] %v15381_v53 }
0x5867 PF: > { %s117_s0 = sadd.s32 1, %s19367_s0  }
0x5868   : > { %p114_p3 = scmp.ge.s32.totalorder %s117_s0, 4  }
0x586a   :  { %116 = sbr.rel (!%p114_p3) target bundleno = 99 (0x63), region = 468 }
0x5871   :  { %15404 = vsyncpa [#allocation3], 1 }
0x5872   :  { %15406 = vsyncpa [#allocation3 + $0x1], 1 }
0x5873   :  { %15407 = vsyncpa [#allocation5], 1 }
0x5874   :  { %15408 = vsyncpa [#allocation8], 1 }
0x5875   :  { %15409 = vsyncpa [#allocation11], 1 }
0x5876   :  { %15410 = vsyncpa [#allocation14], 1 }
0x5877   :  { %15411 = vsyncpa [#allocation17], 1 }
0x5878   :  { %15412 = vsyncpa [#allocation20], 1 }
0x5879   :  { %15413 = vsyncpa [#allocation23], 1 }
0x587a   :  { %15414 = vsyncpa [#allocation26], 1 }
0x587b   :  { %15415 = vsyncpa [#allocation29], 1 }
0x587c   :  { %15416 = vsyncpa [#allocation32], 1 }
0x587d   :  { %15417 = vsyncpa [#allocation35], 1 }
0x587e   :  { %15418 = vsyncpa [#allocation38], 1 }
0x587f   :  { %15419 = vsyncpa [#allocation41], 1 }
0x5880   :  { %15420 = vsyncpa [#allocation44], 1 }
0x5881   :  { %15421 = vsyncpa [#allocation47], 1 }
0x5882   :  { %15422 = vsyncpa [#allocation50], 1 }
0x5883   :  { %15423 = vsyncpa [#allocation53], 1 }

</bundles_post_ra>
